<compile_context>
chip_gen: v6e
topology: v6e:2x2x1
jax: 0.10.0
libtpu: 0.0.40
codegen_flags: <defaults>
</compile_context>

<pallas_src>
import functools

import jax
import jax.numpy as jnp
from jax.experimental import pallas as pl
from jax.experimental.pallas import tpu as pltpu


# Left/right zero-halo width of stored activations.  Sublane-tile aligned (8 rows for
# f32) so the halo construction concatenates along the sublane dim only at tile-aligned
# offsets; the top/bottom halo is the exact conv pad (untiled-dim concat, no alignment
# constraint).
_WPAD = 8

# Synthetic net_dict (same schema the PyTorch module expects).
#   conv entry:  [in_ch, out_ch, kernel, stride, pad]      pool entry:  [k, stride, pad]
IN_CH, FEAT_CH, PRED_CH = 4, 8, 3
NET_DICT = [
    # [0] feature
    [{'conv1_1': [IN_CH, FEAT_CH, 3, 1, 1]},
     {'pool1':   [2, 2, 0]},
     {'conv1_2': [FEAT_CH, FEAT_CH, 3, 1, 1]}],
    # [1] block (stage 1)
    [{'conv2_1': [FEAT_CH, FEAT_CH, 3, 1, 1]}],
    # [2] predict (stage 1) -- no ReLU after 'predict' convs
    [{'predict_1': [FEAT_CH, PRED_CH, 1, 1, 0]}],
    # [3] block_stage{2..6}  (input = concat(predict, feature))
    [{'convN_1': [PRED_CH + FEAT_CH, FEAT_CH, 3, 1, 1]}],
    # [4] predict_stage{2..6}
    [{'predictN_1': [FEAT_CH, PRED_CH, 1, 1, 0]}],
]


# ----------------------------------------------------------------------------
# In-kernel helpers (traced inside the Pallas kernels)
# ----------------------------------------------------------------------------

def _pad_hw(v, hpad, wpad):
    """Zero-halo an (H, W, C) f32 value: hpad rows top/bottom, wpad cols left/right."""
    H, W, C = v.shape
    if hpad:
        z = jnp.zeros((hpad, W, C), v.dtype)
        v = jnp.concatenate([z, v, z], axis=0)          # untiled-dim concat
    if wpad:
        z = jnp.zeros((H + 2 * hpad, wpad, C), v.dtype)
        v = jnp.concatenate([z, v, z], axis=1)          # sublane concat (tile-aligned)
    return v


def _im2col_matmul(xp, w_folded, K, pad):
    """Stride-1 KxK conv over the interior of a zero-haloed (Hp, Wp, Ci) f32 block as
    ONE MXU matmul: the K*K taps are folded into the contraction (column order
    (kh, kw, ci) matches the folded weight).  bf16 operands, f32 accumulation.
    Returns (Ho*Wo, Cout) f32."""
    Hp, Wp, Ci = xp.shape
    Ho, Wo = Hp - 2 * pad, Wp - 2 * _WPAD
    cw = _WPAD - pad
    taps = [xp[kh:kh + Ho, cw + kw:cw + kw + Wo, :]
            for kh in range(K) for kw in range(K)]
    patches = jnp.concatenate(taps, axis=-1).reshape(Ho * Wo, K * K * Ci)
    return jnp.dot(patches.astype(jnp.bfloat16), w_folded,
                   preferred_element_type=jnp.float32)


# ----------------------------------------------------------------------------
# Pallas kernels
# ----------------------------------------------------------------------------

def _feature_kernel(x_ref, w1_ref, b1_ref, w2_ref, b2_ref, o_ref, pool_sc,
                    *, K, pad, pool_k):
    """Fused feature extractor: conv1_1 (+bias+ReLU) -> pool1 -> conv1_2 (+bias+ReLU).
    Stores the feature map with its conv halo already zeroed (it is consumed by every
    stage's 3x3 block conv), so no activation is ever padded on the host."""
    x = x_ref[0].astype(jnp.float32)                    # (H, W, Cin)
    H, W = x.shape[0], x.shape[1]
    Cf = w1_ref.shape[1]

    # conv1_1: one folded-tap matmul + bias + ReLU
    a1 = _im2col_matmul(_pad_hw(x, pad, _WPAD), w1_ref[...], K, pad)
    a1 = jnp.maximum(a1 + b1_ref[...], 0.0).reshape(H, W, Cf)

    # pool1 (pool_k x pool_k, stride pool_k), entirely in VMEM:
    # rows via a free leading-dim regroup, columns via hardware strided loads.
    Hq, Wq = H // pool_k, W // pool_k
    rows = a1.reshape(Hq, pool_k, W, Cf)
    m = rows[:, 0]
    for i in range(1, pool_k):
        m = jnp.maximum(m, rows[:, i])                  # (Hq, W, Cf)
    pool_sc[...] = m
    p = pool_sc[:, pl.ds(0, Wq, stride=pool_k), :]
    for j in range(1, pool_k):
        p = jnp.maximum(p, pool_sc[:, pl.ds(j, Wq, stride=pool_k), :])  # (Hq, Wq, Cf)

    # conv1_2: folded-tap matmul + bias + ReLU
    a2 = _im2col_matmul(_pad_hw(p, pad, _WPAD), w2_ref[...], K, pad)
    a2 = jnp.maximum(a2 + b2_ref[...], 0.0).reshape(Hq, Wq, Cf)

    # bf16 store, zero halo baked in (halved HBM traffic for the most-reused tensor)
    o_ref[0] = _pad_hw(a2, pad, _WPAD).astype(o_ref.dtype)


def _stage_kernel(*refs, n_in, K, pad, emit_next):
    """One fused CPM stage:
         concat(inputs) -> block KxK conv (+bias+ReLU) -> predict 1x1 conv (+bias).

    refs layout (inputs then outputs):
      [0:n_in]        zero-haloed NHWC activations, bf16, (1, Hp, Wp, Ci)
      [n_in:2*n_in]   folded block weights, bf16, (K*K*Ci, Cmid)
      [2*n_in]        block bias, f32, (1, Cmid)
      [2*n_in+1]      predict weight, bf16, (Cpred, Cmid)
      [2*n_in+2]      predict bias, f32, (Cpred, 1)
      if emit_next:   predict weight (Cmid, Cpred) bf16, predict bias (1, Cpred) f32
      then outputs:   o_pred (1, Cpred, Ho*Wo) f32  [lane-dense final heatmaps]
      if emit_next:   o_next (1, Hp, Wp, Cpred) bf16 [zero-haloed, next stage's input]
    """
    x_refs = refs[:n_in]
    w_refs = refs[n_in:2 * n_in]
    b_ref = refs[2 * n_in]
    wpt_ref = refs[2 * n_in + 1]
    bpc_ref = refs[2 * n_in + 2]
    if emit_next:
        wp_ref, bp_ref = refs[2 * n_in + 3], refs[2 * n_in + 4]
        o_pred_ref, o_next_ref = refs[2 * n_in + 5], refs[2 * n_in + 6]
    else:
        o_pred_ref = refs[2 * n_in + 3]

    # Block KxK conv: the channel concat is folded into a sum of folded-tap matmuls.
    acc = None
    for x_ref, w_ref in zip(x_refs, w_refs):
        xp = x_ref[0].astype(jnp.float32)               # inputs arrive pre-haloed
        t = _im2col_matmul(xp, w_ref[...], K, pad)
        acc = t if acc is None else acc + t
    blk = jnp.maximum(acc + b_ref[...], 0.0).astype(jnp.bfloat16)    # (P, Cmid)

    # Predict 1x1 conv, stored lane-dense:  pred[c, p] = sum_m wpt[c, m] * blk[p, m]
    # (contract the Cmid axes of both operands -- native A @ B^T MXU orientation).
    pred_cp = jax.lax.dot_general(wpt_ref[...], blk, (((1,), (1,)), ((), ())),
                                  preferred_element_type=jnp.float32)
    o_pred_ref[0] = (pred_cp + bpc_ref[...]).astype(o_pred_ref.dtype)

    if emit_next:
        # Same prediction, in NHWC order with its 3x3 halo zeroed, for the next stage.
        Hp, Wp = x_refs[0].shape[1], x_refs[0].shape[2]
        Ho, Wo = Hp - 2 * pad, Wp - 2 * _WPAD
        Cpred = wpt_ref.shape[0]
        nxt = jnp.dot(blk, wp_ref[...], preferred_element_type=jnp.float32)
        nxt = (nxt + bp_ref[...]).reshape(Ho, Wo, Cpred)
        o_next_ref[0] = _pad_hw(nxt, pad, _WPAD).astype(o_next_ref.dtype)


# ----------------------------------------------------------------------------
# pallas_call wrappers
# ----------------------------------------------------------------------------

def _feature_call(x_nhwc, fp):
    N, H, W, Cin = x_nhwc.shape
    K, pad, pk = fp['K'], fp['pad'], fp['pool_k']
    Cf = fp['w1'].shape[1]
    assert H % pk == 0 and W % pk == 0, \
        "TODO(synk): PyTorch floor-cropping of odd pool inputs not implemented"
    Hq, Wq = H // pk, W // pk
    Hp, Wp = Hq + 2 * pad, Wq + 2 * _WPAD

    kern = functools.partial(_feature_kernel, K=K, pad=pad, pool_k=pk)
    return pl.pallas_call(
        kern,
        out_shape=jax.ShapeDtypeStruct((N, Hp, Wp, Cf), jnp.bfloat16),
        grid=(N,),
        in_specs=[
            pl.BlockSpec((1, H, W, Cin), lambda n: (n, 0, 0, 0)),
            pl.BlockSpec(fp['w1'].shape, lambda n: (0, 0)),
            pl.BlockSpec(fp['b1'].shape, lambda n: (0, 0)),
            pl.BlockSpec(fp['w2'].shape, lambda n: (0, 0)),
            pl.BlockSpec(fp['b2'].shape, lambda n: (0, 0)),
        ],
        out_specs=pl.BlockSpec((1, Hp, Wp, Cf), lambda n: (n, 0, 0, 0)),
        scratch_shapes=[pltpu.VMEM((Hq, W, Cf), jnp.float32)],
        compiler_params=pltpu.CompilerParams(dimension_semantics=("parallel",)),
    )(x_nhwc, fp['w1'], fp['b1'], fp['w2'], fp['b2'])


def _stage_call(inputs_padded, sp, emit_next):
    N, Hp, Wp = inputs_padded[0].shape[:3]
    K, pad = sp['K'], sp['pad']
    Ho, Wo = Hp - 2 * pad, Wp - 2 * _WPAD
    Cpred = sp['wpt'].shape[0]

    inputs, in_specs = [], []
    for x in inputs_padded:
        assert x.shape[1] == Hp and x.shape[2] == Wp
        inputs.append(x)
        in_specs.append(pl.BlockSpec((1, Hp, Wp, x.shape[3]), lambda n: (n, 0, 0, 0)))
    consts = list(sp['ws']) + [sp['b'], sp['wpt'], sp['bp_c1']]
    if emit_next:
        consts += [sp['wp'], sp['bp_1c']]
    for c in consts:                                     # all constants are rank-2
        inputs.append(c)
        in_specs.append(pl.BlockSpec(c.shape, lambda n: (0, 0)))

    pred_struct = jax.ShapeDtypeStruct((N, Cpred, Ho * Wo), jnp.float32)
    pred_spec = pl.BlockSpec((1, Cpred, Ho * Wo), lambda n: (n, 0, 0))
    if emit_next:
        out_shape = (pred_struct,
                     jax.ShapeDtypeStruct((N, Hp, Wp, Cpred), jnp.bfloat16))
        out_specs = (pred_spec,
                     pl.BlockSpec((1, Hp, Wp, Cpred), lambda n: (n, 0, 0, 0)))
    else:
        out_shape, out_specs = pred_struct, pred_spec

    kern = functools.partial(_stage_kernel, n_in=len(inputs_padded), K=K, pad=pad,
                             emit_next=emit_next)
    res = pl.pallas_call(
        kern,
        out_shape=out_shape,
        grid=(N,),
        in_specs=in_specs,
        out_specs=out_specs,
        compiler_params=pltpu.CompilerParams(dimension_semantics=("parallel",)),
    )(*inputs)
    return (res[0], res[1]) if emit_next else (res, None)


# ----------------------------------------------------------------------------
# Parameters (pre-folded into kernel layouts at init time)
# ----------------------------------------------------------------------------

def _fold_conv_weight(w):
    """PyTorch (Cout, Cin, KH, KW) -> folded (KH*KW*Cin, Cout); column order (kh,kw,ci)
    matches the in-kernel tap order."""
    cout, cin, kh, kw = w.shape
    return jnp.transpose(w, (2, 3, 1, 0)).reshape(kh * kw * cin, cout)


def _cfg(entry):
    (name, v), = entry.items()
    return name, v


def init_cpm_params(key):
    """Replicates CPM._make_layer + _init_weights (conv w ~ N(0, 0.01), b = 0).
    Returns (params folded into kernel layouts, raw f32 PyTorch-layout weights)."""
    params, raw = {}, {}

    (_, c1), (pn, pv), (_, c2) = (_cfg(e) for e in NET_DICT[0])
    assert 'pool' in pn and pv[0] == pv[1] and pv[2] == 0, \
        "TODO(synk): only stride == kernel_size, pad = 0 pooling is supported"
    for c in (c1, c2):
        assert c[3] == 1 and c[2] == 2 * c[4] + 1 and c[4] <= _WPAD, \
            "TODO(synk): only stride-1 'same' convs are supported"
    key, ka, kb = jax.random.split(key, 3)
    w1 = 0.01 * jax.random.normal(ka, (c1[1], c1[0], c1[2], c1[2]), jnp.float32)
    w2 = 0.01 * jax.random.normal(kb, (c2[1], c2[0], c2[2], c2[2]), jnp.float32)
    b1 = jnp.zeros((c1[1],), jnp.float32)
    b2 = jnp.zeros((c2[1],), jnp.float32)
    raw.update(w1=w1, b1=b1, w2=w2, b2=b2, pool_k=pv[0])
    params['feature'] = {
        'w1': _fold_conv_weight(w1).astype(jnp.bfloat16), 'b1': b1.reshape(1, -1),
        'w2': _fold_conv_weight(w2).astype(jnp.bfloat16), 'b2': b2.reshape(1, -1),
        'K': c1[2], 'pad': c1[4], 'pool_k': pv[0],
    }

    def make_stage(key, block_entry, pred_entry, split_channels):
        _, bc = _cfg(block_entry)
        _, pc = _cfg(pred_entry)
        cin_b, cmid, kb_, sb, padb = bc
        cin_p, cpred, kp, sp_, padp = pc
        assert sb == 1 and kb_ == 2 * padb + 1 and padb <= _WPAD
        assert kp == 1 and sp_ == 1 and padp == 0 and cin_p == cmid
        assert sum(split_channels) == cin_b
        key, kw_, kq = jax.random.split(key, 3)
        wb = 0.01 * jax.random.normal(kw_, (cmid, cin_b, kb_, kb_), jnp.float32)
        wq = 0.01 * jax.random.normal(kq, (cpred, cmid, 1, 1), jnp.float32)
        bb = jnp.zeros((cmid,), jnp.float32)
        bq = jnp.zeros((cpred,), jnp.float32)
        # split along Cin so the torch.cat([L, feature]) becomes a sum of matmuls
        ws, off = [], 0
        for ci in split_channels:
            ws.append(_fold_conv_weight(wb[:, off:off + ci]).astype(jnp.bfloat16))
            off += ci
        wq2d = wq[:, :, 0, 0]                                       # (Cpred, Cmid)
        sp = {
            'ws': ws,
            'b': bb.reshape(1, -1),
            'wpt': wq2d.astype(jnp.bfloat16),                       # (Cpred, Cmid)
            'bp_c1': bq.reshape(-1, 1),
            'wp': jnp.transpose(wq2d).astype(jnp.bfloat16),         # (Cmid, Cpred)
            'bp_1c': bq.reshape(1, -1),
            'K': kb_, 'pad': padb,
        }
        return key, sp, {'wb': wb, 'bb': bb, 'wp': wq, 'bp': bq}

    key, params['stage1'], raw['stage1'] = make_stage(
        key, NET_DICT[1][0], NET_DICT[2][0], [FEAT_CH])
    for s in range(2, 7):
        key, params['stage%d' % s], raw['stage%d' % s] = make_stage(
            key, NET_DICT[3][0], NET_DICT[4][0], [PRED_CH, FEAT_CH])
    return params, raw


# ----------------------------------------------------------------------------
# Forward pass + pure-JAX reference
# ----------------------------------------------------------------------------

def cpm_forward(params, x_nchw):
    """Matches CPM.forward; returns the 6 stage heatmaps in NCHW."""
    x = jnp.transpose(x_nchw, (0, 2, 3, 1))             # only host-side relayout
    feat = _feature_call(x, params['feature'])          # zero-haloed, bf16, reused 6x

    preds = []
    pred, nxt = _stage_call([feat], params['stage1'], emit_next=True)
    preds.append(pred)
    for s in range(2, 7):
        pred, nxt = _stage_call([nxt, feat], params['stage%d' % s],
                                emit_next=(s < 6))
        preds.append(pred)

    pad = params['stage1']['pad']
    Hf = feat.shape[1] - 2 * pad
    Wf = feat.shape[2] - 2 * _WPAD
    N = x_nchw.shape[0]
    # lane-dense (N, Cpred, Hf*Wf) -> NCHW is a contiguous reshape (no transpose)
    return tuple(p.reshape(N, -1, Hf, Wf) for p in preds)


def cpm_reference(raw, x_nchw):
    """Pure-JAX f32 reference of CPM.forward (tolerance check for the bf16 kernels)."""
    def conv(x, w, b, pad, relu):
        y = jax.lax.conv_general_dilated(
            x, w, window_strides=(1, 1), padding=[(pad, pad), (pad, pad)],
            dimension_numbers=('NHWC', 'OIHW', 'NHWC'))
        y = y + b.reshape(1, 1, 1, -1)
        return jnp.maximum(y, 0.0) if relu else y

    x = jnp.transpose(x_nchw, (0, 2, 3, 1))
    f = conv(x, raw['w1'], raw['b1'], 1, True)
    k = raw['pool_k']
    f = jax.lax.reduce_window(f, -jnp.inf, jax.lax.max,
                              (1, k, k, 1), (1, k, k, 1), 'VALID')
    f = conv(f, raw['w2'], raw['b2'], 1, True)

    outs, inp = [], f
    for s in range(1, 7):
        r = raw['stage%d' % s]
        blk = conv(inp, r['wb'], r['bb'], 1, True)
        pred = conv(blk, r['wp'], r['bp'], 0, False)
        outs.append(jnp.transpose(pred, (0, 3, 1, 2)))
        inp = jnp.concatenate([pred, f], axis=-1)
    return tuple(outs)


if __name__ == "__main__":
    key = jax.random.PRNGKey(0)
    pkey, xkey = jax.random.split(key)

    params, raw = init_cpm_params(pkey)
    x = jax.random.normal(xkey, (2, IN_CH, 16, 16), jnp.float32)   # NCHW, like PyTorch

    fwd = jax.jit(lambda inp: cpm_forward(params, inp))
    outs = jax.block_until_ready(fwd(x))

    assert len(outs) == 6
    refs = cpm_reference(raw, x)
    for o, r in zip(outs, refs):
        assert o.shape == (2, PRED_CH, 8, 8), o.shape
        assert bool(jnp.all(jnp.isfinite(o)))
        # bf16 MXU operands (f32 accumulation) drift slightly from the f32 reference.
        err = float(jnp.max(jnp.abs(o - r)))
        scale = float(jnp.max(jnp.abs(r))) + 1e-12
        assert err <= 0.1 * scale + 2e-7, (err, scale)

    print("KERNEL_OK")
</pallas_src>

<mosaic_0001>
module attributes {stable_mosaic.version = 11 : i64} {
  func.func @_feature_kernel(%arg0: i32, %arg1: memref<1x16x16x4xf32, #tpu.memory_space<vmem>>, %arg2: memref<36x8xbf16, #tpu.memory_space<vmem>>, %arg3: memref<1x8xf32, #tpu.memory_space<vmem>>, %arg4: memref<72x8xbf16, #tpu.memory_space<vmem>>, %arg5: memref<1x8xf32, #tpu.memory_space<vmem>>, %arg6: memref<1x10x24x8xbf16, #tpu.memory_space<vmem>>, %arg7: memref<8x16x8xf32, #tpu.memory_space<vmem>>) attributes {dimension_semantics = [#tpu.dimension_semantics<parallel>], iteration_bounds = array<i64: 2>, scalar_prefetch = 0 : i64, scratch_operands = 1 : i64, tpu.core_type = #tpu.core_type<tc>, window_params = [{transform_indices = @transform_0, window_bounds = array<i64: 1, 16, 16, 4>}, {pipeline_mode = #tpu.pipeline_mode<synchronous>, transform_indices = @transform_1, window_bounds = array<i64: 36, 8>}, {pipeline_mode = #tpu.pipeline_mode<synchronous>, transform_indices = @transform_2, window_bounds = array<i64: 1, 8>}, {pipeline_mode = #tpu.pipeline_mode<synchronous>, transform_indices = @transform_3, window_bounds = array<i64: 72, 8>}, {pipeline_mode = #tpu.pipeline_mode<synchronous>, transform_indices = @transform_4, window_bounds = array<i64: 1, 8>}, {transform_indices = @transform_5, window_bounds = array<i64: 1, 10, 24, 8>}]} {
    %c0 = arith.constant 0 : index
    %c0_0 = arith.constant 0 : index
    %c0_1 = arith.constant 0 : index
    %c0_2 = arith.constant 0 : index
    %0 = vector.load %arg1[%c0, %c0_0, %c0_1, %c0_2] : memref<1x16x16x4xf32, #tpu.memory_space<vmem>>, vector<1x16x16x4xf32>
    %1 = vector.shape_cast %0 : vector<1x16x16x4xf32> to vector<16x16x4xf32>
    %cst = arith.constant 0.000000e+00 : f32
    %2 = vector.broadcast %cst : f32 to vector<1x16x4xf32>
    %3 = tpu.concatenate %2, %1, %2 in 0 : vector<1x16x4xf32>, vector<16x16x4xf32>, vector<1x16x4xf32> -> vector<18x16x4xf32>
    %cst_3 = arith.constant 0.000000e+00 : f32
    %4 = vector.broadcast %cst_3 : f32 to vector<18x8x4xf32>
    %5 = tpu.concatenate %4, %3, %4 in 1 : vector<18x8x4xf32>, vector<18x16x4xf32>, vector<18x8x4xf32> -> vector<18x32x4xf32>
    %c0_4 = arith.constant 0 : index
    %c0_5 = arith.constant 0 : index
    %6 = vector.load %arg2[%c0_4, %c0_5] : memref<36x8xbf16, #tpu.memory_space<vmem>>, vector<36x8xbf16>
    %7 = vector.extract_strided_slice %5 {offsets = [0, 7, 0], sizes = [16, 16, 4], strides = [1, 1, 1]} : vector<18x32x4xf32> to vector<16x16x4xf32>
    %8 = vector.extract_strided_slice %5 {offsets = [0, 8, 0], sizes = [16, 16, 4], strides = [1, 1, 1]} : vector<18x32x4xf32> to vector<16x16x4xf32>
    %9 = vector.extract_strided_slice %5 {offsets = [0, 9, 0], sizes = [16, 16, 4], strides = [1, 1, 1]} : vector<18x32x4xf32> to vector<16x16x4xf32>
    %10 = vector.extract_strided_slice %5 {offsets = [1, 7, 0], sizes = [16, 16, 4], strides = [1, 1, 1]} : vector<18x32x4xf32> to vector<16x16x4xf32>
    %11 = vector.extract_strided_slice %5 {offsets = [1, 8, 0], sizes = [16, 16, 4], strides = [1, 1, 1]} : vector<18x32x4xf32> to vector<16x16x4xf32>
    %12 = vector.extract_strided_slice %5 {offsets = [1, 9, 0], sizes = [16, 16, 4], strides = [1, 1, 1]} : vector<18x32x4xf32> to vector<16x16x4xf32>
    %13 = vector.extract_strided_slice %5 {offsets = [2, 7, 0], sizes = [16, 16, 4], strides = [1, 1, 1]} : vector<18x32x4xf32> to vector<16x16x4xf32>
    %14 = vector.extract_strided_slice %5 {offsets = [2, 8, 0], sizes = [16, 16, 4], strides = [1, 1, 1]} : vector<18x32x4xf32> to vector<16x16x4xf32>
    %15 = vector.extract_strided_slice %5 {offsets = [2, 9, 0], sizes = [16, 16, 4], strides = [1, 1, 1]} : vector<18x32x4xf32> to vector<16x16x4xf32>
    %16 = tpu.concatenate %7, %8, %9, %10, %11, %12, %13, %14, %15 in 2 : vector<16x16x4xf32>, vector<16x16x4xf32>, vector<16x16x4xf32>, vector<16x16x4xf32>, vector<16x16x4xf32>, vector<16x16x4xf32>, vector<16x16x4xf32>, vector<16x16x4xf32>, vector<16x16x4xf32> -> vector<16x16x36xf32>
    %17 = vector.shape_cast %16 : vector<16x16x36xf32> to vector<256x36xf32>
    %18 = arith.truncf %17 : vector<256x36xf32> to vector<256x36xbf16>
    %cst_6 = arith.constant dense<0.000000e+00> : vector<256x8xf32>
    %19 = tpu.matmul %18, %6, %cst_6 {dimension_numbers = #tpu.dot_dimension_numbers<[1], [0], [0], [1], [0, 0, 1, 1], [], []>} : vector<256x36xbf16>, vector<36x8xbf16>, vector<256x8xf32> -> vector<256x8xf32>
    %c0_7 = arith.constant 0 : index
    %c0_8 = arith.constant 0 : index
    %20 = vector.load %arg3[%c0_7, %c0_8] : memref<1x8xf32, #tpu.memory_space<vmem>>, vector<1x8xf32>
    %21 = vector.broadcast %20 : vector<1x8xf32> to vector<256x8xf32>
    %22 = arith.addf %19, %21 : vector<256x8xf32>
    %cst_9 = arith.constant 0.000000e+00 : f32
    %23 = vector.broadcast %cst_9 : f32 to vector<256x8xf32>
    %24 = arith.maximumf %22, %23 : vector<256x8xf32>
    %25 = vector.shape_cast %24 : vector<256x8xf32> to vector<16x16x8xf32>
    %26 = vector.shape_cast %25 : vector<16x16x8xf32> to vector<8x2x16x8xf32>
    %27 = vector.extract_strided_slice %26 {offsets = [0, 0, 0, 0], sizes = [8, 1, 16, 8], strides = [1, 1, 1, 1]} : vector<8x2x16x8xf32> to vector<8x1x16x8xf32>
    %28 = vector.shape_cast %27 : vector<8x1x16x8xf32> to vector<8x16x8xf32>
    %29 = vector.extract_strided_slice %26 {offsets = [0, 1, 0, 0], sizes = [8, 1, 16, 8], strides = [1, 1, 1, 1]} : vector<8x2x16x8xf32> to vector<8x1x16x8xf32>
    %30 = vector.shape_cast %29 : vector<8x1x16x8xf32> to vector<8x16x8xf32>
    %31 = arith.maximumf %28, %30 : vector<8x16x8xf32>
    %c0_10 = arith.constant 0 : index
    %c0_11 = arith.constant 0 : index
    %c0_12 = arith.constant 0 : index
    %32 = vector.load %arg7[%c0_10, %c0_11, %c0_12] : memref<8x16x8xf32, #tpu.memory_space<vmem>>, vector<8x16x8xf32>
    tpu.vector_store %arg7[%c0_10, %c0_11, %c0_12], %31 {strides = array<i32>} : memref<8x16x8xf32, #tpu.memory_space<vmem>>, vector<8x16x8xf32>,
    %c0_13 = arith.constant 0 : index
    %c0_14 = arith.constant 0 : index
    %c0_15 = arith.constant 0 : index
    %33 = tpu.strided_load %arg7[%c0_13, %c0_14, %c0_15] {strides = array<i32: 1, 2, 1>} : memref<8x16x8xf32, #tpu.memory_space<vmem>>, vector<8x8x8xf32>
    %c0_16 = arith.constant 0 : index
    %c1 = arith.constant 1 : index
    %c0_17 = arith.constant 0 : index
    %34 = tpu.strided_load %arg7[%c0_16, %c1, %c0_17] {strides = array<i32: 1, 2, 1>} : memref<8x16x8xf32, #tpu.memory_space<vmem>>, vector<8x8x8xf32>
    %35 = arith.maximumf %33, %34 : vector<8x8x8xf32>
    %cst_18 = arith.constant 0.000000e+00 : f32
    %36 = vector.broadcast %cst_18 : f32 to vector<1x8x8xf32>
    %37 = tpu.concatenate %36, %35, %36 in 0 : vector<1x8x8xf32>, vector<8x8x8xf32>, vector<1x8x8xf32> -> vector<10x8x8xf32>
    %cst_19 = arith.constant 0.000000e+00 : f32
    %38 = vector.broadcast %cst_19 : f32 to vector<10x8x8xf32>
    %39 = tpu.concatenate %38, %37, %38 in 1 : vector<10x8x8xf32>, vector<10x8x8xf32>, vector<10x8x8xf32> -> vector<10x24x8xf32>
    %c0_20 = arith.constant 0 : index
    %c0_21 = arith.constant 0 : index
    %40 = vector.load %arg4[%c0_20, %c0_21] : memref<72x8xbf16, #tpu.memory_space<vmem>>, vector<72x8xbf16>
    %41 = vector.extract_strided_slice %39 {offsets = [0, 7, 0], sizes = [8, 8, 8], strides = [1, 1, 1]} : vector<10x24x8xf32> to vector<8x8x8xf32>
    %42 = vector.extract_strided_slice %39 {offsets = [0, 8, 0], sizes = [8, 8, 8], strides = [1, 1, 1]} : vector<10x24x8xf32> to vector<8x8x8xf32>
    %43 = vector.extract_strided_slice %39 {offsets = [0, 9, 0], sizes = [8, 8, 8], strides = [1, 1, 1]} : vector<10x24x8xf32> to vector<8x8x8xf32>
    %44 = vector.extract_strided_slice %39 {offsets = [1, 7, 0], sizes = [8, 8, 8], strides = [1, 1, 1]} : vector<10x24x8xf32> to vector<8x8x8xf32>
    %45 = vector.extract_strided_slice %39 {offsets = [1, 8, 0], sizes = [8, 8, 8], strides = [1, 1, 1]} : vector<10x24x8xf32> to vector<8x8x8xf32>
    %46 = vector.extract_strided_slice %39 {offsets = [1, 9, 0], sizes = [8, 8, 8], strides = [1, 1, 1]} : vector<10x24x8xf32> to vector<8x8x8xf32>
    %47 = vector.extract_strided_slice %39 {offsets = [2, 7, 0], sizes = [8, 8, 8], strides = [1, 1, 1]} : vector<10x24x8xf32> to vector<8x8x8xf32>
    %48 = vector.extract_strided_slice %39 {offsets = [2, 8, 0], sizes = [8, 8, 8], strides = [1, 1, 1]} : vector<10x24x8xf32> to vector<8x8x8xf32>
    %49 = vector.extract_strided_slice %39 {offsets = [2, 9, 0], sizes = [8, 8, 8], strides = [1, 1, 1]} : vector<10x24x8xf32> to vector<8x8x8xf32>
    %50 = tpu.concatenate %41, %42, %43, %44, %45, %46, %47, %48, %49 in 2 : vector<8x8x8xf32>, vector<8x8x8xf32>, vector<8x8x8xf32>, vector<8x8x8xf32>, vector<8x8x8xf32>, vector<8x8x8xf32>, vector<8x8x8xf32>, vector<8x8x8xf32>, vector<8x8x8xf32> -> vector<8x8x72xf32>
    %51 = vector.shape_cast %50 : vector<8x8x72xf32> to vector<64x72xf32>
    %52 = arith.truncf %51 : vector<64x72xf32> to vector<64x72xbf16>
    %cst_22 = arith.constant dense<0.000000e+00> : vector<64x8xf32>
    %53 = tpu.matmul %52, %40, %cst_22 {dimension_numbers = #tpu.dot_dimension_numbers<[1], [0], [0], [1], [0, 0, 1, 1], [], []>} : vector<64x72xbf16>, vector<72x8xbf16>, vector<64x8xf32> -> vector<64x8xf32>
    %c0_23 = arith.constant 0 : index
    %c0_24 = arith.constant 0 : index
    %54 = vector.load %arg5[%c0_23, %c0_24] : memref<1x8xf32, #tpu.memory_space<vmem>>, vector<1x8xf32>
    %55 = vector.broadcast %54 : vector<1x8xf32> to vector<64x8xf32>
    %56 = arith.addf %53, %55 : vector<64x8xf32>
    %cst_25 = arith.constant 0.000000e+00 : f32
    %57 = vector.broadcast %cst_25 : f32 to vector<64x8xf32>
    %58 = arith.maximumf %56, %57 : vector<64x8xf32>
    %59 = vector.shape_cast %58 : vector<64x8xf32> to vector<8x8x8xf32>
    %cst_26 = arith.constant 0.000000e+00 : f32
    %60 = vector.broadcast %cst_26 : f32 to vector<1x8x8xf32>
    %61 = tpu.concatenate %60, %59, %60 in 0 : vector<1x8x8xf32>, vector<8x8x8xf32>, vector<1x8x8xf32> -> vector<10x8x8xf32>
    %cst_27 = arith.constant 0.000000e+00 : f32
    %62 = vector.broadcast %cst_27 : f32 to vector<10x8x8xf32>
    %63 = tpu.concatenate %62, %61, %62 in 1 : vector<10x8x8xf32>, vector<10x8x8xf32>, vector<10x8x8xf32> -> vector<10x24x8xf32>
    %64 = arith.truncf %63 : vector<10x24x8xf32> to vector<10x24x8xbf16>
    %c0_28 = arith.constant 0 : index
    %c0_29 = arith.constant 0 : index
    %c0_30 = arith.constant 0 : index
    %c0_31 = arith.constant 0 : index
    %65 = vector.load %arg6[%c0_28, %c0_29, %c0_30, %c0_31] : memref<1x10x24x8xbf16, #tpu.memory_space<vmem>>, vector<1x10x24x8xbf16>
    %66 = vector.shape_cast %65 : vector<1x10x24x8xbf16> to vector<10x24x8xbf16>
    %67 = vector.shape_cast %64 : vector<10x24x8xbf16> to vector<1x10x24x8xbf16>
    tpu.vector_store %arg6[%c0_28, %c0_29, %c0_30, %c0_31], %67 {strides = array<i32>} : memref<1x10x24x8xbf16, #tpu.memory_space<vmem>>, vector<1x10x24x8xbf16>,
    return
  }
  func.func @transform_0(%arg0: i32) -> (i32, i32, i32, i32) {
    %c0_i32 = arith.constant 0 : i32
    %c0_i32_0 = arith.constant 0 : i32
    %c0_i32_1 = arith.constant 0 : i32
    %c0_i32_2 = arith.constant 0 : i32
    return %arg0, %c0_i32, %c0_i32_0, %c0_i32_1 : i32, i32, i32, i32
  }
  func.func @transform_1(%arg0: i32) -> (i32, i32) {
    %c0_i32 = arith.constant 0 : i32
    %c0_i32_0 = arith.constant 0 : i32
    %c0_i32_1 = arith.constant 0 : i32
    return %c0_i32, %c0_i32_0 : i32, i32
  }
  func.func @transform_2(%arg0: i32) -> (i32, i32) {
    %c0_i32 = arith.constant 0 : i32
    %c0_i32_0 = arith.constant 0 : i32
    %c0_i32_1 = arith.constant 0 : i32
    return %c0_i32, %c0_i32_0 : i32, i32
  }
  func.func @transform_3(%arg0: i32) -> (i32, i32) {
    %c0_i32 = arith.constant 0 : i32
    %c0_i32_0 = arith.constant 0 : i32
    %c0_i32_1 = arith.constant 0 : i32
    return %c0_i32, %c0_i32_0 : i32, i32
  }
  func.func @transform_4(%arg0: i32) -> (i32, i32) {
    %c0_i32 = arith.constant 0 : i32
    %c0_i32_0 = arith.constant 0 : i32
    %c0_i32_1 = arith.constant 0 : i32
    return %c0_i32, %c0_i32_0 : i32, i32
  }
  func.func @transform_5(%arg0: i32) -> (i32, i32, i32, i32) {
    %c0_i32 = arith.constant 0 : i32
    %c0_i32_0 = arith.constant 0 : i32
    %c0_i32_1 = arith.constant 0 : i32
    %c0_i32_2 = arith.constant 0 : i32
    return %arg0, %c0_i32, %c0_i32_0, %c0_i32_1 : i32, i32, i32, i32
  }
}

module attributes {stable_mosaic.version = 11 : i64} {
  func.func @_stage_kernel(%arg0: i32, %arg1: memref<1x10x24x3xbf16, #tpu.memory_space<vmem>>, %arg2: memref<1x10x24x8xbf16, #tpu.memory_space<vmem>>, %arg3: memref<27x8xbf16, #tpu.memory_space<vmem>>, %arg4: memref<72x8xbf16, #tpu.memory_space<vmem>>, %arg5: memref<1x8xf32, #tpu.memory_space<vmem>>, %arg6: memref<3x8xbf16, #tpu.memory_space<vmem>>, %arg7: memref<3x1xf32, #tpu.memory_space<vmem>>, %arg8: memref<8x3xbf16, #tpu.memory_space<vmem>>, %arg9: memref<1x3xf32, #tpu.memory_space<vmem>>, %arg10: memref<1x3x64xf32, #tpu.memory_space<vmem>>, %arg11: memref<1x10x24x3xbf16, #tpu.memory_space<vmem>>) attributes {dimension_semantics = [#tpu.dimension_semantics<parallel>], iteration_bounds = array<i64: 2>, scalar_prefetch = 0 : i64, scratch_operands = 0 : i64, tpu.core_type = #tpu.core_type<tc>, window_params = [{transform_indices = @transform_0, window_bounds = array<i64: 1, 10, 24, 3>}, {transform_indices = @transform_1, window_bounds = array<i64: 1, 10, 24, 8>}, {pipeline_mode = #tpu.pipeline_mode<synchronous>, transform_indices = @transform_2, window_bounds = array<i64: 27, 8>}, {pipeline_mode = #tpu.pipeline_mode<synchronous>, transform_indices = @transform_3, window_bounds = array<i64: 72, 8>}, {pipeline_mode = #tpu.pipeline_mode<synchronous>, transform_indices = @transform_4, window_bounds = array<i64: 1, 8>}, {pipeline_mode = #tpu.pipeline_mode<synchronous>, transform_indices = @transform_5, window_bounds = array<i64: 3, 8>}, {pipeline_mode = #tpu.pipeline_mode<synchronous>, transform_indices = @transform_6, window_bounds = array<i64: 3, 1>}, {pipeline_mode = #tpu.pipeline_mode<synchronous>, transform_indices = @transform_7, window_bounds = array<i64: 8, 3>}, {pipeline_mode = #tpu.pipeline_mode<synchronous>, transform_indices = @transform_8, window_bounds = array<i64: 1, 3>}, {transform_indices = @transform_9, window_bounds = array<i64: 1, 3, 64>}, {transform_indices = @transform_10, window_bounds = array<i64: 1, 10, 24, 3>}]} {
    %c0 = arith.constant 0 : index
    %c0_0 = arith.constant 0 : index
    %c0_1 = arith.constant 0 : index
    %c0_2 = arith.constant 0 : index
    %0 = vector.load %arg1[%c0, %c0_0, %c0_1, %c0_2] : memref<1x10x24x3xbf16, #tpu.memory_space<vmem>>, vector<1x10x24x3xbf16>
    %1 = vector.shape_cast %0 : vector<1x10x24x3xbf16> to vector<10x24x3xbf16>
    %2 = arith.extf %1 : vector<10x24x3xbf16> to vector<10x24x3xf32>
    %c0_3 = arith.constant 0 : index
    %c0_4 = arith.constant 0 : index
    %3 = vector.load %arg3[%c0_3, %c0_4] : memref<27x8xbf16, #tpu.memory_space<vmem>>, vector<27x8xbf16>
    %4 = vector.extract_strided_slice %2 {offsets = [0, 7, 0], sizes = [8, 8, 3], strides = [1, 1, 1]} : vector<10x24x3xf32> to vector<8x8x3xf32>
    %5 = vector.extract_strided_slice %2 {offsets = [0, 8, 0], sizes = [8, 8, 3], strides = [1, 1, 1]} : vector<10x24x3xf32> to vector<8x8x3xf32>
    %6 = vector.extract_strided_slice %2 {offsets = [0, 9, 0], sizes = [8, 8, 3], strides = [1, 1, 1]} : vector<10x24x3xf32> to vector<8x8x3xf32>
    %7 = vector.extract_strided_slice %2 {offsets = [1, 7, 0], sizes = [8, 8, 3], strides = [1, 1, 1]} : vector<10x24x3xf32> to vector<8x8x3xf32>
    %8 = vector.extract_strided_slice %2 {offsets = [1, 8, 0], sizes = [8, 8, 3], strides = [1, 1, 1]} : vector<10x24x3xf32> to vector<8x8x3xf32>
    %9 = vector.extract_strided_slice %2 {offsets = [1, 9, 0], sizes = [8, 8, 3], strides = [1, 1, 1]} : vector<10x24x3xf32> to vector<8x8x3xf32>
    %10 = vector.extract_strided_slice %2 {offsets = [2, 7, 0], sizes = [8, 8, 3], strides = [1, 1, 1]} : vector<10x24x3xf32> to vector<8x8x3xf32>
    %11 = vector.extract_strided_slice %2 {offsets = [2, 8, 0], sizes = [8, 8, 3], strides = [1, 1, 1]} : vector<10x24x3xf32> to vector<8x8x3xf32>
    %12 = vector.extract_strided_slice %2 {offsets = [2, 9, 0], sizes = [8, 8, 3], strides = [1, 1, 1]} : vector<10x24x3xf32> to vector<8x8x3xf32>
    %13 = tpu.concatenate %4, %5, %6, %7, %8, %9, %10, %11, %12 in 2 : vector<8x8x3xf32>, vector<8x8x3xf32>, vector<8x8x3xf32>, vector<8x8x3xf32>, vector<8x8x3xf32>, vector<8x8x3xf32>, vector<8x8x3xf32>, vector<8x8x3xf32>, vector<8x8x3xf32> -> vector<8x8x27xf32>
    %14 = vector.shape_cast %13 : vector<8x8x27xf32> to vector<64x27xf32>
    %15 = arith.truncf %14 : vector<64x27xf32> to vector<64x27xbf16>
    %cst = arith.constant dense<0.000000e+00> : vector<64x8xf32>
    %16 = tpu.matmul %15, %3, %cst {dimension_numbers = #tpu.dot_dimension_numbers<[1], [0], [0], [1], [0, 0, 1, 1], [], []>} : vector<64x27xbf16>, vector<27x8xbf16>, vector<64x8xf32> -> vector<64x8xf32>
    %c0_5 = arith.constant 0 : index
    %c0_6 = arith.constant 0 : index
    %c0_7 = arith.constant 0 : index
    %c0_8 = arith.constant 0 : index
    %17 = vector.load %arg2[%c0_5, %c0_6, %c0_7, %c0_8] : memref<1x10x24x8xbf16, #tpu.memory_space<vmem>>, vector<1x10x24x8xbf16>
    %18 = vector.shape_cast %17 : vector<1x10x24x8xbf16> to vector<10x24x8xbf16>
    %19 = arith.extf %18 : vector<10x24x8xbf16> to vector<10x24x8xf32>
    %c0_9 = arith.constant 0 : index
    %c0_10 = arith.constant 0 : index
    %20 = vector.load %arg4[%c0_9, %c0_10] : memref<72x8xbf16, #tpu.memory_space<vmem>>, vector<72x8xbf16>
    %21 = vector.extract_strided_slice %19 {offsets = [0, 7, 0], sizes = [8, 8, 8], strides = [1, 1, 1]} : vector<10x24x8xf32> to vector<8x8x8xf32>
    %22 = vector.extract_strided_slice %19 {offsets = [0, 8, 0], sizes = [8, 8, 8], strides = [1, 1, 1]} : vector<10x24x8xf32> to vector<8x8x8xf32>
    %23 = vector.extract_strided_slice %19 {offsets = [0, 9, 0], sizes = [8, 8, 8], strides = [1, 1, 1]} : vector<10x24x8xf32> to vector<8x8x8xf32>
    %24 = vector.extract_strided_slice %19 {offsets = [1, 7, 0], sizes = [8, 8, 8], strides = [1, 1, 1]} : vector<10x24x8xf32> to vector<8x8x8xf32>
    %25 = vector.extract_strided_slice %19 {offsets = [1, 8, 0], sizes = [8, 8, 8], strides = [1, 1, 1]} : vector<10x24x8xf32> to vector<8x8x8xf32>
    %26 = vector.extract_strided_slice %19 {offsets = [1, 9, 0], sizes = [8, 8, 8], strides = [1, 1, 1]} : vector<10x24x8xf32> to vector<8x8x8xf32>
    %27 = vector.extract_strided_slice %19 {offsets = [2, 7, 0], sizes = [8, 8, 8], strides = [1, 1, 1]} : vector<10x24x8xf32> to vector<8x8x8xf32>
    %28 = vector.extract_strided_slice %19 {offsets = [2, 8, 0], sizes = [8, 8, 8], strides = [1, 1, 1]} : vector<10x24x8xf32> to vector<8x8x8xf32>
    %29 = vector.extract_strided_slice %19 {offsets = [2, 9, 0], sizes = [8, 8, 8], strides = [1, 1, 1]} : vector<10x24x8xf32> to vector<8x8x8xf32>
    %30 = tpu.concatenate %21, %22, %23, %24, %25, %26, %27, %28, %29 in 2 : vector<8x8x8xf32>, vector<8x8x8xf32>, vector<8x8x8xf32>, vector<8x8x8xf32>, vector<8x8x8xf32>, vector<8x8x8xf32>, vector<8x8x8xf32>, vector<8x8x8xf32>, vector<8x8x8xf32> -> vector<8x8x72xf32>
    %31 = vector.shape_cast %30 : vector<8x8x72xf32> to vector<64x72xf32>
    %32 = arith.truncf %31 : vector<64x72xf32> to vector<64x72xbf16>
    %cst_11 = arith.constant dense<0.000000e+00> : vector<64x8xf32>
    %33 = tpu.matmul %32, %20, %cst_11 {dimension_numbers = #tpu.dot_dimension_numbers<[1], [0], [0], [1], [0, 0, 1, 1], [], []>} : vector<64x72xbf16>, vector<72x8xbf16>, vector<64x8xf32> -> vector<64x8xf32>
    %34 = arith.addf %16, %33 : vector<64x8xf32>
    %c0_12 = arith.constant 0 : index
    %c0_13 = arith.constant 0 : index
    %35 = vector.load %arg5[%c0_12, %c0_13] : memref<1x8xf32, #tpu.memory_space<vmem>>, vector<1x8xf32>
    %36 = vector.broadcast %35 : vector<1x8xf32> to vector<64x8xf32>
    %37 = arith.addf %34, %36 : vector<64x8xf32>
    %cst_14 = arith.constant 0.000000e+00 : f32
    %38 = vector.broadcast %cst_14 : f32 to vector<64x8xf32>
    %39 = arith.maximumf %37, %38 : vector<64x8xf32>
    %40 = arith.truncf %39 : vector<64x8xf32> to vector<64x8xbf16>
    %c0_15 = arith.constant 0 : index
    %c0_16 = arith.constant 0 : index
    %41 = vector.load %arg6[%c0_15, %c0_16] : memref<3x8xbf16, #tpu.memory_space<vmem>>, vector<3x8xbf16>
    %cst_17 = arith.constant dense<0.000000e+00> : vector<3x64xf32>
    %42 = tpu.matmul %41, %40, %cst_17 {dimension_numbers = #tpu.dot_dimension_numbers<[1], [1], [0], [0], [0, 0, 1, 0], [], []>} : vector<3x8xbf16>, vector<64x8xbf16>, vector<3x64xf32> -> vector<3x64xf32>
    %c0_18 = arith.constant 0 : index
    %c0_19 = arith.constant 0 : index
    %43 = vector.load %arg7[%c0_18, %c0_19] : memref<3x1xf32, #tpu.memory_space<vmem>>, vector<3x1xf32>
    %44 = vector.broadcast %43 : vector<3x1xf32> to vector<3x64xf32>
    %45 = arith.addf %42, %44 : vector<3x64xf32>
    %c0_20 = arith.constant 0 : index
    %c0_21 = arith.constant 0 : index
    %c0_22 = arith.constant 0 : index
    %46 = vector.load %arg10[%c0_20, %c0_21, %c0_22] : memref<1x3x64xf32, #tpu.memory_space<vmem>>, vector<1x3x64xf32>
    %47 = vector.shape_cast %46 : vector<1x3x64xf32> to vector<3x64xf32>
    %48 = vector.shape_cast %45 : vector<3x64xf32> to vector<1x3x64xf32>
    tpu.vector_store %arg10[%c0_20, %c0_21, %c0_22], %48 {strides = array<i32>} : memref<1x3x64xf32, #tpu.memory_space<vmem>>, vector<1x3x64xf32>,
    %c0_23 = arith.constant 0 : index
    %c0_24 = arith.constant 0 : index
    %49 = vector.load %arg8[%c0_23, %c0_24] : memref<8x3xbf16, #tpu.memory_space<vmem>>, vector<8x3xbf16>
    %cst_25 = arith.constant dense<0.000000e+00> : vector<64x3xf32>
    %50 = tpu.matmul %40, %49, %cst_25 {dimension_numbers = #tpu.dot_dimension_numbers<[1], [0], [0], [1], [0, 0, 1, 1], [], []>} : vector<64x8xbf16>, vector<8x3xbf16>, vector<64x3xf32> -> vector<64x3xf32>
    %c0_26 = arith.constant 0 : index
    %c0_27 = arith.constant 0 : index
    %51 = vector.load %arg9[%c0_26, %c0_27] : memref<1x3xf32, #tpu.memory_space<vmem>>, vector<1x3xf32>
    %52 = vector.broadcast %51 : vector<1x3xf32> to vector<64x3xf32>
    %53 = arith.addf %50, %52 : vector<64x3xf32>
    %54 = vector.shape_cast %53 : vector<64x3xf32> to vector<8x8x3xf32>
    %cst_28 = arith.constant 0.000000e+00 : f32
    %55 = vector.broadcast %cst_28 : f32 to vector<1x8x3xf32>
    %56 = tpu.concatenate %55, %54, %55 in 0 : vector<1x8x3xf32>, vector<8x8x3xf32>, vector<1x8x3xf32> -> vector<10x8x3xf32>
    %cst_29 = arith.constant 0.000000e+00 : f32
    %57 = vector.broadcast %cst_29 : f32 to vector<10x8x3xf32>
    %58 = tpu.concatenate %57, %56, %57 in 1 : vector<10x8x3xf32>, vector<10x8x3xf32>, vector<10x8x3xf32> -> vector<10x24x3xf32>
    %59 = arith.truncf %58 : vector<10x24x3xf32> to vector<10x24x3xbf16>
    %c0_30 = arith.constant 0 : index
    %c0_31 = arith.constant 0 : index
    %c0_32 = arith.constant 0 : index
    %c0_33 = arith.constant 0 : index
    %60 = vector.load %arg11[%c0_30, %c0_31, %c0_32, %c0_33] : memref<1x10x24x3xbf16, #tpu.memory_space<vmem>>, vector<1x10x24x3xbf16>
    %61 = vector.shape_cast %60 : vector<1x10x24x3xbf16> to vector<10x24x3xbf16>
    %62 = vector.shape_cast %59 : vector<10x24x3xbf16> to vector<1x10x24x3xbf16>
    tpu.vector_store %arg11[%c0_30, %c0_31, %c0_32, %c0_33], %62 {strides = array<i32>} : memref<1x10x24x3xbf16, #tpu.memory_space<vmem>>, vector<1x10x24x3xbf16>,
    return
  }
  func.func @transform_0(%arg0: i32) -> (i32, i32, i32, i32) {
    %c0_i32 = arith.constant 0 : i32
    %c0_i32_0 = arith.constant 0 : i32
    %c0_i32_1 = arith.constant 0 : i32
    %c0_i32_2 = arith.constant 0 : i32
    return %arg0, %c0_i32, %c0_i32_0, %c0_i32_1 : i32, i32, i32, i32
  }
  func.func @transform_1(%arg0: i32) -> (i32, i32, i32, i32) {
    %c0_i32 = arith.constant 0 : i32
    %c0_i32_0 = arith.constant 0 : i32
    %c0_i32_1 = arith.constant 0 : i32
    %c0_i32_2 = arith.constant 0 : i32
    return %arg0, %c0_i32, %c0_i32_0, %c0_i32_1 : i32, i32, i32, i32
  }
  func.func @transform_2(%arg0: i32) -> (i32, i32) {
    %c0_i32 = arith.constant 0 : i32
    %c0_i32_0 = arith.constant 0 : i32
    %c0_i32_1 = arith.constant 0 : i32
    return %c0_i32, %c0_i32_0 : i32, i32
  }
  func.func @transform_3(%arg0: i32) -> (i32, i32) {
    %c0_i32 = arith.constant 0 : i32
    %c0_i32_0 = arith.constant 0 : i32
    %c0_i32_1 = arith.constant 0 : i32
    return %c0_i32, %c0_i32_0 : i32, i32
  }
  func.func @transform_4(%arg0: i32) -> (i32, i32) {
    %c0_i32 = arith.constant 0 : i32
    %c0_i32_0 = arith.constant 0 : i32
    %c0_i32_1 = arith.constant 0 : i32
    return %c0_i32, %c0_i32_0 : i32, i32
  }
  func.func @transform_5(%arg0: i32) -> (i32, i32) {
    %c0_i32 = arith.constant 0 : i32
    %c0_i32_0 = arith.constant 0 : i32
    %c0_i32_1 = arith.constant 0 : i32
    return %c0_i32, %c0_i32_0 : i32, i32
  }
  func.func @transform_6(%arg0: i32) -> (i32, i32) {
    %c0_i32 = arith.constant 0 : i32
    %c0_i32_0 = arith.constant 0 : i32
    %c0_i32_1 = arith.constant 0 : i32
    return %c0_i32, %c0_i32_0 : i32, i32
  }
  func.func @transform_7(%arg0: i32) -> (i32, i32) {
    %c0_i32 = arith.constant 0 : i32
    %c0_i32_0 = arith.constant 0 : i32
    %c0_i32_1 = arith.constant 0 : i32
    return %c0_i32, %c0_i32_0 : i32, i32
  }
  func.func @transform_8(%arg0: i32) -> (i32, i32) {
    %c0_i32 = arith.constant 0 : i32
    %c0_i32_0 = arith.constant 0 : i32
    %c0_i32_1 = arith.constant 0 : i32
    return %c0_i32, %c0_i32_0 : i32, i32
  }
  func.func @transform_9(%arg0: i32) -> (i32, i32, i32) {
    %c0_i32 = arith.constant 0 : i32
    %c0_i32_0 = arith.constant 0 : i32
    %c0_i32_1 = arith.constant 0 : i32
    return %arg0, %c0_i32, %c0_i32_0 : i32, i32, i32
  }
  func.func @transform_10(%arg0: i32) -> (i32, i32, i32, i32) {
    %c0_i32 = arith.constant 0 : i32
    %c0_i32_0 = arith.constant 0 : i32
    %c0_i32_1 = arith.constant 0 : i32
    %c0_i32_2 = arith.constant 0 : i32
    return %arg0, %c0_i32, %c0_i32_0, %c0_i32_1 : i32, i32, i32, i32
  }
}

module attributes {stable_mosaic.version = 11 : i64} {
  func.func @_stage_kernel(%arg0: i32, %arg1: memref<1x10x24x3xbf16, #tpu.memory_space<vmem>>, %arg2: memref<1x10x24x8xbf16, #tpu.memory_space<vmem>>, %arg3: memref<27x8xbf16, #tpu.memory_space<vmem>>, %arg4: memref<72x8xbf16, #tpu.memory_space<vmem>>, %arg5: memref<1x8xf32, #tpu.memory_space<vmem>>, %arg6: memref<3x8xbf16, #tpu.memory_space<vmem>>, %arg7: memref<3x1xf32, #tpu.memory_space<vmem>>, %arg8: memref<1x3x64xf32, #tpu.memory_space<vmem>>) attributes {dimension_semantics = [#tpu.dimension_semantics<parallel>], iteration_bounds = array<i64: 2>, scalar_prefetch = 0 : i64, scratch_operands = 0 : i64, tpu.core_type = #tpu.core_type<tc>, window_params = [{transform_indices = @transform_0, window_bounds = array<i64: 1, 10, 24, 3>}, {transform_indices = @transform_1, window_bounds = array<i64: 1, 10, 24, 8>}, {pipeline_mode = #tpu.pipeline_mode<synchronous>, transform_indices = @transform_2, window_bounds = array<i64: 27, 8>}, {pipeline_mode = #tpu.pipeline_mode<synchronous>, transform_indices = @transform_3, window_bounds = array<i64: 72, 8>}, {pipeline_mode = #tpu.pipeline_mode<synchronous>, transform_indices = @transform_4, window_bounds = array<i64: 1, 8>}, {pipeline_mode = #tpu.pipeline_mode<synchronous>, transform_indices = @transform_5, window_bounds = array<i64: 3, 8>}, {pipeline_mode = #tpu.pipeline_mode<synchronous>, transform_indices = @transform_6, window_bounds = array<i64: 3, 1>}, {transform_indices = @transform_7, window_bounds = array<i64: 1, 3, 64>}]} {
    %c0 = arith.constant 0 : index
    %c0_0 = arith.constant 0 : index
    %c0_1 = arith.constant 0 : index
    %c0_2 = arith.constant 0 : index
    %0 = vector.load %arg1[%c0, %c0_0, %c0_1, %c0_2] : memref<1x10x24x3xbf16, #tpu.memory_space<vmem>>, vector<1x10x24x3xbf16>
    %1 = vector.shape_cast %0 : vector<1x10x24x3xbf16> to vector<10x24x3xbf16>
    %2 = arith.extf %1 : vector<10x24x3xbf16> to vector<10x24x3xf32>
    %c0_3 = arith.constant 0 : index
    %c0_4 = arith.constant 0 : index
    %3 = vector.load %arg3[%c0_3, %c0_4] : memref<27x8xbf16, #tpu.memory_space<vmem>>, vector<27x8xbf16>
    %4 = vector.extract_strided_slice %2 {offsets = [0, 7, 0], sizes = [8, 8, 3], strides = [1, 1, 1]} : vector<10x24x3xf32> to vector<8x8x3xf32>
    %5 = vector.extract_strided_slice %2 {offsets = [0, 8, 0], sizes = [8, 8, 3], strides = [1, 1, 1]} : vector<10x24x3xf32> to vector<8x8x3xf32>
    %6 = vector.extract_strided_slice %2 {offsets = [0, 9, 0], sizes = [8, 8, 3], strides = [1, 1, 1]} : vector<10x24x3xf32> to vector<8x8x3xf32>
    %7 = vector.extract_strided_slice %2 {offsets = [1, 7, 0], sizes = [8, 8, 3], strides = [1, 1, 1]} : vector<10x24x3xf32> to vector<8x8x3xf32>
    %8 = vector.extract_strided_slice %2 {offsets = [1, 8, 0], sizes = [8, 8, 3], strides = [1, 1, 1]} : vector<10x24x3xf32> to vector<8x8x3xf32>
    %9 = vector.extract_strided_slice %2 {offsets = [1, 9, 0], sizes = [8, 8, 3], strides = [1, 1, 1]} : vector<10x24x3xf32> to vector<8x8x3xf32>
    %10 = vector.extract_strided_slice %2 {offsets = [2, 7, 0], sizes = [8, 8, 3], strides = [1, 1, 1]} : vector<10x24x3xf32> to vector<8x8x3xf32>
    %11 = vector.extract_strided_slice %2 {offsets = [2, 8, 0], sizes = [8, 8, 3], strides = [1, 1, 1]} : vector<10x24x3xf32> to vector<8x8x3xf32>
    %12 = vector.extract_strided_slice %2 {offsets = [2, 9, 0], sizes = [8, 8, 3], strides = [1, 1, 1]} : vector<10x24x3xf32> to vector<8x8x3xf32>
    %13 = tpu.concatenate %4, %5, %6, %7, %8, %9, %10, %11, %12 in 2 : vector<8x8x3xf32>, vector<8x8x3xf32>, vector<8x8x3xf32>, vector<8x8x3xf32>, vector<8x8x3xf32>, vector<8x8x3xf32>, vector<8x8x3xf32>, vector<8x8x3xf32>, vector<8x8x3xf32> -> vector<8x8x27xf32>
    %14 = vector.shape_cast %13 : vector<8x8x27xf32> to vector<64x27xf32>
    %15 = arith.truncf %14 : vector<64x27xf32> to vector<64x27xbf16>
    %cst = arith.constant dense<0.000000e+00> : vector<64x8xf32>
    %16 = tpu.matmul %15, %3, %cst {dimension_numbers = #tpu.dot_dimension_numbers<[1], [0], [0], [1], [0, 0, 1, 1], [], []>} : vector<64x27xbf16>, vector<27x8xbf16>, vector<64x8xf32> -> vector<64x8xf32>
    %c0_5 = arith.constant 0 : index
    %c0_6 = arith.constant 0 : index
    %c0_7 = arith.constant 0 : index
    %c0_8 = arith.constant 0 : index
    %17 = vector.load %arg2[%c0_5, %c0_6, %c0_7, %c0_8] : memref<1x10x24x8xbf16, #tpu.memory_space<vmem>>, vector<1x10x24x8xbf16>
    %18 = vector.shape_cast %17 : vector<1x10x24x8xbf16> to vector<10x24x8xbf16>
    %19 = arith.extf %18 : vector<10x24x8xbf16> to vector<10x24x8xf32>
    %c0_9 = arith.constant 0 : index
    %c0_10 = arith.constant 0 : index
    %20 = vector.load %arg4[%c0_9, %c0_10] : memref<72x8xbf16, #tpu.memory_space<vmem>>, vector<72x8xbf16>
    %21 = vector.extract_strided_slice %19 {offsets = [0, 7, 0], sizes = [8, 8, 8], strides = [1, 1, 1]} : vector<10x24x8xf32> to vector<8x8x8xf32>
    %22 = vector.extract_strided_slice %19 {offsets = [0, 8, 0], sizes = [8, 8, 8], strides = [1, 1, 1]} : vector<10x24x8xf32> to vector<8x8x8xf32>
    %23 = vector.extract_strided_slice %19 {offsets = [0, 9, 0], sizes = [8, 8, 8], strides = [1, 1, 1]} : vector<10x24x8xf32> to vector<8x8x8xf32>
    %24 = vector.extract_strided_slice %19 {offsets = [1, 7, 0], sizes = [8, 8, 8], strides = [1, 1, 1]} : vector<10x24x8xf32> to vector<8x8x8xf32>
    %25 = vector.extract_strided_slice %19 {offsets = [1, 8, 0], sizes = [8, 8, 8], strides = [1, 1, 1]} : vector<10x24x8xf32> to vector<8x8x8xf32>
    %26 = vector.extract_strided_slice %19 {offsets = [1, 9, 0], sizes = [8, 8, 8], strides = [1, 1, 1]} : vector<10x24x8xf32> to vector<8x8x8xf32>
    %27 = vector.extract_strided_slice %19 {offsets = [2, 7, 0], sizes = [8, 8, 8], strides = [1, 1, 1]} : vector<10x24x8xf32> to vector<8x8x8xf32>
    %28 = vector.extract_strided_slice %19 {offsets = [2, 8, 0], sizes = [8, 8, 8], strides = [1, 1, 1]} : vector<10x24x8xf32> to vector<8x8x8xf32>
    %29 = vector.extract_strided_slice %19 {offsets = [2, 9, 0], sizes = [8, 8, 8], strides = [1, 1, 1]} : vector<10x24x8xf32> to vector<8x8x8xf32>
    %30 = tpu.concatenate %21, %22, %23, %24, %25, %26, %27, %28, %29 in 2 : vector<8x8x8xf32>, vector<8x8x8xf32>, vector<8x8x8xf32>, vector<8x8x8xf32>, vector<8x8x8xf32>, vector<8x8x8xf32>, vector<8x8x8xf32>, vector<8x8x8xf32>, vector<8x8x8xf32> -> vector<8x8x72xf32>
    %31 = vector.shape_cast %30 : vector<8x8x72xf32> to vector<64x72xf32>
    %32 = arith.truncf %31 : vector<64x72xf32> to vector<64x72xbf16>
    %cst_11 = arith.constant dense<0.000000e+00> : vector<64x8xf32>
    %33 = tpu.matmul %32, %20, %cst_11 {dimension_numbers = #tpu.dot_dimension_numbers<[1], [0], [0], [1], [0, 0, 1, 1], [], []>} : vector<64x72xbf16>, vector<72x8xbf16>, vector<64x8xf32> -> vector<64x8xf32>
    %34 = arith.addf %16, %33 : vector<64x8xf32>
    %c0_12 = arith.constant 0 : index
    %c0_13 = arith.constant 0 : index
    %35 = vector.load %arg5[%c0_12, %c0_13] : memref<1x8xf32, #tpu.memory_space<vmem>>, vector<1x8xf32>
    %36 = vector.broadcast %35 : vector<1x8xf32> to vector<64x8xf32>
    %37 = arith.addf %34, %36 : vector<64x8xf32>
    %cst_14 = arith.constant 0.000000e+00 : f32
    %38 = vector.broadcast %cst_14 : f32 to vector<64x8xf32>
    %39 = arith.maximumf %37, %38 : vector<64x8xf32>
    %40 = arith.truncf %39 : vector<64x8xf32> to vector<64x8xbf16>
    %c0_15 = arith.constant 0 : index
    %c0_16 = arith.constant 0 : index
    %41 = vector.load %arg6[%c0_15, %c0_16] : memref<3x8xbf16, #tpu.memory_space<vmem>>, vector<3x8xbf16>
    %cst_17 = arith.constant dense<0.000000e+00> : vector<3x64xf32>
    %42 = tpu.matmul %41, %40, %cst_17 {dimension_numbers = #tpu.dot_dimension_numbers<[1], [1], [0], [0], [0, 0, 1, 0], [], []>} : vector<3x8xbf16>, vector<64x8xbf16>, vector<3x64xf32> -> vector<3x64xf32>
    %c0_18 = arith.constant 0 : index
    %c0_19 = arith.constant 0 : index
    %43 = vector.load %arg7[%c0_18, %c0_19] : memref<3x1xf32, #tpu.memory_space<vmem>>, vector<3x1xf32>
    %44 = vector.broadcast %43 : vector<3x1xf32> to vector<3x64xf32>
    %45 = arith.addf %42, %44 : vector<3x64xf32>
    %c0_20 = arith.constant 0 : index
    %c0_21 = arith.constant 0 : index
    %c0_22 = arith.constant 0 : index
    %46 = vector.load %arg8[%c0_20, %c0_21, %c0_22] : memref<1x3x64xf32, #tpu.memory_space<vmem>>, vector<1x3x64xf32>
    %47 = vector.shape_cast %46 : vector<1x3x64xf32> to vector<3x64xf32>
    %48 = vector.shape_cast %45 : vector<3x64xf32> to vector<1x3x64xf32>
    tpu.vector_store %arg8[%c0_20, %c0_21, %c0_22], %48 {strides = array<i32>} : memref<1x3x64xf32, #tpu.memory_space<vmem>>, vector<1x3x64xf32>,
    return
  }
  func.func @transform_0(%arg0: i32) -> (i32, i32, i32, i32) {
    %c0_i32 = arith.constant 0 : i32
    %c0_i32_0 = arith.constant 0 : i32
    %c0_i32_1 = arith.constant 0 : i32
    %c0_i32_2 = arith.constant 0 : i32
    return %arg0, %c0_i32, %c0_i32_0, %c0_i32_1 : i32, i32, i32, i32
  }
  func.func @transform_1(%arg0: i32) -> (i32, i32, i32, i32) {
    %c0_i32 = arith.constant 0 : i32
    %c0_i32_0 = arith.constant 0 : i32
    %c0_i32_1 = arith.constant 0 : i32
    %c0_i32_2 = arith.constant 0 : i32
    return %arg0, %c0_i32, %c0_i32_0, %c0_i32_1 : i32, i32, i32, i32
  }
  func.func @transform_2(%arg0: i32) -> (i32, i32) {
    %c0_i32 = arith.constant 0 : i32
    %c0_i32_0 = arith.constant 0 : i32
    %c0_i32_1 = arith.constant 0 : i32
    return %c0_i32, %c0_i32_0 : i32, i32
  }
  func.func @transform_3(%arg0: i32) -> (i32, i32) {
    %c0_i32 = arith.constant 0 : i32
    %c0_i32_0 = arith.constant 0 : i32
    %c0_i32_1 = arith.constant 0 : i32
    return %c0_i32, %c0_i32_0 : i32, i32
  }
  func.func @transform_4(%arg0: i32) -> (i32, i32) {
    %c0_i32 = arith.constant 0 : i32
    %c0_i32_0 = arith.constant 0 : i32
    %c0_i32_1 = arith.constant 0 : i32
    return %c0_i32, %c0_i32_0 : i32, i32
  }
  func.func @transform_5(%arg0: i32) -> (i32, i32) {
    %c0_i32 = arith.constant 0 : i32
    %c0_i32_0 = arith.constant 0 : i32
    %c0_i32_1 = arith.constant 0 : i32
    return %c0_i32, %c0_i32_0 : i32, i32
  }
  func.func @transform_6(%arg0: i32) -> (i32, i32) {
    %c0_i32 = arith.constant 0 : i32
    %c0_i32_0 = arith.constant 0 : i32
    %c0_i32_1 = arith.constant 0 : i32
    return %c0_i32, %c0_i32_0 : i32, i32
  }
  func.func @transform_7(%arg0: i32) -> (i32, i32, i32) {
    %c0_i32 = arith.constant 0 : i32
    %c0_i32_0 = arith.constant 0 : i32
    %c0_i32_1 = arith.constant 0 : i32
    return %arg0, %c0_i32, %c0_i32_0 : i32, i32, i32
  }
}

module attributes {stable_mosaic.version = 11 : i64} {
  func.func @_stage_kernel(%arg0: i32, %arg1: memref<1x10x24x8xbf16, #tpu.memory_space<vmem>>, %arg2: memref<72x8xbf16, #tpu.memory_space<vmem>>, %arg3: memref<1x8xf32, #tpu.memory_space<vmem>>, %arg4: memref<3x8xbf16, #tpu.memory_space<vmem>>, %arg5: memref<3x1xf32, #tpu.memory_space<vmem>>, %arg6: memref<8x3xbf16, #tpu.memory_space<vmem>>, %arg7: memref<1x3xf32, #tpu.memory_space<vmem>>, %arg8: memref<1x3x64xf32, #tpu.memory_space<vmem>>, %arg9: memref<1x10x24x3xbf16, #tpu.memory_space<vmem>>) attributes {dimension_semantics = [#tpu.dimension_semantics<parallel>], iteration_bounds = array<i64: 2>, scalar_prefetch = 0 : i64, scratch_operands = 0 : i64, tpu.core_type = #tpu.core_type<tc>, window_params = [{transform_indices = @transform_0, window_bounds = array<i64: 1, 10, 24, 8>}, {pipeline_mode = #tpu.pipeline_mode<synchronous>, transform_indices = @transform_1, window_bounds = array<i64: 72, 8>}, {pipeline_mode = #tpu.pipeline_mode<synchronous>, transform_indices = @transform_2, window_bounds = array<i64: 1, 8>}, {pipeline_mode = #tpu.pipeline_mode<synchronous>, transform_indices = @transform_3, window_bounds = array<i64: 3, 8>}, {pipeline_mode = #tpu.pipeline_mode<synchronous>, transform_indices = @transform_4, window_bounds = array<i64: 3, 1>}, {pipeline_mode = #tpu.pipeline_mode<synchronous>, transform_indices = @transform_5, window_bounds = array<i64: 8, 3>}, {pipeline_mode = #tpu.pipeline_mode<synchronous>, transform_indices = @transform_6, window_bounds = array<i64: 1, 3>}, {transform_indices = @transform_7, window_bounds = array<i64: 1, 3, 64>}, {transform_indices = @transform_8, window_bounds = array<i64: 1, 10, 24, 3>}]} {
    %c0 = arith.constant 0 : index
    %c0_0 = arith.constant 0 : index
    %c0_1 = arith.constant 0 : index
    %c0_2 = arith.constant 0 : index
    %0 = vector.load %arg1[%c0, %c0_0, %c0_1, %c0_2] : memref<1x10x24x8xbf16, #tpu.memory_space<vmem>>, vector<1x10x24x8xbf16>
    %1 = vector.shape_cast %0 : vector<1x10x24x8xbf16> to vector<10x24x8xbf16>
    %2 = arith.extf %1 : vector<10x24x8xbf16> to vector<10x24x8xf32>
    %c0_3 = arith.constant 0 : index
    %c0_4 = arith.constant 0 : index
    %3 = vector.load %arg2[%c0_3, %c0_4] : memref<72x8xbf16, #tpu.memory_space<vmem>>, vector<72x8xbf16>
    %4 = vector.extract_strided_slice %2 {offsets = [0, 7, 0], sizes = [8, 8, 8], strides = [1, 1, 1]} : vector<10x24x8xf32> to vector<8x8x8xf32>
    %5 = vector.extract_strided_slice %2 {offsets = [0, 8, 0], sizes = [8, 8, 8], strides = [1, 1, 1]} : vector<10x24x8xf32> to vector<8x8x8xf32>
    %6 = vector.extract_strided_slice %2 {offsets = [0, 9, 0], sizes = [8, 8, 8], strides = [1, 1, 1]} : vector<10x24x8xf32> to vector<8x8x8xf32>
    %7 = vector.extract_strided_slice %2 {offsets = [1, 7, 0], sizes = [8, 8, 8], strides = [1, 1, 1]} : vector<10x24x8xf32> to vector<8x8x8xf32>
    %8 = vector.extract_strided_slice %2 {offsets = [1, 8, 0], sizes = [8, 8, 8], strides = [1, 1, 1]} : vector<10x24x8xf32> to vector<8x8x8xf32>
    %9 = vector.extract_strided_slice %2 {offsets = [1, 9, 0], sizes = [8, 8, 8], strides = [1, 1, 1]} : vector<10x24x8xf32> to vector<8x8x8xf32>
    %10 = vector.extract_strided_slice %2 {offsets = [2, 7, 0], sizes = [8, 8, 8], strides = [1, 1, 1]} : vector<10x24x8xf32> to vector<8x8x8xf32>
    %11 = vector.extract_strided_slice %2 {offsets = [2, 8, 0], sizes = [8, 8, 8], strides = [1, 1, 1]} : vector<10x24x8xf32> to vector<8x8x8xf32>
    %12 = vector.extract_strided_slice %2 {offsets = [2, 9, 0], sizes = [8, 8, 8], strides = [1, 1, 1]} : vector<10x24x8xf32> to vector<8x8x8xf32>
    %13 = tpu.concatenate %4, %5, %6, %7, %8, %9, %10, %11, %12 in 2 : vector<8x8x8xf32>, vector<8x8x8xf32>, vector<8x8x8xf32>, vector<8x8x8xf32>, vector<8x8x8xf32>, vector<8x8x8xf32>, vector<8x8x8xf32>, vector<8x8x8xf32>, vector<8x8x8xf32> -> vector<8x8x72xf32>
    %14 = vector.shape_cast %13 : vector<8x8x72xf32> to vector<64x72xf32>
    %15 = arith.truncf %14 : vector<64x72xf32> to vector<64x72xbf16>
    %cst = arith.constant dense<0.000000e+00> : vector<64x8xf32>
    %16 = tpu.matmul %15, %3, %cst {dimension_numbers = #tpu.dot_dimension_numbers<[1], [0], [0], [1], [0, 0, 1, 1], [], []>} : vector<64x72xbf16>, vector<72x8xbf16>, vector<64x8xf32> -> vector<64x8xf32>
    %c0_5 = arith.constant 0 : index
    %c0_6 = arith.constant 0 : index
    %17 = vector.load %arg3[%c0_5, %c0_6] : memref<1x8xf32, #tpu.memory_space<vmem>>, vector<1x8xf32>
    %18 = vector.broadcast %17 : vector<1x8xf32> to vector<64x8xf32>
    %19 = arith.addf %16, %18 : vector<64x8xf32>
    %cst_7 = arith.constant 0.000000e+00 : f32
    %20 = vector.broadcast %cst_7 : f32 to vector<64x8xf32>
    %21 = arith.maximumf %19, %20 : vector<64x8xf32>
    %22 = arith.truncf %21 : vector<64x8xf32> to vector<64x8xbf16>
    %c0_8 = arith.constant 0 : index
    %c0_9 = arith.constant 0 : index
    %23 = vector.load %arg4[%c0_8, %c0_9] : memref<3x8xbf16, #tpu.memory_space<vmem>>, vector<3x8xbf16>
    %cst_10 = arith.constant dense<0.000000e+00> : vector<3x64xf32>
    %24 = tpu.matmul %23, %22, %cst_10 {dimension_numbers = #tpu.dot_dimension_numbers<[1], [1], [0], [0], [0, 0, 1, 0], [], []>} : vector<3x8xbf16>, vector<64x8xbf16>, vector<3x64xf32> -> vector<3x64xf32>
    %c0_11 = arith.constant 0 : index
    %c0_12 = arith.constant 0 : index
    %25 = vector.load %arg5[%c0_11, %c0_12] : memref<3x1xf32, #tpu.memory_space<vmem>>, vector<3x1xf32>
    %26 = vector.broadcast %25 : vector<3x1xf32> to vector<3x64xf32>
    %27 = arith.addf %24, %26 : vector<3x64xf32>
    %c0_13 = arith.constant 0 : index
    %c0_14 = arith.constant 0 : index
    %c0_15 = arith.constant 0 : index
    %28 = vector.load %arg8[%c0_13, %c0_14, %c0_15] : memref<1x3x64xf32, #tpu.memory_space<vmem>>, vector<1x3x64xf32>
    %29 = vector.shape_cast %28 : vector<1x3x64xf32> to vector<3x64xf32>
    %30 = vector.shape_cast %27 : vector<3x64xf32> to vector<1x3x64xf32>
    tpu.vector_store %arg8[%c0_13, %c0_14, %c0_15], %30 {strides = array<i32>} : memref<1x3x64xf32, #tpu.memory_space<vmem>>, vector<1x3x64xf32>,
    %c0_16 = arith.constant 0 : index
    %c0_17 = arith.constant 0 : index
    %31 = vector.load %arg6[%c0_16, %c0_17] : memref<8x3xbf16, #tpu.memory_space<vmem>>, vector<8x3xbf16>
    %cst_18 = arith.constant dense<0.000000e+00> : vector<64x3xf32>
    %32 = tpu.matmul %22, %31, %cst_18 {dimension_numbers = #tpu.dot_dimension_numbers<[1], [0], [0], [1], [0, 0, 1, 1], [], []>} : vector<64x8xbf16>, vector<8x3xbf16>, vector<64x3xf32> -> vector<64x3xf32>
    %c0_19 = arith.constant 0 : index
    %c0_20 = arith.constant 0 : index
    %33 = vector.load %arg7[%c0_19, %c0_20] : memref<1x3xf32, #tpu.memory_space<vmem>>, vector<1x3xf32>
    %34 = vector.broadcast %33 : vector<1x3xf32> to vector<64x3xf32>
    %35 = arith.addf %32, %34 : vector<64x3xf32>
    %36 = vector.shape_cast %35 : vector<64x3xf32> to vector<8x8x3xf32>
    %cst_21 = arith.constant 0.000000e+00 : f32
    %37 = vector.broadcast %cst_21 : f32 to vector<1x8x3xf32>
    %38 = tpu.concatenate %37, %36, %37 in 0 : vector<1x8x3xf32>, vector<8x8x3xf32>, vector<1x8x3xf32> -> vector<10x8x3xf32>
    %cst_22 = arith.constant 0.000000e+00 : f32
    %39 = vector.broadcast %cst_22 : f32 to vector<10x8x3xf32>
    %40 = tpu.concatenate %39, %38, %39 in 1 : vector<10x8x3xf32>, vector<10x8x3xf32>, vector<10x8x3xf32> -> vector<10x24x3xf32>
    %41 = arith.truncf %40 : vector<10x24x3xf32> to vector<10x24x3xbf16>
    %c0_23 = arith.constant 0 : index
    %c0_24 = arith.constant 0 : index
    %c0_25 = arith.constant 0 : index
    %c0_26 = arith.constant 0 : index
    %42 = vector.load %arg9[%c0_23, %c0_24, %c0_25, %c0_26] : memref<1x10x24x3xbf16, #tpu.memory_space<vmem>>, vector<1x10x24x3xbf16>
    %43 = vector.shape_cast %42 : vector<1x10x24x3xbf16> to vector<10x24x3xbf16>
    %44 = vector.shape_cast %41 : vector<10x24x3xbf16> to vector<1x10x24x3xbf16>
    tpu.vector_store %arg9[%c0_23, %c0_24, %c0_25, %c0_26], %44 {strides = array<i32>} : memref<1x10x24x3xbf16, #tpu.memory_space<vmem>>, vector<1x10x24x3xbf16>,
    return
  }
  func.func @transform_0(%arg0: i32) -> (i32, i32, i32, i32) {
    %c0_i32 = arith.constant 0 : i32
    %c0_i32_0 = arith.constant 0 : i32
    %c0_i32_1 = arith.constant 0 : i32
    %c0_i32_2 = arith.constant 0 : i32
    return %arg0, %c0_i32, %c0_i32_0, %c0_i32_1 : i32, i32, i32, i32
  }
  func.func @transform_1(%arg0: i32) -> (i32, i32) {
    %c0_i32 = arith.constant 0 : i32
    %c0_i32_0 = arith.constant 0 : i32
    %c0_i32_1 = arith.constant 0 : i32
    return %c0_i32, %c0_i32_0 : i32, i32
  }
  func.func @transform_2(%arg0: i32) -> (i32, i32) {
    %c0_i32 = arith.constant 0 : i32
    %c0_i32_0 = arith.constant 0 : i32
    %c0_i32_1 = arith.constant 0 : i32
    return %c0_i32, %c0_i32_0 : i32, i32
  }
  func.func @transform_3(%arg0: i32) -> (i32, i32) {
    %c0_i32 = arith.constant 0 : i32
    %c0_i32_0 = arith.constant 0 : i32
    %c0_i32_1 = arith.constant 0 : i32
    return %c0_i32, %c0_i32_0 : i32, i32
  }
  func.func @transform_4(%arg0: i32) -> (i32, i32) {
    %c0_i32 = arith.constant 0 : i32
    %c0_i32_0 = arith.constant 0 : i32
    %c0_i32_1 = arith.constant 0 : i32
    return %c0_i32, %c0_i32_0 : i32, i32
  }
  func.func @transform_5(%arg0: i32) -> (i32, i32) {
    %c0_i32 = arith.constant 0 : i32
    %c0_i32_0 = arith.constant 0 : i32
    %c0_i32_1 = arith.constant 0 : i32
    return %c0_i32, %c0_i32_0 : i32, i32
  }
  func.func @transform_6(%arg0: i32) -> (i32, i32) {
    %c0_i32 = arith.constant 0 : i32
    %c0_i32_0 = arith.constant 0 : i32
    %c0_i32_1 = arith.constant 0 : i32
    return %c0_i32, %c0_i32_0 : i32, i32
  }
  func.func @transform_7(%arg0: i32) -> (i32, i32, i32) {
    %c0_i32 = arith.constant 0 : i32
    %c0_i32_0 = arith.constant 0 : i32
    %c0_i32_1 = arith.constant 0 : i32
    return %arg0, %c0_i32, %c0_i32_0 : i32, i32, i32
  }
  func.func @transform_8(%arg0: i32) -> (i32, i32, i32, i32) {
    %c0_i32 = arith.constant 0 : i32
    %c0_i32_0 = arith.constant 0 : i32
    %c0_i32_1 = arith.constant 0 : i32
    %c0_i32_2 = arith.constant 0 : i32
    return %arg0, %c0_i32, %c0_i32_0, %c0_i32_1 : i32, i32, i32, i32
  }
}

</mosaic_0001>

<bundles_post_ra>
// kernel: _lambda_.8
= control target key start
LH: loop header
LB: loop body
LE: loop exit
PB: predicated region body
PF: predicated region fallthrough
CT: control target
= control target key end

     0   :  { %s1965_s27 = smov 0   ;;  %s2548_s0 = inlined_call_operand.vmem [shape: bf16[2,10,24,8], index: 0, kind: input, shape index: {}]   ;;  %s2549_s1 = inlined_call_operand.vmem [shape: bf16[72,8], index: 1, kind: input, shape index: {}]   ;;  %s2550_s2 = inlined_call_operand.vmem [shape: f32[1,8], index: 2, kind: input, shape index: {}]   ;;  %s2551_s3 = inlined_call_operand.vmem [shape: bf16[3,8], index: 3, kind: input, shape index: {}]   ;;  %s2552_s4 = inlined_call_operand.vmem [shape: f32[3,1], index: 4, kind: input, shape index: {}]   ;;  %s2553_s5 = inlined_call_operand.vmem [shape: bf16[8,3], index: 5, kind: input, shape index: {}]   ;;  %s2554_s6 = inlined_call_operand.vmem [shape: f32[1,3], index: 6, kind: input, shape index: {}]   ;;  %s2555_s7 = inlined_call_operand.vmem [shape: f32[2,3,64], index: 7, kind: output, shape index: {0}]   ;;  %s2556_s8 = inlined_call_operand.vmem [shape: bf16[2,10,24,3], index: 8, kind: output, shape index: {1}]  }
   0x1 LB: > { %s1415_s28 = sadd.s32 4294967295, %s1906_s27   ;;  %p1419_p0 = scmp.ge.s32.totalorder %s1906_s27, 1  ;;  %s1906_s27 = sphi %s1965_s27, %s19_s27  }
   0x2   : > { %p265_p1 = scmp.lt.s32.totalorder %s1906_s27, 3 }
   0x4   : > { %p266_p2 = pnand %p1419_p0, %p265_p1 }
   0x5   : > { %p303_p3 = scmp.lt.s32.totalorder (!%p266_p2), %s1415_s28, 1  ;;  %s1908_s11 = smov (!%p266_p2), 24  }
   0x6   : > { %269 = sbr.rel (%p266_p2) target bundleno = 690 (0x2b2), region = 48  ;;  %s1909_s12 = smov (!%p266_p2), 16  }
   0x7   : > { %s1910_s13 = smov (!%p266_p2), 8   ;;  %s1911_s14 = smov (!%p266_p2), 32  }
   0x8   : > { %s1912_s15 = smov (!%p266_p2), 40   ;;  %s1913_s20 = smov (!%p266_p2), 48  }
   0x9   : > { %s1914_s25 = smov (!%p266_p2), 56   ;;  %s1915_s26 = smov (!%p266_p2), 64  }
   0xb   : > { %s2558_s28 = smov (!%p303_p3, %s1415_s28), 1  ;;  %vm435_vm0 = vcmask 1045504   ;;  %vm1005_vm1 = vcmask 1043456   ;;  %vm769_vm2 = vcmask 64512   ;;  %vm786_vm3 = vcmask 130048  }
   0xc   : > { %s1613_s29 = smul.u32 120, %s2558_s28  ;;  %vm803_vm4 = vcmask 195584   ;;  %vm820_vm5 = vcmask 261120   ;;  %vm837_vm6 = vcmask 326656   ;;  %vm854_vm7 = vcmask 392192   ;;  %s1421_s22 = sshll.u32 %s2558_s28, 2 }
   0xd   : > { %vm871_vm8 = vcmask 457728   ;;  %vm888_vm9 = vcmask 523264   ;;  %vm921_vm10 = vcmask 1040384   ;;  %vm992_vm11 = vcmask 588800  }
   0xe   : > { %s1981_s10 = scalar_lea.vmem %s2548_s0, %s1613_s29  ;;  %vm1917_vm12 = vmmov 0   ;;  %s2466_s18 = scalar_lea.vmem %s2556_s8, %s1613_s29  ;;  %vm1298_vm13 = vcmask 19456   ;;  %vm1148_vm14 = vcmask 518144  }
   0xf   : > { %v1984_v0 = vld [vmem:[%s1981_s10 + $0x18] sm:$0xff]   ;;  %v1987_v1 = vld [vmem:[%s1981_s10 + $0x8] sm:$0xff]   ;;  %v1536_v2 = vld [vmem:[%s1981_s10 + $0x10] sm:$0xff]  }
  0x10   : > { %v1489_v3 = vunpack.c.l.bf16 %v1984_v0  ;;  %v1992_v4 = vunpack.c.h.bf16 %v1984_v0  ;;  %v1482_v5 = vunpack.c.h.bf16 %v1987_v1  ;;  %v1995_v6 = vunpack.c.l.bf16 %v1536_v2  ;;  %v1998_v7 = vld [vmem:[%s1981_s10] sm:$0xff]   ;;  %v1539_v8 = vld [vmem:[%s1981_s10 + $0x28] sm:$0xff]   ;;  %v2037_v36 = vld [vmem:[%s1981_s10 + $0x30] sm:$0xff]  }
  0x11   : > { %v1481_v9 = vunpack.c.l.bf16 %v1987_v1  ;;  %v2003_v10 = vunpack.c.h.bf16 %v1998_v7  ;;  %v1486_v11 = vunpack.c.h.bf16 %v1536_v2  ;;  %v2005_v12 = vunpack.c.l.bf16 %v1539_v8  ;;  %v2018_v17 = vld [vmem:[%s1981_s10 + $0x20] sm:$0xff]   ;;  %v2054_v44 = vld [vmem:[%s1981_s10 + $0x38] sm:$0xff]   ;;  %v2075_v54 = vld [vmem:[%s1981_s10 + $0x68] sm:$0xff]  }
  0x12   : > { %v2010_v13 = vpack.i.bf16 %v1992_v4, %v1489_v3  ;;  %v1634_v14 = vpack.i.bf16 %v1995_v6, %v1482_v5  ;;  %v396_v15 = vrot.slane %v1995_v6, 1  ;;  %v439_v16 = vrot.slane %v1995_v6, 2  ;;  %v2069_v49 = vld [vmem:[%s1981_s10 + $0x60] sm:$0xff]   ;;  %v1548_v56 = vld [vmem:[%s1981_s10 + $0x70] sm:$0xff]  }
  0x13   : > { %v437_v18 = vrot.slane %v1481_v9, 2  ;;  %v436_v19 = vrot.slane %v2003_v10, 2  ;;  %v395_v20 = vrot.slane %v2003_v10, 1  ;;  %v440_v21 = vrot.slane %v1486_v11, 2  ;;  %v1542_v9 = vld [vmem:[%s1981_s10 + $0x40] sm:$0xff]  }
  0x14   : > { %1640 = vrot.lane.b32.xlu1 %v2010_v13, %s1908_s11  ;;  %1635 = vrot.lane.b32.xlu0 %v1634_v14, %s1908_s11  ;;  %v397_v22 = vrot.slane %v1992_v4, 1  ;;  %v398_v23 = vrot.slane %v2005_v12, 1  ;;  %v1498_v24 = vunpack.c.h.bf16 %v1539_v8  ;;  %v445_v25 = vrot.slane %v2005_v12, 2 }
  0x15   : > { %v438_v26 = vsel %vm435_vm0, %v436_v19, %v437_v18  ;;  %v1644_v27 = vpack.i.bf16 %v396_v15, %v395_v20  ;;  %v441_v28 = vsel %vm435_vm0, %v439_v16, %v440_v21  ;;  %v1493_v29 = vunpack.c.l.bf16 %v2018_v17 }
  0x16   : > { %v1654_v30 = vpack.i.bf16 %v438_v26, %v436_v19  ;;  %v446_v31 = vrot.slane %v1498_v24, 2  ;;  %v442_v32 = vrot.slane %v1992_v4, 2  ;;  %v1659_v34 = vpack.i.bf16 %v441_v28, %v439_v16  ;;  %v2131_v26 = vld [vmem:[%s1981_s10 + $0x48] sm:$0xff]  }
  0x17   : > { %v443_v33 = vrot.slane %v1493_v29, 2  ;;  %v2034_v35 = vpack.i.bf16 %v398_v23, %v397_v22  ;;  %v1501_v39 = vunpack.c.l.bf16 %v2037_v36  ;;  %v2050_v42 = vunpack.c.h.bf16 %v2037_v36  ;;  %v1898_v29 = vld [vmem:[%s2549_s1 + $0x8] sm:$0xff]  }
  0x18   : > { %1655 = vrot.lane.b32.xlu1 %v1654_v30, %s1909_s12  ;;  %1645 = vrot.lane.b32.xlu0 %v1644_v27, %s1910_s13  ;;  %v447_v37 = vsel %vm435_vm0, %v445_v25, %v446_v31  ;;  %v1494_v43 = vunpack.c.h.bf16 %v2018_v17  ;;  %v1505_v48 = vunpack.c.l.bf16 %v2054_v44  ;;  %v1684_v51 = vpack.i.bf16 %v397_v22, %v396_v15  ;;  %v1895_v15 = vld [vmem:[%s2549_s1 + $0x20] ss:$0 sps:$4 sm:$0xff]   ;;  %v1896_v22 = vld [vmem:[%s2549_s1 + $0x18] sm:$0xff]  }
  0x19   : > { %v444_v38 = vsel %vm435_vm0, %v442_v32, %v443_v33  ;;  %v2045_v40 = vpack.i.bf16 %v447_v37, %v445_v25  ;;  %v1679_v45 = vpack.i.bf16 %v2050_v42, %v1501_v39  ;;  %v399_v47 = vrot.slane %v2050_v42, 1  ;;  %1610 = vmatprep.subr.msk.bf16.mxu0 %vm1005_vm1, %v1895_v15  ;;  %v1897_v25 = vld [vmem:[%s2549_s1 + $0x10] sm:$0xff]   ;;  %v1545_v27 = vld [vmem:[%s1981_s10 + $0x58] sm:$0xff]  }
  0x1a   : > { %v2047_v41 = vpack.i.bf16 %v444_v38, %v442_v32  ;;  %v1669_v46 = vpack.i.bf16 %v2005_v12, %v1494_v43  ;;  %v448_v52 = vrot.slane %v2050_v42, 2  ;;  %v449_v53 = vrot.slane %v1505_v48, 2  ;;  %v1899_v38 = vld [vmem:[%s2549_s1] sm:$0xff]  }
  0x1b   : > { %v1689_v50 = vpack.i.bf16 %v399_v47, %v398_v23  ;;  %v2078_v55 = vunpack.c.h.bf16 %v2069_v49  ;;  %v1529_v57 = vunpack.c.l.bf16 %v2075_v54  ;;  %v2086_v61 = vunpack.c.l.bf16 %v1548_v56 }
  0x1c   : > { %1660 = vrot.lane.b32.xlu1 %v1659_v34, %s1909_s12  ;;  %1650 = vrot.lane.b32.xlu0 %v2034_v35, %s1910_s13  ;;  %v450_v59 = vsel %vm435_vm0, %v448_v52, %v449_v53  ;;  %v1534_v62 = vunpack.c.h.bf16 %v1548_v56  ;;  %v1506_v18 = vunpack.c.h.bf16 %v2054_v44  ;;  %v2107_v19 = vunpack.c.l.bf16 %v1542_v9 }
  0x1d   : > { %v591_v58 = vrot.slane %v2078_v55, 2  ;;  %v592_v60 = vrot.slane %v1529_v57, 2  ;;  %v2091_v63 = vpack.i.bf16 %v450_v59, %v448_v52  ;;  %v718_v8 = vrot.slane %v2086_v61, 2 }
  0x1e   : > { %v719_v14 = vrot.slane %v1534_v62, 2  ;;  %v1007_v21 = vsel %vm1005_vm1, %v1895_v15, 0  ;;  %v1729_v23 = vpack.i.bf16 %v2107_v19, %v1506_v18  ;;  %v400_v24 = vrot.slane %v2107_v19, 1 }
  0x1f   : > { %v593_v2 = vsel %vm435_vm0, %v591_v58, %v592_v60  ;;  %1569 = vmatpush3.bf16.msra.mxu0 %v1007_v21  ;;  %v1510_v28 = vunpack.c.h.bf16 %v1542_v9  ;;  %v2141_v30 = vunpack.c.h.bf16 %v2131_v26  ;;  %v2143_v31 = vunpack.c.l.bf16 %v1545_v27 }
  0x20   : > { %1675 = vrot.lane.b32.xlu1 %v2045_v40, %s1909_s12  ;;  %1665 = vrot.lane.b32.xlu0 %v2047_v41, %s1909_s12  ;;  %v2096_v11 = vpack.i.bf16 %v593_v2, %v591_v58  ;;  %v720_v16 = vsel %vm435_vm0, %v718_v8, %v719_v14  ;;  %v451_v32 = vrot.slane %v2107_v19, 2  ;;  %v1513_v59 = vunpack.c.l.bf16 %v2131_v26 }
  0x21   : > { %v2109_v20 = vpack.i.bf16 %v720_v16, %v718_v8  ;;  %1570 = vmatprep.subr.bf16.mxu0 %v1896_v22  ;;  %v452_v33 = vrot.slane %v1510_v28, 2  ;;  %v402_v37 = vrot.slane %v2143_v31, 1  ;;  %v457_v48 = vrot.slane %v2143_v31, 2 }
  0x22   : > { %v1799_v60 = vpack.i.bf16 %v2141_v30, %v1513_v59  ;;  %v1525_v62 = vunpack.c.l.bf16 %v2069_v49  ;;  %v565_v9 = vrot.slane %v2078_v55, 1  ;;  %v692_v16 = vrot.slane %v2086_v61, 1 }
  0x23   : > { %1571 = vmatpush3.bf16.msra.mxu0 %v1896_v22 }
  0x24   : > { %1680 = vrot.lane.b32.xlu1 %v1679_v45, %s1908_s11  ;;  %1670 = vrot.lane.b32.xlu0 %v1669_v46, %s1908_s11  ;;  %v1819_v14 = vpack.i.bf16 %v565_v9, %v402_v37  ;;  %v1869_v21 = vpack.i.bf16 %v692_v16, %v565_v9 }
  0x25   : > { %1572 = vmatprep.subr.bf16.mxu0 %v1897_v25 }
  0x27   : > { %1573 = vmatpush3.bf16.msra.mxu0 %v1897_v25 }
  0x28   : > { %1690 = vrot.lane.b32.xlu1 %v1689_v50, %s1911_s14  ;;  %1685 = vrot.lane.b32.xlu0 %v1684_v51, %s1911_s14  ;;  %v454_v51 = vrot.slane %v2141_v30, 2 }
  0x29   : > { %1574 = vmatprep.subr.bf16.mxu0 %v1898_v29 }
  0x2b   : > { %1575 = vmatpush3.bf16.msra.mxu0 %v1898_v29 }
  0x2c   : > { %1700 = vrot.lane.b32.xlu1 %v2047_v41, %s1912_s15  ;;  %1695 = vrot.lane.b32.xlu0 %v1659_v34, %s1912_s15  ;;  %v2147_v34 = vld [vmem:[%s1981_s10 + $0x50] sm:$0xff]  }
  0x2d   : > { %1576 = vmatprep.subr.bf16.mxu0 %v1899_v38  ;;  %v1518_v2 = vunpack.c.h.bf16 %v2147_v34 }
  0x2f   : > { %1577 = vmatpush3.bf16.msra.mxu0 %v1899_v38  ;;  %v1804_v8 = vpack.i.bf16 %v2143_v31, %v1518_v2 }
  0x30   : > { %1710 = vrot.lane.b32.xlu1 %v2091_v63, %s1912_s15  ;;  %1705 = vrot.lane.b32.xlu0 %v2045_v40, %s1912_s15 }
  0x34   : > { %1720 = vrot.lane.b32.xlu1 %v1669_v46, %s1913_s20  ;;  %1715 = vrot.lane.b32.xlu0 %v2010_v13, %s1913_s20  ;;  %v1739_v13 = vpack.i.bf16 %v400_v24, %v399_v47  ;;  %v1522_v46 = vunpack.c.h.bf16 %v1545_v27  ;;  %v1517_v47 = vunpack.c.l.bf16 %v2147_v34 }
  0x36   : > { %v458_v50 = vrot.slane %v1522_v46, 2  ;;  %v455_v52 = vrot.slane %v1517_v47, 2 }
  0x38   : > { %1730 = vrot.lane.b32.xlu1 %v1729_v23, %s1913_s20  ;;  %1725 = vrot.lane.b32.xlu0 %v1679_v45, %s1913_s20  ;;  %v453_v45 = vsel %vm435_vm0, %v451_v32, %v452_v33  ;;  %v459_v53 = vsel %vm435_vm0, %v457_v48, %v458_v50  ;;  %v456_v56 = vsel %vm435_vm0, %v454_v51, %v455_v52  ;;  %v1477_v33 = vunpack.c.l.bf16 %v1998_v7 }
  0x39   : > { %v1789_v57 = vpack.i.bf16 %v459_v53, %v457_v48  ;;  %v1784_v58 = vpack.i.bf16 %v456_v56, %v454_v51 }
  0x3c   : > { %1740 = vrot.lane.b32.xlu1 %v1739_v13, %s1914_s25  ;;  %1735 = vrot.lane.b32.xlu0 %v2034_v35, %s1914_s25  ;;  %v401_v35 = vrot.slane %v2141_v30, 1 }
  0x3e   : > { %v1814_v49 = vpack.i.bf16 %v401_v35, %v400_v24 }
  0x40   : > { %1750 = vrot.lane.b32.xlu1 %v2045_v40, %s1915_s26  ;;  %1745 = vrot.lane.b32.xlu0 %v2047_v41, %s1915_s26  ;;  %v1769_v40 = vpack.i.bf16 %v402_v37, %v401_v35  ;;  %v1764_v41 = vpack.i.bf16 %v453_v45, %v451_v32 }
  0x44   : > { %1760 = vrot.lane.b32.xlu1 %v2091_v63, %s1915_s26  ;;  %1755 = vrot.lane.b32.xlu0 %v1739_v13, %s1910_s13 }
  0x48   : > { %1770 = vrot.lane.b32.xlu1 %v1769_v40, %s1910_s13  ;;  %1765 = vrot.lane.b32.xlu0 %v1764_v41, %s1915_s26 }
  0x4c   : > { %1780 = vrot.lane.b32.xlu1 %v1764_v41, %s1909_s12  ;;  %1775 = vrot.lane.b32.xlu0 %v2091_v63, %s1909_s12  ;;  %v1809_v63 = vpack.i.bf16 %v2078_v55, %v1525_v62  ;;  %v1530_v55 = vunpack.c.h.bf16 %v2075_v54 }
  0x4e   : > { %v1859_v15 = vpack.i.bf16 %v2086_v61, %v1530_v55 }
  0x50   : > { %1790 = vrot.lane.b32.xlu1 %v1789_v57, %s1909_s12  ;;  %1785 = vrot.lane.b32.xlu0 %v1784_v58, %s1909_s12 }
  0x54   : > { %1800 = vrot.lane.b32.xlu1 %v1799_v60, %s1908_s11  ;;  %1795 = vrot.lane.b32.xlu0 %v1729_v23, %s1908_s11 }
  0x58   : > { %1810 = vrot.lane.b32.xlu1 %v1809_v63, %s1908_s11  ;;  %1805 = vrot.lane.b32.xlu0 %v1804_v8, %s1908_s11 }
  0x5c   : > { %1820 = vrot.lane.b32.xlu1 %v1819_v14, %s1911_s14  ;;  %1815 = vrot.lane.b32.xlu0 %v1814_v49, %s1911_s14 }
  0x60   : > { %1830 = vrot.lane.b32.xlu1 %v1784_v58, %s1912_s15  ;;  %1825 = vrot.lane.b32.xlu0 %v1764_v41, %s1912_s15 }
  0x64   : > { %1840 = vrot.lane.b32.xlu1 %v2096_v11, %s1912_s15  ;;  %1835 = vrot.lane.b32.xlu0 %v1789_v57, %s1912_s15 }
  0x68   : > { %1850 = vrot.lane.b32.xlu1 %v1804_v8, %s1913_s20  ;;  %1845 = vrot.lane.b32.xlu0 %v1799_v60, %s1913_s20 }
  0x6c   : > { %1860 = vrot.lane.b32.xlu1 %v1859_v15, %s1913_s20  ;;  %1855 = vrot.lane.b32.xlu0 %v1809_v63, %s1913_s20 }
  0x70   : > { %1870 = vrot.lane.b32.xlu1 %v1869_v21, %s1914_s25  ;;  %1865 = vrot.lane.b32.xlu0 %v1769_v40, %s1914_s25  ;;  %s311_s25 = scalar_lea.vmem %s2555_s7, %s1421_s22 }
  0x74   : > { %1880 = vrot.lane.b32.xlu1 %v1789_v57, %s1915_s26  ;;  %1875 = vrot.lane.b32.xlu0 %v1784_v58, %s1915_s26 }
  0x78   : > { %1890 = vrot.lane.b32.xlu1 %v2109_v20, %s1915_s26  ;;  %1885 = vrot.lane.b32.xlu0 %v2096_v11, %s1915_s26 }
  0x86   : > { %v1641_v54 = vpop.permute.xlu1 %1640  ;;  %v1636_v61 = vpop.permute.xlu0 %1635 }
  0x87   : > { %v1638_v52 = vunpack.i.h.bf16 %v1636_v61  ;;  %v1637_v53 = vunpack.i.l.bf16 %v1636_v61  ;;  %v1643_v56 = vunpack.i.h.bf16 %v1641_v54  ;;  %v1642_v57 = vunpack.i.l.bf16 %v1641_v54 }
  0x8a   : > { %v1656_v22 = vpop.permute.xlu1 %1655  ;;  %v1646_v23 = vpop.permute.xlu0 %1645 }
  0x8b   : > { %v1647_v32 = vunpack.i.l.bf16 %v1646_v23  ;;  %v1657_v11 = vunpack.i.l.bf16 %v1656_v22  ;;  %v1658_v37 = vunpack.i.h.bf16 %v1656_v22  ;;  %v1648_v46 = vunpack.i.h.bf16 %v1646_v23 }
  0x8d   : > { %v770_v38 = vsel %vm769_vm2, %v1477_v33, %v1647_v32  ;;  %v771_v45 = vsel %vm769_vm2, %v2003_v10, %v1647_v32  ;;  %v772_v10 = vsel %vm769_vm2, %v1482_v5, %v1648_v46  ;;  %v773_v62 = vsel %vm769_vm2, %v1995_v6, %v1648_v46 }
  0x8e   : > { %v1661_v24 = vpop.permute.xlu1 %1660  ;;  %v1651_v25 = vpop.permute.xlu0 %1650  ;;  %v787_v7 = vsel %vm786_vm3, %v770_v38, %v1657_v11  ;;  %v788_v41 = vsel %vm786_vm3, %v771_v45, %v1658_v37 }
  0x8f   : > { %v1663_v48 = vunpack.i.h.bf16 %v1661_v24  ;;  %v1662_v50 = vunpack.i.l.bf16 %v1661_v24  ;;  %v1653_v51 = vunpack.i.h.bf16 %v1651_v25  ;;  %v1652_v63 = vunpack.i.l.bf16 %v1651_v25 }
  0x90   : > { %v804_v8 = vsel %vm803_vm4, %v787_v7, %v1637_v53  ;;  %v805_v9 = vsel %vm803_vm4, %v788_v41, %v1638_v52 }
  0x91   : > { %v789_v14 = vsel %vm786_vm3, %v772_v10, %v1662_v50  ;;  %v790_v1 = vsel %vm786_vm3, %v773_v62, %v1663_v48  ;;  %v776_v5 = vsel %vm769_vm2, %v1494_v43, %v1653_v51  ;;  %v777_v21 = vsel %vm769_vm2, %v2005_v12, %v1653_v51 }
  0x92   : > { %v1676_v13 = vpop.permute.xlu1 %1675  ;;  %v1666_v27 = vpop.permute.xlu0 %1665  ;;  %v774_v43 = vsel %vm769_vm2, %v1489_v3, %v1652_v63  ;;  %v775_v24 = vsel %vm769_vm2, %v1992_v4, %v1652_v63  ;;  %v806_v25 = vsel %vm803_vm4, %v789_v14, %v1642_v57  ;;  %v807_v12 = vsel %vm803_vm4, %v790_v1, %v1643_v56 }
  0x93   : > { %v1677_v49 = vunpack.i.l.bf16 %v1676_v13  ;;  %v1678_v55 = vunpack.i.h.bf16 %v1676_v13  ;;  %v1668_v15 = vunpack.i.h.bf16 %v1666_v27  ;;  %v1667_v16 = vunpack.i.l.bf16 %v1666_v27 }
  0x95   : > { %v793_v13 = vsel %vm786_vm3, %v776_v5, %v1677_v49  ;;  %v794_v32 = vsel %vm786_vm3, %v777_v21, %v1678_v55  ;;  %v791_v0 = vsel %vm786_vm3, %v774_v43, %v1667_v16  ;;  %v792_v3 = vsel %vm786_vm3, %v775_v24, %v1668_v15 }
  0x96   : > { %v2213_v28 = vpop.permute.xlu1 %1680  ;;  %v2215_v29 = vpop.permute.xlu0 %1670 }
  0x97   : > { %v1682_v6 = vunpack.i.l.bf16 %v2213_v28  ;;  %v1683_v54 = vunpack.i.h.bf16 %v2213_v28  ;;  %v1673_v61 = vunpack.i.h.bf16 %v2215_v29  ;;  %v1672_v22 = vunpack.i.l.bf16 %v2215_v29 }
  0x99   : > { %v2268_v4 = vsel %vm803_vm4, %v793_v13, %v1682_v6  ;;  %v2271_v33 = vsel %vm803_vm4, %v794_v32, %v1683_v54  ;;  %v808_v11 = vsel %vm803_vm4, %v791_v0, %v1672_v22  ;;  %v809_v37 = vsel %vm803_vm4, %v792_v3, %v1673_v61 }
  0x9a   : > { %v2218_v20 = vpop.permute.xlu1 %1690  ;;  %v2220_v35 = vpop.permute.xlu0 %1685 }
  0x9b   : > { %v1692_v27 = vunpack.i.l.bf16 %v2218_v20  ;;  %v1688_v28 = vunpack.i.h.bf16 %v2220_v35  ;;  %v1687_v29 = vunpack.i.l.bf16 %v2220_v35  ;;  %v1693_v46 = vunpack.i.h.bf16 %v2218_v20 }
  0x9d   : > { %v825_v50 = vsel %vm820_vm5, %v808_v11, %v1692_v27  ;;  %v826_v51 = vsel %vm820_vm5, %v809_v37, %v1692_v27  ;;  %v821_v52 = vsel %vm820_vm5, %v804_v8, %v1687_v29  ;;  %v823_v53 = vsel %vm820_vm5, %v806_v25, %v1688_v28 }
  0x9e   : > { %v2225_v47 = vpop.permute.xlu1 %1700  ;;  %v2227_v40 = vpop.permute.xlu0 %1695  ;;  %v822_v63 = vsel %vm820_vm5, %v805_v9, %v1687_v29 }
  0x9f   : > { %v1702_v38 = vunpack.i.l.bf16 %v2225_v47  ;;  %v1703_v7 = vunpack.i.h.bf16 %v2225_v47  ;;  %v1698_v41 = vunpack.i.h.bf16 %v2227_v40  ;;  %v1697_v48 = vunpack.i.l.bf16 %v2227_v40 }
  0xa0   : > { %v824_v47 = vsel %vm820_vm5, %v807_v12, %v1688_v28 }
  0xa1   : > { %v840_v14 = vsel %vm837_vm6, %v823_v53, %v1702_v38  ;;  %v841_v8 = vsel %vm837_vm6, %v824_v47, %v1703_v7  ;;  %v838_v49 = vsel %vm837_vm6, %v821_v52, %v1697_v48  ;;  %v839_v55 = vsel %vm837_vm6, %v822_v63, %v1698_v41 }
  0xa2   : > { %v2234_v58 = vpop.permute.xlu1 %1710  ;;  %v2236_v60 = vpop.permute.xlu0 %1705 }
  0xa3   : > { %v1707_v56 = vunpack.i.l.bf16 %v2236_v60  ;;  %v1713_v15 = vunpack.i.h.bf16 %v2234_v58  ;;  %v1712_v16 = vunpack.i.l.bf16 %v2234_v58  ;;  %v1708_v9 = vunpack.i.h.bf16 %v2236_v60 }
  0xa5   : > { %v842_v54 = vsel %vm837_vm6, %v825_v50, %v1707_v56  ;;  %v843_v56 = vsel %vm837_vm6, %v826_v51, %v1708_v9 }
  0xa6   : > { %v1721_v23 = vpop.permute.xlu1 %1720  ;;  %v1716_v17 = vpop.permute.xlu0 %1715 }
  0xa7   : > { %v1723_v57 = vunpack.i.h.bf16 %v1721_v23  ;;  %v1722_v10 = vunpack.i.l.bf16 %v1721_v23  ;;  %v1717_v62 = vunpack.i.l.bf16 %v1716_v17  ;;  %v1718_v40 = vunpack.i.h.bf16 %v1716_v17 }
  0xa9   : > { %v857_v61 = vsel %vm854_vm7, %v840_v14, %v1722_v10  ;;  %v858_v22 = vsel %vm854_vm7, %v841_v8, %v1723_v57  ;;  %v855_v23 = vsel %vm854_vm7, %v838_v49, %v1717_v62  ;;  %v856_v17 = vsel %vm854_vm7, %v839_v55, %v1718_v40 }
  0xaa   : > { %v2276_v35 = vpop.permute.xlu1 %1730  ;;  %v2278_v45 = vpop.permute.xlu0 %1725  ;;  %v827_v55 = vsel %vm820_vm5, %v2268_v4, %v1693_v46 }
  0xab   : > { %v1728_v43 = vunpack.i.h.bf16 %v2278_v45  ;;  %v1727_v24 = vunpack.i.l.bf16 %v2278_v45  ;;  %v1733_v57 = vunpack.i.h.bf16 %v2276_v35  ;;  %v1732_v63 = vunpack.i.l.bf16 %v2276_v35 }
  0xac   : > { %v828_v35 = vsel %vm820_vm5, %v2271_v33, %v1693_v46 }
  0xad   : > { %v859_v47 = vsel %vm854_vm7, %v842_v54, %v1727_v24  ;;  %v860_v14 = vsel %vm854_vm7, %v843_v56, %v1728_v43  ;;  %v844_v54 = vsel %vm837_vm6, %v827_v55, %v1712_v16 }
  0xae   : > { %v2292_v1 = vpop.permute.xlu1 %1740  ;;  %v1736_v5 = vpop.permute.xlu0 %1735 }
  0xaf   : > { %v1738_v6 = vunpack.i.h.bf16 %v1736_v5  ;;  %v1737_v21 = vunpack.i.l.bf16 %v1736_v5  ;;  %v1742_v58 = vunpack.i.l.bf16 %v2292_v1  ;;  %v1743_v40 = vunpack.i.h.bf16 %v2292_v1 }
  0xb1   : > { %v872_v29 = vsel %vm871_vm8, %v855_v23, %v1737_v21  ;;  %v873_v32 = vsel %vm871_vm8, %v856_v17, %v1737_v21  ;;  %v874_v0 = vsel %vm871_vm8, %v857_v61, %v1738_v6  ;;  %v875_v3 = vsel %vm871_vm8, %v858_v22, %v1738_v6 }
  0xb2   : > { %v1751_v25 = vpop.permute.xlu1 %1750  ;;  %v1746_v60 = vpop.permute.xlu0 %1745  ;;  %v876_v5 = vsel %vm871_vm8, %v859_v47, %v1742_v58  ;;  %v877_v8 = vsel %vm871_vm8, %v860_v14, %v1742_v58  ;;  %v845_v61 = vsel %vm837_vm6, %v828_v35, %v1713_v15  ;;  %v861_v17 = vsel %vm854_vm7, %v844_v54, %v1732_v63 }
  0xb3   : > { %v1753_v12 = vunpack.i.h.bf16 %v1751_v25  ;;  %v1752_v13 = vunpack.i.l.bf16 %v1751_v25  ;;  %v1748_v27 = vunpack.i.h.bf16 %v1746_v60  ;;  %v1747_v28 = vunpack.i.l.bf16 %v1746_v60 }
  0xb4   : > { %v862_v4 = vsel %vm854_vm7, %v845_v61, %v1733_v57  ;;  %v878_v43 = vsel %vm871_vm8, %v861_v17, %v1743_v40 }
  0xb5   : > { %v891_v11 = vsel %vm888_vm9, %v874_v0, %v1752_v13  ;;  %v892_v37 = vsel %vm888_vm9, %v875_v3, %v1753_v12  ;;  %v889_v38 = vsel %vm888_vm9, %v872_v29, %v1747_v28  ;;  %v890_v45 = vsel %vm888_vm9, %v873_v32, %v1748_v27 }
  0xb6   : > { %v925_v7 = vrot.slane %v891_v11, 7  ;;  %v926_v41 = vrot.slane %v892_v37, 7  ;;  %v922_v48 = vrot.slane %v889_v38, 7  ;;  %v923_v50 = vrot.slane %v890_v45, 7  ;;  %v1761_v52 = vpop.permute.xlu1 %1760  ;;  %v1756_v53 = vpop.permute.xlu0 %1755 }
  0xb7   : > { %v1763_v10 = vunpack.i.h.bf16 %v1761_v52  ;;  %v1762_v62 = vunpack.i.l.bf16 %v1761_v52  ;;  %v879_v33 = vsel %vm871_vm8, %v862_v4, %v1743_v40  ;;  %v1758_v38 = vunpack.i.h.bf16 %v1756_v53 }
  0xb8   : > { %v924_v49 = vsel %vm921_vm10, %v922_v48, %v923_v50  ;;  %v927_v51 = vsel %vm921_vm10, %v925_v7, %v926_v41  ;;  %v1757_v45 = vunpack.i.l.bf16 %v1756_v53 }
  0xb9   : > { %v893_v1 = vsel %vm888_vm9, %v876_v5, %v1762_v62  ;;  %v894_v9 = vsel %vm888_vm9, %v877_v8, %v1763_v10  ;;  %v954_v20 = vpack.c.bf16 %v927_v51, %v924_v49  ;;  %v780_v57 = vsel %vm769_vm2, %v1506_v18, %v1758_v38 }
  0xba   : > { %v1771_v6 = vpop.permute.xlu1 %1770  ;;  %v1766_v21 = vpop.permute.xlu0 %1765  ;;  %v928_v46 = vrot.slane %v893_v1, 7  ;;  %v929_v24 = vrot.slane %v894_v9, 7  ;;  %v781_v10 = vsel %vm769_vm2, %v2107_v19, %v1758_v38  ;;  %v778_v53 = vsel %vm769_vm2, %v1501_v39, %v1757_v45 }
  0xbb   : > { %v1768_v22 = vunpack.i.h.bf16 %v1766_v21  ;;  %v1767_v23 = vunpack.i.l.bf16 %v1766_v21  ;;  %1578 = vmatprep.mubr.msk.bf16.mxu0 %vm992_vm11, %v954_v20  ;;  %v1773_v7 = vunpack.i.h.bf16 %v1771_v6  ;;  %v1772_v50 = vunpack.i.l.bf16 %v1771_v6 }
  0xbc   : > { %v930_v13 = vsel %vm921_vm10, %v928_v46, %v929_v24  ;;  %v779_v47 = vsel %vm769_vm2, %v2050_v42, %v1757_v45 }
  0xbd   : > { %v895_v58 = vsel %vm888_vm9, %v878_v43, %v1767_v23  ;;  %v896_v25 = vsel %vm888_vm9, %v879_v33, %v1768_v22  ;;  %v784_v14 = vsel %vm769_vm2, %v1518_v2, %v1773_v7  ;;  %v785_v44 = vsel %vm769_vm2, %v2143_v31, %v1773_v7 }
  0xbe   : > { %v1781_v15 = vpop.permute.xlu1 %1780  ;;  %v1776_v16 = vpop.permute.xlu0 %1775  ;;  %v931_v60 = vrot.slane %v895_v58, 7  ;;  %v932_v12 = vrot.slane %v896_v25, 7  ;;  %v782_v19 = vsel %vm769_vm2, %v1513_v59, %v1772_v50  ;;  %v783_v36 = vsel %vm769_vm2, %v2141_v30, %v1772_v50 }
  0xbf   : > { %v1782_v52 = vunpack.i.l.bf16 %v1781_v15  ;;  %v1783_v56 = vunpack.i.h.bf16 %v1781_v15  ;;  %v1778_v62 = vunpack.i.h.bf16 %v1776_v16  ;;  %v1777_v63 = vunpack.i.l.bf16 %v1776_v16 }
  0xc0   : > { %v933_v27 = vsel %vm921_vm10, %v931_v60, %v932_v12 }
  0xc1   : > { %v955_v32 = vpack.c.bf16 %v933_v27, %v930_v13  ;;  %v797_v39 = vsel %vm786_vm3, %v780_v57, %v1782_v52  ;;  %v798_v34 = vsel %vm786_vm3, %v781_v10, %v1783_v56  ;;  %v795_v31 = vsel %vm786_vm3, %v778_v53, %v1777_v63 }
  0xc2   : > { %v1791_v28 = vpop.permute.xlu1 %1790  ;;  %v1786_v29 = vpop.permute.xlu0 %1785  ;;  %v796_v49 = vsel %vm786_vm3, %v779_v47, %v1778_v62 }
  0xc3   : > { %1579 = vmatmul.mubr.msk.bf16.vlgmr.msra.gmra.mxu0 %vm992_vm11, %v955_v32  ;;  %v1792_v42 = vunpack.i.l.bf16 %v1791_v28  ;;  %v1793_v5 = vunpack.i.h.bf16 %v1791_v28  ;;  %v1788_v2 = vunpack.i.h.bf16 %v1786_v29  ;;  %v1787_v8 = vunpack.i.l.bf16 %v1786_v29 }
  0xc5   : > { %v801_v6 = vsel %vm786_vm3, %v784_v14, %v1792_v42  ;;  %v802_v22 = vsel %vm786_vm3, %v785_v44, %v1793_v5  ;;  %v800_v23 = vsel %vm786_vm3, %v783_v36, %v1788_v2  ;;  %v799_v17 = vsel %vm786_vm3, %v782_v19, %v1787_v8 }
  0xc6   : > { %v1801_v0 = vpop.permute.xlu1 %1800  ;;  %v1796_v3 = vpop.permute.xlu0 %1795 }
  0xc7   : > { %v1803_v51 = vunpack.i.h.bf16 %v1801_v0  ;;  %v1802_v55 = vunpack.i.l.bf16 %v1801_v0  ;;  %v1798_v26 = vunpack.i.h.bf16 %v1796_v3  ;;  %v1797_v35 = vunpack.i.l.bf16 %v1796_v3 }
  0xc9   : > { %v814_v20 = vsel %vm803_vm4, %v797_v39, %v1802_v55  ;;  %v815_v43 = vsel %vm803_vm4, %v798_v34, %v1803_v51  ;;  %v812_v24 = vsel %vm803_vm4, %v795_v31, %v1797_v35  ;;  %v813_v58 = vsel %vm803_vm4, %v796_v49, %v1798_v26 }
  0xca   : > { %v1811_v11 = vpop.permute.xlu1 %1810  ;;  %v1806_v37 = vpop.permute.xlu0 %1805 }
  0xcb   : > { %v1812_v59 = vunpack.i.l.bf16 %v1811_v11  ;;  %v1807_v1 = vunpack.i.l.bf16 %v1806_v37  ;;  %v1813_v21 = vunpack.i.h.bf16 %v1811_v11  ;;  %v1808_v54 = vunpack.i.h.bf16 %v1806_v37 }
  0xcd   : > { %v818_v25 = vsel %vm803_vm4, %v801_v6, %v1812_v59  ;;  %v816_v15 = vsel %vm803_vm4, %v799_v17, %v1807_v1  ;;  %v819_v12 = vsel %vm803_vm4, %v802_v22, %v1813_v21  ;;  %v817_v13 = vsel %vm803_vm4, %v800_v23, %v1808_v54 }
  0xce   : > { %v1821_v41 = vpop.permute.xlu1 %1820  ;;  %v2348_v48 = vpop.permute.xlu0 %1815 }
  0xcf   : > { %v1822_v61 = vunpack.i.l.bf16 %v1821_v41  ;;  %v1823_v4 = vunpack.i.h.bf16 %v1821_v41  ;;  %v1818_v33 = vunpack.i.h.bf16 %v2348_v48  ;;  %v1817_v46 = vunpack.i.l.bf16 %v2348_v48 }
  0xd1   : > { %v833_v27 = vsel %vm820_vm5, %v816_v15, %v1822_v61  ;;  %v834_v29 = vsel %vm820_vm5, %v817_v13, %v1822_v61  ;;  %v835_v32 = vsel %vm820_vm5, %v818_v25, %v1823_v4  ;;  %v836_v11 = vsel %vm820_vm5, %v819_v12, %v1823_v4 }
  0xd2   : > { %v1831_v18 = vpop.permute.xlu1 %1830  ;;  %v2365_v40 = vpop.permute.xlu0 %1825  ;;  %v829_v37 = vsel %vm820_vm5, %v812_v24, %v1817_v46  ;;  %v830_v38 = vsel %vm820_vm5, %v813_v58, %v1817_v46  ;;  %v831_v45 = vsel %vm820_vm5, %v814_v20, %v1818_v33  ;;  %v832_v7 = vsel %vm820_vm5, %v815_v43, %v1818_v33 }
  0xd3   : > { %v1832_v28 = vunpack.i.l.bf16 %v1831_v18  ;;  %v1833_v0 = vunpack.i.h.bf16 %v1831_v18  ;;  %v1827_v3 = vunpack.i.l.bf16 %v2365_v40  ;;  %v1828_v41 = vunpack.i.h.bf16 %v2365_v40 }
  0xd5   : > { %v848_v57 = vsel %vm837_vm6, %v831_v45, %v1832_v28  ;;  %v849_v53 = vsel %vm837_vm6, %v832_v7, %v1833_v0  ;;  %v846_v47 = vsel %vm837_vm6, %v829_v37, %v1827_v3  ;;  %v847_v40 = vsel %vm837_vm6, %v830_v38, %v1828_v41 }
  0xd6   : > { %v1841_v9 = vpop.permute.xlu1 %1840  ;;  %v1836_v30 = vpop.permute.xlu0 %1835 }
  0xd7   : > { %v1843_v48 = vunpack.i.h.bf16 %v1841_v9  ;;  %v1842_v50 = vunpack.i.l.bf16 %v1841_v9  ;;  %v1838_v10 = vunpack.i.h.bf16 %v1836_v30  ;;  %v1837_v62 = vunpack.i.l.bf16 %v1836_v30 }
  0xd9   : > { %v852_v42 = vsel %vm837_vm6, %v835_v32, %v1842_v50  ;;  %v853_v34 = vsel %vm837_vm6, %v836_v11, %v1843_v48  ;;  %v850_v31 = vsel %vm837_vm6, %v833_v27, %v1837_v62  ;;  %v851_v49 = vsel %vm837_vm6, %v834_v29, %v1838_v10 }
  0xda   : > { %v1851_v16 = vpop.permute.xlu1 %1850  ;;  %v1846_v60 = vpop.permute.xlu0 %1845 }
  0xdb   : > { %v1852_v63 = vunpack.i.l.bf16 %v1851_v16  ;;  %v1853_v14 = vunpack.i.h.bf16 %v1851_v16  ;;  %v1847_v44 = vunpack.i.l.bf16 %v1846_v60  ;;  %v1848_v18 = vunpack.i.h.bf16 %v1846_v60 }
  0xdd   : > { %v865_v51 = vsel %vm854_vm7, %v848_v57, %v1852_v63  ;;  %v866_v26 = vsel %vm854_vm7, %v849_v53, %v1853_v14  ;;  %v863_v35 = vsel %vm854_vm7, %v846_v47, %v1847_v44  ;;  %v864_v9 = vsel %vm854_vm7, %v847_v40, %v1848_v18 }
  0xde   : > { %v1861_v52 = vpop.permute.xlu1 %1860  ;;  %v1856_v56 = vpop.permute.xlu0 %1855  ;;  %v1916_v40 = vmov 0.0  }
  0xdf   : > { %v1862_v19 = vunpack.i.l.bf16 %v1861_v52  ;;  %v1858_v36 = vunpack.i.h.bf16 %v1856_v56  ;;  %v1857_v39 = vunpack.i.l.bf16 %v1856_v56  ;;  %v1863_v5 = vunpack.i.h.bf16 %v1861_v52  ;;  %1586 = vmatprep.subr.bf16.mxu1 %v1916_v40  ;;  %1594 = vmatprep.mubr.msk.bf16.mxu1 %vm1917_vm12, %v1916_v40 }
  0xe1   : > { %v869_v30 = vsel %vm854_vm7, %v852_v42, %v1862_v19  ;;  %v867_v6 = vsel %vm854_vm7, %v850_v31, %v1857_v39  ;;  %v868_v21 = vsel %vm854_vm7, %v851_v49, %v1858_v36  ;;  %v870_v54 = vsel %vm854_vm7, %v853_v34, %v1863_v5  ;;  %v2441_v36 = vld [vmem:[%s2553_s5] sm:$0xf] }
  0xe2   : > { %v1871_v2 = vpop.permute.xlu1 %1870  ;;  %v1866_v8 = vpop.permute.xlu0 %1865  ;;  %1611 = vmatprep.subr.msk.bf16.mxu0 %vm1005_vm1, %v2441_v36  ;;  %v2447_v39 = vsel %vm1005_vm1, %v2441_v36, 0  ;;  %v1087_v42 = vld [vmem:[%s2552_s4] sm:$0x7]  ;;  %v1918_v34 = vmov 0  }
  0xe3   : > { %v1872_v55 = vunpack.i.l.bf16 %v1871_v2  ;;  %v1868_v59 = vunpack.i.h.bf16 %v1866_v8  ;;  %v1867_v1 = vunpack.i.l.bf16 %v1866_v8  ;;  %v1873_v61 = vunpack.i.h.bf16 %v1871_v2  ;;  %1599 = vmatpush3.bf16.msra.mxu0 %v2447_v39  ;;  %1894 = vset.pattern.permute.xlu0 %v1918_v34  ;;  %v1423_v8 = vld [vmem:[%s2550_s2] ss:$0 sm:$0xff] }
  0xe4   : > { %1090 = vperm.xlu0 %1894, %v1087_v42  }
  0xe5   : > { %v884_v22 = vsel %vm871_vm8, %v867_v6, %v1872_v55  ;;  %v885_v23 = vsel %vm871_vm8, %v868_v21, %v1872_v55  ;;  %v880_v24 = vsel %vm871_vm8, %v863_v35, %v1867_v1  ;;  %v881_v58 = vsel %vm871_vm8, %v864_v9, %v1867_v1 }
  0xe6   : > { %v1881_v17 = vpop.permute.xlu1 %1880  ;;  %v1876_v4 = vpop.permute.xlu0 %1875  ;;  %v882_v25 = vsel %vm871_vm8, %v865_v51, %v1868_v59  ;;  %v883_v15 = vsel %vm871_vm8, %v866_v26, %v1868_v59  ;;  %v886_v7 = vsel %vm871_vm8, %v869_v30, %v1873_v61  ;;  %v887_v41 = vsel %vm871_vm8, %v870_v54, %v1873_v61 }
  0xe7   : > { %v1883_v20 = vunpack.i.h.bf16 %v1881_v17  ;;  %v1882_v43 = vunpack.i.l.bf16 %v1881_v17  ;;  %v1878_v33 = vunpack.i.h.bf16 %v1876_v4  ;;  %v1877_v46 = vunpack.i.l.bf16 %v1876_v4 }
  0xe9   : > { %v899_v16 = vsel %vm888_vm9, %v882_v25, %v1882_v43  ;;  %v900_v60 = vsel %vm888_vm9, %v883_v15, %v1883_v20  ;;  %v897_v12 = vsel %vm888_vm9, %v880_v24, %v1877_v46  ;;  %v898_v13 = vsel %vm888_vm9, %v881_v58, %v1878_v33 }
  0xea   : > { %v937_v27 = vrot.slane %v899_v16, 7  ;;  %v938_v28 = vrot.slane %v900_v60, 7  ;;  %v934_v29 = vrot.slane %v897_v12, 7  ;;  %v935_v32 = vrot.slane %v898_v13, 7  ;;  %v1891_v0 = vpop.permute.xlu1 %1890  ;;  %v1886_v3 = vpop.permute.xlu0 %1885 }
  0xeb   : > { %v1893_v11 = vunpack.i.h.bf16 %v1891_v0  ;;  %v1892_v37 = vunpack.i.l.bf16 %v1891_v0  ;;  %v1888_v38 = vunpack.i.h.bf16 %v1886_v3  ;;  %v1887_v45 = vunpack.i.l.bf16 %v1886_v3  ;;  %v1434_v0 = vld [vmem:[%s2554_s6] ss:$0 sm:$0xff] }
  0xec   : > { %v936_v48 = vsel %vm921_vm10, %v934_v29, %v935_v32  ;;  %v939_v50 = vsel %vm921_vm10, %v937_v27, %v938_v28  ;;  %v1919_v13 = vmov 0.0|0.0   ;;  %v1086_v32 = vld [vmem:[%s2551_s3] sm:$0x3] }
  0xed   : > { %v903_v52 = vsel %vm888_vm9, %v886_v7, %v1892_v37  ;;  %v904_v56 = vsel %vm888_vm9, %v887_v41, %v1893_v11  ;;  %v901_v57 = vsel %vm888_vm9, %v884_v22, %v1887_v45  ;;  %v902_v10 = vsel %vm888_vm9, %v885_v23, %v1888_v38  ;;  %1302 = vst.msk [vmem:[%s2466_s18 + $0xc] sm:$0xf] %vm1298_vm13, %v1919_v13 }
  0xee   : > { %v943_v62 = vrot.slane %v903_v52, 7  ;;  %v944_v63 = vrot.slane %v904_v56, 7  ;;  %v940_v53 = vrot.slane %v901_v57, 7  ;;  %v941_v47 = vrot.slane %v902_v10, 7  ;;  %1305 = vst.msk [vmem:[%s2466_s18 + $0x18] sm:$0xf] %vm1298_vm13, %v1919_v13 }
  0xef   : > { %v956_v14 = vpack.c.bf16 %v939_v50, %v936_v48  ;;  %v1439_v27 = vcombine.low %v1919_v13, %v1919_v13  ;;  %v1440_v28 = vcombine.high %v1919_v13, %v1919_v13  ;;  %1308 = vst.msk [vmem:[%s2466_s18 + $0x24] sm:$0xf] %vm1298_vm13, %v1919_v13  ;;  %1311 = vst.msk [vmem:[%s2466_s18 + $0x30] sm:$0xf] %vm1298_vm13, %v1919_v13 }
  0xf0   : > { %v942_v44 = vsel %vm921_vm10, %v940_v53, %v941_v47  ;;  %v945_v18 = vsel %vm921_vm10, %v943_v62, %v944_v63  ;;  %1314 = vst.msk [vmem:[%s2466_s18 + $0x3c] sm:$0xf] %vm1298_vm13, %v1919_v13  ;;  %1317 = vst.msk [vmem:[%s2466_s18 + $0x48] sm:$0xf] %vm1298_vm13, %v1919_v13 }
  0xf1   : > { %1582 = vmatprep.mubr.msk.bf16.mxu0 %vm992_vm11, %v956_v14  ;;  %v957_v19 = vpack.c.bf16 %v945_v18, %v942_v44  ;;  %1299 = vst.msk [vmem:[%s2466_s18] sm:$0xf] %vm1298_vm13, %v1439_v27  ;;  %1300 = vst.msk [vmem:[%s2466_s18 + $0x4] sm:$0xf] %vm1298_vm13, %v1440_v28 }
  0xf2   : > { %1301 = vst.msk [vmem:[%s2466_s18 + $0x8] sm:$0xf] %vm1298_vm13, %v1439_v27  ;;  %1304 = vst.msk [vmem:[%s2466_s18 + $0x14] sm:$0xf] %vm1298_vm13, %v1439_v27 }
  0xf3   : > { %1583 = vmatmul.mubr.msk.bf16.gmra.mxu0 %vm992_vm11, %v957_v19  ;;  %1307 = vst.msk [vmem:[%s2466_s18 + $0x20] sm:$0xf] %vm1298_vm13, %v1439_v27  ;;  %1310 = vst.msk [vmem:[%s2466_s18 + $0x2c] sm:$0xf] %vm1298_vm13, %v1439_v27 }
  0xf4   : > { %1313 = vst.msk [vmem:[%s2466_s18 + $0x38] sm:$0xf] %vm1298_vm13, %v1439_v27  ;;  %1316 = vst.msk [vmem:[%s2466_s18 + $0x44] sm:$0xf] %vm1298_vm13, %v1439_v27 }
  0xf5   : > { %1319 = vst.msk [vmem:[%s2466_s18 + $0x50] sm:$0xf] %vm1298_vm13, %v1439_v27  ;;  %1320 = vst.msk [vmem:[%s2466_s18 + $0x54] sm:$0xf] %vm1298_vm13, %v1919_v13 }
  0xf6   : > { %1322 = vst.msk [vmem:[%s2466_s18 + $0x5c] sm:$0xf] %vm1298_vm13, %v1439_v27  ;;  %1323 = vst.msk [vmem:[%s2466_s18 + $0x60] sm:$0xf] %vm1298_vm13, %v1919_v13 }
  0xf7   : > { %1325 = vst.msk [vmem:[%s2466_s18 + $0x68] sm:$0xf] %vm1298_vm13, %v1439_v27  ;;  %1326 = vst.msk [vmem:[%s2466_s18 + $0x6c] sm:$0xf] %vm1298_vm13, %v1439_v27 }
  0xf8   : > { %1327 = vst.msk [vmem:[%s2466_s18 + $0x70] sm:$0xf] %vm1298_vm13, %v1440_v28  ;;  %1328 = vst.msk [vmem:[%s2466_s18 + $0x74] sm:$0xf] %vm1298_vm13, %v1439_v27 }
 0x15f   : > { %v1091_v10 = vpop.permute.xlu0 %1090 }
 0x183   : > { %v1580_v5 = vpop.f32.mrf.mxu0 }
 0x184   : > { %v1052_v55 = vadd.f32 %v1580_v5, %v1423_v8 }
 0x185   : > { %v1043_v2 = vpop.f32.mrf.mxu0 }
 0x186   : > { %v1044_v49 = vadd.f32 %v1423_v8, %v1043_v2  ;;  %v1076_v30 = vmax.f32 %v1052_v55, 0.0 }
 0x187   : > { %v1581_v31 = vpop.f32.mrf.mxu0 }
 0x188   : > { %v1055_v51 = vadd.f32 %v1581_v31, %v1423_v8  ;;  %v1074_v1 = vmax.f32 %v1044_v49, 0.0 }
 0x189   : > { %v1046_v26 = vpop.f32.mrf.mxu0 }
 0x18a   : > { %v1047_v35 = vadd.f32 %v1423_v8, %v1046_v26  ;;  %v1077_v59 = vmax.f32 %v1055_v51, 0.0 }
 0x18c   : > { %v1075_v9 = vmax.f32 %v1047_v35, 0.0  ;;  %v1083_v21 = vpack.c.bf16 %v1077_v59, %v1076_v30 }
 0x18e   : > { %v1082_v6 = vpack.c.bf16 %v1075_v9, %v1074_v1  ;;  %v1100_v12 = vsel %vm769_vm2, %v1083_v21, 0 }
 0x190   : > { %1600 = vmatprep.mubr.msk.bf16.mxu0 %vm769_vm2, %v1082_v6  ;;  %v1097_v29 = vsel %vm769_vm2, %v1082_v6, 0 }
 0x191   : > { %1601 = vmatmul.mubr.msk.bf16.vlgmr.msra.gmra.mxu0 %vm769_vm2, %v1083_v21 }
 0x1b3   : > { %v1584_v54 = vpop.f32.mrf.mxu0 }
 0x1b4   : > { %v1068_v22 = vadd.f32 %v1584_v54, %v1423_v8 }
 0x1b5   : > { %v1059_v61 = vpop.f32.mrf.mxu0 }
 0x1b6   : > { %v1080_v20 = vmax.f32 %v1068_v22, 0.0  ;;  %v1060_v46 = vadd.f32 %v1423_v8, %v1059_v61 }
 0x1b7   : > { %v1585_v23 = vpop.f32.mrf.mxu0 }
 0x1b8   : > { %v1071_v17 = vadd.f32 %v1585_v23, %v1423_v8  ;;  %v1078_v15 = vmax.f32 %v1060_v46, 0.0 }
 0x1b9   : > { %v1062_v4 = vpop.f32.mrf.mxu0 }
 0x1ba   : > { %v1081_v43 = vmax.f32 %v1071_v17, 0.0  ;;  %v1063_v33 = vadd.f32 %v1423_v8, %v1062_v4 }
 0x1bc   : > { %v1085_v24 = vpack.c.bf16 %v1081_v43, %v1080_v20  ;;  %v1079_v58 = vmax.f32 %v1063_v33, 0.0 }
 0x1be   : > { %v1106_v25 = vsel %vm769_vm2, %v1085_v24, 0  ;;  %v1084_v16 = vpack.c.bf16 %v1079_v58, %v1078_v15 }
 0x1bf   : > { %1587 = vmatpush3.bf16.xpose.msra.mxu1 %v1106_v25 }
 0x1c0   : > { %1588 = vmatprep.subr.bf16.mxu1 %v1916_v40  ;;  %v1103_v60 = vsel %vm769_vm2, %v1084_v16, 0 }
 0x1c7   : > { %1589 = vmatpush3.bf16.xpose.msra.mxu1 %v1103_v60 }
 0x1c8   : > { %1590 = vmatprep.subr.bf16.mxu1 %v1916_v40 }
 0x1cf   : > { %1591 = vmatpush3.bf16.xpose.msra.mxu1 %v1100_v12 }
 0x1d0   : > { %1592 = vmatprep.subr.bf16.mxu1 %v1916_v40 }
 0x1d7   : > { %1593 = vmatpush3.bf16.xpose.msra.mxu1 %v1097_v29 }
 0x1d8   : > { %1612 = vmatprep.subr.msk.bf16.mxu1 %vm1005_vm1, %v2441_v36 }
 0x1de   : > { %1595 = vmatmul.mubr.msk.bf16.vlgmr.msra.gmra.mxu1 %vm769_vm2, %v1086_v32 }
 0x1df   : > { %1609 = vmatpush3.bf16.msra.mxu1 %v2447_v39  ;;  %1604 = vmatprep.mubr.msk.bf16.mxu1 %vm769_vm2, %v1084_v16 }
 0x1e6   : > { %1605 = vmatmul.mubr.msk.bf16.vlgmr.msra.gmra.mxu1 %vm769_vm2, %v1085_v24 }
 0x251   : > { %v1602_v3 = vpop.f32.mrf.mxu0 }
 0x252   : > { %v1204_v11 = vadd.f32 %v1602_v3, %v1434_v0 }
 0x253   : > { %v1195_v37 = vpop.f32.mrf.mxu0 }
 0x254   : > { %v1464_v38 = vpack.c.bf16 %v1204_v11, %v1204_v11  ;;  %v1196_v45 = vadd.f32 %v1434_v0, %v1195_v37 }
 0x255   : > { %v1603_v7 = vpop.f32.mrf.mxu0 }
 0x256   : > { %1309 = vst.msk [vmem:[%s2466_s18 + $0x28] sm:$0xf] %vm1298_vm13, %v1464_v38  ;;  %v1460_v41 = vpack.c.bf16 %v1196_v45, %v1196_v45  ;;  %v1207_v48 = vadd.f32 %v1603_v7, %v1434_v0 }
 0x257   : > { %v1198_v50 = vpop.f32.mrf.mxu0 }
 0x258   : > { %1303 = vst.msk [vmem:[%s2466_s18 + $0x10] sm:$0xf] %vm1298_vm13, %v1460_v41  ;;  %v1466_v52 = vpack.c.bf16 %v1207_v48, %v1207_v48  ;;  %v1199_v56 = vadd.f32 %v1434_v0, %v1198_v50 }
 0x25a   : > { %1312 = vst.msk [vmem:[%s2466_s18 + $0x34] sm:$0xf] %vm1298_vm13, %v1466_v52  ;;  %v1462_v57 = vpack.c.bf16 %v1199_v56, %v1199_v56 }
 0x25c   : > { %1306 = vst.msk [vmem:[%s2466_s18 + $0x1c] sm:$0xf] %vm1298_vm13, %v1462_v57 }
 0x29e   : > { %v1142_v62 = vpop.f32.mrf.mxu1 }
 0x29f   : > { %v1143_v63 = vadd.f32 %v1142_v62, %v1091_v10 }
 0x2a0   : > { %v1596_v53 = vpop.f32.mrf.mxu1 }
 0x2a1   : > { %1149 = vst.msk [vmem:[%s311_s25] sm:$0x7] %vm1148_vm14, %v1143_v63 }
 0x2a2   : > { %v1145_v47 = vpop.f32.mrf.mxu1 }
 0x2a4   : > { %v1597_v14 = vpop.f32.mrf.mxu1 }
 0x2a6   : > { %v1606_v44 = vpop.f32.mrf.mxu1 }
 0x2a7   : > { %v1220_v18 = vadd.f32 %v1606_v44, %v1434_v0 }
 0x2a8   : > { %v1211_v19 = vpop.f32.mrf.mxu1 }
 0x2a9   : > { %v1472_v36 = vpack.c.bf16 %v1220_v18, %v1220_v18  ;;  %v1212_v39 = vadd.f32 %v1434_v0, %v1211_v19 }
 0x2aa   : > { %v1607_v40 = vpop.f32.mrf.mxu1 }
 0x2ab   : > { %1321 = vst.msk [vmem:[%s2466_s18 + $0x58] sm:$0xf] %vm1298_vm13, %v1472_v36  ;;  %v1468_v42 = vpack.c.bf16 %v1212_v39, %v1212_v39  ;;  %v1223_v34 = vadd.f32 %v1607_v40, %v1434_v0 }
 0x2ac   : > { %v1214_v5 = vpop.f32.mrf.mxu1 }
 0x2ad   : > { %1315 = vst.msk [vmem:[%s2466_s18 + $0x40] sm:$0xf] %vm1298_vm13, %v1468_v42  ;;  %v1474_v2 = vpack.c.bf16 %v1223_v34, %v1223_v34  ;;  %v1215_v8 = vadd.f32 %v1434_v0, %v1214_v5 }
 0x2af   : > { %1324 = vst.msk [vmem:[%s2466_s18 + $0x64] sm:$0xf] %vm1298_vm13, %v1474_v2  ;;  %v1470_v31 = vpack.c.bf16 %v1215_v8, %v1215_v8 }
 0x2b1   : > { %1318 = vst.msk [vmem:[%s2466_s18 + $0x4c] sm:$0xf] %vm1298_vm13, %v1470_v31 }
 0x2b2 PF: > { %s19_s27 = sadd.s32 1, %s1906_s27  }
 0x2b3   : > { %p16_p4 = scmp.ge.s32.totalorder %s19_s27, 4  }
 0x2b5   :  { %18 = sbr.rel (!%p16_p4) target bundleno = 1 (0x1), region = 90 }

// kernel: _lambda_.13
= control target key start
LH: loop header
LB: loop body
LE: loop exit
PB: predicated region body
PF: predicated region fallthrough
CT: control target
= control target key end

     0   :  { %s2791_s24 = smov 0   ;;  %s4051_s0 = inlined_call_operand.vmem [shape: bf16[2,10,24,3], index: 0, kind: input, shape index: {}]   ;;  %s4052_s1 = inlined_call_operand.vmem [shape: bf16[2,10,24,8], index: 1, kind: input, shape index: {}]   ;;  %s4053_s2 = inlined_call_operand.vmem [shape: bf16[27,8], index: 2, kind: input, shape index: {}]   ;;  %s4054_s3 = inlined_call_operand.vmem [shape: bf16[72,8], index: 3, kind: input, shape index: {}]   ;;  %s4055_s4 = inlined_call_operand.vmem [shape: f32[1,8], index: 4, kind: input, shape index: {}]   ;;  %s4056_s5 = inlined_call_operand.vmem [shape: bf16[3,8], index: 5, kind: input, shape index: {}]   ;;  %s4057_s6 = inlined_call_operand.vmem [shape: f32[3,1], index: 6, kind: input, shape index: {}]   ;;  %s4058_s7 = inlined_call_operand.vmem [shape: f32[2,3,64], index: 7, kind: output, shape index: {}]  }
   0x1 LB: > { %s1930_s25 = sadd.s32 4294967295, %s2730_s24   ;;  %p1934_p0 = scmp.ge.s32.totalorder %s2730_s24, 1  ;;  %s2730_s24 = sphi %s2791_s24, %s17_s24  }
   0x2   : > { %p247_p1 = scmp.lt.s32.totalorder %s2730_s24, 3 }
   0x4   : > { %p248_p2 = pnand %p1934_p0, %p247_p1 }
   0x6   : > { %251 = sbr.rel (%p248_p2) target bundleno = 788 (0x314), region = 48 }
   0xb   : > { %p283_p3 = scmp.lt.s32.totalorder %s1930_s25, 1  ;;  %vm410_vm0 = vcmask 1045504   ;;  %s2732_s10 = smov 3   ;;  %vm1610_vm1 = vcmask 1043456   ;;  %vm1703_vm2 = vcmask 1044480   ;;  %vm744_vm3 = vcmask 23552  }
   0xc   : > { %s2733_s11 = smov 8   ;;  %s2734_s12 = smov 6   ;;  %vm761_vm4 = vcmask 48128   ;;  %vm778_vm5 = vcmask 72704   ;;  %vm4103_vm6 = vcmask 64512   ;;  %vm1400_vm7 = vcmask 130048  }
   0xd   : > { %s4196_s25 = smov (!%p283_p3, %s1930_s25), 1  ;;  %s2735_s13 = smov 16   ;;  %vm863_vm8 = vcmask 195584   ;;  %vm795_vm9 = vcmask 97280   ;;  %vm1433_vm10 = vcmask 261120   ;;  %vm4102_vm11 = vcmask 121856  }
   0xe   : > { %s2168_s26 = smul.u32 120, %s4196_s25  ;;  %s2736_s14 = smov 9   ;;  %vm4101_vm12 = vcmask 326656   ;;  %vm829_vm13 = vcmask 146432   ;;  %vm1467_vm14 = vcmask 392192   ;;  %vm846_vm15 = vcmask 171008  }
   0xf   : > { %s2737_s15 = smov 24   ;;  %s2738_s16 = smov 12  }
  0x10   : > { %s2805_s29 = scalar_lea.vmem %s4051_s0, %s2168_s26  ;;  %s2810_s9 = scalar_lea.vmem %s4052_s1, %s2168_s26 }
  0x11   : > { %v2813_v0 = vld [vmem:[%s2805_s29 + $0x18] sm:$0xff]   ;;  %v2081_v1 = vld [vmem:[%s2805_s29 + $0x28] sm:$0xff]   ;;  %v2817_v2 = vld [vmem:[%s2805_s29] sm:$0xff]   ;;  %s2739_s17 = smov 32   ;;  %s2740_s18 = smov 15  }
  0x12   : > { %v2820_v3 = vunpack.c.h.bf16 %v2813_v0  ;;  %v2822_v4 = vunpack.c.l.bf16 %v2081_v1  ;;  %v2825_v5 = vunpack.c.h.bf16 %v2817_v2  ;;  %v2078_v6 = vld [vmem:[%s2805_s29 + $0x10] sm:$0xff]   ;;  %v2829_v7 = vld [vmem:[%s2810_s9 + $0x18] sm:$0xff]   ;;  %v2832_v8 = vld [vmem:[%s2810_s9 + $0x28] sm:$0xff]   ;;  %v1980_v39 = vunpack.c.h.bf16 %v2081_v1  ;;  %s2741_s19 = smov 40   ;;  %s2742_s20 = smov 18  }
  0x13   : > { %v2834_v9 = vunpack.c.l.bf16 %v2078_v6  ;;  %v2837_v10 = vunpack.c.h.bf16 %v2829_v7  ;;  %v2840_v11 = vunpack.c.l.bf16 %v2832_v8  ;;  %v2843_v12 = vld [vmem:[%s2810_s9] sm:$0xff]   ;;  %v2092_v13 = vld [vmem:[%s2810_s9 + $0x10] sm:$0xff]   ;;  %v2847_v14 = vld [vmem:[%s2805_s29 + $0x8] sm:$0xff]   ;;  %v1968_v15 = vunpack.c.h.bf16 %v2078_v6  ;;  %s2743_s21 = smov 48   ;;  %s2744_s22 = smov 21  }
  0x14   : > { %v372_v16 = vrot.slane %v2820_v3, 1  ;;  %v373_v17 = vrot.slane %v2822_v4, 1  ;;  %v370_v18 = vrot.slane %v2825_v5, 1  ;;  %v2853_v19 = vunpack.c.h.bf16 %v2843_v12  ;;  %v2870_v28 = vld [vmem:[%s2810_s9 + $0x8] sm:$0xff]   ;;  %v2890_v40 = vld [vmem:[%s2805_s29 + $0x20] sm:$0xff]   ;;  %s2745_s27 = smov 56  }
  0x15   : > { %v371_v20 = vrot.slane %v2834_v9, 1  ;;  %v1012_v21 = vrot.slane %v2837_v10, 1  ;;  %v1013_v22 = vrot.slane %v2840_v11, 1  ;;  %v2858_v23 = vunpack.c.l.bf16 %v2092_v13  ;;  %v2906_v55 = vld [vmem:[%s2810_s9 + $0x20] sm:$0xff]   ;;  %s2747_s30 = smov 64  }
  0x16   : > { %v2864_v24 = vpack.i.bf16 %v373_v17, %v372_v16  ;;  %v1010_v25 = vrot.slane %v2853_v19, 1  ;;  %v1963_v26 = vunpack.c.l.bf16 %v2847_v14  ;;  %v411_v27 = vrot.slane %v2825_v5, 2 }
  0x17   : > { %v2196_v29 = vpack.i.bf16 %v371_v20, %v370_v18  ;;  %v1011_v30 = vrot.slane %v2858_v23, 1  ;;  %v414_v31 = vrot.slane %v2834_v9, 2  ;;  %v2882_v32 = vpack.i.bf16 %v1013_v22, %v1012_v21 }
  0x18   : > { %2207 = vrot.lane.b32.xlu1 %v2864_v24, %s2732_s10  ;;  %v412_v33 = vrot.slane %v1963_v26, 2  ;;  %v415_v34 = vrot.slane %v1968_v15, 2  ;;  %v2028_v35 = vunpack.c.h.bf16 %v2092_v13  ;;  %v1053_v37 = vrot.slane %v2858_v23, 2 }
  0x19   : > { %2197 = vrot.lane.b32.xlu0 %v2196_v29, %s2732_s10  ;;  %v2201_v36 = vpack.i.bf16 %v1011_v30, %v1010_v25  ;;  %v2023_v38 = vunpack.c.l.bf16 %v2870_v28  ;;  %v1050_v44 = vrot.slane %v2853_v19, 2  ;;  %v1975_v47 = vunpack.c.l.bf16 %v2890_v40 }
  0x1a   : > { %v413_v41 = vsel %vm410_vm0, %v411_v27, %v412_v33  ;;  %v416_v42 = vsel %vm410_vm0, %v414_v31, %v415_v34  ;;  %v1054_v43 = vrot.slane %v2028_v35, 2  ;;  %v420_v50 = vrot.slane %v2822_v4, 2 }
  0x1b   : > { %v1051_v45 = vrot.slane %v2023_v38, 2  ;;  %v2216_v46 = vpack.i.bf16 %v413_v41, %v411_v27  ;;  %v2899_v48 = vpack.i.bf16 %v416_v42, %v414_v31  ;;  %v421_v51 = vrot.slane %v1980_v39, 2 }
  0x1c   : > { %2212 = vrot.lane.b32.xlu1 %v2882_v32, %s2733_s11  ;;  %v1055_v49 = vsel %vm410_vm0, %v1053_v37, %v1054_v43  ;;  %v417_v53 = vrot.slane %v2820_v3, 2  ;;  %v418_v54 = vrot.slane %v1975_v47, 2  ;;  %v2040_v59 = vunpack.c.h.bf16 %v2832_v8 }
  0x1d   : > { %2202 = vrot.lane.b32.xlu0 %v2201_v36, %s2733_s11  ;;  %v1052_v52 = vsel %vm410_vm0, %v1050_v44, %v1051_v45  ;;  %v2909_v56 = vpack.i.bf16 %v1055_v49, %v1053_v37  ;;  %v422_v58 = vsel %vm410_vm0, %v420_v50, %v421_v51  ;;  %v2035_v61 = vunpack.c.l.bf16 %v2906_v55  ;;  %v2952_v36 = vld [vmem:[%s2805_s29 + $0x30] sm:$0xff]  }
  0x1e   : > { %v2226_v57 = vpack.i.bf16 %v1052_v52, %v1050_v44  ;;  %v419_v60 = vsel %vm410_vm0, %v417_v53, %v418_v54  ;;  %v2919_v62 = vpack.i.bf16 %v422_v58, %v420_v50  ;;  %v4065_v63 = vunpack.c.l.bf16 %v2813_v0  ;;  %4105 = vst [vmem:[#allocation2_spill] sm:$0xff] %v2952_v36  ;;  %v2087_v58 = vld [vmem:[%s2805_s29 + $0x58] sm:$0xff]  }
  0x1f   : > { %v2923_v1 = vpack.i.bf16 %v419_v60, %v417_v53  ;;  %v4063_v6 = vunpack.c.h.bf16 %v2847_v14  ;;  %v1059_v8 = vrot.slane %v2840_v11, 2  ;;  %v1060_v13 = vrot.slane %v2040_v59, 2  ;;  %v3019_v53 = vld [vmem:[%s2805_s29 + $0x38] sm:$0xff]  }
  0x20   : > { %2217 = vrot.lane.b32.xlu1 %v2216_v46, %s2734_s12  ;;  %v1056_v15 = vrot.slane %v2837_v10, 2  ;;  %v1057_v18 = vrot.slane %v2035_v61, 2  ;;  %v2933_v25 = vpack.i.bf16 %v2820_v3, %v4065_v63  ;;  %v4064_v33 = vunpack.c.l.bf16 %v2829_v7  ;;  %v2986_v46 = vld [vmem:[%s2810_s9 + $0x30] sm:$0xff]   ;;  %4109 = vst [vmem:[#allocation6_spill] sm:$0xff] %v3019_v53 }
  0x21   : > { %2222 = vrot.lane.b32.xlu0 %v2899_v48, %s2734_s12  ;;  %v2246_v26 = vpack.i.bf16 %v2834_v9, %v4063_v6  ;;  %v1061_v27 = vsel %vm410_vm0, %v1059_v8, %v1060_v13  ;;  %v4061_v35 = vunpack.c.h.bf16 %v2870_v28  ;;  %v4060_v38 = vunpack.c.l.bf16 %v2952_v36  ;;  %4107 = vst [vmem:[#allocation4_spill] sm:$0xff] %v2986_v46 }
  0x22   : > { %v1058_v29 = vsel %vm410_vm0, %v1056_v15, %v1057_v18  ;;  %v2944_v31 = vpack.i.bf16 %v1061_v27, %v1059_v8  ;;  %v2959_v37 = vpack.i.bf16 %v2837_v10, %v4064_v33  ;;  %v2963_v39 = vunpack.c.h.bf16 %v2952_v36  ;;  %v3055_v18 = vld [vmem:[%s2805_s29 + $0x50] sm:$0xff]  }
  0x23   : > { %v2948_v34 = vpack.i.bf16 %v1058_v29, %v1056_v15  ;;  %v2266_v41 = vpack.i.bf16 %v2858_v23, %v4061_v35  ;;  %v4066_v42 = vunpack.c.h.bf16 %v2890_v40  ;;  %v4062_v44 = vunpack.c.h.bf16 %v2906_v55  ;;  %v3051_v15 = vld [vmem:[%s2810_s9 + $0x48] sm:$0xff]   ;;  %4115 = vst [vmem:[#allocation12_spill] sm:$0xff] %v3055_v18 }
  0x24   : > { %2232 = vrot.lane.b32.xlu1 %v2909_v56, %s2735_s13  ;;  %4106 = vst [vmem:[#allocation3_spill] sm:$0xff] %v2963_v39  ;;  %v2976_v43 = vpack.i.bf16 %v2963_v39, %v4060_v38  ;;  %v2286_v49 = vpack.i.bf16 %v372_v16, %v371_v20  ;;  %v4059_v50 = vunpack.c.l.bf16 %v2986_v46  ;;  %v3003_v51 = vunpack.c.h.bf16 %v2986_v46  ;;  %4114 = vst [vmem:[#allocation11_spill] sm:$0xff] %v3051_v15 }
  0x25   : > { %2227 = vrot.lane.b32.xlu0 %v2226_v57, %s2735_s13  ;;  %v2983_v45 = vpack.i.bf16 %v2822_v4, %v4066_v42  ;;  %v2993_v47 = vpack.i.bf16 %v2840_v11, %v4062_v44  ;;  %v2301_v52 = vpack.i.bf16 %v1012_v21, %v1011_v30  ;;  %v374_v20 = vrot.slane %v2963_v39, 1  ;;  %v3031_v57 = vld [vmem:[%s2805_s29 + $0x48] sm:$0xff]   ;;  %v3087_v44 = vld [vmem:[%s2810_s9 + $0x50] sm:$0xff]  }
  0x26   : > { %4108 = vst [vmem:[#allocation5_spill] sm:$0xff] %v3003_v51  ;;  %v3015_v16 = vpack.i.bf16 %v3003_v51, %v4059_v50  ;;  %v1014_v54 = vrot.slane %v3003_v51, 1  ;;  %v1987_v30 = vunpack.c.l.bf16 %v3019_v53  ;;  %4110 = vst [vmem:[#allocation7_spill] sm:$0xff] %v3031_v57  ;;  %v423_v60 = vrot.slane %v2963_v39, 2 }
  0x27   : > { %v2306_v21 = vpack.i.bf16 %v374_v20, %v373_v17  ;;  %v3043_v17 = vld [vmem:[%s2810_s9 + $0x38] sm:$0xff]   ;;  %v3046_v8 = vunpack.c.h.bf16 %v3031_v57  ;;  %v3048_v13 = vunpack.c.l.bf16 %v2087_v58  ;;  %v3063_v27 = vunpack.c.h.bf16 %v3051_v15  ;;  %4119 = vst [vmem:[#allocation16_spill] sm:$0xff] %v3087_v44 }
  0x28   : > { %2242 = vrot.lane.b32.xlu1 %v2919_v62, %s2734_s12  ;;  %v2321_v59 = vpack.i.bf16 %v1014_v54, %v1013_v22  ;;  %v424_v61 = vrot.slane %v1987_v30, 2  ;;  %4111 = vst [vmem:[#allocation8_spill] sm:$0xff] %v3043_v17  ;;  %v2004_v35 = vunpack.c.h.bf16 %v2087_v58  ;;  %v2059_v63 = vunpack.c.l.bf16 %v3087_v44 }
  0x29   : > { %2237 = vrot.lane.b32.xlu0 %v2923_v1, %s2734_s12  ;;  %4112 = vst [vmem:[#allocation9_spill] sm:$0xff] %v3046_v8  ;;  %4113 = vst [vmem:[#allocation10_spill] sm:$0xff] %v3048_v13  ;;  %v4073_v50 = vrot.slane %v3063_v27, 1  ;;  %v432_v58 = vrot.slane %v3048_v13, 2  ;;  %v4134_v36 = vunpack.c.h.bf16 %v2890_v40 }
  0x2a   : > { %v425_v22 = vsel %vm410_vm0, %v423_v60, %v424_v61  ;;  %4116 = vst [vmem:[#allocation13_spill] sm:$0xff] %v3063_v27 }
  0x2c   : > { %2252 = vrot.lane.b32.xlu1 %v2933_v25, %s2736_s14 }
  0x2d   : > { %2247 = vrot.lane.b32.xlu0 %v2246_v26, %s2736_s14  ;;  %v2047_v26 = vunpack.c.l.bf16 %v3043_v17 }
  0x2f   : > { %v1063_v61 = vrot.slane %v2047_v26, 2  ;;  %v433_v26 = vrot.slane %v2004_v35, 2 }
  0x30   : > { %2262 = vrot.lane.b32.xlu1 %v2944_v31, %s2735_s13 }
  0x31   : > { %2257 = vrot.lane.b32.xlu0 %v2948_v34, %s2735_s13  ;;  %v434_v35 = vsel %vm410_vm0, %v432_v58, %v433_v26 }
  0x34   : > { %2272 = vrot.lane.b32.xlu1 %v2959_v37, %s2737_s15 }
  0x35   : > { %2267 = vrot.lane.b32.xlu0 %v2266_v41, %s2737_s15  ;;  %v4075_v41 = vrot.slane %v3046_v8, 1 }
  0x38   : > { %2282 = vrot.lane.b32.xlu1 %v2976_v43, %s2736_s14 }
  0x39   : > { %2277 = vrot.lane.b32.xlu0 %v2983_v45, %s2736_s14 }
  0x3c   : > { %2292 = vrot.lane.b32.xlu1 %v2993_v47, %s2737_s15 }
  0x3d   : > { %2287 = vrot.lane.b32.xlu0 %v2286_v49, %s2738_s16  ;;  %v4068_v49 = vrot.slane %v3048_v13, 1 }
  0x3f   : > { %v3078_v30 = vpack.i.bf16 %v4068_v49, %v4075_v41  ;;  %v2102_v41 = vld [vmem:[%s2810_s9 + $0x60] sm:$0xff]  }
  0x40   : > { %2302 = vrot.lane.b32.xlu1 %v2301_v52, %s2739_s17  ;;  %v1999_v52 = vunpack.c.l.bf16 %v3055_v18 }
  0x41   : > { %2297 = vrot.lane.b32.xlu0 %v3015_v16, %s2737_s15  ;;  %4118 = vst [vmem:[#allocation15_spill] sm:$0xff] %v3078_v30 }
  0x44   : > { %2312 = vrot.lane.b32.xlu1 %v2899_v48, %s2740_s18  ;;  %v2101_v48 = vld [vmem:[%s2810_s9 + $0x58] sm:$0xff]  }
  0x45   : > { %2307 = vrot.lane.b32.xlu0 %v2306_v21, %s2738_s16  ;;  %v3065_v29 = vunpack.c.l.bf16 %v2101_v48  ;;  %v3072_v21 = vpack.i.bf16 %v425_v22, %v423_v60  ;;  %v429_v60 = vrot.slane %v3046_v8, 2  ;;  %v430_v22 = vrot.slane %v1999_v52, 2 }
  0x46   : > { %v2064_v33 = vunpack.c.h.bf16 %v2101_v48  ;;  %v1068_v48 = vrot.slane %v3063_v27, 2 }
  0x47   : > { %4117 = vst [vmem:[#allocation14_spill] sm:$0xff] %v3065_v29  ;;  %v4067_v38 = vrot.slane %v3065_v29, 1  ;;  %v431_v52 = vsel %vm410_vm0, %v429_v60, %v430_v22  ;;  %v1071_v49 = vrot.slane %v3065_v29, 2 }
  0x48   : > { %2322 = vrot.lane.b32.xlu1 %v2321_v59, %s2739_s17  ;;  %v1062_v59 = vrot.slane %v3003_v51, 2  ;;  %v3103_v42 = vpack.i.bf16 %v431_v52, %v429_v60  ;;  %v1072_v22 = vrot.slane %v2064_v33, 2  ;;  %v1069_v60 = vrot.slane %v2059_v63, 2 }
  0x49   : > { %2317 = vrot.lane.b32.xlu0 %v2923_v1, %s2740_s18  ;;  %v3093_v6 = vpack.i.bf16 %v4067_v38, %v4073_v50  ;;  %v3115_v52 = vpack.i.bf16 %v434_v35, %v432_v58  ;;  %v2098_v58 = vld [vmem:[%s2810_s9 + $0x40] sm:$0xff]   ;;  %v3317_v51 = vunpack.c.h.bf16 %v2102_v41 }
  0x4a   : > { %v1070_v33 = vsel %vm410_vm0, %v1068_v48, %v1069_v60  ;;  %v3145_v35 = vunpack.c.l.bf16 %v2098_v58  ;;  %v2720_v60 = vld [vmem:[%s4053_s2 + $0x8] sm:$0x3f]  }
  0x4b   : > { %4120 = vst [vmem:[#allocation17_spill] sm:$0xff] %v3093_v6  ;;  %v3128_v26 = vpack.i.bf16 %v1070_v33, %v1068_v48  ;;  %v2718_v48 = vld [vmem:[%s4054_s3 + $0x18] sm:$0xff]  }
  0x4c   : > { %2332 = vrot.lane.b32.xlu1 %v2948_v34, %s2741_s19  ;;  %4123 = vst [vmem:[#allocation20_spill] sm:$0xff] %v3145_v35 }
  0x4d   : > { %2327 = vrot.lane.b32.xlu0 %v2909_v56, %s2741_s19  ;;  %v1064_v56 = vsel %vm410_vm0, %v1062_v59, %v1063_v61  ;;  %v2084_v61 = vld [vmem:[%s2805_s29 + $0x40] sm:$0xff]   ;;  %4122 = vst [vmem:[#allocation19_spill] sm:$0xff] %v3128_v26 }
  0x4e   : > { %v3107_v38 = vpack.i.bf16 %v1064_v56, %v1062_v59  ;;  %v3120_v59 = vunpack.c.l.bf16 %v2084_v61 }
  0x50   : > { %2342 = vrot.lane.b32.xlu1 %v3072_v21, %s2740_s18  ;;  %4121 = vst [vmem:[#allocation18_spill] sm:$0xff] %v3120_v59 }
  0x51   : > { %2337 = vrot.lane.b32.xlu0 %v2919_v62, %s2740_s18 }
  0x54   : > { %2352 = vrot.lane.b32.xlu1 %v2983_v45, %s2742_s20  ;;  %v4071_v45 = vunpack.c.h.bf16 %v3019_v53 }
  0x55   : > { %2347 = vrot.lane.b32.xlu0 %v2933_v25, %s2742_s20  ;;  %v1073_v25 = vsel %vm410_vm0, %v1071_v49, %v1072_v22 }
  0x56   : > { %v3126_v56 = vpack.i.bf16 %v1073_v25, %v1071_v49  ;;  %v3135_v63 = vpack.i.bf16 %v3120_v59, %v4071_v45  ;;  %v4070_v49 = vunpack.c.h.bf16 %v3043_v17  ;;  %v2746_v25 = vmov 65535  }
  0x57   : > { %v1704_v33 = vsel %vm1703_vm2, 4294967295, %v2746_v25  ;;  %v2721_v25 = vld [vmem:[%s4054_s3 + $0x8] sm:$0xff]   ;;  %vm1501_vm2 = vcmask 523264  }
  0x58   : > { %2362 = vrot.lane.b32.xlu1 %v3107_v38, %s2741_s19 }
  0x59   : > { %2357 = vrot.lane.b32.xlu0 %v2944_v31, %s2741_s19 }
  0x5c   : > { %2372 = vrot.lane.b32.xlu1 %v2993_v47, %s2743_s21  ;;  %v4076_v47 = vrot.slane %v3120_v59, 1 }
  0x5d   : > { %2367 = vrot.lane.b32.xlu0 %v2959_v37, %s2743_s21  ;;  %v3154_v37 = vpack.i.bf16 %v3145_v35, %v4070_v49  ;;  %v1959_v49 = vunpack.c.l.bf16 %v2817_v2 }
  0x60   : > { %2382 = vrot.lane.b32.xlu1 %v3135_v63, %s2742_s20 }
  0x61   : > { %2377 = vrot.lane.b32.xlu0 %v2976_v43, %s2742_s20  ;;  %v2717_v43 = vld [vmem:[%s4054_s3 + $0x20] ss:$0 sps:$4 sm:$0xff]  }
  0x62   : > { %2167 = vmatprep.subr.msk.bf16.mxu0 %vm1610_vm1, %v2717_v43  ;;  %v1612_v22 = vsel %vm1610_vm1, %v2717_v43, 0  ;;  %v1705_v43 = vsel %vm410_vm0, %v1704_v33, 0  ;;  %vm1484_vm1 = vcmask 457728  }
  0x63   : > { %2126 = vmatpush3.bf16.msra.mxu0 %v1612_v22  ;;  %v426_v22 = vrot.slane %v3120_v59, 2 }
  0x64   : > { %2392 = vrot.lane.b32.xlu1 %v3015_v16, %s2743_s21  ;;  %v4074_v16 = vrot.slane %v3145_v35, 1  ;;  %2127 = vmatprep.subr.bf16.mxu0 %v2718_v48 }
  0x65   : > { %2387 = vrot.lane.b32.xlu0 %v2864_v24, %s2744_s22  ;;  %v2406_v24 = vpack.i.bf16 %v4076_v47, %v374_v20  ;;  %v1992_v20 = vunpack.c.h.bf16 %v2084_v61  ;;  %v2052_v61 = vunpack.c.h.bf16 %v2098_v58  ;;  %v1065_v58 = vrot.slane %v3145_v35, 2 }
  0x67   : > { %2128 = vmatpush3.bf16.msra.mxu0 %v2718_v48  ;;  %v427_v48 = vrot.slane %v1992_v20, 2  ;;  %v1066_v20 = vrot.slane %v2052_v61, 2 }
  0x68   : > { %2402 = vrot.lane.b32.xlu1 %v2882_v32, %s2745_s27  ;;  %v2421_v32 = vpack.i.bf16 %v4074_v16, %v1014_v54  ;;  %v1707_v54 = vand.u32 %v2720_v60, %v1705_v43 }
  0x69   : > { %2397 = vrot.lane.b32.xlu0 %v3154_v37, %s2743_s21  ;;  %v428_v60 = vsel %vm410_vm0, %v426_v22, %v427_v48 }
  0x6a   : > { %2143 = vmatprep.subr.bf16.mxu1 %v1707_v54  ;;  %v3208_v33 = vpack.i.bf16 %v428_v60, %v426_v22 }
  0x6b   : > { %2144 = vmatpush3.bf16.msra.mxu1 %v1707_v54 }
  0x6c   : > { %2412 = vrot.lane.b32.xlu1 %v2923_v1, %s2737_s15  ;;  %v2719_v1 = vld [vmem:[%s4054_s3 + $0x10] sm:$0xff]  }
  0x6d   : > { %2407 = vrot.lane.b32.xlu0 %v2406_v24, %s2744_s22  ;;  %2129 = vmatprep.subr.bf16.mxu0 %v2719_v1 }
  0x6e   : > { %2130 = vmatpush3.bf16.msra.mxu0 %v2719_v1  ;;  %v4069_v1 = vunpack.c.l.bf16 %v3031_v57  ;;  %v4125_v57 = vrot.slane %v3120_v59, 1 }
  0x6f   : > { %2131 = vmatprep.subr.bf16.mxu0 %v2721_v25 }
  0x70   : > { %2422 = vrot.lane.b32.xlu1 %v2421_v32, %s2745_s27  ;;  %v3246_v61 = vpack.i.bf16 %v3046_v8, %v4069_v1 }
  0x71   : > { %2417 = vrot.lane.b32.xlu0 %v2919_v62, %s2737_s15  ;;  %v2722_v62 = vld [vmem:[%s4053_s2] sm:$0xff]  }
  0x72   : > { %2145 = vmatprep.subr.bf16.mxu1 %v2722_v62  ;;  %2132 = vmatpush3.bf16.msra.mxu0 %v2721_v25  ;;  %v2088_v25 = vld [vmem:[%s2805_s29 + $0x60] sm:$0xff]  }
  0x73   : > { %2146 = vmatpush3.bf16.msra.mxu1 %v2722_v62  ;;  %v2007_v60 = vunpack.c.l.bf16 %v2088_v25 }
  0x74   : > { %2432 = vrot.lane.b32.xlu1 %v2944_v31, %s2747_s30  ;;  %v2723_v31 = vld [vmem:[%s4054_s3] sm:$0xff]  }
  0x75   : > { %2427 = vrot.lane.b32.xlu0 %v2948_v34, %s2747_s30  ;;  %v1067_v34 = vsel %vm410_vm0, %v1065_v58, %v1066_v20  ;;  %2133 = vmatprep.subr.bf16.mxu0 %v2723_v31 }
  0x76   : > { %2134 = vmatpush3.bf16.msra.mxu0 %v2723_v31  ;;  %v3212_v43 = vpack.i.bf16 %v1067_v34, %v1065_v58  ;;  %v3271_v31 = vunpack.c.h.bf16 %v2088_v25 }
  0x78   : > { %2442 = vrot.lane.b32.xlu1 %v3072_v21, %s2737_s15 }
  0x79   : > { %2437 = vrot.lane.b32.xlu0 %v2406_v24, %s2732_s10 }
  0x7c   : > { %2452 = vrot.lane.b32.xlu1 %v2421_v32, %s2733_s11 }
  0x7d   : > { %2447 = vrot.lane.b32.xlu0 %v3208_v33, %s2737_s15 }
  0x80   : > { %2462 = vrot.lane.b32.xlu1 %v3212_v43, %s2747_s30 }
  0x81   : > { %2457 = vrot.lane.b32.xlu0 %v3107_v38, %s2747_s30 }
  0x84   : > { %2472 = vrot.lane.b32.xlu1 %v3072_v21, %s2734_s12 }
  0x85   : > { %2467 = vrot.lane.b32.xlu0 %v3078_v30, %s2732_s10 }
  0x88   : > { %2482 = vrot.lane.b32.xlu1 %v3093_v6, %s2733_s11 }
  0x89   : > { %2477 = vrot.lane.b32.xlu0 %v3208_v33, %s2734_s12 }
  0x8a   : > { %v3228_v24 = vpop.permute.xlu1 %2207 }
  0x8b   : > { %v3230_v32 = vpop.permute.xlu0 %2197  ;;  %v2209_v59 = vunpack.i.l.bf16 %v3228_v24 }
  0x8c   : > { %2492 = vrot.lane.b32.xlu1 %v3212_v43, %s2735_s13  ;;  %v4081_v45 = vunpack.i.l.bf16 %v3230_v32 }
  0x8d   : > { %2487 = vrot.lane.b32.xlu0 %v3107_v38, %s2735_s13  ;;  %v4072_v38 = vunpack.c.l.bf16 %v3051_v15  ;;  %v750_v40 = vsel %vm744_vm3, %v2820_v3, %v2209_v59 }
  0x8e   : > { %v3237_v21 = vpop.permute.xlu1 %2212  ;;  %v745_v47 = vsel %vm744_vm3, %v1959_v49, %v4081_v45  ;;  %v2067_v45 = vunpack.c.l.bf16 %v2102_v41 }
  0x8f   : > { %v3239_v54 = vpop.permute.xlu0 %2202  ;;  %v3269_v20 = vpack.i.bf16 %v3063_v27, %v4072_v38  ;;  %v3283_v38 = vpack.i.bf16 %v3271_v31, %v2007_v60 }
  0x90   : > { %2502 = vrot.lane.b32.xlu1 %v3115_v52, %s2734_s12  ;;  %v3338_v41 = vpack.i.bf16 %v3317_v51, %v2067_v45  ;;  %v4132_v45 = vrot.slane %v3065_v29, 1 }
  0x91   : > { %2497 = vrot.lane.b32.xlu0 %v3103_v42, %s2734_s12 }
  0x92   : > { %v3250_v22 = vpop.permute.xlu1 %2217  ;;  %4130 = vst [vmem:[#allocation22_spill] sm:$0xff] %v3338_v41 }
  0x93   : > { %v3252_v48 = vpop.permute.xlu0 %2222  ;;  %v2219_v50 = vunpack.i.l.bf16 %v3250_v22 }
  0x94   : > { %2512 = vrot.lane.b32.xlu1 %v3246_v61, %s2736_s14 }
  0x95   : > { %2507 = vrot.lane.b32.xlu0 %v3135_v63, %s2736_s14  ;;  %v4077_v63 = vunpack.c.h.bf16 %v3055_v18  ;;  %v762_v15 = vsel %vm761_vm4, %v745_v47, %v2219_v50  ;;  %v4126_v18 = vrot.slane %v3046_v8, 1  ;;  %v4128_v50 = vrot.slane %v3145_v35, 1 }
  0x96   : > { %v3260_v62 = vpop.permute.xlu1 %2232  ;;  %v4129_v47 = vrot.slane %v3063_v27, 1  ;;  %v4133_v35 = vrot.slane %v3317_v51, 1 }
  0x97   : > { %v3262_v58 = vpop.permute.xlu0 %2227  ;;  %v3292_v2 = vpack.i.bf16 %v3048_v13, %v4077_v63  ;;  %v2546_v49 = vpack.i.bf16 %v4126_v18, %v4125_v57  ;;  %v4095_v57 = vrot.slane %v3271_v31, 1  ;;  %v4131_v18 = vrot.slane %v3048_v13, 1 }
  0x98   : > { %2522 = vrot.lane.b32.xlu1 %v3126_v56, %s2735_s13  ;;  %v2561_v8 = vpack.i.bf16 %v4129_v47, %v4128_v50  ;;  %v2581_v39 = vpack.i.bf16 %v4133_v35, %v4132_v45 }
  0x99   : > { %2517 = vrot.lane.b32.xlu0 %v3128_v26, %s2735_s13 }
  0x9a   : > { %v2243_v34 = vpop.permute.xlu1 %2242 }
  0x9b   : > { %v3276_v1 = vpop.permute.xlu0 %2237  ;;  %v2245_v27 = vunpack.i.h.bf16 %v2243_v34  ;;  %v2244_v50 = vunpack.i.l.bf16 %v2243_v34 }
  0x9c   : > { %2532 = vrot.lane.b32.xlu1 %v3269_v20, %s2737_s15  ;;  %v2240_v6 = vunpack.i.h.bf16 %v3276_v1 }
  0x9d   : > { %2527 = vrot.lane.b32.xlu0 %v3154_v37, %s2737_s15  ;;  %v4124_v37 = vunpack.c.h.bf16 %v3087_v44 }
  0x9e   : > { %v3294_v16 = vpop.permute.xlu1 %2252  ;;  %v767_v3 = vsel %vm761_vm4, %v750_v40, %v2240_v6  ;;  %v2103_v6 = vld [vmem:[%s2810_s9 + $0x68] sm:$0xff]  }
  0x9f   : > { %v3297_v60 = vpop.permute.xlu0 %2247  ;;  %v3308_v63 = vpack.i.bf16 %v3065_v29, %v4124_v37  ;;  %v3325_v37 = vld [vmem:[%s2805_s29 + $0x68] sm:$0xff]  }
  0xa0   : > { %v2249_v25 = vunpack.i.l.bf16 %v3297_v60  ;;  %2542 = vrot.lane.b32.xlu1 %v3283_v38, %s2736_s14 }
  0xa1   : > { %2537 = vrot.lane.b32.xlu0 %v3292_v2, %s2736_s14  ;;  %s1937_s14 = sshll.u32 %s4196_s25, 2 }
  0xa2   : > { %v3320_v46 = vsel %vm778_vm5, %v762_v15, %v2249_v25  ;;  %v3322_v44 = vpop.permute.xlu1 %2262  ;;  %v2210_v15 = vunpack.i.h.bf16 %v3228_v24  ;;  %v2011_v25 = vunpack.c.l.bf16 %v3325_v37  ;;  %v566_v24 = vrot.slane %v3271_v31, 2 }
  0xa3   : > { %4127 = vst [vmem:[#allocation21_spill] sm:$0xff] %v3320_v46  ;;  %v2258_v17 = vpop.permute.xlu0 %2257 }
  0xa4   : > { %2552 = vrot.lane.b32.xlu1 %v3308_v63, %s2737_s15  ;;  %v751_v34 = vsel %vm744_vm3, %v4134_v36, %v2210_v15  ;;  %v567_v13 = vrot.slane %v2011_v25, 2  ;;  %v2214_v36 = vunpack.i.l.bf16 %v3237_v21 }
  0xa5   : > { %2547 = vrot.lane.b32.xlu0 %v2546_v49, %s2738_s16  ;;  %v2566_v49 = vpack.i.bf16 %v4095_v57, %v4131_v18  ;;  %v752_v18 = vsel %vm744_vm3, %v2822_v4, %v2210_v15  ;;  %v4135_v57 = vunpack.c.l.bf16 %v2813_v0  ;;  %v2259_v4 = vunpack.i.l.bf16 %v2258_v17 }
  0xa6   : > { %v3342_v53 = vpop.permute.xlu1 %2272  ;;  %v769_v29 = vsel %vm761_vm4, %v752_v18, %v2245_v27 }
  0xa7   : > { %v3344_v47 = vpop.permute.xlu0 %2267  ;;  %v749_v35 = vsel %vm744_vm3, %v4135_v57, %v2209_v59 }
  0xa8   : > { %2562 = vrot.lane.b32.xlu1 %v2561_v8, %s2739_s17  ;;  %v2239_v8 = vunpack.i.l.bf16 %v3276_v1  ;;  %v768_v1 = vsel %vm761_vm4, %v751_v34, %v2244_v50  ;;  %v4136_v34 = vunpack.c.l.bf16 %v2829_v7 }
  0xa9   : > { %2557 = vrot.lane.b32.xlu0 %v3338_v41, %s2737_s15  ;;  %v2260_v41 = vunpack.i.h.bf16 %v2258_v17 }
  0xaa   : > { %v2283_v45 = vpop.permute.xlu1 %2282  ;;  %v766_v59 = vsel %vm761_vm4, %v749_v35, %v2239_v8 }
  0xab   : > { %v2285_v46 = vunpack.i.h.bf16 %v2283_v45  ;;  %v2284_v30 = vunpack.i.l.bf16 %v2283_v45  ;;  %v2278_v25 = vpop.permute.xlu0 %2277 }
  0xac   : > { %v2280_v15 = vunpack.i.h.bf16 %v2278_v25  ;;  %v2279_v0 = vunpack.i.l.bf16 %v2278_v25  ;;  %2572 = vrot.lane.b32.xlu1 %v3208_v33, %s2740_s18 }
  0xad   : > { %v3378_v57 = vsel %vm778_vm5, %v768_v1, %v2284_v30  ;;  %v3381_v27 = vsel %vm778_vm5, %v769_v29, %v2285_v46  ;;  %2567 = vrot.lane.b32.xlu0 %v2566_v49, %s2738_s16  ;;  %v1388_v30 = vsel %vm4103_vm6, %v4136_v34, %v2214_v36  ;;  %v1389_v46 = vsel %vm4103_vm6, %v2837_v10, %v2214_v36 }
  0xae   : > { %v3385_v17 = vsel %vm778_vm5, %v766_v59, %v2279_v0  ;;  %v3388_v50 = vsel %vm778_vm5, %v767_v3, %v2280_v15  ;;  %v2293_v33 = vpop.permute.xlu1 %2292  ;;  %v1406_v18 = vsel %vm1400_vm7, %v1389_v46, %v2260_v41  ;;  %v1405_v35 = vsel %vm1400_vm7, %v1388_v30, %v2259_v4  ;;  %v2090_v4 = vld [vmem:[%s2805_s29 + $0x70] sm:$0xff]  }
  0xaf   : > { %v2295_v29 = vunpack.i.h.bf16 %v2293_v33  ;;  %v2294_v8 = vunpack.i.l.bf16 %v2293_v33  ;;  %v3396_v49 = vpop.permute.xlu0 %2287  ;;  %v568_v10 = vsel %vm410_vm0, %v566_v24, %v567_v13  ;;  %v2071_v36 = vunpack.c.l.bf16 %v2103_v6  ;;  %v2104_v15 = vld [vmem:[%s2810_s9 + $0x70] sm:$0xff]  }
  0xb0   : > { %2582 = vrot.lane.b32.xlu1 %v2581_v39, %s2739_s17  ;;  %v3416_v39 = vpack.i.bf16 %v568_v10, %v566_v24  ;;  %v1205_v1 = vrot.slane %v3317_v51, 2  ;;  %v2016_v13 = vunpack.c.h.bf16 %v2090_v4  ;;  %v2076_v3 = vunpack.c.h.bf16 %v2104_v15  ;;  %s296_s17 = scalar_lea.vmem %s4058_s7, %s1937_s14 }
  0xb1   : > { %v3402_v40 = vsel %vm863_vm8, %v1405_v35, %v2294_v8  ;;  %v3405_v7 = vsel %vm863_vm8, %v1406_v18, %v2295_v29  ;;  %2577 = vrot.lane.b32.xlu0 %v3103_v42, %s2740_s18  ;;  %v1206_v25 = vrot.slane %v2071_v36, 2  ;;  %v2015_v33 = vunpack.c.l.bf16 %v2090_v4 }
  0xb2   : > { %v3410_v45 = vpop.permute.xlu1 %2302  ;;  %4137 = vst [vmem:[#allocation23_spill] sm:$0xff] %v3416_v39  ;;  %v2075_v24 = vunpack.c.l.bf16 %v2104_v15  ;;  %v694_v30 = vrot.slane %v2016_v13, 2  ;;  %v1333_v46 = vrot.slane %v2076_v3, 2  ;;  %v2012_v35 = vunpack.c.h.bf16 %v3325_v37 }
  0xb3   : > { %v3412_v41 = vpop.permute.xlu0 %2297  ;;  %v693_v29 = vrot.slane %v2015_v33, 2  ;;  %v2019_v10 = vunpack.c.l.bf16 %v2843_v12  ;;  %v2072_v4 = vunpack.c.h.bf16 %v2103_v6  ;;  %v667_v15 = vrot.slane %v2015_v33, 1 }
  0xb4   : > { %2592 = vrot.lane.b32.xlu1 %v3128_v26, %s2741_s19  ;;  %v1332_v8 = vrot.slane %v2075_v24, 2  ;;  %v2200_v13 = vunpack.i.h.bf16 %v3230_v32  ;;  %v2215_v12 = vunpack.i.h.bf16 %v3237_v21  ;;  %v2205_v6 = vunpack.i.h.bf16 %v3239_v54 }
  0xb5   : > { %2587 = vrot.lane.b32.xlu0 %v3212_v43, %s2741_s19  ;;  %v1207_v43 = vsel %vm410_vm0, %v1205_v1, %v1206_v25  ;;  %v1306_v25 = vrot.slane %v2075_v24, 1  ;;  %v4139_v21 = vrot.slane %v3317_v51, 1  ;;  %v4141_v51 = vunpack.i.l.bf16 %v3230_v32 }
  0xb6   : > { %v3423_v0 = vpop.permute.xlu1 %2312  ;;  %v3440_v36 = vpack.i.bf16 %v1207_v43, %v1205_v1  ;;  %v1334_v37 = vsel %vm410_vm0, %v1332_v8, %v1333_v46  ;;  %v4138_v1 = vrot.slane %v3271_v31, 1  ;;  %v748_v31 = vsel %vm744_vm3, %v2834_v9, %v2200_v13 }
  0xb7   : > { %v3425_v59 = vpop.permute.xlu0 %2307  ;;  %v3466_v46 = vpack.i.bf16 %v1306_v25, %v4139_v21  ;;  %v2225_v9 = vunpack.i.h.bf16 %v3252_v48  ;;  %v4143_v25 = vunpack.c.h.bf16 %v2870_v28  ;;  %v1387_v32 = vsel %vm4103_vm6, %v2858_v23, %v2205_v6 }
  0xb8   : > { %2602 = vrot.lane.b32.xlu1 %v3416_v39, %s2740_s18  ;;  %v695_v39 = vsel %vm410_vm0, %v693_v29, %v694_v30  ;;  %v3459_v43 = vpack.i.bf16 %v667_v15, %v4138_v1  ;;  %v2204_v30 = vunpack.i.l.bf16 %v3239_v54  ;;  %v2220_v54 = vunpack.i.h.bf16 %v3250_v22 }
  0xb9   : > { %2597 = vrot.lane.b32.xlu0 %v3115_v52, %s2740_s18  ;;  %v2224_v15 = vunpack.i.l.bf16 %v3252_v48  ;;  %v2230_v28 = vunpack.i.h.bf16 %v3262_v58  ;;  %vm896_vm0 = vcmask 1040384  }
  0xba   : > { %v3432_v34 = vpop.permute.xlu1 %2322  ;;  %v1385_v48 = vsel %vm4103_vm6, %v2853_v19, %v2204_v30  ;;  %v765_v19 = vsel %vm761_vm4, %v748_v31, %v2225_v9 }
  0xbb   : > { %v3434_v18 = vpop.permute.xlu0 %2317 }
  0xbc   : > { %2612 = vrot.lane.b32.xlu1 %v3292_v2, %s2742_s20  ;;  %v2641_v2 = vpack.i.bf16 %v2015_v33, %v2012_v35  ;;  %v3468_v33 = vpack.i.bf16 %v695_v39, %v693_v29  ;;  %v3470_v35 = vpack.i.bf16 %v1334_v37, %v1332_v8  ;;  %v746_v39 = vsel %vm744_vm3, %v2825_v5, %v4141_v51 }
  0xbd   : > { %2607 = vrot.lane.b32.xlu0 %v3246_v61, %s2742_s20  ;;  %v3455_v61 = vpack.i.bf16 %v2075_v24, %v2072_v4  ;;  %v4140_v24 = vunpack.c.h.bf16 %v2847_v14  ;;  %v4142_v29 = vunpack.c.h.bf16 %v2906_v55  ;;  %v1391_v8 = vsel %vm4103_vm6, %v2840_v11, %v2215_v12 }
  0xbe   : > { %v3445_v3 = vpop.permute.xlu1 %2332  ;;  %v2235_v5 = vunpack.i.h.bf16 %v3260_v62  ;;  %v2234_v55 = vunpack.i.l.bf16 %v3260_v62  ;;  %v1384_v11 = vsel %vm4103_vm6, %v2019_v10, %v2204_v30  ;;  %v2229_v37 = vunpack.i.l.bf16 %v3262_v58 }
  0xbf   : > { %v3450_v26 = vpop.permute.xlu0 %2327  ;;  %v747_v4 = vsel %vm744_vm3, %v4140_v24, %v2200_v13  ;;  %v1390_v14 = vsel %vm4103_vm6, %v4142_v29, %v2215_v12  ;;  %v1386_v13 = vsel %vm4103_vm6, %v4143_v25, %v2205_v6  ;;  %v763_v23 = vsel %vm761_vm4, %v746_v39, %v2220_v54 }
  0xc0   : > { %2622 = vrot.lane.b32.xlu1 %v3440_v36, %s2741_s19  ;;  %v764_v62 = vsel %vm761_vm4, %v747_v4, %v2224_v15  ;;  %v2255_v12 = vunpack.i.h.bf16 %v3294_v16  ;;  %v2250_v6 = vunpack.i.h.bf16 %v3297_v60  ;;  %v2265_v58 = vunpack.i.h.bf16 %v3322_v44 }
  0xc1   : > { %2617 = vrot.lane.b32.xlu0 %v3126_v56, %s2741_s19  ;;  %v2264_v30 = vunpack.i.l.bf16 %v3322_v44  ;;  %v1403_v21 = vsel %vm1400_vm7, %v1386_v13, %v2234_v55  ;;  %v1404_v24 = vsel %vm1400_vm7, %v1387_v32, %v2235_v5  ;;  %v2275_v4 = vunpack.i.h.bf16 %v3342_v53  ;;  %v4144_v55 = vld [vmem:[#allocation22_spill] sm:$0xff] }
  0xc2   : > { %v3479_v1 = vpop.permute.xlu1 %2342  ;;  %v1401_v31 = vsel %vm1400_vm7, %v1384_v11, %v2229_v37  ;;  %v1402_v60 = vsel %vm1400_vm7, %v1385_v48, %v2230_v28  ;;  %v2270_v54 = vunpack.i.h.bf16 %v3344_v47  ;;  %v2269_v44 = vunpack.i.l.bf16 %v3344_v47  ;;  %v4145_v28 = vld [vmem:[#allocation15_spill] sm:$0xff]  ;;  %v4146_v37 = vld [vmem:[#allocation21_spill] sm:$0xff] }
  0xc3   : > { %v3491_v22 = vpop.permute.xlu0 %2337  ;;  %v782_v51 = vsel %vm778_vm5, %v765_v19, %v2255_v12  ;;  %v2290_v39 = vunpack.i.h.bf16 %v3396_v49  ;;  %v780_v29 = vsel %vm778_vm5, %v763_v23, %v2250_v6  ;;  %v1408_v9 = vsel %vm1400_vm7, %v1391_v8, %v2265_v58 }
  0xc4   : > { %2632 = vrot.lane.b32.xlu1 %v3308_v63, %s2743_s21  ;;  %v2254_v63 = vunpack.i.l.bf16 %v3294_v16  ;;  %v2274_v16 = vunpack.i.l.bf16 %v3342_v53  ;;  %v2289_v53 = vunpack.i.l.bf16 %v3396_v49  ;;  %v1407_v25 = vsel %vm1400_vm7, %v1390_v14, %v2264_v30 }
  0xc5   : > { %2627 = vrot.lane.b32.xlu0 %v3269_v20, %s2743_s21  ;;  %v2304_v47 = vunpack.i.l.bf16 %v3410_v45  ;;  %v1420_v32 = vsel %vm863_vm8, %v1404_v24, %v2275_v4  ;;  %v2305_v5 = vunpack.i.h.bf16 %v3410_v45  ;;  %v2300_v49 = vunpack.i.h.bf16 %v3412_v41 }
  0xc6   : > { %v3513_v10 = vpop.permute.xlu1 %2352  ;;  %v781_v15 = vsel %vm778_vm5, %v764_v62, %v2254_v63  ;;  %v1419_v13 = vsel %vm863_vm8, %v1403_v21, %v2274_v16  ;;  %v1417_v8 = vsel %vm863_vm8, %v1401_v31, %v2269_v44  ;;  %v1418_v14 = vsel %vm863_vm8, %v1402_v60, %v2270_v54  ;;  %v4147_v31 = vld [vmem:[#allocation17_spill] sm:$0xff] }
  0xc7   : > { %v3519_v20 = vpop.permute.xlu0 %2347  ;;  %v2299_v11 = vunpack.i.l.bf16 %v3412_v41  ;;  %v2314_v48 = vunpack.i.l.bf16 %v3423_v0  ;;  %v796_v23 = vsel %vm795_vm9, %v4146_v37, %v2289_v53  ;;  %v797_v45 = vsel %vm795_vm9, %v780_v29, %v2289_v53 }
  0xc8   : > { %2642 = vrot.lane.b32.xlu1 %v2641_v2, %s2742_s20  ;;  %v798_v62 = vsel %vm795_vm9, %v781_v15, %v2290_v39  ;;  %v799_v12 = vsel %vm795_vm9, %v782_v51, %v2290_v39  ;;  %v1434_v19 = vsel %vm1433_vm10, %v1417_v8, %v2304_v47  ;;  %v2315_v41 = vunpack.i.h.bf16 %v3423_v0 }
  0xc9   : > { %2637 = vrot.lane.b32.xlu0 %v3283_v38, %s2742_s20  ;;  %v2310_v6 = vunpack.i.h.bf16 %v3425_v59  ;;  %v2309_v58 = vunpack.i.l.bf16 %v3425_v59  ;;  %v1435_v21 = vsel %vm1433_vm10, %v1418_v14, %v2304_v47  ;;  %v1436_v24 = vsel %vm1433_vm10, %v1419_v13, %v2305_v5 }
  0xca   : > { %v3536_v2 = vpop.permute.xlu1 %2362  ;;  %v1437_v4 = vsel %vm1433_vm10, %v1420_v32, %v2305_v5  ;;  %v1424_v16 = vsel %vm863_vm8, %v1408_v9, %v2300_v49  ;;  %v1423_v0 = vsel %vm863_vm8, %v1407_v25, %v2299_v11  ;;  %v3577_v60 = vsel %vm4102_vm11, %v796_v23, %v2314_v48 }
  0xcb   : > { %v3542_v38 = vpop.permute.xlu0 %2357  ;;  %v2325_v59 = vunpack.i.h.bf16 %v3432_v34  ;;  %v2324_v54 = vunpack.i.l.bf16 %v3432_v34  ;;  %v2320_v44 = vunpack.i.h.bf16 %v3434_v18  ;;  %v2319_v15 = vunpack.i.l.bf16 %v3434_v18 }
  0xcc   : > { %2652 = vrot.lane.b32.xlu1 %v4144_v55, %s2743_s21  ;;  %v2335_v51 = vunpack.i.h.bf16 %v3445_v3  ;;  %v2334_v39 = vunpack.i.l.bf16 %v3445_v3  ;;  %v814_v29 = vsel %vm4102_vm11, %v797_v45, %v2315_v41  ;;  %v802_v9 = vsel %vm795_vm9, %v3378_v57, %v2310_v6 }
  0xcd   : > { %2647 = vrot.lane.b32.xlu0 %v4145_v28, %s2744_s22  ;;  %v803_v34 = vsel %vm795_vm9, %v3381_v27, %v2310_v6  ;;  %v801_v18 = vsel %vm795_vm9, %v3388_v50, %v2309_v58  ;;  %v2330_v3 = vunpack.i.h.bf16 %v3450_v26  ;;  %v2329_v47 = vunpack.i.l.bf16 %v3450_v26 }
  0xce   : > { %v3561_v63 = vpop.permute.xlu1 %2372  ;;  %v2344_v13 = vunpack.i.l.bf16 %v3479_v1  ;;  %v1438_v57 = vsel %vm1433_vm10, %v3402_v40, %v2324_v54  ;;  %v1439_v27 = vsel %vm1433_vm10, %v3405_v7, %v2324_v54  ;;  %v1441_v32 = vsel %vm1433_vm10, %v1424_v16, %v2325_v59 }
  0xcf   : > { %v3567_v30 = vpop.permute.xlu0 %2367  ;;  %v815_v26 = vsel %vm4102_vm11, %v798_v62, %v2319_v15  ;;  %v816_v50 = vsel %vm4102_vm11, %v799_v12, %v2320_v44  ;;  %v1454_v5 = vsel %vm4101_vm12, %v1437_v4, %v2335_v51  ;;  %v2345_v7 = vunpack.i.h.bf16 %v3479_v1 }
  0xd0   : > { %2662 = vrot.lane.b32.xlu1 %v4147_v31, %s2745_s27  ;;  %v2340_v49 = vunpack.i.h.bf16 %v3491_v22  ;;  %v2339_v55 = vunpack.i.l.bf16 %v3491_v22  ;;  %v2354_v8 = vunpack.i.l.bf16 %v3513_v10  ;;  %v1451_v14 = vsel %vm4101_vm12, %v1434_v19, %v2329_v47  ;;  %v4148_v31 = vld [vmem:[#allocation19_spill] sm:$0xff] }
  0xd1   : > { %2657 = vrot.lane.b32.xlu0 %v3455_v61, %s2743_s21  ;;  %v800_v61 = vsel %vm795_vm9, %v3385_v17, %v2309_v58  ;;  %v1440_v17 = vsel %vm1433_vm10, %v1423_v0, %v2325_v59  ;;  %v1452_v11 = vsel %vm4101_vm12, %v1435_v21, %v2330_v3  ;;  %v3628_v48 = vsel %vm4102_vm11, %v802_v9, %v2344_v13  ;;  %v4149_v13 = vld [vmem:[#allocation23_spill] sm:$0xff] }
  0xd2   : > { %v3587_v53 = vpop.permute.xlu1 %2382  ;;  %v2355_v28 = vunpack.i.h.bf16 %v3513_v10  ;;  %v2350_v1 = vunpack.i.h.bf16 %v3519_v20  ;;  %v2349_v22 = vunpack.i.l.bf16 %v3519_v20  ;;  %v2365_v37 = vunpack.i.h.bf16 %v3536_v2 }
  0xd3   : > { %v3596_v25 = vpop.permute.xlu0 %2377  ;;  %v2364_v23 = vunpack.i.l.bf16 %v3536_v2  ;;  %v2360_v45 = vunpack.i.h.bf16 %v3542_v38  ;;  %v2359_v62 = vunpack.i.l.bf16 %v3542_v38  ;;  %v2375_v10 = vunpack.i.h.bf16 %v3561_v63 }
  0xd4   : > { %2672 = vrot.lane.b32.xlu1 %v3103_v42, %s2737_s15  ;;  %v1453_v42 = vsel %vm4101_vm12, %v1436_v24, %v2334_v39  ;;  %v3646_v20 = vsel %vm4102_vm11, %v803_v34, %v2345_v7  ;;  %v817_v19 = vsel %vm4102_vm11, %v800_v61, %v2339_v55  ;;  %v818_v2 = vsel %vm4102_vm11, %v801_v18, %v2340_v49 }
  0xd5   : > { %2667 = vrot.lane.b32.xlu0 %v3459_v43, %s2744_s22  ;;  %v833_v38 = vsel %vm829_vm13, %v816_v50, %v2355_v28  ;;  %v2370_v6 = vunpack.i.h.bf16 %v3567_v30  ;;  %v830_v21 = vsel %vm829_vm13, %v3577_v60, %v2349_v22  ;;  %v831_v24 = vsel %vm829_vm13, %v814_v29, %v2350_v1 }
  0xd6   : > { %v3617_v40 = vpop.permute.xlu1 %2392  ;;  %v3663_v4 = vsel %vm4101_vm12, %v1440_v17, %v2364_v23  ;;  %v3666_v16 = vsel %vm4101_vm12, %v1441_v32, %v2365_v37  ;;  %v3674_v0 = vsel %vm4101_vm12, %v1439_v27, %v2360_v45  ;;  %v1471_v60 = vsel %vm1467_vm14, %v1454_v5, %v2375_v10 }
  0xd7   : > { %v3623_v43 = vpop.permute.xlu0 %2387  ;;  %v2380_v54 = vunpack.i.h.bf16 %v3596_v25  ;;  %v2379_v44 = vunpack.i.l.bf16 %v3596_v25  ;;  %v1469_v9 = vsel %vm1467_vm14, %v1452_v11, %v2370_v6  ;;  %v2385_v18 = vunpack.i.h.bf16 %v3587_v53 }
  0xd8   : > { %2682 = vrot.lane.b32.xlu1 %v3466_v46, %s2745_s27  ;;  %v2374_v46 = vunpack.i.l.bf16 %v3561_v63  ;;  %v2369_v63 = vunpack.i.l.bf16 %v3567_v30  ;;  %v2389_v58 = vunpack.i.l.bf16 %v3623_v43  ;;  %v3671_v30 = vsel %vm4101_vm12, %v1438_v57, %v2359_v62 }
  0xd9   : > { %2677 = vrot.lane.b32.xlu0 %v3115_v52, %s2737_s15  ;;  %v832_v52 = vsel %vm829_vm13, %v815_v26, %v2354_v8  ;;  %v2390_v3 = vunpack.i.h.bf16 %v3623_v43  ;;  %v834_v50 = vsel %vm829_vm13, %v817_v19, %v2379_v44  ;;  %v2395_v5 = vunpack.i.h.bf16 %v3617_v40 }
  0xda   : > { %v3643_v12 = vpop.permute.xlu1 %2402  ;;  %v1468_v29 = vsel %vm1467_vm14, %v1451_v14, %v2369_v63  ;;  %v847_v34 = vsel %vm846_vm15, %v830_v21, %v2389_v58  ;;  %v848_v61 = vsel %vm846_vm15, %v831_v24, %v2389_v58  ;;  %vm1690_vm12 = vcmask 220160  }
  0xdb   : > { %v3651_v41 = vpop.permute.xlu0 %2397  ;;  %v2405_v57 = vunpack.i.h.bf16 %v3643_v12  ;;  %v2404_v27 = vunpack.i.l.bf16 %v3643_v12  ;;  %v2394_v49 = vunpack.i.l.bf16 %v3617_v40  ;;  %v849_v14 = vsel %vm846_vm15, %v832_v52, %v2390_v3 }
  0xdc   : > { %2692 = vrot.lane.b32.xlu1 %v3126_v56, %s2747_s30  ;;  %v1470_v56 = vsel %vm1467_vm14, %v1453_v42, %v2374_v46  ;;  %v835_v42 = vsel %vm829_vm13, %v818_v2, %v2380_v54  ;;  %v850_v11 = vsel %vm846_vm15, %v833_v38, %v2390_v3  ;;  %v2400_v28 = vunpack.i.h.bf16 %v3651_v41 }
  0xdd   : > { %2687 = vrot.lane.b32.xlu0 %v4148_v31, %s2747_s30  ;;  %v2399_v1 = vunpack.i.l.bf16 %v3651_v41  ;;  %v1485_v40 = vsel %vm1484_vm1, %v1468_v29, %v2404_v27  ;;  %v1487_v22 = vsel %vm1484_vm1, %v1470_v56, %v2405_v57  ;;  %vm4104_vm11 = vcmask 588800  }
  0xde   : > { %v2413_v59 = vpop.permute.xlu1 %2412  ;;  %v1488_v19 = vsel %vm1484_vm1, %v1471_v60, %v2405_v57  ;;  %v1486_v41 = vsel %vm1484_vm1, %v1469_v9, %v2404_v27 }
  0xdf   : > { %v2415_v15 = vunpack.i.h.bf16 %v2413_v59  ;;  %v2414_v51 = vunpack.i.l.bf16 %v2413_v59  ;;  %v3680_v39 = vpop.permute.xlu0 %2407 }
  0xe0   : > { %2702 = vrot.lane.b32.xlu1 %v3468_v33, %s2737_s15  ;;  %v2384_v33 = vunpack.i.l.bf16 %v3587_v53  ;;  %v2409_v2 = vunpack.i.l.bf16 %v3680_v39  ;;  %v1475_v53 = vsel %vm1467_vm14, %v3666_v16, %v2400_v28 }
  0xe1   : > { %v864_v25 = vsel %vm863_vm8, %v847_v34, %v2414_v51  ;;  %v865_v47 = vsel %vm863_vm8, %v848_v61, %v2415_v15  ;;  %2697 = vrot.lane.b32.xlu0 %v4149_v13, %s2737_s15  ;;  %v2410_v51 = vunpack.i.h.bf16 %v3680_v39 }
  0xe2   : > { %v897_v17 = vrot.slane %v864_v25, 7  ;;  %v898_v32 = vrot.slane %v865_v47, 7  ;;  %v3696_v26 = vpop.permute.xlu1 %2422  ;;  %v851_v29 = vsel %vm846_vm15, %v834_v50, %v2409_v2  ;;  %v852_v9 = vsel %vm846_vm15, %v835_v42, %v2409_v2 }
  0xe3   : > { %v2418_v7 = vpop.permute.xlu0 %2417  ;;  %v2425_v13 = vunpack.i.h.bf16 %v3696_v26  ;;  %v2424_v57 = vunpack.i.l.bf16 %v3696_v26  ;;  %v837_v50 = vsel %vm829_vm13, %v3646_v20, %v2385_v18  ;;  %v1472_v42 = vsel %vm1467_vm14, %v3671_v30, %v2394_v49 }
  0xe4   : > { %v2420_v55 = vunpack.i.h.bf16 %v2418_v7  ;;  %v2419_v8 = vunpack.i.l.bf16 %v2418_v7  ;;  %2712 = vrot.lane.b32.xlu1 %v3470_v35, %s2747_s30  ;;  %v899_v43 = vsel %vm896_vm0, %v897_v17, %v898_v32  ;;  %v836_v32 = vsel %vm829_vm13, %v3628_v48, %v2384_v33 }
  0xe5   : > { %2707 = vrot.lane.b32.xlu0 %v3440_v36, %s2747_s30  ;;  %v1473_v26 = vsel %vm1467_vm14, %v3674_v0, %v2395_v5  ;;  %v1474_v48 = vsel %vm1467_vm14, %v3663_v4, %v2399_v1  ;;  %v853_v20 = vsel %vm846_vm15, %v836_v32, %v2410_v51  ;;  %v854_v18 = vsel %vm846_vm15, %v837_v50, %v2410_v51 }
  0xe6   : > { %v866_v37 = vsel %vm863_vm8, %v849_v14, %v2419_v8  ;;  %v867_v35 = vsel %vm863_vm8, %v850_v11, %v2420_v55  ;;  %v2433_v23 = vpop.permute.xlu1 %2432  ;;  %v1489_v30 = vsel %vm1484_vm1, %v1472_v42, %v2424_v57  ;;  %v1491_v0 = vsel %vm1484_vm1, %v1474_v48, %v2425_v13 }
  0xe7   : > { %v900_v45 = vrot.slane %v866_v37, 7  ;;  %v901_v62 = vrot.slane %v867_v35, 7  ;;  %v2435_v10 = vunpack.i.h.bf16 %v2433_v23  ;;  %v2434_v46 = vunpack.i.l.bf16 %v2433_v23  ;;  %v2428_v12 = vpop.permute.xlu0 %2427 }
  0xe8   : > { %v2430_v36 = vunpack.i.h.bf16 %v2428_v12  ;;  %v2429_v52 = vunpack.i.l.bf16 %v2428_v12  ;;  %v1492_v28 = vsel %vm1484_vm1, %v1475_v53, %v2425_v13  ;;  %v1490_v23 = vsel %vm1484_vm1, %v1473_v26, %v2424_v57  ;;  %v4153_v57 = vld [vmem:[#allocation6_spill] sm:$0xff] }
  0xe9   : > { %v1504_v38 = vsel %vm1501_vm2, %v1487_v22, %v2434_v46  ;;  %v1505_v6 = vsel %vm1501_vm2, %v1488_v19, %v2435_v10  ;;  %v902_v63 = vsel %vm896_vm0, %v900_v45, %v901_v62 }
  0xea   : > { %v1537_v58 = vrot.slane %v1504_v38, 7  ;;  %v1538_v21 = vrot.slane %v1505_v6, 7  ;;  %v1502_v24 = vsel %vm1501_vm2, %v1485_v40, %v2429_v52  ;;  %v1503_v31 = vsel %vm1501_vm2, %v1486_v41, %v2430_v36  ;;  %v2443_v56 = vpop.permute.xlu1 %2442 }
  0xeb   : > { %v1534_v60 = vrot.slane %v1502_v24, 7  ;;  %v1535_v59 = vrot.slane %v1503_v31, 7  ;;  %v2445_v54 = vunpack.i.h.bf16 %v2443_v56  ;;  %v2444_v44 = vunpack.i.l.bf16 %v2443_v56  ;;  %v3724_v15 = vpop.permute.xlu0 %2437  ;;  %v4152_v31 = vld [vmem:[#allocation3_spill] sm:$0xff] }
  0xec   : > { %v929_v34 = vpack.c.bf16 %v902_v63, %v899_v43  ;;  %v1539_v47 = vsel %vm896_vm0, %v1537_v58, %v1538_v21  ;;  %v2439_v22 = vunpack.i.l.bf16 %v3724_v15  ;;  %v4150_v58 = vld [vmem:[#allocation2_spill] sm:$0xff] }
  0xed   : > { %v868_v61 = vsel %vm863_vm8, %v851_v29, %v2444_v44  ;;  %v869_v3 = vsel %vm863_vm8, %v852_v9, %v2445_v54  ;;  %v1536_v25 = vsel %vm896_vm0, %v1534_v60, %v1535_v59  ;;  %v4151_v21 = vunpack.c.l.bf16 %v4150_v58 }
  0xee   : > { %v903_v27 = vrot.slane %v868_v61, 7  ;;  %v904_v17 = vrot.slane %v869_v3, 7  ;;  %2147 = vmatprep.mubr.msk.bf16.mxu1 %vm1690_vm12, %v929_v34  ;;  %v3736_v39 = vpop.permute.xlu1 %2452  ;;  %v1566_v43 = vpack.c.bf16 %v1539_v47, %v1536_v25  ;;  %v754_v56 = vsel %vm744_vm3, %v4152_v31, %v2439_v22 }
  0xef   : > { %v2448_v7 = vpop.permute.xlu0 %2447  ;;  %v753_v24 = vsel %vm744_vm3, %v4151_v21, %v2439_v22  ;;  %v2440_v54 = vunpack.i.h.bf16 %v3724_v15  ;;  %v2455_v34 = vunpack.i.h.bf16 %v3736_v39  ;;  %v2454_v25 = vunpack.i.l.bf16 %v3736_v39 }
  0xf0   : > { %v2450_v55 = vunpack.i.h.bf16 %v2448_v7  ;;  %v2449_v8 = vunpack.i.l.bf16 %v2448_v7  ;;  %v905_v14 = vsel %vm896_vm0, %v903_v27, %v904_v17  ;;  %2135 = vmatprep.mubr.msk.bf16.mxu0 %vm4104_vm11, %v1566_v43  ;;  %v4154_v15 = vunpack.c.h.bf16 %v4153_v57  ;;  %v4155_v17 = vld [vmem:[#allocation18_spill] sm:$0xff]  ;;  %v4156_v7 = vld [vmem:[#allocation8_spill] sm:$0xff] }
  0xf1   : > { %v756_v32 = vsel %vm744_vm3, %v4155_v17, %v2440_v54 }
  0xf2   : > { %v870_v33 = vsel %vm863_vm8, %v853_v20, %v2449_v8  ;;  %v871_v5 = vsel %vm863_vm8, %v854_v18, %v2450_v55  ;;  %v2463_v49 = vpop.permute.xlu1 %2462  ;;  %v755_v27 = vsel %vm744_vm3, %v4154_v15, %v2440_v54  ;;  %v4157_v55 = vunpack.c.h.bf16 %v4156_v7  ;;  %v4158_v8 = vld [vmem:[#allocation20_spill] sm:$0xff]  ;;  %v4170_v7 = vld [vmem:[#allocation14_spill] sm:$0xff] }
  0xf3   : > { %v906_v11 = vrot.slane %v870_v33, 7  ;;  %v907_v4 = vrot.slane %v871_v5, 7  ;;  %v2465_v1 = vunpack.i.h.bf16 %v2463_v49  ;;  %v2464_v40 = vunpack.i.l.bf16 %v2463_v49  ;;  %v2458_v16 = vpop.permute.xlu0 %2457  ;;  %v4159_v20 = vld [vmem:[#allocation4_spill] sm:$0xff]  ;;  %v4161_v49 = vld [vmem:[#allocation5_spill] sm:$0xff] }
  0xf4   : > { %v2460_v37 = vunpack.i.h.bf16 %v2458_v16  ;;  %v2459_v35 = vunpack.i.l.bf16 %v2458_v16  ;;  %v1394_v39 = vsel %vm4103_vm6, %v4157_v55, %v2455_v34  ;;  %v1395_v43 = vsel %vm4103_vm6, %v4158_v8, %v2455_v34 }
  0xf5   : > { %v1508_v45 = vsel %vm1501_vm2, %v1491_v0, %v2464_v40  ;;  %v1509_v62 = vsel %vm1501_vm2, %v1492_v28, %v2465_v1  ;;  %v908_v10 = vsel %vm896_vm0, %v906_v11, %v907_v4  ;;  %v4160_v18 = vunpack.c.l.bf16 %v4159_v20 }
  0xf6   : > { %v1543_v46 = vrot.slane %v1508_v45, 7  ;;  %v1544_v12 = vrot.slane %v1509_v62, 7  ;;  %v1506_v19 = vsel %vm1501_vm2, %v1489_v30, %v2459_v35  ;;  %v1507_v2 = vsel %vm1501_vm2, %v1490_v23, %v2460_v37  ;;  %v2473_v36 = vpop.permute.xlu1 %2472  ;;  %v4162_v45 = vld [vmem:[#allocation12_spill] sm:$0xff] }
  0xf7   : > { %v1540_v52 = vrot.slane %v1506_v19, 7  ;;  %v1541_v41 = vrot.slane %v1507_v2, 7  ;;  %v2475_v38 = vunpack.i.h.bf16 %v2473_v36  ;;  %v2474_v6 = vunpack.i.l.bf16 %v2473_v36  ;;  %v2468_v63 = vpop.permute.xlu0 %2467  ;;  %v4165_v36 = vld [vmem:[#allocation7_spill] sm:$0xff] }
  0xf8   : > { %v930_v60 = vpack.c.bf16 %v908_v10, %v905_v14  ;;  %v1545_v59 = vsel %vm896_vm0, %v1543_v46, %v1544_v12  ;;  %v1392_v30 = vsel %vm4103_vm6, %v4160_v18, %v2454_v25  ;;  %v2470_v0 = vunpack.i.h.bf16 %v2468_v63  ;;  %v4164_v46 = vld [vmem:[#allocation10_spill] sm:$0xff] }
  0xf9   : > { %v770_v44 = vsel %vm761_vm4, %v753_v24, %v2474_v6  ;;  %v771_v51 = vsel %vm761_vm4, %v754_v56, %v2475_v38  ;;  %v1542_v29 = vsel %vm896_vm0, %v1540_v52, %v1541_v41  ;;  %v1393_v11 = vsel %vm4103_vm6, %v4161_v49, %v2454_v25  ;;  %v4167_v38 = vld [vmem:[#allocation9_spill] sm:$0xff] }
  0xfa   : > { %2148 = vmatmul.mubr.msk.bf16.vlgmr.msra.gmra.mxu1 %vm1690_vm12, %v930_v60  ;;  %v3779_v9 = vpop.permute.xlu1 %2482  ;;  %v1567_v3 = vpack.c.bf16 %v1545_v59, %v1542_v29  ;;  %v2469_v4 = vunpack.i.l.bf16 %v2468_v63  ;;  %v4163_v62 = vunpack.c.h.bf16 %v4162_v45  ;;  %v760_v12 = vsel %vm744_vm3, %v4164_v46, %v2470_v0 }
  0xfb   : > { %v2478_v61 = vpop.permute.xlu0 %2477  ;;  %v4166_v52 = vunpack.c.l.bf16 %v4165_v36  ;;  %v2485_v54 = vunpack.i.h.bf16 %v3779_v9 }
  0xfc   : > { %v2480_v47 = vunpack.i.h.bf16 %v2478_v61  ;;  %v2479_v13 = vunpack.i.l.bf16 %v2478_v61  ;;  %2136 = vmatmul.mubr.msk.bf16.vlgmr.msra.gmra.mxu0 %vm4104_vm11, %v1567_v3  ;;  %v759_v10 = vsel %vm744_vm3, %v4163_v62, %v2470_v0  ;;  %v758_v6 = vsel %vm744_vm3, %v4167_v38, %v2469_v4 }
  0xfd   : > { %v757_v41 = vsel %vm744_vm3, %v4166_v52, %v2469_v4  ;;  %v2484_v61 = vunpack.i.l.bf16 %v3779_v9  ;;  %vm4174_vm3 = vcmask 121856  }
  0xfe   : > { %v772_v50 = vsel %vm761_vm4, %v755_v27, %v2479_v13  ;;  %v773_v42 = vsel %vm761_vm4, %v756_v32, %v2480_v47  ;;  %v2493_v26 = vpop.permute.xlu1 %2492  ;;  %v4168_v32 = vld [vmem:[#allocation16_spill] sm:$0xff] }
  0xff   : > { %v2495_v14 = vunpack.i.h.bf16 %v2493_v26  ;;  %v2494_v48 = vunpack.i.l.bf16 %v2493_v26  ;;  %v2488_v53 = vpop.permute.xlu0 %2487  ;;  %v4169_v26 = vunpack.c.h.bf16 %v4168_v32 }
 0x100   : > { %v2490_v33 = vunpack.i.h.bf16 %v2488_v53  ;;  %v2489_v5 = vunpack.i.l.bf16 %v2488_v53 }
 0x101   : > { %v3802_v1 = vsel %vm1400_vm7, %v1394_v39, %v2494_v48  ;;  %v3805_v40 = vsel %vm1400_vm7, %v1395_v43, %v2495_v14  ;;  %v1398_v9 = vsel %vm4103_vm6, %v4169_v26, %v2485_v54  ;;  %v4171_v39 = vld [vmem:[#allocation11_spill] sm:$0xff]  ;;  %v4173_v43 = vld [vmem:[#allocation13_spill] sm:$0xff] }
 0x102   : > { %v3808_v16 = vsel %vm1400_vm7, %v1393_v11, %v2490_v33  ;;  %v3811_v28 = vsel %vm1400_vm7, %v1392_v30, %v2489_v5  ;;  %v2503_v22 = vpop.permute.xlu1 %2502  ;;  %v4172_v8 = vunpack.c.l.bf16 %v4171_v39 }
 0x103   : > { %v2505_v37 = vunpack.i.h.bf16 %v2503_v22  ;;  %v2504_v35 = vunpack.i.l.bf16 %v2503_v22  ;;  %v2498_v23 = vpop.permute.xlu0 %2497 }
 0x104   : > { %v2500_v19 = vunpack.i.h.bf16 %v2498_v23  ;;  %v2499_v2 = vunpack.i.l.bf16 %v2498_v23 }
 0x105   : > { %v776_v63 = vsel %vm761_vm4, %v759_v10, %v2504_v35  ;;  %v777_v58 = vsel %vm761_vm4, %v760_v12, %v2505_v37 }
 0x106   : > { %v3826_v21 = vsel %vm761_vm4, %v757_v41, %v2499_v2  ;;  %v3829_v24 = vsel %vm761_vm4, %v758_v6, %v2500_v19  ;;  %v2513_v31 = vpop.permute.xlu1 %2512  ;;  %vm4175_vm4 = vmmov %vm4174_vm3 }
 0x107   : > { %v2515_v56 = vunpack.i.h.bf16 %v2513_v31  ;;  %v2514_v60 = vunpack.i.l.bf16 %v2513_v31  ;;  %v2508_v59 = vpop.permute.xlu0 %2507 }
 0x108   : > { %v2510_v29 = vunpack.i.h.bf16 %v2508_v59  ;;  %v2509_v34 = vunpack.i.l.bf16 %v2508_v59 }
 0x109   : > { %v3834_v3 = vsel %vm778_vm5, %v772_v50, %v2514_v60  ;;  %v3837_v25 = vsel %vm778_vm5, %v773_v42, %v2515_v56  ;;  %v1399_v50 = vsel %vm4103_vm6, %v4170_v7, %v2485_v54 }
 0x10a   : > { %v3840_v47 = vsel %vm778_vm5, %v770_v44, %v2509_v34  ;;  %v3843_v13 = vsel %vm778_vm5, %v771_v51, %v2510_v29  ;;  %v2523_v57 = vpop.permute.xlu1 %2522  ;;  %v1396_v44 = vsel %vm4103_vm6, %v4172_v8, %v2484_v61  ;;  %v1397_v51 = vsel %vm4103_vm6, %v4173_v43, %v2484_v61 }
 0x10b   : > { %v2525_v15 = vunpack.i.h.bf16 %v2523_v57  ;;  %v2524_v27 = vunpack.i.l.bf16 %v2523_v57  ;;  %v2518_v17 = vpop.permute.xlu0 %2517 }
 0x10c   : > { %v2520_v55 = vunpack.i.h.bf16 %v2518_v17  ;;  %v2519_v42 = vunpack.i.l.bf16 %v2518_v17 }
 0x10d   : > { %v3856_v14 = vsel %vm1400_vm7, %v1398_v9, %v2524_v27  ;;  %v3859_v48 = vsel %vm1400_vm7, %v1399_v50, %v2525_v15 }
 0x10e   : > { %v1414_v53 = vsel %vm1400_vm7, %v1397_v51, %v2520_v55  ;;  %v1413_v20 = vsel %vm1400_vm7, %v1396_v44, %v2519_v42  ;;  %v2533_v18 = vpop.permute.xlu1 %2532  ;;  %vm4177_vm7 = vmmov %vm4174_vm3 }
 0x10f   : > { %v2528_v30 = vpop.permute.xlu0 %2527  ;;  %v2534_v10 = vunpack.i.l.bf16 %v2533_v18  ;;  %v2535_v46 = vunpack.i.h.bf16 %v2533_v18 }
 0x110   : > { %v2530_v12 = vunpack.i.h.bf16 %v2528_v30  ;;  %v2529_v19 = vunpack.i.l.bf16 %v2528_v30 }
 0x111   : > { %v1427_v31 = vsel %vm863_vm8, %v3802_v1, %v2534_v10  ;;  %v1428_v60 = vsel %vm863_vm8, %v3805_v40, %v2535_v46 }
 0x112   : > { %v2543_v0 = vpop.permute.xlu1 %2542  ;;  %v1425_v59 = vsel %vm863_vm8, %v3811_v28, %v2529_v19  ;;  %v1426_v54 = vsel %vm863_vm8, %v3808_v16, %v2530_v12 }
 0x113   : > { %v2538_v33 = vpop.permute.xlu0 %2537  ;;  %v2545_v36 = vunpack.i.h.bf16 %v2543_v0  ;;  %v2544_v52 = vunpack.i.l.bf16 %v2543_v0 }
 0x114   : > { %v2540_v38 = vunpack.i.h.bf16 %v2538_v33  ;;  %v2539_v6 = vunpack.i.l.bf16 %v2538_v33 }
 0x115   : > { %v793_v61 = vsel %vm778_vm5, %v776_v63, %v2544_v52  ;;  %v794_v57 = vsel %vm778_vm5, %v777_v58, %v2545_v36 }
 0x116   : > { %v2553_v5 = vpop.permute.xlu1 %2552  ;;  %v791_v40 = vsel %vm778_vm5, %v3826_v21, %v2539_v6  ;;  %v792_v28 = vsel %vm778_vm5, %v3829_v24, %v2540_v38  ;;  %vm4176_vm5 = vmmov %vm4174_vm3 }
 0x117   : > { %v2548_v49 = vpop.permute.xlu0 %2547  ;;  %v2554_v56 = vunpack.i.l.bf16 %v2553_v5  ;;  %v2555_v29 = vunpack.i.h.bf16 %v2553_v5  ;;  %vm4182_vm11 = vmmov %vm4176_vm5 }
 0x118   : > { %v2550_v15 = vunpack.i.h.bf16 %v2548_v49  ;;  %v2549_v27 = vunpack.i.l.bf16 %v2548_v49 }
 0x119   : > { %v1429_v16 = vsel %vm863_vm8, %v1413_v20, %v2554_v56  ;;  %v1430_v63 = vsel %vm863_vm8, %v1414_v53, %v2555_v29 }
 0x11a   : > { %v2563_v11 = vpop.permute.xlu1 %2562  ;;  %v804_v21 = vsel %vm795_vm9, %v3840_v47, %v2549_v27  ;;  %v805_v24 = vsel %vm795_vm9, %v3843_v13, %v2549_v27  ;;  %v806_v39 = vsel %vm795_vm9, %v3834_v3, %v2550_v15  ;;  %v807_v8 = vsel %vm795_vm9, %v3837_v25, %v2550_v15 }
 0x11b   : > { %v2558_v4 = vpop.permute.xlu0 %2557  ;;  %v2565_v17 = vunpack.i.h.bf16 %v2563_v11  ;;  %v2564_v32 = vunpack.i.l.bf16 %v2563_v11 }
 0x11c   : > { %v2560_v26 = vunpack.i.h.bf16 %v2558_v4  ;;  %v2559_v9 = vunpack.i.l.bf16 %v2558_v4 }
 0x11d   : > { %v1442_v43 = vsel %vm1433_vm10, %v1425_v59, %v2564_v32  ;;  %v1443_v51 = vsel %vm1433_vm10, %v1426_v54, %v2564_v32  ;;  %v1444_v53 = vsel %vm1433_vm10, %v1427_v31, %v2565_v17  ;;  %v1445_v47 = vsel %vm1433_vm10, %v1428_v60, %v2565_v17 }
 0x11e   : > { %v2573_v22 = vpop.permute.xlu1 %2572  ;;  %v1432_v13 = vsel %vm863_vm8, %v3859_v48, %v2560_v26  ;;  %v1431_v3 = vsel %vm863_vm8, %v3856_v14, %v2559_v9 }
 0x11f   : > { %v2568_v37 = vpop.permute.xlu0 %2567  ;;  %v2574_v7 = vunpack.i.l.bf16 %v2573_v22  ;;  %v2575_v58 = vunpack.i.h.bf16 %v2573_v22 }
 0x120   : > { %v2570_v50 = vunpack.i.h.bf16 %v2568_v37  ;;  %v2569_v55 = vunpack.i.l.bf16 %v2568_v37 }
 0x121   : > { %v821_v25 = vsel %vm4174_vm3, %v804_v21, %v2574_v7  ;;  %v822_v18 = vsel %vm4175_vm4, %v805_v24, %v2575_v58 }
 0x122   : > { %v3863_v35 = vpop.permute.xlu1 %2582  ;;  %v808_v30 = vsel %vm795_vm9, %v791_v40, %v2569_v55  ;;  %v809_v0 = vsel %vm795_vm9, %v792_v28, %v2569_v55  ;;  %v810_v33 = vsel %vm795_vm9, %v793_v61, %v2570_v50  ;;  %v811_v49 = vsel %vm795_vm9, %v794_v57, %v2570_v50 }
 0x123   : > { %v3865_v23 = vpop.permute.xlu0 %2577  ;;  %v2584_v20 = vunpack.i.l.bf16 %v3863_v35  ;;  %v2585_v11 = vunpack.i.h.bf16 %v3863_v35  ;;  %vm4178_vm9 = vcmask 326656  }
 0x124   : > { %v2580_v48 = vunpack.i.h.bf16 %v3865_v23  ;;  %v2579_v14 = vunpack.i.l.bf16 %v3865_v23  ;;  %vm4179_vm3 = vmmov %vm4178_vm9 }
 0x125   : > { %v1446_v22 = vsel %vm1433_vm10, %v1429_v16, %v2584_v20  ;;  %v1447_v37 = vsel %vm1433_vm10, %v1430_v63, %v2584_v20  ;;  %v1448_v56 = vsel %vm1433_vm10, %v1431_v3, %v2585_v11  ;;  %vm4180_vm4 = vmmov %vm4179_vm3 }
 0x126   : > { %v3867_v45 = vpop.permute.xlu1 %2592  ;;  %v823_v60 = vsel %vm4176_vm5, %v806_v39, %v2579_v14  ;;  %vm4181_vm6 = vmmov %vm4179_vm3 }
 0x127   : > { %v3869_v62 = vpop.permute.xlu0 %2587  ;;  %v2595_v10 = vunpack.i.h.bf16 %v3867_v45  ;;  %v2594_v46 = vunpack.i.l.bf16 %v3867_v45  ;;  %v1449_v45 = vsel %vm1433_vm10, %v1432_v13, %v2585_v11  ;;  %vm4183_vm10 = vmmov %vm4176_vm5 }
 0x128   : > { %v2590_v12 = vunpack.i.h.bf16 %v3869_v62  ;;  %v2589_v19 = vunpack.i.l.bf16 %v3869_v62  ;;  %v824_v62 = vsel %vm4177_vm7, %v807_v8, %v2580_v48  ;;  %vm4184_vm7 = vmmov %vm4176_vm5 }
 0x129   : > { %v1462_v54 = vsel %vm4179_vm3, %v1445_v47, %v2595_v10 }
 0x12a   : > { %v3871_v2 = vpop.permute.xlu1 %2602  ;;  %v1460_v61 = vsel %vm4181_vm6, %v1443_v51, %v2590_v12  ;;  %vm4185_vm6 = vmmov %vm4179_vm3 }
 0x12b   : > { %v3873_v41 = vpop.permute.xlu0 %2597  ;;  %v2605_v36 = vunpack.i.h.bf16 %v3871_v2  ;;  %v2604_v35 = vunpack.i.l.bf16 %v3871_v2  ;;  %v1461_v2 = vsel %vm4178_vm9, %v1444_v53, %v2594_v46  ;;  %vm4187_vm9 = vmmov %vm4179_vm3 }
 0x12c   : > { %v2600_v52 = vunpack.i.h.bf16 %v3873_v41  ;;  %v2599_v23 = vunpack.i.l.bf16 %v3873_v41 }
 0x12d   : > { %v827_v57 = vsel %vm4182_vm11, %v810_v33, %v2604_v35  ;;  %v828_v15 = vsel %vm4183_vm10, %v811_v49, %v2605_v36  ;;  %vm4186_vm11 = vmmov %vm4179_vm3 }
 0x12e   : > { %v3883_v34 = vpop.permute.xlu1 %2612  ;;  %v825_v27 = vsel %vm4176_vm5, %v808_v30, %v2599_v23  ;;  %v826_v40 = vsel %vm4184_vm7, %v809_v0, %v2600_v52 }
 0x12f   : > { %v3887_v1 = vpop.permute.xlu0 %2607  ;;  %v2615_v38 = vunpack.i.h.bf16 %v3883_v34  ;;  %v2614_v6 = vunpack.i.l.bf16 %v3883_v34  ;;  %v1459_v34 = vsel %vm4180_vm4, %v1442_v43, %v2589_v19  ;;  %vm1863_vm4 = vcmask 518144  }
 0x130   : > { %v2610_v41 = vunpack.i.h.bf16 %v3887_v1  ;;  %v2609_v29 = vunpack.i.l.bf16 %v3887_v1 }
 0x131   : > { %v840_v28 = vsel %vm829_vm13, %v823_v60, %v2614_v6  ;;  %v841_v17 = vsel %vm829_vm13, %v824_v62, %v2615_v38 }
 0x132   : > { %v3895_v42 = vpop.permute.xlu1 %2622  ;;  %v838_v63 = vsel %vm829_vm13, %v821_v25, %v2609_v29  ;;  %v839_v58 = vsel %vm829_vm13, %v822_v18, %v2610_v41 }
 0x133   : > { %v3905_v44 = vpop.permute.xlu0 %2617  ;;  %v2625_v16 = vunpack.i.h.bf16 %v3895_v42  ;;  %v2624_v1 = vunpack.i.l.bf16 %v3895_v42 }
 0x134   : > { %v2620_v26 = vunpack.i.h.bf16 %v3905_v44  ;;  %v2619_v9 = vunpack.i.l.bf16 %v3905_v44 }
 0x135   : > { %v1465_v44 = vsel %vm4185_vm6, %v1448_v56, %v2624_v1  ;;  %v1466_v47 = vsel %vm4186_vm11, %v1449_v45, %v2625_v16 }
 0x136   : > { %v3921_v5 = vpop.permute.xlu1 %2632  ;;  %v1463_v13 = vsel %vm4187_vm9, %v1446_v22, %v2619_v9  ;;  %v1464_v3 = vsel %vm4179_vm3, %v1447_v37, %v2620_v26 }
 0x137   : > { %v2628_v4 = vpop.permute.xlu0 %2627  ;;  %v2635_v50 = vunpack.i.h.bf16 %v3921_v5  ;;  %v2634_v55 = vunpack.i.l.bf16 %v3921_v5 }
 0x138   : > { %v2630_v21 = vunpack.i.h.bf16 %v2628_v4  ;;  %v2629_v24 = vunpack.i.l.bf16 %v2628_v4 }
 0x139   : > { %v1478_v18 = vsel %vm1467_vm14, %v1461_v2, %v2634_v55  ;;  %v1479_v30 = vsel %vm1467_vm14, %v1462_v54, %v2635_v50 }
 0x13a   : > { %v2643_v31 = vpop.permute.xlu1 %2642  ;;  %v1476_v5 = vsel %vm1467_vm14, %v1459_v34, %v2629_v24  ;;  %v1477_v49 = vsel %vm1467_vm14, %v1460_v61, %v2630_v21 }
 0x13b   : > { %v2638_v59 = vpop.permute.xlu0 %2637  ;;  %v2645_v39 = vunpack.i.h.bf16 %v2643_v31  ;;  %v2644_v8 = vunpack.i.l.bf16 %v2643_v31 }
 0x13c   : > { %v2640_v43 = vunpack.i.h.bf16 %v2638_v59  ;;  %v2639_v51 = vunpack.i.l.bf16 %v2638_v59 }
 0x13d   : > { %v844_v11 = vsel %vm829_vm13, %v827_v57, %v2644_v8  ;;  %v845_v48 = vsel %vm829_vm13, %v828_v15, %v2645_v39 }
 0x13e   : > { %v2653_v32 = vpop.permute.xlu1 %2652  ;;  %v842_v14 = vsel %vm829_vm13, %v825_v27, %v2639_v51  ;;  %v843_v4 = vsel %vm829_vm13, %v826_v40, %v2640_v43 }
 0x13f   : > { %v2648_v7 = vpop.permute.xlu0 %2647  ;;  %v2655_v42 = vunpack.i.h.bf16 %v2653_v32  ;;  %v2654_v53 = vunpack.i.l.bf16 %v2653_v32 }
 0x140   : > { %v2650_v0 = vunpack.i.h.bf16 %v2648_v7  ;;  %v2649_v33 = vunpack.i.l.bf16 %v2648_v7 }
 0x141   : > { %v1480_v22 = vsel %vm1467_vm14, %v1463_v13, %v2654_v53  ;;  %v3977_v37 = vsel %vm1467_vm14, %v1464_v3, %v2655_v42 }
 0x142   : > { %v2663_v20 = vpop.permute.xlu1 %2662  ;;  %v855_v52 = vsel %vm846_vm15, %v838_v63, %v2649_v33  ;;  %v856_v23 = vsel %vm846_vm15, %v839_v58, %v2649_v33  ;;  %v857_v38 = vsel %vm846_vm15, %v840_v28, %v2650_v0  ;;  %v858_v62 = vsel %vm846_vm15, %v841_v17, %v2650_v0 }
 0x143   : > { %v2658_v25 = vpop.permute.xlu0 %2657  ;;  %v2665_v46 = vunpack.i.h.bf16 %v2663_v20  ;;  %v2664_v12 = vunpack.i.l.bf16 %v2663_v20 }
 0x144   : > { %v2660_v6 = vunpack.i.h.bf16 %v2658_v25  ;;  %v2659_v31 = vunpack.i.l.bf16 %v2658_v25 }
 0x145   : > { %v1493_v29 = vsel %vm1484_vm1, %v1476_v5, %v2664_v12  ;;  %v1494_v34 = vsel %vm1484_vm1, %v1477_v49, %v2664_v12  ;;  %v1495_v61 = vsel %vm1484_vm1, %v1478_v18, %v2665_v46  ;;  %v1496_v57 = vsel %vm1484_vm1, %v1479_v30, %v2665_v46 }
 0x146   : > { %v2673_v10 = vpop.permute.xlu1 %2672  ;;  %v1482_v32 = vsel %vm1467_vm14, %v1465_v44, %v2659_v31  ;;  %v1483_v16 = vsel %vm1467_vm14, %v1466_v47, %v2660_v6  ;;  %vm2749_vm14 = vmmov 0  }
 0x147   : > { %v2675_v19 = vunpack.i.h.bf16 %v2673_v10  ;;  %v2674_v36 = vunpack.i.l.bf16 %v2673_v10  ;;  %v2668_v35 = vpop.permute.xlu0 %2667 }
 0x148   : > { %v2669_v60 = vunpack.i.l.bf16 %v2668_v35  ;;  %v2670_v54 = vunpack.i.h.bf16 %v2668_v35 }
 0x149   : > { %v872_v56 = vsel %vm863_vm8, %v855_v52, %v2674_v36  ;;  %v873_v45 = vsel %vm863_vm8, %v856_v23, %v2675_v19 }
 0x14a   : > { %v909_v59 = vrot.slane %v872_v56, 7  ;;  %v910_v2 = vrot.slane %v873_v45, 7  ;;  %v3985_v41 = vpop.permute.xlu1 %2682  ;;  %v859_v1 = vsel %vm846_vm15, %v842_v14, %v2669_v60  ;;  %v860_v9 = vsel %vm846_vm15, %v843_v4, %v2669_v60 }
 0x14b   : > { %v2678_v15 = vpop.permute.xlu0 %2677  ;;  %v2684_v27 = vunpack.i.l.bf16 %v3985_v41  ;;  %v2685_v26 = vunpack.i.h.bf16 %v3985_v41  ;;  %v861_v7 = vsel %vm846_vm15, %v844_v11, %v2670_v54  ;;  %v862_v43 = vsel %vm846_vm15, %v845_v48, %v2670_v54 }
 0x14c   : > { %v2680_v40 = vunpack.i.h.bf16 %v2678_v15  ;;  %v2679_v28 = vunpack.i.l.bf16 %v2678_v15  ;;  %v911_v17 = vsel %vm896_vm0, %v909_v59, %v910_v2 }
 0x14d   : > { %v1497_v51 = vsel %vm1484_vm1, %v1480_v22, %v2684_v27  ;;  %v1499_v20 = vsel %vm1484_vm1, %v1482_v32, %v2685_v26  ;;  %v1500_v46 = vsel %vm1484_vm1, %v1483_v16, %v2685_v26 }
 0x14e   : > { %v874_v63 = vsel %vm863_vm8, %v857_v38, %v2679_v28  ;;  %v875_v58 = vsel %vm863_vm8, %v858_v62, %v2680_v40  ;;  %v2693_v50 = vpop.permute.xlu1 %2692 }
 0x14f   : > { %v912_v55 = vrot.slane %v874_v63, 7  ;;  %v913_v21 = vrot.slane %v875_v58, 7  ;;  %v2695_v24 = vunpack.i.h.bf16 %v2693_v50  ;;  %v2694_v39 = vunpack.i.l.bf16 %v2693_v50  ;;  %v2688_v8 = vpop.permute.xlu0 %2687 }
 0x150   : > { %v2690_v42 = vunpack.i.h.bf16 %v2688_v8  ;;  %v2689_v53 = vunpack.i.l.bf16 %v2688_v8  ;;  %v2750_v63 = vmov 0  }
 0x151   : > { %v1512_v44 = vsel %vm1501_vm2, %v1495_v61, %v2694_v39  ;;  %v1513_v47 = vsel %vm1501_vm2, %v1496_v57, %v2695_v24  ;;  %v914_v13 = vsel %vm896_vm0, %v912_v55, %v913_v21  ;;  %2716 = vset.pattern.permute.xlu0 %v2750_v63 }
 0x152   : > { %v1549_v3 = vrot.slane %v1512_v44, 7  ;;  %v1550_v25 = vrot.slane %v1513_v47, 7  ;;  %v1510_v18 = vsel %vm1501_vm2, %v1493_v29, %v2689_v53  ;;  %v1511_v30 = vsel %vm1501_vm2, %v1494_v34, %v2690_v42  ;;  %v2703_v0 = vpop.permute.xlu1 %2702 }
 0x153   : > { %v1546_v33 = vrot.slane %v1510_v18, 7  ;;  %v1547_v5 = vrot.slane %v1511_v30, 7  ;;  %v2705_v49 = vunpack.i.h.bf16 %v2703_v0  ;;  %v2704_v11 = vunpack.i.l.bf16 %v2703_v0  ;;  %v2698_v48 = vpop.permute.xlu0 %2697 }
 0x154   : > { %v2700_v14 = vunpack.i.h.bf16 %v2698_v48  ;;  %v2699_v4 = vunpack.i.l.bf16 %v2698_v48  ;;  %v931_v22 = vpack.c.bf16 %v914_v13, %v911_v17  ;;  %v1551_v10 = vsel %vm896_vm0, %v1549_v3, %v1550_v25  ;;  %v1953_v13 = vld [vmem:[%s4055_s4] ss:$0 sm:$0xff] }
 0x155   : > { %v878_v12 = vsel %vm863_vm8, %v861_v7, %v2704_v11  ;;  %v879_v19 = vsel %vm863_vm8, %v862_v43, %v2705_v49  ;;  %v1548_v36 = vsel %vm896_vm0, %v1546_v33, %v1547_v5  ;;  %v1498_v29 = vsel %vm1484_vm1, %v3977_v37, %v2684_v27  ;;  %v1802_v7 = vld [vmem:[%s4057_s6] sm:$0x7] }
 0x156   : > { %v918_v35 = vrot.slane %v878_v12, 7  ;;  %v919_v52 = vrot.slane %v879_v19, 7  ;;  %v876_v23 = vsel %vm863_vm8, %v859_v1, %v2699_v4  ;;  %v877_v38 = vsel %vm863_vm8, %v860_v9, %v2700_v14  ;;  %2151 = vmatprep.mubr.msk.bf16.mxu1 %vm1690_vm12, %v931_v22  ;;  %v2713_v6 = vpop.permute.xlu1 %2712  ;;  %1805 = vperm.xlu0 %2716, %v1802_v7  }
 0x157   : > { %v915_v31 = vrot.slane %v876_v23, 7  ;;  %v916_v56 = vrot.slane %v877_v38, 7  ;;  %v2715_v45 = vunpack.i.h.bf16 %v2713_v6  ;;  %v2714_v60 = vunpack.i.l.bf16 %v2713_v6  ;;  %v2708_v62 = vpop.permute.xlu0 %2707 }
 0x158   : > { %v2710_v59 = vunpack.i.h.bf16 %v2708_v62  ;;  %v2709_v2 = vunpack.i.l.bf16 %v2708_v62  ;;  %v1568_v54 = vpack.c.bf16 %v1551_v10, %v1548_v36  ;;  %v920_v41 = vsel %vm896_vm0, %v918_v35, %v919_v52 }
 0x159   : > { %v1516_v34 = vsel %vm1501_vm2, %v1499_v20, %v2714_v60  ;;  %v1517_v61 = vsel %vm1501_vm2, %v1500_v46, %v2715_v45  ;;  %v917_v57 = vsel %vm896_vm0, %v915_v31, %v916_v56  ;;  %vm4188_vm8 = vcmask 588800  }
 0x15a   : > { %v1555_v15 = vrot.slane %v1516_v34, 7  ;;  %v1556_v40 = vrot.slane %v1517_v61, 7  ;;  %v1514_v28 = vsel %vm1501_vm2, %v1497_v51, %v2709_v2  ;;  %v1515_v17 = vsel %vm1501_vm2, %v1498_v29, %v2710_v59  ;;  %2139 = vmatprep.mubr.msk.bf16.mxu0 %vm4188_vm8, %v1568_v54  ;;  %vm4189_vm13 = vmmov %vm4188_vm8  ;;  %v1801_v61 = vld [vmem:[%s4056_s5] sm:$0x3] }
 0x15b   : > { %v1552_v32 = vrot.slane %v1514_v28, 7  ;;  %v1553_v16 = vrot.slane %v1515_v17, 7  ;;  %v932_v1 = vpack.c.bf16 %v920_v41, %v917_v57  ;;  %v2748_v9 = vmov 0.0  }
 0x15c   : > { %v1557_v26 = vsel %vm896_vm0, %v1555_v15, %v1556_v40  ;;  %2155 = vmatprep.subr.bf16.mxu1 %v2748_v9 }
 0x15d   : > { %2152 = vmatmul.mubr.msk.bf16.gmra.mxu1 %vm1690_vm12, %v932_v1  ;;  %v1554_v37 = vsel %vm896_vm0, %v1552_v32, %v1553_v16  ;;  %vm4190_vm12 = vcmask 64512  }
 0x15e   : > { %v1569_v27 = vpack.c.bf16 %v1557_v26, %v1554_v37  ;;  %2163 = vmatprep.mubr.msk.bf16.mxu1 %vm2749_vm14, %v2748_v9  ;;  %vm4191_vm15 = vmmov %vm4190_vm12 }
 0x15f   : > { %vm4192_vm0 = vmmov %vm4190_vm12 }
 0x160   : > { %2140 = vmatmul.mubr.msk.bf16.gmra.mxu0 %vm4189_vm13, %v1569_v27  ;;  %vm4193_vm1 = vmmov %vm4192_vm0 }
 0x161   : > { %vm4194_vm2 = vmmov %vm4192_vm0 }
 0x1ba   : > { %v2149_v58 = vpop.f32.mrf.mxu1 }
 0x1bc   : > { %v2137_v50 = vpop.f32.mrf.mxu0  ;;  %v1743_v55 = vpop.f32.mrf.mxu1 }
 0x1bd   : > { %v1752_v19 = vadd.f32 %v2149_v58, %v2137_v50 }
 0x1be   : > { %v1648_v21 = vpop.f32.mrf.mxu0  ;;  %v2150_v24 = vpop.f32.mrf.mxu1 }
 0x1bf   : > { %v1783_v23 = vadd.f32 %v1953_v13, %v1752_v19  ;;  %v1744_v45 = vadd.f32 %v1743_v55, %v1648_v21 }
 0x1c0   : > { %v2138_v39 = vpop.f32.mrf.mxu0  ;;  %v1746_v8 = vpop.f32.mrf.mxu1 }
 0x1c1   : > { %v1755_v10 = vadd.f32 %v2150_v24, %v2138_v39  ;;  %v1791_v56 = vmax.f32 %v1783_v23, 0.0  ;;  %v1781_v59 = vadd.f32 %v1953_v13, %v1744_v45 }
 0x1c2   : > { %v1651_v51 = vpop.f32.mrf.mxu0 }
 0x1c3   : > { %v1784_v35 = vadd.f32 %v1953_v13, %v1755_v10  ;;  %v1747_v6 = vadd.f32 %v1746_v8, %v1651_v51  ;;  %v1789_v41 = vmax.f32 %v1781_v59, 0.0 }
 0x1c5   : > { %v1792_v38 = vmax.f32 %v1784_v35, 0.0  ;;  %v1782_v62 = vadd.f32 %v1953_v13, %v1747_v6 }
 0x1c7   : > { %v1798_v60 = vpack.c.bf16 %v1792_v38, %v1791_v56  ;;  %v1790_v2 = vmax.f32 %v1782_v62, 0.0 }
 0x1c9   : > { %v1815_v54 = vsel %vm4192_vm0, %v1798_v60, 0  ;;  %v1797_v29 = vpack.c.bf16 %v1790_v2, %v1789_v41 }
 0x1cb   : > { %v1812_v34 = vsel %vm4193_vm1, %v1797_v29, 0 }
 0x1d1   : > { %v1806_v57 = vpop.permute.xlu0 %1805 }
 0x21d   : > { %v2153_v43 = vpop.f32.mrf.mxu1 }
 0x21f   : > { %v1759_v42 = vpop.f32.mrf.mxu1 }
 0x220   : > { %v2141_v53 = vpop.f32.mrf.mxu0 }
 0x221   : > { %v1768_v20 = vadd.f32 %v2153_v43, %v2141_v53  ;;  %v2154_v44 = vpop.f32.mrf.mxu1 }
 0x222   : > { %v1664_v47 = vpop.f32.mrf.mxu0 }
 0x223   : > { %v1787_v25 = vadd.f32 %v1953_v13, %v1768_v20  ;;  %v1762_v30 = vpop.f32.mrf.mxu1  ;;  %v1760_v33 = vadd.f32 %v1759_v42, %v1664_v47 }
 0x224   : > { %v2142_v3 = vpop.f32.mrf.mxu0 }
 0x225   : > { %v1771_v18 = vadd.f32 %v2154_v44, %v2142_v3  ;;  %v1795_v11 = vmax.f32 %v1787_v25, 0.0  ;;  %v1785_v4 = vadd.f32 %v1953_v13, %v1760_v33 }
 0x226   : > { %v1667_v0 = vpop.f32.mrf.mxu0 }
 0x227   : > { %v1788_v5 = vadd.f32 %v1953_v13, %v1771_v18  ;;  %v1763_v49 = vadd.f32 %v1762_v30, %v1667_v0  ;;  %v1793_v36 = vmax.f32 %v1785_v4, 0.0 }
 0x229   : > { %v1796_v48 = vmax.f32 %v1788_v5, 0.0  ;;  %v1786_v14 = vadd.f32 %v1953_v13, %v1763_v49 }
 0x22b   : > { %v1800_v22 = vpack.c.bf16 %v1796_v48, %v1795_v11  ;;  %v1794_v46 = vmax.f32 %v1786_v14, 0.0 }
 0x22d   : > { %v1821_v12 = vsel %vm4190_vm12, %v1800_v22, 0  ;;  %v1799_v52 = vpack.c.bf16 %v1794_v46, %v1793_v36 }
 0x22e   : > { %2156 = vmatpush3.bf16.xpose.msra.mxu1 %v1821_v12 }
 0x22f   : > { %2157 = vmatprep.subr.bf16.mxu1 %v2748_v9  ;;  %v1818_v31 = vsel %vm4191_vm15, %v1799_v52, 0 }
 0x236   : > { %2158 = vmatpush3.bf16.xpose.msra.mxu1 %v1818_v31 }
 0x237   : > { %2159 = vmatprep.subr.bf16.mxu1 %v2748_v9 }
 0x23e   : > { %2160 = vmatpush3.bf16.xpose.msra.mxu1 %v1815_v54 }
 0x23f   : > { %2161 = vmatprep.subr.bf16.mxu1 %v2748_v9 }
 0x246   : > { %2162 = vmatpush3.bf16.xpose.msra.mxu1 %v1812_v34 }
 0x24d   : > { %2164 = vmatmul.mubr.msk.bf16.vlgmr.msra.gmra.mxu1 %vm4194_vm2, %v1801_v61 }
 0x30d   : > { %v1857_v15 = vpop.f32.mrf.mxu1 }
 0x30e   : > { %v1858_v40 = vadd.f32 %v1857_v15, %v1806_v57 }
 0x30f   : > { %v2165_v28 = vpop.f32.mrf.mxu1 }
 0x310   : > { %1864 = vst.msk [vmem:[%s296_s17] sm:$0x7] %vm1863_vm4, %v1858_v40 }
 0x311   : > { %v1860_v17 = vpop.f32.mrf.mxu1 }
 0x313   : > { %v2166_v32 = vpop.f32.mrf.mxu1 }
 0x314 PF: > { %s17_s24 = sadd.s32 1, %s2730_s24  }
 0x315   : > { %p14_p4 = scmp.ge.s32.totalorder %s17_s24, 4  }
 0x317   :  { %16 = sbr.rel (!%p14_p4) target bundleno = 1 (0x1), region = 81 }

// kernel: _lambda_.9
= control target key start
LH: loop header
LB: loop body
LE: loop exit
PB: predicated region body
PF: predicated region fallthrough
CT: control target
= control target key end

     0   :  { %s3170_s13 = smov 0   ;;  %s4547_s0 = inlined_call_operand.vmem [shape: bf16[2,10,24,3], index: 0, kind: input, shape index: {}]   ;;  %s4548_s1 = inlined_call_operand.vmem [shape: bf16[2,10,24,8], index: 1, kind: input, shape index: {}]   ;;  %s4549_s2 = inlined_call_operand.vmem [shape: bf16[27,8], index: 2, kind: input, shape index: {}]   ;;  %s4550_s3 = inlined_call_operand.vmem [shape: bf16[72,8], index: 3, kind: input, shape index: {}]   ;;  %s4551_s4 = inlined_call_operand.vmem [shape: f32[1,8], index: 4, kind: input, shape index: {}]   ;;  %s4552_s5 = inlined_call_operand.vmem [shape: bf16[3,8], index: 5, kind: input, shape index: {}]   ;;  %s4553_s6 = inlined_call_operand.vmem [shape: f32[3,1], index: 6, kind: input, shape index: {}]   ;;  %s4554_s7 = inlined_call_operand.vmem [shape: bf16[8,3], index: 7, kind: input, shape index: {}]   ;;  %s4555_s8 = inlined_call_operand.vmem [shape: f32[1,3], index: 8, kind: input, shape index: {}]   ;;  %s4556_s9 = inlined_call_operand.vmem [shape: f32[2,3,64], index: 9, kind: output, shape index: {0}]   ;;  %s4557_s10 = inlined_call_operand.vmem [shape: bf16[2,10,24,3], index: 10, kind: output, shape index: {1}]  }
   0x1 LB: > { %s2236_s14 = sadd.s32 4294967295, %s3093_s13   ;;  %p2240_p0 = scmp.ge.s32.totalorder %s3093_s13, 1  ;;  %s3093_s13 = sphi %s3170_s13, %s21_s13  }
   0x2   : > { %p325_p1 = scmp.lt.s32.totalorder %s3093_s13, 3 }
   0x4   : > { %p326_p2 = pnand %p2240_p0, %p325_p1 }
   0x6   : > { %329 = sbr.rel (%p326_p2) target bundleno = 788 (0x314), region = 56 }
   0xb   : > { %p372_p3 = scmp.lt.s32.totalorder %s2236_s14, 1  ;;  %vm504_vm0 = vcmask 1045504   ;;  %s3095_s22 = smov 3   ;;  %vm4608_vm1 = vcmask 1043456   ;;  %vm1797_vm2 = vcmask 1044480   ;;  %vm838_vm3 = vcmask 23552  }
   0xc   : > { %s3096_s23 = smov 8   ;;  %s3097_s24 = smov 6   ;;  %vm855_vm4 = vcmask 48128   ;;  %vm872_vm5 = vcmask 72704   ;;  %vm4611_vm6 = vcmask 64512   ;;  %vm1494_vm7 = vcmask 130048  }
   0xd   : > { %s4714_s14 = smov (!%p372_p3, %s2236_s14), 1  ;;  %s3098_s25 = smov 16   ;;  %vm957_vm8 = vcmask 195584   ;;  %vm889_vm9 = vcmask 97280   ;;  %vm1527_vm10 = vcmask 261120   ;;  %vm4610_vm11 = vcmask 121856  }
   0xe   : > { %s3181_s15 = smul.u32 120, %s4714_s14  ;;  %s3099_s26 = smov 9   ;;  %vm4609_vm12 = vcmask 326656   ;;  %vm923_vm13 = vcmask 146432   ;;  %vm1561_vm14 = vcmask 392192   ;;  %vm940_vm15 = vcmask 171008  }
   0xf   : > { %s3100_s27 = smov 24   ;;  %s3101_s28 = smov 12  }
  0x10   : > { %s3187_s18 = scalar_lea.vmem %s4547_s0, %s3181_s15  ;;  %s3200_s21 = scalar_lea.vmem %s4548_s1, %s3181_s15 }
  0x11   : > { %v3190_v0 = vld [vmem:[%s3187_s18 + $0x18] sm:$0xff]   ;;  %v2427_v1 = vld [vmem:[%s3187_s18 + $0x28] sm:$0xff]   ;;  %v3194_v2 = vld [vmem:[%s3187_s18] sm:$0xff]   ;;  %s3102_s29 = smov 32   ;;  %s3103_s30 = smov 15  }
  0x12   : > { %v3203_v3 = vunpack.c.h.bf16 %v3190_v0  ;;  %v3205_v4 = vunpack.c.l.bf16 %v2427_v1  ;;  %v3208_v5 = vunpack.c.h.bf16 %v3194_v2  ;;  %v2424_v6 = vld [vmem:[%s3187_s18 + $0x10] sm:$0xff]   ;;  %v3212_v7 = vld [vmem:[%s3200_s21 + $0x18] sm:$0xff]   ;;  %v3215_v8 = vld [vmem:[%s3200_s21 + $0x28] sm:$0xff]   ;;  %v2326_v39 = vunpack.c.h.bf16 %v2427_v1  ;;  %s4572_s11 = smov 40   ;;  %s4568_s12 = smov 18  }
  0x13   : > { %v3217_v9 = vunpack.c.l.bf16 %v2424_v6  ;;  %v3220_v10 = vunpack.c.h.bf16 %v3212_v7  ;;  %v3223_v11 = vunpack.c.l.bf16 %v3215_v8  ;;  %v3226_v12 = vld [vmem:[%s3200_s21] sm:$0xff]   ;;  %v2438_v13 = vld [vmem:[%s3200_s21 + $0x10] sm:$0xff]   ;;  %v3230_v14 = vld [vmem:[%s3187_s18 + $0x8] sm:$0xff]   ;;  %v2314_v15 = vunpack.c.h.bf16 %v2424_v6  ;;  %s4570_s16 = smov 48   ;;  %s3107_s17 = smov 21  }
  0x14   : > { %v466_v16 = vrot.slane %v3203_v3, 1  ;;  %v467_v17 = vrot.slane %v3205_v4, 1  ;;  %v464_v18 = vrot.slane %v3208_v5, 1  ;;  %v3236_v19 = vunpack.c.h.bf16 %v3226_v12  ;;  %v3253_v28 = vld [vmem:[%s3200_s21 + $0x8] sm:$0xff]   ;;  %v3273_v40 = vld [vmem:[%s3187_s18 + $0x20] sm:$0xff]  }
  0x15   : > { %v465_v20 = vrot.slane %v3217_v9, 1  ;;  %v1106_v21 = vrot.slane %v3220_v10, 1  ;;  %v1107_v22 = vrot.slane %v3223_v11, 1  ;;  %v3241_v23 = vunpack.c.l.bf16 %v2438_v13  ;;  %v3289_v55 = vld [vmem:[%s3200_s21 + $0x20] sm:$0xff]  }
  0x16   : > { %v3247_v24 = vpack.i.bf16 %v467_v17, %v466_v16  ;;  %v1104_v25 = vrot.slane %v3236_v19, 1  ;;  %v2309_v26 = vunpack.c.l.bf16 %v3230_v14  ;;  %v505_v27 = vrot.slane %v3208_v5, 2 }
  0x17   : > { %v2559_v29 = vpack.i.bf16 %v465_v20, %v464_v18  ;;  %v1105_v30 = vrot.slane %v3241_v23, 1  ;;  %v508_v31 = vrot.slane %v3217_v9, 2  ;;  %v3265_v32 = vpack.i.bf16 %v1107_v22, %v1106_v21 }
  0x18   : > { %2570 = vrot.lane.b32.xlu1 %v3247_v24, %s3095_s22  ;;  %v506_v33 = vrot.slane %v2309_v26, 2  ;;  %v509_v34 = vrot.slane %v2314_v15, 2  ;;  %v2374_v35 = vunpack.c.h.bf16 %v2438_v13  ;;  %v1147_v37 = vrot.slane %v3241_v23, 2 }
  0x19   : > { %2560 = vrot.lane.b32.xlu0 %v2559_v29, %s3095_s22  ;;  %v2564_v36 = vpack.i.bf16 %v1105_v30, %v1104_v25  ;;  %v2369_v38 = vunpack.c.l.bf16 %v3253_v28  ;;  %v1144_v44 = vrot.slane %v3236_v19, 2  ;;  %v2321_v47 = vunpack.c.l.bf16 %v3273_v40 }
  0x1a   : > { %v507_v41 = vsel %vm504_vm0, %v505_v27, %v506_v33  ;;  %v510_v42 = vsel %vm504_vm0, %v508_v31, %v509_v34  ;;  %v1148_v43 = vrot.slane %v2374_v35, 2  ;;  %v514_v50 = vrot.slane %v3205_v4, 2 }
  0x1b   : > { %v1145_v45 = vrot.slane %v2369_v38, 2  ;;  %v2579_v46 = vpack.i.bf16 %v507_v41, %v505_v27  ;;  %v3282_v48 = vpack.i.bf16 %v510_v42, %v508_v31  ;;  %v515_v51 = vrot.slane %v2326_v39, 2 }
  0x1c   : > { %2575 = vrot.lane.b32.xlu1 %v3265_v32, %s3096_s23  ;;  %v1149_v49 = vsel %vm504_vm0, %v1147_v37, %v1148_v43  ;;  %v511_v53 = vrot.slane %v3203_v3, 2  ;;  %v512_v54 = vrot.slane %v2321_v47, 2  ;;  %v2386_v59 = vunpack.c.h.bf16 %v3215_v8 }
  0x1d   : > { %2565 = vrot.lane.b32.xlu0 %v2564_v36, %s3096_s23  ;;  %v1146_v52 = vsel %vm504_vm0, %v1144_v44, %v1145_v45  ;;  %v3292_v56 = vpack.i.bf16 %v1149_v49, %v1147_v37  ;;  %v516_v58 = vsel %vm504_vm0, %v514_v50, %v515_v51  ;;  %v2381_v61 = vunpack.c.l.bf16 %v3289_v55  ;;  %v3335_v36 = vld [vmem:[%s3187_s18 + $0x30] sm:$0xff]  }
  0x1e   : > { %v2589_v57 = vpack.i.bf16 %v1146_v52, %v1144_v44  ;;  %v513_v60 = vsel %vm504_vm0, %v511_v53, %v512_v54  ;;  %v3302_v62 = vpack.i.bf16 %v516_v58, %v514_v50  ;;  %v4564_v63 = vunpack.c.l.bf16 %v3190_v0  ;;  %4613 = vst [vmem:[#allocation2_spill] sm:$0xff] %v3335_v36  ;;  %v2433_v58 = vld [vmem:[%s3187_s18 + $0x58] sm:$0xff]  }
  0x1f   : > { %v3306_v1 = vpack.i.bf16 %v513_v60, %v511_v53  ;;  %v4562_v6 = vunpack.c.h.bf16 %v3230_v14  ;;  %v1153_v8 = vrot.slane %v3223_v11, 2  ;;  %v1154_v13 = vrot.slane %v2386_v59, 2  ;;  %v3402_v53 = vld [vmem:[%s3187_s18 + $0x38] sm:$0xff]  }
  0x20   : > { %2580 = vrot.lane.b32.xlu1 %v2579_v46, %s3097_s24  ;;  %v1150_v15 = vrot.slane %v3220_v10, 2  ;;  %v1151_v18 = vrot.slane %v2381_v61, 2  ;;  %v3316_v25 = vpack.i.bf16 %v3203_v3, %v4564_v63  ;;  %v4563_v33 = vunpack.c.l.bf16 %v3212_v7  ;;  %v3369_v46 = vld [vmem:[%s3200_s21 + $0x30] sm:$0xff]   ;;  %4617 = vst [vmem:[#allocation6_spill] sm:$0xff] %v3402_v53 }
  0x21   : > { %2585 = vrot.lane.b32.xlu0 %v3282_v48, %s3097_s24  ;;  %v2609_v26 = vpack.i.bf16 %v3217_v9, %v4562_v6  ;;  %v1155_v27 = vsel %vm504_vm0, %v1153_v8, %v1154_v13  ;;  %v4560_v35 = vunpack.c.h.bf16 %v3253_v28  ;;  %v4559_v38 = vunpack.c.l.bf16 %v3335_v36  ;;  %4615 = vst [vmem:[#allocation4_spill] sm:$0xff] %v3369_v46 }
  0x22   : > { %v1152_v29 = vsel %vm504_vm0, %v1150_v15, %v1151_v18  ;;  %v3327_v31 = vpack.i.bf16 %v1155_v27, %v1153_v8  ;;  %v3342_v37 = vpack.i.bf16 %v3220_v10, %v4563_v33  ;;  %v3346_v39 = vunpack.c.h.bf16 %v3335_v36  ;;  %v3438_v18 = vld [vmem:[%s3187_s18 + $0x50] sm:$0xff]  }
  0x23   : > { %v3331_v34 = vpack.i.bf16 %v1152_v29, %v1150_v15  ;;  %v2629_v41 = vpack.i.bf16 %v3241_v23, %v4560_v35  ;;  %v4565_v42 = vunpack.c.h.bf16 %v3273_v40  ;;  %v4561_v44 = vunpack.c.h.bf16 %v3289_v55  ;;  %v3434_v15 = vld [vmem:[%s3200_s21 + $0x48] sm:$0xff]   ;;  %4623 = vst [vmem:[#allocation12_spill] sm:$0xff] %v3438_v18 }
  0x24   : > { %2595 = vrot.lane.b32.xlu1 %v3292_v56, %s3098_s25  ;;  %4614 = vst [vmem:[#allocation3_spill] sm:$0xff] %v3346_v39  ;;  %v3359_v43 = vpack.i.bf16 %v3346_v39, %v4559_v38  ;;  %v2649_v49 = vpack.i.bf16 %v466_v16, %v465_v20  ;;  %v4558_v50 = vunpack.c.l.bf16 %v3369_v46  ;;  %v3386_v51 = vunpack.c.h.bf16 %v3369_v46  ;;  %4622 = vst [vmem:[#allocation11_spill] sm:$0xff] %v3434_v15 }
  0x25   : > { %2590 = vrot.lane.b32.xlu0 %v2589_v57, %s3098_s25  ;;  %v3366_v45 = vpack.i.bf16 %v3205_v4, %v4565_v42  ;;  %v3376_v47 = vpack.i.bf16 %v3223_v11, %v4561_v44  ;;  %v2664_v52 = vpack.i.bf16 %v1106_v21, %v1105_v30  ;;  %v468_v20 = vrot.slane %v3346_v39, 1  ;;  %v3414_v57 = vld [vmem:[%s3187_s18 + $0x48] sm:$0xff]   ;;  %v3470_v44 = vld [vmem:[%s3200_s21 + $0x50] sm:$0xff]  }
  0x26   : > { %4616 = vst [vmem:[#allocation5_spill] sm:$0xff] %v3386_v51  ;;  %v3398_v16 = vpack.i.bf16 %v3386_v51, %v4558_v50  ;;  %v1108_v54 = vrot.slane %v3386_v51, 1  ;;  %v2333_v30 = vunpack.c.l.bf16 %v3402_v53  ;;  %4618 = vst [vmem:[#allocation7_spill] sm:$0xff] %v3414_v57  ;;  %v517_v60 = vrot.slane %v3346_v39, 2 }
  0x27   : > { %v2669_v21 = vpack.i.bf16 %v468_v20, %v467_v17  ;;  %v3426_v17 = vld [vmem:[%s3200_s21 + $0x38] sm:$0xff]   ;;  %v3429_v8 = vunpack.c.h.bf16 %v3414_v57  ;;  %v3431_v13 = vunpack.c.l.bf16 %v2433_v58  ;;  %v3446_v27 = vunpack.c.h.bf16 %v3434_v15  ;;  %4627 = vst [vmem:[#allocation16_spill] sm:$0xff] %v3470_v44 }
  0x28   : > { %2605 = vrot.lane.b32.xlu1 %v3302_v62, %s3097_s24  ;;  %v2684_v59 = vpack.i.bf16 %v1108_v54, %v1107_v22  ;;  %v518_v61 = vrot.slane %v2333_v30, 2  ;;  %4619 = vst [vmem:[#allocation8_spill] sm:$0xff] %v3426_v17  ;;  %v2350_v35 = vunpack.c.h.bf16 %v2433_v58  ;;  %v2405_v63 = vunpack.c.l.bf16 %v3470_v44 }
  0x29   : > { %2600 = vrot.lane.b32.xlu0 %v3306_v1, %s3097_s24  ;;  %4620 = vst [vmem:[#allocation9_spill] sm:$0xff] %v3429_v8  ;;  %4621 = vst [vmem:[#allocation10_spill] sm:$0xff] %v3431_v13  ;;  %v4580_v50 = vrot.slane %v3446_v27, 1  ;;  %v526_v58 = vrot.slane %v3431_v13, 2  ;;  %v4642_v36 = vunpack.c.h.bf16 %v3273_v40 }
  0x2a   : > { %v519_v22 = vsel %vm504_vm0, %v517_v60, %v518_v61  ;;  %4624 = vst [vmem:[#allocation13_spill] sm:$0xff] %v3446_v27 }
  0x2c   : > { %2615 = vrot.lane.b32.xlu1 %v3316_v25, %s3099_s26 }
  0x2d   : > { %2610 = vrot.lane.b32.xlu0 %v2609_v26, %s3099_s26  ;;  %v2393_v26 = vunpack.c.l.bf16 %v3426_v17 }
  0x2f   : > { %v1157_v61 = vrot.slane %v2393_v26, 2  ;;  %v527_v26 = vrot.slane %v2350_v35, 2 }
  0x30   : > { %2625 = vrot.lane.b32.xlu1 %v3327_v31, %s3098_s25 }
  0x31   : > { %2620 = vrot.lane.b32.xlu0 %v3331_v34, %s3098_s25  ;;  %v528_v35 = vsel %vm504_vm0, %v526_v58, %v527_v26 }
  0x34   : > { %2635 = vrot.lane.b32.xlu1 %v3342_v37, %s3100_s27 }
  0x35   : > { %2630 = vrot.lane.b32.xlu0 %v2629_v41, %s3100_s27  ;;  %v4582_v41 = vrot.slane %v3429_v8, 1 }
  0x38   : > { %2645 = vrot.lane.b32.xlu1 %v3359_v43, %s3099_s26 }
  0x39   : > { %2640 = vrot.lane.b32.xlu0 %v3366_v45, %s3099_s26 }
  0x3c   : > { %2655 = vrot.lane.b32.xlu1 %v3376_v47, %s3100_s27 }
  0x3d   : > { %2650 = vrot.lane.b32.xlu0 %v2649_v49, %s3101_s28  ;;  %v4567_v49 = vrot.slane %v3431_v13, 1 }
  0x3f   : > { %v3461_v30 = vpack.i.bf16 %v4567_v49, %v4582_v41  ;;  %v2448_v41 = vld [vmem:[%s3200_s21 + $0x60] sm:$0xff]  }
  0x40   : > { %2665 = vrot.lane.b32.xlu1 %v2664_v52, %s3102_s29  ;;  %v2345_v52 = vunpack.c.l.bf16 %v3438_v18 }
  0x41   : > { %2660 = vrot.lane.b32.xlu0 %v3398_v16, %s3100_s27  ;;  %4626 = vst [vmem:[#allocation15_spill] sm:$0xff] %v3461_v30 }
  0x44   : > { %2675 = vrot.lane.b32.xlu1 %v3282_v48, %s3103_s30  ;;  %v2447_v48 = vld [vmem:[%s3200_s21 + $0x58] sm:$0xff]  }
  0x45   : > { %2670 = vrot.lane.b32.xlu0 %v2669_v21, %s3101_s28  ;;  %v3448_v29 = vunpack.c.l.bf16 %v2447_v48  ;;  %v3455_v21 = vpack.i.bf16 %v519_v22, %v517_v60  ;;  %v523_v60 = vrot.slane %v3429_v8, 2  ;;  %v524_v22 = vrot.slane %v2345_v52, 2 }
  0x46   : > { %v2410_v33 = vunpack.c.h.bf16 %v2447_v48  ;;  %v1162_v48 = vrot.slane %v3446_v27, 2 }
  0x47   : > { %4625 = vst [vmem:[#allocation14_spill] sm:$0xff] %v3448_v29  ;;  %v4566_v38 = vrot.slane %v3448_v29, 1  ;;  %v525_v52 = vsel %vm504_vm0, %v523_v60, %v524_v22  ;;  %v1165_v49 = vrot.slane %v3448_v29, 2 }
  0x48   : > { %2685 = vrot.lane.b32.xlu1 %v2684_v59, %s3102_s29  ;;  %v1156_v59 = vrot.slane %v3386_v51, 2  ;;  %v3486_v42 = vpack.i.bf16 %v525_v52, %v523_v60  ;;  %v1166_v22 = vrot.slane %v2410_v33, 2  ;;  %v1163_v60 = vrot.slane %v2405_v63, 2 }
  0x49   : > { %2680 = vrot.lane.b32.xlu0 %v3306_v1, %s3103_s30  ;;  %v3476_v6 = vpack.i.bf16 %v4566_v38, %v4580_v50  ;;  %v3498_v52 = vpack.i.bf16 %v528_v35, %v526_v58  ;;  %v2444_v58 = vld [vmem:[%s3200_s21 + $0x40] sm:$0xff]   ;;  %v3702_v51 = vunpack.c.h.bf16 %v2448_v41 }
  0x4a   : > { %v1164_v33 = vsel %vm504_vm0, %v1162_v48, %v1163_v60  ;;  %v3528_v35 = vunpack.c.l.bf16 %v2444_v58  ;;  %v3083_v60 = vld [vmem:[%s4549_s2 + $0x8] sm:$0x3f]  }
  0x4b   : > { %4628 = vst [vmem:[#allocation17_spill] sm:$0xff] %v3476_v6  ;;  %v3511_v26 = vpack.i.bf16 %v1164_v33, %v1162_v48 }
  0x4c   : > { %2695 = vrot.lane.b32.xlu1 %v3331_v34, %s4572_s11  ;;  %4631 = vst [vmem:[#allocation20_spill] sm:$0xff] %v3528_v35 }
  0x4d   : > { %2690 = vrot.lane.b32.xlu0 %v3292_v56, %s4572_s11  ;;  %v1158_v56 = vsel %vm504_vm0, %v1156_v59, %v1157_v61  ;;  %v2430_v61 = vld [vmem:[%s3187_s18 + $0x40] sm:$0xff]   ;;  %4630 = vst [vmem:[#allocation19_spill] sm:$0xff] %v3511_v26 }
  0x4e   : > { %v3490_v38 = vpack.i.bf16 %v1158_v56, %v1156_v59  ;;  %v3503_v59 = vunpack.c.l.bf16 %v2430_v61 }
  0x50   : > { %2705 = vrot.lane.b32.xlu1 %v3455_v21, %s3103_s30  ;;  %4629 = vst [vmem:[#allocation18_spill] sm:$0xff] %v3503_v59 }
  0x51   : > { %2700 = vrot.lane.b32.xlu0 %v3302_v62, %s3103_s30 }
  0x54   : > { %2715 = vrot.lane.b32.xlu1 %v3366_v45, %s4568_s12  ;;  %v4578_v45 = vunpack.c.h.bf16 %v3402_v53 }
  0x55   : > { %2710 = vrot.lane.b32.xlu0 %v3316_v25, %s4568_s12  ;;  %v1167_v25 = vsel %vm504_vm0, %v1165_v49, %v1166_v22 }
  0x56   : > { %v3509_v56 = vpack.i.bf16 %v1167_v25, %v1165_v49  ;;  %v3518_v63 = vpack.i.bf16 %v3503_v59, %v4578_v45  ;;  %v4577_v49 = vunpack.c.h.bf16 %v3426_v17  ;;  %v3109_v25 = vmov 65535  }
  0x57   : > { %v1798_v33 = vsel %vm1797_vm2, 4294967295, %v3109_v25  ;;  %v3084_v25 = vld [vmem:[%s4550_s3 + $0x8] sm:$0xff]   ;;  %vm1578_vm2 = vcmask 457728  }
  0x58   : > { %2725 = vrot.lane.b32.xlu1 %v3490_v38, %s4572_s11 }
  0x59   : > { %2720 = vrot.lane.b32.xlu0 %v3327_v31, %s4572_s11  ;;  %s3110_s11 = smov 64  }
  0x5c   : > { %2735 = vrot.lane.b32.xlu1 %v3376_v47, %s4570_s16  ;;  %v4583_v47 = vrot.slane %v3503_v59, 1 }
  0x5d   : > { %2730 = vrot.lane.b32.xlu0 %v3342_v37, %s4570_s16  ;;  %v3537_v37 = vpack.i.bf16 %v3528_v35, %v4577_v49  ;;  %v2305_v49 = vunpack.c.l.bf16 %v3194_v2 }
  0x60   : > { %2745 = vrot.lane.b32.xlu1 %v3518_v63, %s4568_s12 }
  0x61   : > { %2740 = vrot.lane.b32.xlu0 %v3359_v43, %s4568_s12  ;;  %v3080_v43 = vld [vmem:[%s4550_s3 + $0x20] ss:$0 sps:$4 sm:$0xff]   ;;  %s4574_s12 = smov 56  }
  0x62   : > { %2528 = vmatprep.subr.msk.bf16.mxu0 %vm4608_vm1, %v3080_v43  ;;  %v1706_v22 = vsel %vm4608_vm1, %v3080_v43, 0  ;;  %v1799_v43 = vsel %vm504_vm0, %v1798_v33, 0  ;;  %vm1595_vm1 = vcmask 523264  }
  0x63   : > { %2477 = vmatpush3.bf16.msra.mxu0 %v1706_v22  ;;  %v520_v22 = vrot.slane %v3503_v59, 2 }
  0x64   : > { %2755 = vrot.lane.b32.xlu1 %v3398_v16, %s4570_s16  ;;  %v4581_v16 = vrot.slane %v3528_v35, 1 }
  0x65   : > { %2750 = vrot.lane.b32.xlu0 %v3247_v24, %s3107_s17  ;;  %v2769_v24 = vpack.i.bf16 %v4583_v47, %v468_v20  ;;  %v2338_v20 = vunpack.c.h.bf16 %v2430_v61  ;;  %v2398_v61 = vunpack.c.h.bf16 %v2444_v58  ;;  %v1159_v58 = vrot.slane %v3528_v35, 2 }
  0x66   : > { %v2784_v48 = vpack.i.bf16 %v4581_v16, %v1108_v54  ;;  %v1801_v54 = vand.u32 %v3083_v60, %v1799_v43 }
  0x68   : > { %2765 = vrot.lane.b32.xlu1 %v3265_v32, %s4574_s12  ;;  %v3081_v32 = vld [vmem:[%s4550_s3 + $0x18] sm:$0xff]   ;;  %2494 = vmatprep.subr.bf16.mxu1 %v1801_v54 }
  0x69   : > { %2760 = vrot.lane.b32.xlu0 %v3537_v37, %s4570_s16  ;;  %2478 = vmatprep.subr.bf16.mxu0 %v3081_v32  ;;  %s2243_s16 = sshll.u32 %s4714_s14, 2 }
  0x6a   : > { %2479 = vmatpush3.bf16.msra.mxu0 %v3081_v32  ;;  %v521_v32 = vrot.slane %v2338_v20, 2  ;;  %2495 = vmatpush3.bf16.msra.mxu1 %v1801_v54  ;;  %v1160_v20 = vrot.slane %v2398_v61, 2 }
  0x6c   : > { %2775 = vrot.lane.b32.xlu1 %v3306_v1, %s3100_s27  ;;  %v3082_v1 = vld [vmem:[%s4550_s3 + $0x10] sm:$0xff]   ;;  %v522_v60 = vsel %vm504_vm0, %v520_v22, %v521_v32 }
  0x6d   : > { %2770 = vrot.lane.b32.xlu0 %v2769_v24, %s3107_s17  ;;  %2480 = vmatprep.subr.bf16.mxu0 %v3082_v1  ;;  %v3593_v33 = vpack.i.bf16 %v522_v60, %v520_v22 }
  0x6e   : > { %2481 = vmatpush3.bf16.msra.mxu0 %v3082_v1  ;;  %v4576_v1 = vunpack.c.l.bf16 %v3414_v57  ;;  %v4633_v57 = vrot.slane %v3503_v59, 1 }
  0x6f   : > { %2482 = vmatprep.subr.bf16.mxu0 %v3084_v25 }
  0x70   : > { %2785 = vrot.lane.b32.xlu1 %v2784_v48, %s4574_s12  ;;  %v3631_v61 = vpack.i.bf16 %v3429_v8, %v4576_v1 }
  0x71   : > { %2780 = vrot.lane.b32.xlu0 %v3302_v62, %s3100_s27  ;;  %v3085_v62 = vld [vmem:[%s4549_s2] sm:$0xff]  }
  0x72   : > { %2496 = vmatprep.subr.bf16.mxu1 %v3085_v62  ;;  %2483 = vmatpush3.bf16.msra.mxu0 %v3084_v25  ;;  %v2434_v25 = vld [vmem:[%s3187_s18 + $0x60] sm:$0xff]  }
  0x73   : > { %2497 = vmatpush3.bf16.msra.mxu1 %v3085_v62  ;;  %v2353_v60 = vunpack.c.l.bf16 %v2434_v25 }
  0x74   : > { %2795 = vrot.lane.b32.xlu1 %v3327_v31, %s3110_s11  ;;  %v3086_v31 = vld [vmem:[%s4550_s3] sm:$0xff]  }
  0x75   : > { %2790 = vrot.lane.b32.xlu0 %v3331_v34, %s3110_s11  ;;  %v1161_v34 = vsel %vm504_vm0, %v1159_v58, %v1160_v20  ;;  %2484 = vmatprep.subr.bf16.mxu0 %v3086_v31 }
  0x76   : > { %2485 = vmatpush3.bf16.msra.mxu0 %v3086_v31  ;;  %v3597_v43 = vpack.i.bf16 %v1161_v34, %v1159_v58  ;;  %v3656_v31 = vunpack.c.h.bf16 %v2434_v25 }
  0x78   : > { %2805 = vrot.lane.b32.xlu1 %v3455_v21, %s3100_s27 }
  0x79   : > { %2800 = vrot.lane.b32.xlu0 %v2769_v24, %s3095_s22 }
  0x7c   : > { %2815 = vrot.lane.b32.xlu1 %v2784_v48, %s3096_s23 }
  0x7d   : > { %2810 = vrot.lane.b32.xlu0 %v3593_v33, %s3100_s27 }
  0x80   : > { %2825 = vrot.lane.b32.xlu1 %v3597_v43, %s3110_s11 }
  0x81   : > { %2820 = vrot.lane.b32.xlu0 %v3490_v38, %s3110_s11 }
  0x84   : > { %2835 = vrot.lane.b32.xlu1 %v3455_v21, %s3097_s24 }
  0x85   : > { %2830 = vrot.lane.b32.xlu0 %v3461_v30, %s3095_s22  ;;  %s4645_s22 = smov 40  }
  0x88   : > { %2845 = vrot.lane.b32.xlu1 %v3476_v6, %s3096_s23  ;;  %s4658_s23 = smov 56  }
  0x89   : > { %2840 = vrot.lane.b32.xlu0 %v3593_v33, %s3097_s24 }
  0x8a   : > { %v3613_v24 = vpop.permute.xlu1 %2570 }
  0x8b   : > { %v3615_v48 = vpop.permute.xlu0 %2560  ;;  %v2572_v59 = vunpack.i.l.bf16 %v3613_v24 }
  0x8c   : > { %2855 = vrot.lane.b32.xlu1 %v3597_v43, %s3098_s25  ;;  %v4588_v45 = vunpack.i.l.bf16 %v3615_v48 }
  0x8d   : > { %2850 = vrot.lane.b32.xlu0 %v3490_v38, %s3098_s25  ;;  %v4579_v38 = vunpack.c.l.bf16 %v3434_v15  ;;  %v844_v40 = vsel %vm838_vm3, %v3203_v3, %v2572_v59 }
  0x8e   : > { %v3622_v21 = vpop.permute.xlu1 %2575  ;;  %v839_v47 = vsel %vm838_vm3, %v2305_v49, %v4588_v45  ;;  %v2413_v45 = vunpack.c.l.bf16 %v2448_v41 }
  0x8f   : > { %v3624_v54 = vpop.permute.xlu0 %2565  ;;  %v3654_v20 = vpack.i.bf16 %v3446_v27, %v4579_v38  ;;  %v3668_v38 = vpack.i.bf16 %v3656_v31, %v2353_v60 }
  0x90   : > { %2865 = vrot.lane.b32.xlu1 %v3498_v52, %s3097_s24  ;;  %v3723_v41 = vpack.i.bf16 %v3702_v51, %v2413_v45  ;;  %v4640_v45 = vrot.slane %v3448_v29, 1 }
  0x91   : > { %2860 = vrot.lane.b32.xlu0 %v3486_v42, %s3097_s24 }
  0x92   : > { %v3635_v22 = vpop.permute.xlu1 %2580  ;;  %4638 = vst [vmem:[#allocation22_spill] sm:$0xff] %v3723_v41 }
  0x93   : > { %v3637_v32 = vpop.permute.xlu0 %2585  ;;  %v2582_v50 = vunpack.i.l.bf16 %v3635_v22 }
  0x94   : > { %2875 = vrot.lane.b32.xlu1 %v3631_v61, %s3099_s26 }
  0x95   : > { %2870 = vrot.lane.b32.xlu0 %v3518_v63, %s3099_s26  ;;  %v4584_v63 = vunpack.c.h.bf16 %v3438_v18  ;;  %v856_v15 = vsel %vm855_vm4, %v839_v47, %v2582_v50  ;;  %v4634_v18 = vrot.slane %v3429_v8, 1  ;;  %v4636_v50 = vrot.slane %v3528_v35, 1 }
  0x96   : > { %v3645_v62 = vpop.permute.xlu1 %2595  ;;  %v4637_v47 = vrot.slane %v3446_v27, 1  ;;  %v4641_v35 = vrot.slane %v3702_v51, 1 }
  0x97   : > { %v3647_v58 = vpop.permute.xlu0 %2590  ;;  %v3677_v2 = vpack.i.bf16 %v3431_v13, %v4584_v63  ;;  %v2909_v49 = vpack.i.bf16 %v4634_v18, %v4633_v57  ;;  %v4602_v57 = vrot.slane %v3656_v31, 1  ;;  %v4639_v18 = vrot.slane %v3431_v13, 1 }
  0x98   : > { %2885 = vrot.lane.b32.xlu1 %v3509_v56, %s3098_s25  ;;  %v2924_v8 = vpack.i.bf16 %v4637_v47, %v4636_v50  ;;  %v2944_v39 = vpack.i.bf16 %v4641_v35, %v4640_v45 }
  0x99   : > { %2880 = vrot.lane.b32.xlu0 %v3511_v26, %s3098_s25 }
  0x9a   : > { %v2606_v34 = vpop.permute.xlu1 %2605 }
  0x9b   : > { %v3661_v1 = vpop.permute.xlu0 %2600  ;;  %v2608_v27 = vunpack.i.h.bf16 %v2606_v34  ;;  %v2607_v50 = vunpack.i.l.bf16 %v2606_v34 }
  0x9c   : > { %2895 = vrot.lane.b32.xlu1 %v3654_v20, %s3100_s27  ;;  %v2603_v6 = vunpack.i.h.bf16 %v3661_v1 }
  0x9d   : > { %2890 = vrot.lane.b32.xlu0 %v3537_v37, %s3100_s27  ;;  %v4632_v37 = vunpack.c.h.bf16 %v3470_v44 }
  0x9e   : > { %v3679_v16 = vpop.permute.xlu1 %2615  ;;  %v861_v3 = vsel %vm855_vm4, %v844_v40, %v2603_v6  ;;  %v2449_v6 = vld [vmem:[%s3200_s21 + $0x68] sm:$0xff]  }
  0x9f   : > { %v3682_v60 = vpop.permute.xlu0 %2610  ;;  %v3693_v63 = vpack.i.bf16 %v3448_v29, %v4632_v37  ;;  %v3710_v37 = vld [vmem:[%s3187_s18 + $0x68] sm:$0xff]  }
  0xa0   : > { %v2612_v25 = vunpack.i.l.bf16 %v3682_v60  ;;  %2905 = vrot.lane.b32.xlu1 %v3668_v38, %s3099_s26 }
  0xa1   : > { %2900 = vrot.lane.b32.xlu0 %v3677_v2, %s3099_s26 }
  0xa2   : > { %v3705_v46 = vsel %vm872_vm5, %v856_v15, %v2612_v25  ;;  %v3707_v44 = vpop.permute.xlu1 %2625  ;;  %v2573_v15 = vunpack.i.h.bf16 %v3613_v24  ;;  %v2357_v25 = vunpack.c.l.bf16 %v3710_v37  ;;  %v660_v24 = vrot.slane %v3656_v31, 2 }
  0xa3   : > { %4635 = vst [vmem:[#allocation21_spill] sm:$0xff] %v3705_v46  ;;  %v2621_v17 = vpop.permute.xlu0 %2620 }
  0xa4   : > { %2915 = vrot.lane.b32.xlu1 %v3693_v63, %s3100_s27  ;;  %v845_v34 = vsel %vm838_vm3, %v4642_v36, %v2573_v15  ;;  %v661_v13 = vrot.slane %v2357_v25, 2  ;;  %v2577_v36 = vunpack.i.l.bf16 %v3622_v21 }
  0xa5   : > { %2910 = vrot.lane.b32.xlu0 %v2909_v49, %s3101_s28  ;;  %v2929_v49 = vpack.i.bf16 %v4602_v57, %v4639_v18  ;;  %v846_v18 = vsel %vm838_vm3, %v3205_v4, %v2573_v15  ;;  %v4643_v57 = vunpack.c.l.bf16 %v3190_v0  ;;  %v2622_v4 = vunpack.i.l.bf16 %v2621_v17 }
  0xa6   : > { %v3727_v53 = vpop.permute.xlu1 %2635  ;;  %v863_v29 = vsel %vm855_vm4, %v846_v18, %v2608_v27 }
  0xa7   : > { %v3729_v47 = vpop.permute.xlu0 %2630  ;;  %v843_v35 = vsel %vm838_vm3, %v4643_v57, %v2572_v59 }
  0xa8   : > { %2925 = vrot.lane.b32.xlu1 %v2924_v8, %s3102_s29  ;;  %v2602_v8 = vunpack.i.l.bf16 %v3661_v1  ;;  %v862_v1 = vsel %vm855_vm4, %v845_v34, %v2607_v50  ;;  %v4644_v34 = vunpack.c.l.bf16 %v3212_v7 }
  0xa9   : > { %2920 = vrot.lane.b32.xlu0 %v3723_v41, %s3100_s27  ;;  %v2623_v41 = vunpack.i.h.bf16 %v2621_v17 }
  0xaa   : > { %v2646_v45 = vpop.permute.xlu1 %2645  ;;  %v860_v59 = vsel %vm855_vm4, %v843_v35, %v2602_v8 }
  0xab   : > { %v2648_v46 = vunpack.i.h.bf16 %v2646_v45  ;;  %v2647_v30 = vunpack.i.l.bf16 %v2646_v45  ;;  %v2641_v25 = vpop.permute.xlu0 %2640 }
  0xac   : > { %v2643_v15 = vunpack.i.h.bf16 %v2641_v25  ;;  %v2642_v0 = vunpack.i.l.bf16 %v2641_v25  ;;  %2935 = vrot.lane.b32.xlu1 %v3593_v33, %s3103_s30 }
  0xad   : > { %v3763_v57 = vsel %vm872_vm5, %v862_v1, %v2647_v30  ;;  %v3766_v27 = vsel %vm872_vm5, %v863_v29, %v2648_v46  ;;  %2930 = vrot.lane.b32.xlu0 %v2929_v49, %s3101_s28  ;;  %v1482_v30 = vsel %vm4611_vm6, %v4644_v34, %v2577_v36  ;;  %v1483_v46 = vsel %vm4611_vm6, %v3220_v10, %v2577_v36 }
  0xae   : > { %v3770_v17 = vsel %vm872_vm5, %v860_v59, %v2642_v0  ;;  %v3773_v50 = vsel %vm872_vm5, %v861_v3, %v2643_v15  ;;  %v2656_v33 = vpop.permute.xlu1 %2655  ;;  %v1500_v18 = vsel %vm1494_vm7, %v1483_v46, %v2623_v41  ;;  %v1499_v35 = vsel %vm1494_vm7, %v1482_v30, %v2622_v4  ;;  %v2436_v4 = vld [vmem:[%s3187_s18 + $0x70] sm:$0xff]   ;;  %s4647_s18 = smov 18  }
  0xaf   : > { %v2658_v29 = vunpack.i.h.bf16 %v2656_v33  ;;  %v2657_v8 = vunpack.i.l.bf16 %v2656_v33  ;;  %v3781_v49 = vpop.permute.xlu0 %2650  ;;  %v662_v10 = vsel %vm504_vm0, %v660_v24, %v661_v13  ;;  %v2417_v36 = vunpack.c.l.bf16 %v2449_v6  ;;  %v2450_v15 = vld [vmem:[%s3200_s21 + $0x70] sm:$0xff]   ;;  %s4654_s21 = smov 48  }
  0xb0   : > { %2945 = vrot.lane.b32.xlu1 %v2944_v39, %s3102_s29  ;;  %v3801_v39 = vpack.i.bf16 %v662_v10, %v660_v24  ;;  %v1299_v1 = vrot.slane %v3702_v51, 2  ;;  %v2362_v13 = vunpack.c.h.bf16 %v2436_v4  ;;  %v2422_v3 = vunpack.c.h.bf16 %v2450_v15 }
  0xb1   : > { %v3787_v40 = vsel %vm957_vm8, %v1499_v35, %v2657_v8  ;;  %v3790_v7 = vsel %vm957_vm8, %v1500_v18, %v2658_v29  ;;  %2940 = vrot.lane.b32.xlu0 %v3486_v42, %s3103_s30  ;;  %v1300_v25 = vrot.slane %v2417_v36, 2  ;;  %v2361_v33 = vunpack.c.l.bf16 %v2436_v4 }
  0xb2   : > { %v3795_v45 = vpop.permute.xlu1 %2665  ;;  %4646 = vst [vmem:[#allocation23_spill] sm:$0xff] %v3801_v39  ;;  %v2421_v24 = vunpack.c.l.bf16 %v2450_v15  ;;  %v788_v30 = vrot.slane %v2362_v13, 2  ;;  %v1427_v46 = vrot.slane %v2422_v3, 2  ;;  %v2358_v35 = vunpack.c.h.bf16 %v3710_v37 }
  0xb3   : > { %v3797_v41 = vpop.permute.xlu0 %2660  ;;  %v787_v29 = vrot.slane %v2361_v33, 2  ;;  %v2365_v10 = vunpack.c.l.bf16 %v3226_v12  ;;  %v2418_v4 = vunpack.c.h.bf16 %v2449_v6  ;;  %v761_v15 = vrot.slane %v2361_v33, 1 }
  0xb4   : > { %2955 = vrot.lane.b32.xlu1 %v3511_v26, %s4645_s22  ;;  %v1426_v8 = vrot.slane %v2421_v24, 2  ;;  %v2563_v13 = vunpack.i.h.bf16 %v3615_v48  ;;  %v2578_v12 = vunpack.i.h.bf16 %v3622_v21  ;;  %v2568_v6 = vunpack.i.h.bf16 %v3624_v54 }
  0xb5   : > { %2950 = vrot.lane.b32.xlu0 %v3597_v43, %s4645_s22  ;;  %v1301_v43 = vsel %vm504_vm0, %v1299_v1, %v1300_v25  ;;  %v1400_v25 = vrot.slane %v2421_v24, 1  ;;  %v4649_v21 = vrot.slane %v3702_v51, 1  ;;  %v4651_v51 = vunpack.i.l.bf16 %v3615_v48 }
  0xb6   : > { %v3808_v0 = vpop.permute.xlu1 %2675  ;;  %v3825_v36 = vpack.i.bf16 %v1301_v43, %v1299_v1  ;;  %v1428_v37 = vsel %vm504_vm0, %v1426_v8, %v1427_v46  ;;  %v4648_v1 = vrot.slane %v3656_v31, 1  ;;  %v842_v31 = vsel %vm838_vm3, %v3217_v9, %v2563_v13 }
  0xb7   : > { %v3810_v59 = vpop.permute.xlu0 %2670  ;;  %v3851_v46 = vpack.i.bf16 %v1400_v25, %v4649_v21  ;;  %v2588_v9 = vunpack.i.h.bf16 %v3637_v32  ;;  %v4653_v25 = vunpack.c.h.bf16 %v3253_v28  ;;  %v1481_v48 = vsel %vm4611_vm6, %v3241_v23, %v2568_v6 }
  0xb8   : > { %2965 = vrot.lane.b32.xlu1 %v3801_v39, %s3103_s30  ;;  %v789_v39 = vsel %vm504_vm0, %v787_v29, %v788_v30  ;;  %v3844_v43 = vpack.i.bf16 %v761_v15, %v4648_v1  ;;  %v2567_v30 = vunpack.i.l.bf16 %v3624_v54  ;;  %v2583_v54 = vunpack.i.h.bf16 %v3635_v22 }
  0xb9   : > { %2960 = vrot.lane.b32.xlu0 %v3498_v52, %s3103_s30  ;;  %v2587_v15 = vunpack.i.l.bf16 %v3637_v32  ;;  %v2593_v28 = vunpack.i.h.bf16 %v3647_v58  ;;  %vm990_vm0 = vcmask 1040384   ;;  %s4453_s30 = scalar_lea.vmem %s4557_s10, %s3181_s15 }
  0xba   : > { %v3817_v34 = vpop.permute.xlu1 %2685  ;;  %v1479_v32 = vsel %vm4611_vm6, %v3236_v19, %v2567_v30  ;;  %v859_v19 = vsel %vm855_vm4, %v842_v31, %v2588_v9 }
  0xbb   : > { %v3819_v18 = vpop.permute.xlu0 %2680 }
  0xbc   : > { %2975 = vrot.lane.b32.xlu1 %v3677_v2, %s4647_s18  ;;  %v3004_v2 = vpack.i.bf16 %v2361_v33, %v2358_v35  ;;  %v3853_v33 = vpack.i.bf16 %v789_v39, %v787_v29  ;;  %v3855_v35 = vpack.i.bf16 %v1428_v37, %v1426_v8  ;;  %v840_v39 = vsel %vm838_vm3, %v3208_v5, %v4651_v51 }
  0xbd   : > { %2970 = vrot.lane.b32.xlu0 %v3631_v61, %s4647_s18  ;;  %v3840_v61 = vpack.i.bf16 %v2421_v24, %v2418_v4  ;;  %v4650_v24 = vunpack.c.h.bf16 %v3230_v14  ;;  %v4652_v29 = vunpack.c.h.bf16 %v3289_v55  ;;  %v1485_v8 = vsel %vm4611_vm6, %v3223_v11, %v2578_v12 }
  0xbe   : > { %v3830_v3 = vpop.permute.xlu1 %2695  ;;  %v2598_v5 = vunpack.i.h.bf16 %v3645_v62  ;;  %v2597_v55 = vunpack.i.l.bf16 %v3645_v62  ;;  %v1478_v11 = vsel %vm4611_vm6, %v2365_v10, %v2567_v30  ;;  %v2592_v37 = vunpack.i.l.bf16 %v3647_v58 }
  0xbf   : > { %v3835_v26 = vpop.permute.xlu0 %2690  ;;  %v841_v4 = vsel %vm838_vm3, %v4650_v24, %v2563_v13  ;;  %v1484_v14 = vsel %vm4611_vm6, %v4652_v29, %v2578_v12  ;;  %v1480_v13 = vsel %vm4611_vm6, %v4653_v25, %v2568_v6  ;;  %v857_v23 = vsel %vm855_vm4, %v840_v39, %v2583_v54 }
  0xc0   : > { %2985 = vrot.lane.b32.xlu1 %v3825_v36, %s4645_s22  ;;  %v858_v62 = vsel %vm855_vm4, %v841_v4, %v2587_v15  ;;  %v2618_v12 = vunpack.i.h.bf16 %v3679_v16  ;;  %v2613_v6 = vunpack.i.h.bf16 %v3682_v60  ;;  %v2628_v58 = vunpack.i.h.bf16 %v3707_v44 }
  0xc1   : > { %2980 = vrot.lane.b32.xlu0 %v3509_v56, %s4645_s22  ;;  %v2627_v30 = vunpack.i.l.bf16 %v3707_v44  ;;  %v1497_v21 = vsel %vm1494_vm7, %v1480_v13, %v2597_v55  ;;  %v1498_v24 = vsel %vm1494_vm7, %v1481_v48, %v2598_v5  ;;  %v2638_v4 = vunpack.i.h.bf16 %v3727_v53  ;;  %v4655_v55 = vld [vmem:[#allocation22_spill] sm:$0xff] }
  0xc2   : > { %v3864_v1 = vpop.permute.xlu1 %2705  ;;  %v1495_v31 = vsel %vm1494_vm7, %v1478_v11, %v2592_v37  ;;  %v1496_v60 = vsel %vm1494_vm7, %v1479_v32, %v2593_v28  ;;  %v2633_v54 = vunpack.i.h.bf16 %v3729_v47  ;;  %v2632_v44 = vunpack.i.l.bf16 %v3729_v47  ;;  %v4656_v28 = vld [vmem:[#allocation15_spill] sm:$0xff]  ;;  %v4657_v37 = vld [vmem:[#allocation21_spill] sm:$0xff] }
  0xc3   : > { %v3876_v22 = vpop.permute.xlu0 %2700  ;;  %v876_v51 = vsel %vm872_vm5, %v859_v19, %v2618_v12  ;;  %v2653_v39 = vunpack.i.h.bf16 %v3781_v49  ;;  %v874_v29 = vsel %vm872_vm5, %v857_v23, %v2613_v6  ;;  %v1502_v9 = vsel %vm1494_vm7, %v1485_v8, %v2628_v58 }
  0xc4   : > { %2995 = vrot.lane.b32.xlu1 %v3693_v63, %s4654_s21  ;;  %v2617_v63 = vunpack.i.l.bf16 %v3679_v16  ;;  %v2637_v16 = vunpack.i.l.bf16 %v3727_v53  ;;  %v2652_v53 = vunpack.i.l.bf16 %v3781_v49  ;;  %v1501_v25 = vsel %vm1494_vm7, %v1484_v14, %v2627_v30 }
  0xc5   : > { %2990 = vrot.lane.b32.xlu0 %v3654_v20, %s4654_s21  ;;  %v2667_v47 = vunpack.i.l.bf16 %v3795_v45  ;;  %v1514_v48 = vsel %vm957_vm8, %v1498_v24, %v2638_v4  ;;  %v2668_v5 = vunpack.i.h.bf16 %v3795_v45  ;;  %v2663_v49 = vunpack.i.h.bf16 %v3797_v41 }
  0xc6   : > { %v3898_v10 = vpop.permute.xlu1 %2715  ;;  %v875_v15 = vsel %vm872_vm5, %v858_v62, %v2617_v63  ;;  %v1513_v13 = vsel %vm957_vm8, %v1497_v21, %v2637_v16  ;;  %v1511_v8 = vsel %vm957_vm8, %v1495_v31, %v2632_v44  ;;  %v1512_v14 = vsel %vm957_vm8, %v1496_v60, %v2633_v54  ;;  %v4659_v31 = vld [vmem:[#allocation17_spill] sm:$0xff] }
  0xc7   : > { %v3904_v20 = vpop.permute.xlu0 %2710  ;;  %v2662_v11 = vunpack.i.l.bf16 %v3797_v41  ;;  %v2677_v32 = vunpack.i.l.bf16 %v3808_v0  ;;  %v890_v23 = vsel %vm889_vm9, %v4657_v37, %v2652_v53  ;;  %v891_v45 = vsel %vm889_vm9, %v874_v29, %v2652_v53 }
  0xc8   : > { %3005 = vrot.lane.b32.xlu1 %v3004_v2, %s4647_s18  ;;  %v892_v62 = vsel %vm889_vm9, %v875_v15, %v2653_v39  ;;  %v893_v12 = vsel %vm889_vm9, %v876_v51, %v2653_v39  ;;  %v1528_v19 = vsel %vm1527_vm10, %v1511_v8, %v2667_v47  ;;  %v2678_v41 = vunpack.i.h.bf16 %v3808_v0 }
  0xc9   : > { %3000 = vrot.lane.b32.xlu0 %v3668_v38, %s4647_s18  ;;  %v2673_v6 = vunpack.i.h.bf16 %v3810_v59  ;;  %v2672_v58 = vunpack.i.l.bf16 %v3810_v59  ;;  %v1529_v21 = vsel %vm1527_vm10, %v1512_v14, %v2667_v47  ;;  %v1530_v24 = vsel %vm1527_vm10, %v1513_v13, %v2668_v5 }
  0xca   : > { %v3921_v2 = vpop.permute.xlu1 %2725  ;;  %v1531_v4 = vsel %vm1527_vm10, %v1514_v48, %v2668_v5  ;;  %v1518_v16 = vsel %vm957_vm8, %v1502_v9, %v2663_v49  ;;  %v1517_v0 = vsel %vm957_vm8, %v1501_v25, %v2662_v11  ;;  %v3962_v60 = vsel %vm4610_vm11, %v890_v23, %v2677_v32 }
  0xcb   : > { %v3927_v38 = vpop.permute.xlu0 %2720  ;;  %v2688_v59 = vunpack.i.h.bf16 %v3817_v34  ;;  %v2687_v54 = vunpack.i.l.bf16 %v3817_v34  ;;  %v2683_v44 = vunpack.i.h.bf16 %v3819_v18  ;;  %v2682_v15 = vunpack.i.l.bf16 %v3819_v18 }
  0xcc   : > { %3015 = vrot.lane.b32.xlu1 %v4655_v55, %s4654_s21  ;;  %v2698_v51 = vunpack.i.h.bf16 %v3830_v3  ;;  %v2697_v39 = vunpack.i.l.bf16 %v3830_v3  ;;  %v908_v29 = vsel %vm4610_vm11, %v891_v45, %v2678_v41  ;;  %v896_v9 = vsel %vm889_vm9, %v3763_v57, %v2673_v6 }
  0xcd   : > { %3010 = vrot.lane.b32.xlu0 %v4656_v28, %s3107_s17  ;;  %v897_v34 = vsel %vm889_vm9, %v3766_v27, %v2673_v6  ;;  %v895_v18 = vsel %vm889_vm9, %v3773_v50, %v2672_v58  ;;  %v2693_v3 = vunpack.i.h.bf16 %v3835_v26  ;;  %v2692_v47 = vunpack.i.l.bf16 %v3835_v26 }
  0xce   : > { %v3946_v63 = vpop.permute.xlu1 %2735  ;;  %v2707_v13 = vunpack.i.l.bf16 %v3864_v1  ;;  %v1532_v57 = vsel %vm1527_vm10, %v3787_v40, %v2687_v54  ;;  %v1533_v27 = vsel %vm1527_vm10, %v3790_v7, %v2687_v54  ;;  %v1535_v48 = vsel %vm1527_vm10, %v1518_v16, %v2688_v59 }
  0xcf   : > { %v3952_v30 = vpop.permute.xlu0 %2730  ;;  %v909_v26 = vsel %vm4610_vm11, %v892_v62, %v2682_v15  ;;  %v910_v50 = vsel %vm4610_vm11, %v893_v12, %v2683_v44  ;;  %v1548_v5 = vsel %vm4609_vm12, %v1531_v4, %v2698_v51  ;;  %v2708_v7 = vunpack.i.h.bf16 %v3864_v1 }
  0xd0   : > { %3025 = vrot.lane.b32.xlu1 %v4659_v31, %s4658_s23  ;;  %v2703_v49 = vunpack.i.h.bf16 %v3876_v22  ;;  %v2702_v55 = vunpack.i.l.bf16 %v3876_v22  ;;  %v2717_v8 = vunpack.i.l.bf16 %v3898_v10  ;;  %v1545_v14 = vsel %vm4609_vm12, %v1528_v19, %v2692_v47  ;;  %v4660_v31 = vld [vmem:[#allocation19_spill] sm:$0xff] }
  0xd1   : > { %3020 = vrot.lane.b32.xlu0 %v3840_v61, %s4654_s21  ;;  %v894_v61 = vsel %vm889_vm9, %v3770_v17, %v2672_v58  ;;  %v1534_v17 = vsel %vm1527_vm10, %v1517_v0, %v2688_v59  ;;  %v1546_v11 = vsel %vm4609_vm12, %v1529_v21, %v2693_v3  ;;  %v4013_v32 = vsel %vm4610_vm11, %v896_v9, %v2707_v13  ;;  %v4661_v13 = vld [vmem:[#allocation23_spill] sm:$0xff]  ;;  %s385_s21 = scalar_lea.vmem %s4556_s9, %s2243_s16 }
  0xd2   : > { %v3972_v53 = vpop.permute.xlu1 %2745  ;;  %v2718_v28 = vunpack.i.h.bf16 %v3898_v10  ;;  %v2713_v1 = vunpack.i.h.bf16 %v3904_v20  ;;  %v2712_v22 = vunpack.i.l.bf16 %v3904_v20  ;;  %v2728_v37 = vunpack.i.h.bf16 %v3921_v2 }
  0xd3   : > { %v3981_v25 = vpop.permute.xlu0 %2740  ;;  %v2727_v23 = vunpack.i.l.bf16 %v3921_v2  ;;  %v2723_v45 = vunpack.i.h.bf16 %v3927_v38  ;;  %v2722_v62 = vunpack.i.l.bf16 %v3927_v38  ;;  %v2738_v10 = vunpack.i.h.bf16 %v3946_v63 }
  0xd4   : > { %3035 = vrot.lane.b32.xlu1 %v3486_v42, %s3100_s27  ;;  %v1547_v42 = vsel %vm4609_vm12, %v1530_v24, %v2697_v39  ;;  %v4031_v20 = vsel %vm4610_vm11, %v897_v34, %v2708_v7  ;;  %v911_v19 = vsel %vm4610_vm11, %v894_v61, %v2702_v55  ;;  %v912_v2 = vsel %vm4610_vm11, %v895_v18, %v2703_v49 }
  0xd5   : > { %3030 = vrot.lane.b32.xlu0 %v3844_v43, %s3107_s17  ;;  %v927_v38 = vsel %vm923_vm13, %v910_v50, %v2718_v28  ;;  %v2733_v6 = vunpack.i.h.bf16 %v3952_v30  ;;  %v924_v21 = vsel %vm923_vm13, %v3962_v60, %v2712_v22  ;;  %v925_v24 = vsel %vm923_vm13, %v908_v29, %v2713_v1 }
  0xd6   : > { %v4002_v40 = vpop.permute.xlu1 %2755  ;;  %v4048_v4 = vsel %vm4609_vm12, %v1534_v17, %v2727_v23  ;;  %v4051_v16 = vsel %vm4609_vm12, %v1535_v48, %v2728_v37  ;;  %v4059_v0 = vsel %vm4609_vm12, %v1533_v27, %v2723_v45  ;;  %v1565_v60 = vsel %vm1561_vm14, %v1548_v5, %v2738_v10 }
  0xd7   : > { %v4008_v43 = vpop.permute.xlu0 %2750  ;;  %v2743_v54 = vunpack.i.h.bf16 %v3981_v25  ;;  %v2742_v44 = vunpack.i.l.bf16 %v3981_v25  ;;  %v1563_v9 = vsel %vm1561_vm14, %v1546_v11, %v2733_v6  ;;  %v2748_v18 = vunpack.i.h.bf16 %v3972_v53 }
  0xd8   : > { %3045 = vrot.lane.b32.xlu1 %v3851_v46, %s4658_s23  ;;  %v2737_v46 = vunpack.i.l.bf16 %v3946_v63  ;;  %v2732_v63 = vunpack.i.l.bf16 %v3952_v30  ;;  %v2752_v58 = vunpack.i.l.bf16 %v4008_v43  ;;  %v4056_v30 = vsel %vm4609_vm12, %v1532_v57, %v2722_v62 }
  0xd9   : > { %3040 = vrot.lane.b32.xlu0 %v3498_v52, %s3100_s27  ;;  %v926_v52 = vsel %vm923_vm13, %v909_v26, %v2717_v8  ;;  %v2753_v3 = vunpack.i.h.bf16 %v4008_v43  ;;  %v928_v50 = vsel %vm923_vm13, %v911_v19, %v2742_v44  ;;  %v2758_v5 = vunpack.i.h.bf16 %v4002_v40 }
  0xda   : > { %v4028_v12 = vpop.permute.xlu1 %2765  ;;  %v1562_v29 = vsel %vm1561_vm14, %v1545_v14, %v2732_v63  ;;  %v941_v34 = vsel %vm940_vm15, %v924_v21, %v2752_v58  ;;  %v942_v61 = vsel %vm940_vm15, %v925_v24, %v2752_v58  ;;  %vm1784_vm12 = vcmask 220160  }
  0xdb   : > { %v4036_v41 = vpop.permute.xlu0 %2760  ;;  %v2768_v57 = vunpack.i.h.bf16 %v4028_v12  ;;  %v2767_v27 = vunpack.i.l.bf16 %v4028_v12  ;;  %v2757_v49 = vunpack.i.l.bf16 %v4002_v40  ;;  %v943_v14 = vsel %vm940_vm15, %v926_v52, %v2753_v3 }
  0xdc   : > { %3055 = vrot.lane.b32.xlu1 %v3509_v56, %s3110_s11  ;;  %v1564_v56 = vsel %vm1561_vm14, %v1547_v42, %v2737_v46  ;;  %v929_v42 = vsel %vm923_vm13, %v912_v2, %v2743_v54  ;;  %v944_v11 = vsel %vm940_vm15, %v927_v38, %v2753_v3  ;;  %v2763_v28 = vunpack.i.h.bf16 %v4036_v41 }
  0xdd   : > { %3050 = vrot.lane.b32.xlu0 %v4660_v31, %s3110_s11  ;;  %v2762_v1 = vunpack.i.l.bf16 %v4036_v41  ;;  %v1579_v40 = vsel %vm1578_vm2, %v1562_v29, %v2767_v27  ;;  %v1581_v22 = vsel %vm1578_vm2, %v1564_v56, %v2768_v57  ;;  %vm4612_vm11 = vcmask 588800  }
  0xde   : > { %v2776_v59 = vpop.permute.xlu1 %2775  ;;  %v1582_v19 = vsel %vm1578_vm2, %v1565_v60, %v2768_v57  ;;  %v1580_v41 = vsel %vm1578_vm2, %v1563_v9, %v2767_v27 }
  0xdf   : > { %v2778_v15 = vunpack.i.h.bf16 %v2776_v59  ;;  %v2777_v51 = vunpack.i.l.bf16 %v2776_v59  ;;  %v4065_v39 = vpop.permute.xlu0 %2770 }
  0xe0   : > { %3065 = vrot.lane.b32.xlu1 %v3853_v33, %s3100_s27  ;;  %v2747_v33 = vunpack.i.l.bf16 %v3972_v53  ;;  %v2772_v2 = vunpack.i.l.bf16 %v4065_v39  ;;  %v1569_v53 = vsel %vm1561_vm14, %v4051_v16, %v2763_v28 }
  0xe1   : > { %v958_v25 = vsel %vm957_vm8, %v941_v34, %v2777_v51  ;;  %v959_v47 = vsel %vm957_vm8, %v942_v61, %v2778_v15  ;;  %3060 = vrot.lane.b32.xlu0 %v4661_v13, %s3100_s27  ;;  %v2773_v51 = vunpack.i.h.bf16 %v4065_v39 }
  0xe2   : > { %v991_v17 = vrot.slane %v958_v25, 7  ;;  %v992_v48 = vrot.slane %v959_v47, 7  ;;  %v4081_v26 = vpop.permute.xlu1 %2785  ;;  %v945_v29 = vsel %vm940_vm15, %v928_v50, %v2772_v2  ;;  %v946_v9 = vsel %vm940_vm15, %v929_v42, %v2772_v2 }
  0xe3   : > { %v2781_v7 = vpop.permute.xlu0 %2780  ;;  %v2788_v13 = vunpack.i.h.bf16 %v4081_v26  ;;  %v2787_v57 = vunpack.i.l.bf16 %v4081_v26  ;;  %v931_v50 = vsel %vm923_vm13, %v4031_v20, %v2748_v18  ;;  %v1566_v42 = vsel %vm1561_vm14, %v4056_v30, %v2757_v49 }
  0xe4   : > { %v2783_v55 = vunpack.i.h.bf16 %v2781_v7  ;;  %v2782_v8 = vunpack.i.l.bf16 %v2781_v7  ;;  %3075 = vrot.lane.b32.xlu1 %v3855_v35, %s3110_s11  ;;  %v993_v43 = vsel %vm990_vm0, %v991_v17, %v992_v48  ;;  %v930_v48 = vsel %vm923_vm13, %v4013_v32, %v2747_v33 }
  0xe5   : > { %3070 = vrot.lane.b32.xlu0 %v3825_v36, %s3110_s11  ;;  %v1567_v26 = vsel %vm1561_vm14, %v4059_v0, %v2758_v5  ;;  %v1568_v32 = vsel %vm1561_vm14, %v4048_v4, %v2762_v1  ;;  %v947_v20 = vsel %vm940_vm15, %v930_v48, %v2773_v51  ;;  %v948_v18 = vsel %vm940_vm15, %v931_v50, %v2773_v51 }
  0xe6   : > { %v960_v37 = vsel %vm957_vm8, %v943_v14, %v2782_v8  ;;  %v961_v35 = vsel %vm957_vm8, %v944_v11, %v2783_v55  ;;  %v2796_v23 = vpop.permute.xlu1 %2795  ;;  %v1583_v30 = vsel %vm1578_vm2, %v1566_v42, %v2787_v57  ;;  %v1585_v0 = vsel %vm1578_vm2, %v1568_v32, %v2788_v13 }
  0xe7   : > { %v994_v45 = vrot.slane %v960_v37, 7  ;;  %v995_v62 = vrot.slane %v961_v35, 7  ;;  %v2798_v10 = vunpack.i.h.bf16 %v2796_v23  ;;  %v2797_v46 = vunpack.i.l.bf16 %v2796_v23  ;;  %v2791_v12 = vpop.permute.xlu0 %2790 }
  0xe8   : > { %v2793_v36 = vunpack.i.h.bf16 %v2791_v12  ;;  %v2792_v52 = vunpack.i.l.bf16 %v2791_v12  ;;  %v1586_v28 = vsel %vm1578_vm2, %v1569_v53, %v2788_v13  ;;  %v1584_v23 = vsel %vm1578_vm2, %v1567_v26, %v2787_v57  ;;  %v4665_v57 = vld [vmem:[#allocation6_spill] sm:$0xff] }
  0xe9   : > { %v1598_v38 = vsel %vm1595_vm1, %v1581_v22, %v2797_v46  ;;  %v1599_v6 = vsel %vm1595_vm1, %v1582_v19, %v2798_v10  ;;  %v996_v63 = vsel %vm990_vm0, %v994_v45, %v995_v62 }
  0xea   : > { %v1631_v58 = vrot.slane %v1598_v38, 7  ;;  %v1632_v21 = vrot.slane %v1599_v6, 7  ;;  %v1596_v24 = vsel %vm1595_vm1, %v1579_v40, %v2792_v52  ;;  %v1597_v31 = vsel %vm1595_vm1, %v1580_v41, %v2793_v36  ;;  %v2806_v56 = vpop.permute.xlu1 %2805 }
  0xeb   : > { %v1628_v60 = vrot.slane %v1596_v24, 7  ;;  %v1629_v59 = vrot.slane %v1597_v31, 7  ;;  %v2808_v54 = vunpack.i.h.bf16 %v2806_v56  ;;  %v2807_v44 = vunpack.i.l.bf16 %v2806_v56  ;;  %v4109_v15 = vpop.permute.xlu0 %2800  ;;  %v4664_v31 = vld [vmem:[#allocation3_spill] sm:$0xff] }
  0xec   : > { %v1023_v34 = vpack.c.bf16 %v996_v63, %v993_v43  ;;  %v1633_v47 = vsel %vm990_vm0, %v1631_v58, %v1632_v21  ;;  %v2802_v22 = vunpack.i.l.bf16 %v4109_v15  ;;  %v4662_v58 = vld [vmem:[#allocation2_spill] sm:$0xff] }
  0xed   : > { %v962_v61 = vsel %vm957_vm8, %v945_v29, %v2807_v44  ;;  %v963_v3 = vsel %vm957_vm8, %v946_v9, %v2808_v54  ;;  %v1630_v25 = vsel %vm990_vm0, %v1628_v60, %v1629_v59  ;;  %v4663_v21 = vunpack.c.l.bf16 %v4662_v58 }
  0xee   : > { %v997_v27 = vrot.slane %v962_v61, 7  ;;  %v998_v17 = vrot.slane %v963_v3, 7  ;;  %2498 = vmatprep.mubr.msk.bf16.mxu1 %vm1784_vm12, %v1023_v34  ;;  %v4121_v39 = vpop.permute.xlu1 %2815  ;;  %v1660_v43 = vpack.c.bf16 %v1633_v47, %v1630_v25  ;;  %v848_v56 = vsel %vm838_vm3, %v4664_v31, %v2802_v22 }
  0xef   : > { %v2811_v7 = vpop.permute.xlu0 %2810  ;;  %v847_v24 = vsel %vm838_vm3, %v4663_v21, %v2802_v22  ;;  %v2803_v54 = vunpack.i.h.bf16 %v4109_v15  ;;  %v2818_v34 = vunpack.i.h.bf16 %v4121_v39  ;;  %v2817_v25 = vunpack.i.l.bf16 %v4121_v39 }
  0xf0   : > { %v2813_v55 = vunpack.i.h.bf16 %v2811_v7  ;;  %v2812_v8 = vunpack.i.l.bf16 %v2811_v7  ;;  %v999_v14 = vsel %vm990_vm0, %v997_v27, %v998_v17  ;;  %2486 = vmatprep.mubr.msk.bf16.mxu0 %vm4612_vm11, %v1660_v43  ;;  %v4666_v15 = vunpack.c.h.bf16 %v4665_v57  ;;  %v4667_v17 = vld [vmem:[#allocation18_spill] sm:$0xff]  ;;  %v4668_v7 = vld [vmem:[#allocation8_spill] sm:$0xff] }
  0xf1   : > { %v850_v48 = vsel %vm838_vm3, %v4667_v17, %v2803_v54 }
  0xf2   : > { %v964_v33 = vsel %vm957_vm8, %v947_v20, %v2812_v8  ;;  %v965_v5 = vsel %vm957_vm8, %v948_v18, %v2813_v55  ;;  %v2826_v49 = vpop.permute.xlu1 %2825  ;;  %v849_v27 = vsel %vm838_vm3, %v4666_v15, %v2803_v54  ;;  %v4669_v55 = vunpack.c.h.bf16 %v4668_v7  ;;  %v4670_v8 = vld [vmem:[#allocation20_spill] sm:$0xff]  ;;  %v4682_v7 = vld [vmem:[#allocation14_spill] sm:$0xff] }
  0xf3   : > { %v1000_v11 = vrot.slane %v964_v33, 7  ;;  %v1001_v4 = vrot.slane %v965_v5, 7  ;;  %v2828_v1 = vunpack.i.h.bf16 %v2826_v49  ;;  %v2827_v40 = vunpack.i.l.bf16 %v2826_v49  ;;  %v2821_v16 = vpop.permute.xlu0 %2820  ;;  %v4671_v20 = vld [vmem:[#allocation4_spill] sm:$0xff]  ;;  %v4673_v49 = vld [vmem:[#allocation5_spill] sm:$0xff] }
  0xf4   : > { %v2823_v37 = vunpack.i.h.bf16 %v2821_v16  ;;  %v2822_v35 = vunpack.i.l.bf16 %v2821_v16  ;;  %v1488_v39 = vsel %vm4611_vm6, %v4669_v55, %v2818_v34  ;;  %v1489_v43 = vsel %vm4611_vm6, %v4670_v8, %v2818_v34 }
  0xf5   : > { %v1602_v45 = vsel %vm1595_vm1, %v1585_v0, %v2827_v40  ;;  %v1603_v62 = vsel %vm1595_vm1, %v1586_v28, %v2828_v1  ;;  %v1002_v10 = vsel %vm990_vm0, %v1000_v11, %v1001_v4  ;;  %v4672_v18 = vunpack.c.l.bf16 %v4671_v20 }
  0xf6   : > { %v1637_v46 = vrot.slane %v1602_v45, 7  ;;  %v1638_v12 = vrot.slane %v1603_v62, 7  ;;  %v1600_v19 = vsel %vm1595_vm1, %v1583_v30, %v2822_v35  ;;  %v1601_v2 = vsel %vm1595_vm1, %v1584_v23, %v2823_v37  ;;  %v2836_v36 = vpop.permute.xlu1 %2835  ;;  %v4674_v45 = vld [vmem:[#allocation12_spill] sm:$0xff] }
  0xf7   : > { %v1634_v52 = vrot.slane %v1600_v19, 7  ;;  %v1635_v41 = vrot.slane %v1601_v2, 7  ;;  %v2838_v38 = vunpack.i.h.bf16 %v2836_v36  ;;  %v2837_v6 = vunpack.i.l.bf16 %v2836_v36  ;;  %v2831_v63 = vpop.permute.xlu0 %2830  ;;  %v4677_v36 = vld [vmem:[#allocation7_spill] sm:$0xff] }
  0xf8   : > { %v1024_v60 = vpack.c.bf16 %v1002_v10, %v999_v14  ;;  %v1639_v59 = vsel %vm990_vm0, %v1637_v46, %v1638_v12  ;;  %v1486_v30 = vsel %vm4611_vm6, %v4672_v18, %v2817_v25  ;;  %v2833_v0 = vunpack.i.h.bf16 %v2831_v63  ;;  %v4676_v46 = vld [vmem:[#allocation10_spill] sm:$0xff] }
  0xf9   : > { %v864_v44 = vsel %vm855_vm4, %v847_v24, %v2837_v6  ;;  %v865_v51 = vsel %vm855_vm4, %v848_v56, %v2838_v38  ;;  %v1636_v29 = vsel %vm990_vm0, %v1634_v52, %v1635_v41  ;;  %v1487_v11 = vsel %vm4611_vm6, %v4673_v49, %v2817_v25  ;;  %v4679_v38 = vld [vmem:[#allocation9_spill] sm:$0xff] }
  0xfa   : > { %2499 = vmatmul.mubr.msk.bf16.vlgmr.msra.gmra.mxu1 %vm1784_vm12, %v1024_v60  ;;  %v4164_v9 = vpop.permute.xlu1 %2845  ;;  %v1661_v3 = vpack.c.bf16 %v1639_v59, %v1636_v29  ;;  %v2832_v4 = vunpack.i.l.bf16 %v2831_v63  ;;  %v4675_v62 = vunpack.c.h.bf16 %v4674_v45  ;;  %v854_v12 = vsel %vm838_vm3, %v4676_v46, %v2833_v0 }
  0xfb   : > { %v2841_v61 = vpop.permute.xlu0 %2840  ;;  %v4678_v52 = vunpack.c.l.bf16 %v4677_v36  ;;  %v2848_v54 = vunpack.i.h.bf16 %v4164_v9 }
  0xfc   : > { %v2843_v47 = vunpack.i.h.bf16 %v2841_v61  ;;  %v2842_v13 = vunpack.i.l.bf16 %v2841_v61  ;;  %2487 = vmatmul.mubr.msk.bf16.vlgmr.msra.gmra.mxu0 %vm4612_vm11, %v1661_v3  ;;  %v853_v10 = vsel %vm838_vm3, %v4675_v62, %v2833_v0  ;;  %v852_v6 = vsel %vm838_vm3, %v4679_v38, %v2832_v4 }
  0xfd   : > { %v851_v41 = vsel %vm838_vm3, %v4678_v52, %v2832_v4  ;;  %v2847_v61 = vunpack.i.l.bf16 %v4164_v9  ;;  %vm4686_vm3 = vcmask 121856  }
  0xfe   : > { %v866_v50 = vsel %vm855_vm4, %v849_v27, %v2842_v13  ;;  %v867_v42 = vsel %vm855_vm4, %v850_v48, %v2843_v47  ;;  %v2856_v26 = vpop.permute.xlu1 %2855  ;;  %v4680_v48 = vld [vmem:[#allocation16_spill] sm:$0xff] }
  0xff   : > { %v2858_v14 = vunpack.i.h.bf16 %v2856_v26  ;;  %v2857_v32 = vunpack.i.l.bf16 %v2856_v26  ;;  %v2851_v53 = vpop.permute.xlu0 %2850  ;;  %v4681_v26 = vunpack.c.h.bf16 %v4680_v48 }
 0x100   : > { %v2853_v33 = vunpack.i.h.bf16 %v2851_v53  ;;  %v2852_v5 = vunpack.i.l.bf16 %v2851_v53 }
 0x101   : > { %v4187_v1 = vsel %vm1494_vm7, %v1488_v39, %v2857_v32  ;;  %v4190_v40 = vsel %vm1494_vm7, %v1489_v43, %v2858_v14  ;;  %v1492_v9 = vsel %vm4611_vm6, %v4681_v26, %v2848_v54  ;;  %v4683_v39 = vld [vmem:[#allocation11_spill] sm:$0xff]  ;;  %v4685_v43 = vld [vmem:[#allocation13_spill] sm:$0xff] }
 0x102   : > { %v4193_v16 = vsel %vm1494_vm7, %v1487_v11, %v2853_v33  ;;  %v4196_v28 = vsel %vm1494_vm7, %v1486_v30, %v2852_v5  ;;  %v2866_v22 = vpop.permute.xlu1 %2865  ;;  %v4684_v8 = vunpack.c.l.bf16 %v4683_v39 }
 0x103   : > { %v2868_v37 = vunpack.i.h.bf16 %v2866_v22  ;;  %v2867_v35 = vunpack.i.l.bf16 %v2866_v22  ;;  %v2861_v23 = vpop.permute.xlu0 %2860 }
 0x104   : > { %v2863_v19 = vunpack.i.h.bf16 %v2861_v23  ;;  %v2862_v2 = vunpack.i.l.bf16 %v2861_v23 }
 0x105   : > { %v4209_v63 = vsel %vm855_vm4, %v853_v10, %v2867_v35  ;;  %v4212_v58 = vsel %vm855_vm4, %v854_v12, %v2868_v37 }
 0x106   : > { %v4215_v21 = vsel %vm855_vm4, %v851_v41, %v2862_v2  ;;  %v4218_v24 = vsel %vm855_vm4, %v852_v6, %v2863_v19  ;;  %v2876_v31 = vpop.permute.xlu1 %2875  ;;  %vm4687_vm4 = vmmov %vm4686_vm3 }
 0x107   : > { %v2878_v56 = vunpack.i.h.bf16 %v2876_v31  ;;  %v2877_v60 = vunpack.i.l.bf16 %v2876_v31  ;;  %v2871_v59 = vpop.permute.xlu0 %2870 }
 0x108   : > { %v2873_v29 = vunpack.i.h.bf16 %v2871_v59  ;;  %v2872_v34 = vunpack.i.l.bf16 %v2871_v59 }
 0x109   : > { %v4223_v3 = vsel %vm872_vm5, %v866_v50, %v2877_v60  ;;  %v4226_v25 = vsel %vm872_vm5, %v867_v42, %v2878_v56  ;;  %v1493_v50 = vsel %vm4611_vm6, %v4682_v7, %v2848_v54 }
 0x10a   : > { %v4229_v47 = vsel %vm872_vm5, %v864_v44, %v2872_v34  ;;  %v4232_v13 = vsel %vm872_vm5, %v865_v51, %v2873_v29  ;;  %v2886_v57 = vpop.permute.xlu1 %2885  ;;  %v1490_v44 = vsel %vm4611_vm6, %v4684_v8, %v2847_v61  ;;  %v1491_v51 = vsel %vm4611_vm6, %v4685_v43, %v2847_v61 }
 0x10b   : > { %v2888_v15 = vunpack.i.h.bf16 %v2886_v57  ;;  %v2887_v27 = vunpack.i.l.bf16 %v2886_v57  ;;  %v2881_v17 = vpop.permute.xlu0 %2880 }
 0x10c   : > { %v2883_v55 = vunpack.i.h.bf16 %v2881_v17  ;;  %v2882_v42 = vunpack.i.l.bf16 %v2881_v17 }
 0x10d   : > { %v4245_v14 = vsel %vm1494_vm7, %v1492_v9, %v2887_v27  ;;  %v4248_v32 = vsel %vm1494_vm7, %v1493_v50, %v2888_v15 }
 0x10e   : > { %v1508_v53 = vsel %vm1494_vm7, %v1491_v51, %v2883_v55  ;;  %v1507_v20 = vsel %vm1494_vm7, %v1490_v44, %v2882_v42  ;;  %v2896_v18 = vpop.permute.xlu1 %2895  ;;  %vm4689_vm7 = vmmov %vm4686_vm3 }
 0x10f   : > { %v2891_v30 = vpop.permute.xlu0 %2890  ;;  %v2898_v10 = vunpack.i.h.bf16 %v2896_v18  ;;  %v2897_v46 = vunpack.i.l.bf16 %v2896_v18 }
 0x110   : > { %v2893_v12 = vunpack.i.h.bf16 %v2891_v30  ;;  %v2892_v19 = vunpack.i.l.bf16 %v2891_v30 }
 0x111   : > { %v1521_v56 = vsel %vm957_vm8, %v4187_v1, %v2897_v46  ;;  %v1522_v60 = vsel %vm957_vm8, %v4190_v40, %v2898_v10 }
 0x112   : > { %v2906_v0 = vpop.permute.xlu1 %2905  ;;  %v1519_v59 = vsel %vm957_vm8, %v4196_v28, %v2892_v19  ;;  %v1520_v54 = vsel %vm957_vm8, %v4193_v16, %v2893_v12 }
 0x113   : > { %v2901_v33 = vpop.permute.xlu0 %2900  ;;  %v2908_v36 = vunpack.i.h.bf16 %v2906_v0  ;;  %v2907_v52 = vunpack.i.l.bf16 %v2906_v0 }
 0x114   : > { %v2902_v41 = vunpack.i.l.bf16 %v2901_v33  ;;  %v2903_v6 = vunpack.i.h.bf16 %v2901_v33 }
 0x115   : > { %v887_v57 = vsel %vm872_vm5, %v4209_v63, %v2907_v52  ;;  %v888_v15 = vsel %vm872_vm5, %v4212_v58, %v2908_v36 }
 0x116   : > { %v2916_v5 = vpop.permute.xlu1 %2915  ;;  %v885_v1 = vsel %vm872_vm5, %v4215_v21, %v2902_v41  ;;  %v886_v28 = vsel %vm872_vm5, %v4218_v24, %v2903_v6  ;;  %vm4688_vm5 = vmmov %vm4686_vm3 }
 0x117   : > { %v2911_v49 = vpop.permute.xlu0 %2910  ;;  %v2917_v31 = vunpack.i.l.bf16 %v2916_v5  ;;  %v2918_v29 = vunpack.i.h.bf16 %v2916_v5  ;;  %vm4694_vm11 = vmmov %vm4688_vm5 }
 0x118   : > { %v2912_v34 = vunpack.i.l.bf16 %v2911_v49  ;;  %v2913_v40 = vunpack.i.h.bf16 %v2911_v49 }
 0x119   : > { %v1523_v16 = vsel %vm957_vm8, %v1507_v20, %v2917_v31  ;;  %v1524_v50 = vsel %vm957_vm8, %v1508_v53, %v2918_v29 }
 0x11a   : > { %v2926_v11 = vpop.permute.xlu1 %2925  ;;  %v898_v58 = vsel %vm889_vm9, %v4229_v47, %v2912_v34  ;;  %v899_v24 = vsel %vm889_vm9, %v4232_v13, %v2912_v34  ;;  %v900_v39 = vsel %vm889_vm9, %v4223_v3, %v2913_v40  ;;  %v901_v8 = vsel %vm889_vm9, %v4226_v25, %v2913_v40 }
 0x11b   : > { %v2921_v4 = vpop.permute.xlu0 %2920  ;;  %v2928_v17 = vunpack.i.h.bf16 %v2926_v11  ;;  %v2927_v48 = vunpack.i.l.bf16 %v2926_v11 }
 0x11c   : > { %v2923_v26 = vunpack.i.h.bf16 %v2921_v4  ;;  %v2922_v9 = vunpack.i.l.bf16 %v2921_v4 }
 0x11d   : > { %v1536_v51 = vsel %vm1527_vm10, %v1519_v59, %v2927_v48  ;;  %v1537_v47 = vsel %vm1527_vm10, %v1520_v54, %v2927_v48  ;;  %v1538_v53 = vsel %vm1527_vm10, %v1521_v56, %v2928_v17  ;;  %v1539_v20 = vsel %vm1527_vm10, %v1522_v60, %v2928_v17 }
 0x11e   : > { %v2936_v22 = vpop.permute.xlu1 %2935  ;;  %v1526_v13 = vsel %vm957_vm8, %v4248_v32, %v2923_v26  ;;  %v1525_v3 = vsel %vm957_vm8, %v4245_v14, %v2922_v9 }
 0x11f   : > { %v2931_v37 = vpop.permute.xlu0 %2930  ;;  %v2938_v7 = vunpack.i.h.bf16 %v2936_v22  ;;  %v2937_v63 = vunpack.i.l.bf16 %v2936_v22 }
 0x120   : > { %v2933_v21 = vunpack.i.h.bf16 %v2931_v37  ;;  %v2932_v55 = vunpack.i.l.bf16 %v2931_v37 }
 0x121   : > { %v915_v25 = vsel %vm4686_vm3, %v898_v58, %v2937_v63  ;;  %v916_v18 = vsel %vm4687_vm4, %v899_v24, %v2938_v7 }
 0x122   : > { %v4252_v35 = vpop.permute.xlu1 %2945  ;;  %v902_v30 = vsel %vm889_vm9, %v885_v1, %v2932_v55  ;;  %v903_v0 = vsel %vm889_vm9, %v886_v28, %v2932_v55  ;;  %v904_v33 = vsel %vm889_vm9, %v887_v57, %v2933_v21  ;;  %v905_v11 = vsel %vm889_vm9, %v888_v15, %v2933_v21 }
 0x123   : > { %v4254_v23 = vpop.permute.xlu0 %2940  ;;  %v2947_v44 = vunpack.i.l.bf16 %v4252_v35  ;;  %v2948_v5 = vunpack.i.h.bf16 %v4252_v35  ;;  %vm4690_vm9 = vcmask 326656  }
 0x124   : > { %v2943_v14 = vunpack.i.h.bf16 %v4254_v23  ;;  %v2942_v4 = vunpack.i.l.bf16 %v4254_v23  ;;  %vm4691_vm3 = vmmov %vm4690_vm9 }
 0x125   : > { %v1540_v32 = vsel %vm1527_vm10, %v1523_v16, %v2947_v44  ;;  %v1541_v37 = vsel %vm1527_vm10, %v1524_v50, %v2947_v44  ;;  %v1542_v41 = vsel %vm1527_vm10, %v1525_v3, %v2948_v5  ;;  %vm4692_vm4 = vmmov %vm4691_vm3 }
 0x126   : > { %v4256_v45 = vpop.permute.xlu1 %2955  ;;  %v917_v60 = vsel %vm4688_vm5, %v900_v39, %v2942_v4  ;;  %vm4693_vm6 = vmmov %vm4691_vm3 }
 0x127   : > { %v4258_v62 = vpop.permute.xlu0 %2950  ;;  %v2958_v10 = vunpack.i.h.bf16 %v4256_v45  ;;  %v2957_v46 = vunpack.i.l.bf16 %v4256_v45  ;;  %v1543_v45 = vsel %vm1527_vm10, %v1526_v13, %v2948_v5  ;;  %vm4695_vm10 = vmmov %vm4688_vm5 }
 0x128   : > { %v2952_v12 = vunpack.i.l.bf16 %v4258_v62  ;;  %v2953_v35 = vunpack.i.h.bf16 %v4258_v62  ;;  %v918_v62 = vsel %vm4689_vm7, %v901_v8, %v2943_v14  ;;  %vm4696_vm7 = vmmov %vm4688_vm5 }
 0x129   : > { %v1555_v54 = vsel %vm4690_vm9, %v1538_v53, %v2957_v46  ;;  %v1556_v29 = vsel %vm4691_vm3, %v1539_v20, %v2958_v10  ;;  %vm4699_vm9 = vmmov %vm4691_vm3 }
 0x12a   : > { %v4260_v2 = vpop.permute.xlu1 %2965 }
 0x12b   : > { %v4262_v38 = vpop.permute.xlu0 %2960  ;;  %v2968_v19 = vunpack.i.h.bf16 %v4260_v2  ;;  %v2967_v36 = vunpack.i.l.bf16 %v4260_v2 }
 0x12c   : > { %v2962_v52 = vunpack.i.l.bf16 %v4262_v38  ;;  %v2963_v23 = vunpack.i.h.bf16 %v4262_v38  ;;  %v1553_v38 = vsel %vm4692_vm4, %v1536_v51, %v2952_v12 }
 0x12d   : > { %v921_v57 = vsel %vm4694_vm11, %v904_v33, %v2967_v36  ;;  %v922_v15 = vsel %vm4695_vm10, %v905_v11, %v2968_v19  ;;  %vm4698_vm11 = vmmov %vm4691_vm3 }
 0x12e   : > { %v4272_v61 = vpop.permute.xlu1 %2975  ;;  %v919_v1 = vsel %vm4688_vm5, %v902_v30, %v2962_v52  ;;  %v920_v40 = vsel %vm4696_vm7, %v903_v0, %v2963_v23 }
 0x12f   : > { %v4280_v27 = vpop.permute.xlu0 %2970  ;;  %v2978_v6 = vunpack.i.h.bf16 %v4272_v61  ;;  %v2977_v31 = vunpack.i.l.bf16 %v4272_v61  ;;  %v1554_v61 = vsel %vm4693_vm6, %v1537_v47, %v2953_v35  ;;  %vm4697_vm6 = vmmov %vm4691_vm3 }
 0x130   : > { %v2972_v59 = vunpack.i.l.bf16 %v4280_v27  ;;  %v2973_v34 = vunpack.i.h.bf16 %v4280_v27 }
 0x131   : > { %v934_v28 = vsel %vm923_vm13, %v917_v60, %v2977_v31  ;;  %v935_v16 = vsel %vm923_vm13, %v918_v62, %v2978_v6 }
 0x132   : > { %v4288_v42 = vpop.permute.xlu1 %2985  ;;  %v932_v26 = vsel %vm923_vm13, %v915_v25, %v2972_v59  ;;  %v933_v50 = vsel %vm923_vm13, %v916_v18, %v2973_v34  ;;  %v1959_v59 = vld [vmem:[%s4554_s7] sm:$0xf] }
 0x133   : > { %v4297_v43 = vpop.permute.xlu0 %2980  ;;  %v2987_v17 = vunpack.i.l.bf16 %v4288_v42  ;;  %v2988_v27 = vunpack.i.h.bf16 %v4288_v42 }
 0x134   : > { %v2983_v9 = vunpack.i.h.bf16 %v4297_v43  ;;  %v2982_v7 = vunpack.i.l.bf16 %v4297_v43 }
 0x135   : > { %v1559_v51 = vsel %vm4697_vm6, %v1542_v41, %v2987_v17  ;;  %v1560_v43 = vsel %vm4698_vm11, %v1543_v45, %v2988_v27 }
 0x136   : > { %v4313_v49 = vpop.permute.xlu1 %2995  ;;  %v1557_v13 = vsel %vm4699_vm9, %v1540_v32, %v2982_v7  ;;  %v1558_v3 = vsel %vm4691_vm3, %v1541_v37, %v2983_v9  ;;  %vm1957_vm3 = vcmask 518144  }
 0x137   : > { %v2991_v22 = vpop.permute.xlu0 %2990  ;;  %v2998_v58 = vunpack.i.h.bf16 %v4313_v49  ;;  %v2997_v21 = vunpack.i.l.bf16 %v4313_v49 }
 0x138   : > { %v2992_v55 = vunpack.i.l.bf16 %v2991_v22  ;;  %v2993_v24 = vunpack.i.h.bf16 %v2991_v22 }
 0x139   : > { %v1572_v30 = vsel %vm1561_vm14, %v1555_v54, %v2997_v21  ;;  %v1573_v0 = vsel %vm1561_vm14, %v1556_v29, %v2998_v58 }
 0x13a   : > { %v3006_v56 = vpop.permute.xlu1 %3005  ;;  %v1570_v33 = vsel %vm1561_vm14, %v1553_v38, %v2992_v55  ;;  %v1571_v49 = vsel %vm1561_vm14, %v1554_v61, %v2993_v24 }
 0x13b   : > { %v3001_v2 = vpop.permute.xlu0 %3000  ;;  %v3008_v39 = vunpack.i.h.bf16 %v3006_v56  ;;  %v3007_v8 = vunpack.i.l.bf16 %v3006_v56 }
 0x13c   : > { %v3002_v44 = vunpack.i.l.bf16 %v3001_v2  ;;  %v3003_v47 = vunpack.i.h.bf16 %v3001_v2 }
 0x13d   : > { %v938_v11 = vsel %vm923_vm13, %v921_v57, %v3007_v8  ;;  %v939_v14 = vsel %vm923_vm13, %v922_v15, %v3008_v39 }
 0x13e   : > { %v3016_v48 = vpop.permute.xlu1 %3015  ;;  %v936_v4 = vsel %vm923_vm13, %v919_v1, %v3002_v44  ;;  %v937_v32 = vsel %vm923_vm13, %v920_v40, %v3003_v47  ;;  %vm4700_vm13 = vcmask 1043456  }
 0x13f   : > { %v3011_v63 = vpop.permute.xlu0 %3010  ;;  %v3018_v42 = vunpack.i.h.bf16 %v3016_v48  ;;  %v3017_v53 = vunpack.i.l.bf16 %v3016_v48  ;;  %2529 = vmatprep.subr.msk.bf16.mxu0 %vm4700_vm13, %v1959_v59  ;;  %vm4701_vm4 = vmmov %vm4700_vm13 }
 0x140   : > { %v3012_v25 = vunpack.i.l.bf16 %v3011_v63  ;;  %v3013_v5 = vunpack.i.h.bf16 %v3011_v63  ;;  %v1968_v48 = vsel %vm4701_vm4, %v1959_v59, 0 }
 0x141   : > { %v1574_v22 = vsel %vm1561_vm14, %v1557_v13, %v3017_v53  ;;  %v4368_v37 = vsel %vm1561_vm14, %v1558_v3, %v3018_v42  ;;  %2519 = vmatpush3.bf16.msra.mxu0 %v1968_v48 }
 0x142   : > { %v3026_v20 = vpop.permute.xlu1 %3025  ;;  %v949_v12 = vsel %vm940_vm15, %v932_v26, %v3012_v25  ;;  %v950_v41 = vsel %vm940_vm15, %v933_v50, %v3012_v25  ;;  %v951_v23 = vsel %vm940_vm15, %v934_v28, %v3013_v5  ;;  %v952_v6 = vsel %vm940_vm15, %v935_v16, %v3013_v5 }
 0x143   : > { %v3021_v18 = vpop.permute.xlu0 %3020  ;;  %v3027_v10 = vunpack.i.l.bf16 %v3026_v20  ;;  %v3028_v35 = vunpack.i.h.bf16 %v3026_v20 }
 0x144   : > { %v3023_v31 = vunpack.i.h.bf16 %v3021_v18  ;;  %v3022_v56 = vunpack.i.l.bf16 %v3021_v18 }
 0x145   : > { %v1587_v2 = vsel %vm1578_vm2, %v1570_v33, %v3027_v10  ;;  %v1588_v61 = vsel %vm1578_vm2, %v1571_v49, %v3027_v10  ;;  %v1589_v57 = vsel %vm1578_vm2, %v1572_v30, %v3028_v35  ;;  %v1590_v15 = vsel %vm1578_vm2, %v1573_v0, %v3028_v35 }
 0x146   : > { %v3036_v46 = vpop.permute.xlu1 %3035  ;;  %v1576_v26 = vsel %vm1561_vm14, %v1559_v51, %v3022_v56  ;;  %v1577_v27 = vsel %vm1561_vm14, %v1560_v43, %v3023_v31 }
 0x147   : > { %v3038_v19 = vunpack.i.h.bf16 %v3036_v46  ;;  %v3037_v36 = vunpack.i.l.bf16 %v3036_v46  ;;  %v3031_v52 = vpop.permute.xlu0 %3030 }
 0x148   : > { %v3032_v62 = vunpack.i.l.bf16 %v3031_v52  ;;  %v3033_v38 = vunpack.i.h.bf16 %v3031_v52 }
 0x149   : > { %v966_v45 = vsel %vm957_vm8, %v949_v12, %v3037_v36  ;;  %v967_v60 = vsel %vm957_vm8, %v950_v41, %v3038_v19 }
 0x14a   : > { %v1003_v54 = vrot.slane %v966_v45, 7  ;;  %v1004_v29 = vrot.slane %v967_v60, 7  ;;  %v4380_v34 = vpop.permute.xlu1 %3045  ;;  %v953_v9 = vsel %vm940_vm15, %v936_v4, %v3032_v62  ;;  %v954_v63 = vsel %vm940_vm15, %v937_v32, %v3032_v62 }
 0x14b   : > { %v3047_v1 = vunpack.i.l.bf16 %v4380_v34  ;;  %v3041_v40 = vpop.permute.xlu0 %3040  ;;  %v3048_v7 = vunpack.i.h.bf16 %v4380_v34  ;;  %v955_v50 = vsel %vm940_vm15, %v938_v11, %v3033_v38  ;;  %v956_v47 = vsel %vm940_vm15, %v939_v14, %v3033_v38 }
 0x14c   : > { %v3043_v28 = vunpack.i.h.bf16 %v3041_v40  ;;  %v3042_v16 = vunpack.i.l.bf16 %v3041_v40  ;;  %v1005_v17 = vsel %vm990_vm0, %v1003_v54, %v1004_v29 }
 0x14d   : > { %v1591_v42 = vsel %vm1578_vm2, %v1574_v22, %v3047_v1  ;;  %v1593_v43 = vsel %vm1578_vm2, %v1576_v26, %v3048_v7  ;;  %v1594_v35 = vsel %vm1578_vm2, %v1577_v27, %v3048_v7 }
 0x14e   : > { %v968_v58 = vsel %vm957_vm8, %v951_v23, %v3042_v16  ;;  %v969_v21 = vsel %vm957_vm8, %v952_v6, %v3043_v28  ;;  %v3056_v55 = vpop.permute.xlu1 %3055 }
 0x14f   : > { %v1006_v24 = vrot.slane %v968_v58, 7  ;;  %v1007_v39 = vrot.slane %v969_v21, 7  ;;  %v3058_v8 = vunpack.i.h.bf16 %v3056_v55  ;;  %v3057_v44 = vunpack.i.l.bf16 %v3056_v55  ;;  %v3051_v51 = vpop.permute.xlu0 %3050 }
 0x150   : > { %v3053_v53 = vunpack.i.h.bf16 %v3051_v51  ;;  %v3052_v20 = vunpack.i.l.bf16 %v3051_v51  ;;  %v4434_v51 = vld [vmem:[%s4551_s4] ss:$0 sm:$0xff] }
 0x151   : > { %v1606_v13 = vsel %vm1595_vm1, %v1589_v57, %v3057_v44  ;;  %v1607_v3 = vsel %vm1595_vm1, %v1590_v15, %v3058_v8  ;;  %v1008_v25 = vsel %vm990_vm0, %v1006_v24, %v1007_v39  ;;  %v1592_v57 = vsel %vm1578_vm2, %v4368_v37, %v3047_v1 }
 0x152   : > { %v1643_v18 = vrot.slane %v1606_v13, 7  ;;  %v1644_v30 = vrot.slane %v1607_v3, 7  ;;  %v1604_v0 = vsel %vm1595_vm1, %v1587_v2, %v3052_v20  ;;  %v1605_v33 = vsel %vm1595_vm1, %v1588_v61, %v3053_v53  ;;  %v3066_v5 = vpop.permute.xlu1 %3065 }
 0x153   : > { %v1640_v49 = vrot.slane %v1604_v0, 7  ;;  %v1641_v11 = vrot.slane %v1605_v33, 7  ;;  %v3068_v14 = vunpack.i.h.bf16 %v3066_v5  ;;  %v3067_v4 = vunpack.i.l.bf16 %v3066_v5  ;;  %v3061_v32 = vpop.permute.xlu0 %3060 }
 0x154   : > { %v3063_v22 = vunpack.i.h.bf16 %v3061_v32  ;;  %v3062_v10 = vunpack.i.l.bf16 %v3061_v32  ;;  %v1025_v46 = vpack.c.bf16 %v1008_v25, %v1005_v17  ;;  %v1645_v12 = vsel %vm990_vm0, %v1643_v18, %v1644_v30 }
 0x155   : > { %v972_v19 = vsel %vm957_vm8, %v955_v50, %v3067_v4  ;;  %v973_v36 = vsel %vm957_vm8, %v956_v47, %v3068_v14  ;;  %v1642_v52 = vsel %vm990_vm0, %v1640_v49, %v1641_v11  ;;  %v3113_v11 = vmov 0.0|0.0  }
 0x156   : > { %v1012_v41 = vrot.slane %v972_v19, 7  ;;  %v1013_v23 = vrot.slane %v973_v36, 7  ;;  %v970_v6 = vsel %vm957_vm8, %v953_v9, %v3062_v10  ;;  %v971_v31 = vsel %vm957_vm8, %v954_v63, %v3063_v22  ;;  %2502 = vmatprep.mubr.msk.bf16.mxu1 %vm1784_vm12, %v1025_v46  ;;  %v3076_v56 = vpop.permute.xlu1 %3075  ;;  %v1896_v22 = vld [vmem:[%s4553_s6] sm:$0x7] }
 0x157   : > { %v1009_v45 = vrot.slane %v970_v6, 7  ;;  %v1010_v60 = vrot.slane %v971_v31, 7  ;;  %v3078_v62 = vunpack.i.h.bf16 %v3076_v56  ;;  %v3077_v59 = vunpack.i.l.bf16 %v3076_v56  ;;  %v3071_v2 = vpop.permute.xlu0 %3070 }
 0x158   : > { %v3073_v54 = vunpack.i.h.bf16 %v3071_v2  ;;  %v3072_v29 = vunpack.i.l.bf16 %v3071_v2  ;;  %v1662_v38 = vpack.c.bf16 %v1645_v12, %v1642_v52  ;;  %v1014_v61 = vsel %vm990_vm0, %v1012_v41, %v1013_v23 }
 0x159   : > { %v1610_v15 = vsel %vm1595_vm1, %v1593_v43, %v3077_v59  ;;  %v1611_v40 = vsel %vm1595_vm1, %v1594_v35, %v3078_v62  ;;  %v1011_v28 = vsel %vm990_vm0, %v1009_v45, %v1010_v60  ;;  %vm4702_vm8 = vcmask 588800  }
 0x15a   : > { %v1649_v16 = vrot.slane %v1610_v15, 7  ;;  %v1650_v17 = vrot.slane %v1611_v40, 7  ;;  %v1608_v48 = vsel %vm1595_vm1, %v1591_v42, %v3072_v29  ;;  %v1609_v26 = vsel %vm1595_vm1, %v1592_v57, %v3073_v54  ;;  %2490 = vmatprep.mubr.msk.bf16.mxu0 %vm4702_vm8, %v1662_v38  ;;  %vm4703_vm14 = vmmov %vm4702_vm8 }
 0x15b   : > { %v1646_v27 = vrot.slane %v1608_v48, 7  ;;  %v1647_v9 = vrot.slane %v1609_v26, 7  ;;  %v1026_v34 = vpack.c.bf16 %v1014_v61, %v1011_v28  ;;  %v3111_v63 = vmov 0.0   ;;  %v2262_v48 = vld [vmem:[%s4555_s8] ss:$0 sm:$0xff] }
 0x15c   : > { %v1651_v7 = vsel %vm990_vm0, %v1649_v16, %v1650_v17  ;;  %2506 = vmatprep.subr.bf16.mxu1 %v3111_v63  ;;  %vm3112_vm1 = vmmov 0   ;;  %v2267_v14 = vcombine.low %v3113_v11, %v3113_v11  ;;  %v2268_v4 = vcombine.high %v3113_v11, %v3113_v11  ;;  %v1895_v17 = vld [vmem:[%s4552_s5] sm:$0x3] }
 0x15d   : > { %2503 = vmatmul.mubr.msk.bf16.gmra.mxu1 %vm1784_vm12, %v1026_v34  ;;  %v1648_v37 = vsel %vm990_vm0, %v1646_v27, %v1647_v9  ;;  %vm4704_vm12 = vcmask 64512   ;;  %vm2107_vm0 = vcmask 19456   ;;  %v3114_v32 = vmov 0  }
 0x15e   : > { %v1663_v1 = vpack.c.bf16 %v1651_v7, %v1648_v37  ;;  %2514 = vmatprep.mubr.msk.bf16.mxu1 %vm3112_vm1, %v3111_v63  ;;  %vm4705_vm15 = vmmov %vm4704_vm12  ;;  %2108 = vst.msk [vmem:[%s4453_s30] sm:$0xf] %vm2107_vm0, %v2267_v14  ;;  %3079 = vset.pattern.permute.xlu0 %v3114_v32 }
 0x15f   : > { %2109 = vst.msk [vmem:[%s4453_s30 + $0x4] sm:$0xf] %vm2107_vm0, %v2268_v4  ;;  %2110 = vst.msk [vmem:[%s4453_s30 + $0x8] sm:$0xf] %vm2107_vm0, %v2267_v14  ;;  %1899 = vperm.xlu0 %3079, %v1896_v22  }
 0x160   : > { %2491 = vmatmul.mubr.msk.bf16.gmra.mxu0 %vm4703_vm14, %v1663_v1  ;;  %2111 = vst.msk [vmem:[%s4453_s30 + $0xc] sm:$0xf] %vm2107_vm0, %v3113_v11  ;;  %2113 = vst.msk [vmem:[%s4453_s30 + $0x14] sm:$0xf] %vm2107_vm0, %v2267_v14 }
 0x161   : > { %2114 = vst.msk [vmem:[%s4453_s30 + $0x18] sm:$0xf] %vm2107_vm0, %v3113_v11  ;;  %2116 = vst.msk [vmem:[%s4453_s30 + $0x20] sm:$0xf] %vm2107_vm0, %v2267_v14 }
 0x162   : > { %2117 = vst.msk [vmem:[%s4453_s30 + $0x24] sm:$0xf] %vm2107_vm0, %v3113_v11  ;;  %2119 = vst.msk [vmem:[%s4453_s30 + $0x2c] sm:$0xf] %vm2107_vm0, %v2267_v14 }
 0x163   : > { %2120 = vst.msk [vmem:[%s4453_s30 + $0x30] sm:$0xf] %vm2107_vm0, %v3113_v11  ;;  %2122 = vst.msk [vmem:[%s4453_s30 + $0x38] sm:$0xf] %vm2107_vm0, %v2267_v14 }
 0x164   : > { %2123 = vst.msk [vmem:[%s4453_s30 + $0x3c] sm:$0xf] %vm2107_vm0, %v3113_v11  ;;  %2125 = vst.msk [vmem:[%s4453_s30 + $0x44] sm:$0xf] %vm2107_vm0, %v2267_v14 }
 0x165   : > { %2126 = vst.msk [vmem:[%s4453_s30 + $0x48] sm:$0xf] %vm2107_vm0, %v3113_v11  ;;  %2128 = vst.msk [vmem:[%s4453_s30 + $0x50] sm:$0xf] %vm2107_vm0, %v2267_v14 }
 0x166   : > { %2129 = vst.msk [vmem:[%s4453_s30 + $0x54] sm:$0xf] %vm2107_vm0, %v3113_v11  ;;  %2131 = vst.msk [vmem:[%s4453_s30 + $0x5c] sm:$0xf] %vm2107_vm0, %v2267_v14 }
 0x167   : > { %2132 = vst.msk [vmem:[%s4453_s30 + $0x60] sm:$0xf] %vm2107_vm0, %v3113_v11  ;;  %2134 = vst.msk [vmem:[%s4453_s30 + $0x68] sm:$0xf] %vm2107_vm0, %v2267_v14 }
 0x168   : > { %2135 = vst.msk [vmem:[%s4453_s30 + $0x6c] sm:$0xf] %vm2107_vm0, %v2267_v14  ;;  %2136 = vst.msk [vmem:[%s4453_s30 + $0x70] sm:$0xf] %vm2107_vm0, %v2268_v4 }
 0x169   : > { %2137 = vst.msk [vmem:[%s4453_s30 + $0x74] sm:$0xf] %vm2107_vm0, %v2267_v14  ;;  %vm4706_vm2 = vmmov %vm4704_vm12 }
 0x16a   : > { %vm4707_vm10 = vmmov %vm4706_vm2 }
 0x16b   : > { %vm4708_vm5 = vmmov %vm4706_vm2 }
 0x16c   : > { %vm4709_vm7 = vmmov %vm4706_vm2 }
 0x16d   : > { %vm4710_vm6 = vmmov %vm4706_vm2 }
 0x16e   : > { %vm4711_vm11 = vmmov %vm4706_vm2 }
 0x16f   : > { %vm4712_vm9 = vmmov %vm4706_vm2 }
 0x1ba   : > { %v2500_v50 = vpop.f32.mrf.mxu1 }
 0x1bc   : > { %v1837_v58 = vpop.f32.mrf.mxu1  ;;  %v2488_v21 = vpop.f32.mrf.mxu0 }
 0x1bd   : > { %v1846_v8 = vadd.f32 %v2500_v50, %v2488_v21 }
 0x1be   : > { %v2501_v55 = vpop.f32.mrf.mxu1  ;;  %v1742_v24 = vpop.f32.mrf.mxu0 }
 0x1bf   : > { %v1838_v39 = vadd.f32 %v1837_v58, %v1742_v24  ;;  %v1877_v3 = vadd.f32 %v4434_v51, %v1846_v8 }
 0x1c0   : > { %v2489_v44 = vpop.f32.mrf.mxu0  ;;  %v1840_v42 = vpop.f32.mrf.mxu1 }
 0x1c1   : > { %v1849_v47 = vadd.f32 %v2501_v55, %v2489_v44  ;;  %v1875_v20 = vadd.f32 %v4434_v51, %v1838_v39  ;;  %v1885_v33 = vmax.f32 %v1877_v3, 0.0 }
 0x1c2   : > { %v1745_v53 = vpop.f32.mrf.mxu0 }
 0x1c3   : > { %v1878_v43 = vadd.f32 %v4434_v51, %v1849_v47  ;;  %v1841_v13 = vadd.f32 %v1840_v42, %v1745_v53  ;;  %v1883_v30 = vmax.f32 %v1875_v20, 0.0 }
 0x1c5   : > { %v1876_v25 = vadd.f32 %v4434_v51, %v1841_v13  ;;  %v1886_v18 = vmax.f32 %v1878_v43, 0.0 }
 0x1c7   : > { %v1884_v0 = vmax.f32 %v1876_v25, 0.0  ;;  %v4443_v49 = vpack.c.bf16 %v1886_v18, %v1885_v33 }
 0x1c9   : > { %v4441_v5 = vpack.c.bf16 %v1884_v0, %v1883_v30  ;;  %v1909_v28 = vsel %vm4710_vm6, %v4443_v49, 0 }
 0x1cb   : > { %2520 = vmatprep.mubr.msk.bf16.mxu0 %vm4704_vm12, %v4441_v5  ;;  %v1906_v16 = vsel %vm4711_vm11, %v4441_v5, 0 }
 0x1cc   : > { %2521 = vmatmul.mubr.msk.bf16.vlgmr.msra.gmra.mxu0 %vm4705_vm15, %v4443_v49 }
 0x1da   : > { %v1900_v25 = vpop.permute.xlu0 %1899 }
 0x21d   : > { %v2504_v10 = vpop.f32.mrf.mxu1 }
 0x21f   : > { %v1853_v46 = vpop.f32.mrf.mxu1 }
 0x220   : > { %v2492_v12 = vpop.f32.mrf.mxu0 }
 0x221   : > { %v1862_v35 = vadd.f32 %v2504_v10, %v2492_v12  ;;  %v2505_v19 = vpop.f32.mrf.mxu1 }
 0x222   : > { %v1758_v36 = vpop.f32.mrf.mxu0 }
 0x223   : > { %v1854_v52 = vadd.f32 %v1853_v46, %v1758_v36  ;;  %v1881_v23 = vadd.f32 %v4434_v51, %v1862_v35  ;;  %v1856_v31 = vpop.f32.mrf.mxu1 }
 0x224   : > { %v2493_v41 = vpop.f32.mrf.mxu0 }
 0x225   : > { %v1865_v6 = vadd.f32 %v2505_v19, %v2493_v41  ;;  %v1879_v45 = vadd.f32 %v4434_v51, %v1854_v52  ;;  %v1889_v59 = vmax.f32 %v1881_v23, 0.0 }
 0x226   : > { %v1761_v56 = vpop.f32.mrf.mxu0 }
 0x227   : > { %v1882_v60 = vadd.f32 %v4434_v51, %v1865_v6  ;;  %v1857_v62 = vadd.f32 %v1856_v31, %v1761_v56  ;;  %v1887_v29 = vmax.f32 %v1879_v45, 0.0 }
 0x229   : > { %v1890_v2 = vmax.f32 %v1882_v60, 0.0  ;;  %v1880_v54 = vadd.f32 %v4434_v51, %v1857_v62 }
 0x22b   : > { %v1894_v38 = vpack.c.bf16 %v1890_v2, %v1889_v59  ;;  %v1888_v61 = vmax.f32 %v1880_v54, 0.0 }
 0x22d   : > { %v1893_v57 = vpack.c.bf16 %v1888_v61, %v1887_v29  ;;  %v1915_v15 = vsel %vm4706_vm2, %v1894_v38, 0 }
 0x22e   : > { %2507 = vmatpush3.bf16.xpose.msra.mxu1 %v1915_v15 }
 0x22f   : > { %2524 = vmatprep.mubr.msk.bf16.mxu0 %vm4707_vm10, %v1893_v57  ;;  %2508 = vmatprep.subr.bf16.mxu1 %v3111_v63  ;;  %v1912_v40 = vsel %vm4709_vm7, %v1893_v57, 0 }
 0x230   : > { %2525 = vmatmul.mubr.msk.bf16.gmra.mxu0 %vm4708_vm5, %v1894_v38 }
 0x236   : > { %2509 = vmatpush3.bf16.xpose.msra.mxu1 %v1912_v40 }
 0x237   : > { %2510 = vmatprep.subr.bf16.mxu1 %v3111_v63 }
 0x23e   : > { %2511 = vmatpush3.bf16.xpose.msra.mxu1 %v1909_v28 }
 0x23f   : > { %2512 = vmatprep.subr.bf16.mxu1 %v3111_v63 }
 0x246   : > { %2513 = vmatpush3.bf16.xpose.msra.mxu1 %v1906_v16 }
 0x24d   : > { %2515 = vmatmul.mubr.msk.bf16.vlgmr.msra.gmra.mxu1 %vm4712_vm9, %v1895_v17 }
 0x28c   : > { %v2522_v26 = vpop.f32.mrf.mxu0 }
 0x28d   : > { %v2013_v27 = vadd.f32 %v2522_v26, %v2262_v48 }
 0x28e   : > { %v2004_v9 = vpop.f32.mrf.mxu0 }
 0x28f   : > { %v2292_v34 = vpack.c.bf16 %v2013_v27, %v2013_v27  ;;  %v2005_v7 = vadd.f32 %v2262_v48, %v2004_v9 }
 0x290   : > { %v2523_v37 = vpop.f32.mrf.mxu0 }
 0x291   : > { %2118 = vst.msk [vmem:[%s4453_s30 + $0x28] sm:$0xf] %vm2107_vm0, %v2292_v34  ;;  %v2288_v1 = vpack.c.bf16 %v2005_v7, %v2005_v7  ;;  %v2016_v63 = vadd.f32 %v2523_v37, %v2262_v48 }
 0x292   : > { %v2007_v50 = vpop.f32.mrf.mxu0 }
 0x293   : > { %2112 = vst.msk [vmem:[%s4453_s30 + $0x10] sm:$0xf] %vm2107_vm0, %v2288_v1  ;;  %v2294_v58 = vpack.c.bf16 %v2016_v63, %v2016_v63  ;;  %v2008_v21 = vadd.f32 %v2262_v48, %v2007_v50 }
 0x295   : > { %2121 = vst.msk [vmem:[%s4453_s30 + $0x34] sm:$0xf] %vm2107_vm0, %v2294_v58  ;;  %v2290_v55 = vpack.c.bf16 %v2008_v21, %v2008_v21 }
 0x297   : > { %2115 = vst.msk [vmem:[%s4453_s30 + $0x1c] sm:$0xf] %vm2107_vm0, %v2290_v55 }
 0x2f0   : > { %v2526_v24 = vpop.f32.mrf.mxu0 }
 0x2f1   : > { %v2029_v39 = vadd.f32 %v2526_v24, %v2262_v48 }
 0x2f2   : > { %v2020_v8 = vpop.f32.mrf.mxu0 }
 0x2f3   : > { %v2300_v44 = vpack.c.bf16 %v2029_v39, %v2029_v39  ;;  %v2021_v51 = vadd.f32 %v2262_v48, %v2020_v8 }
 0x2f4   : > { %v2527_v47 = vpop.f32.mrf.mxu0 }
 0x2f5   : > { %2130 = vst.msk [vmem:[%s4453_s30 + $0x58] sm:$0xf] %vm2107_vm0, %v2300_v44  ;;  %v2296_v42 = vpack.c.bf16 %v2021_v51, %v2021_v51  ;;  %v2032_v53 = vadd.f32 %v2527_v47, %v2262_v48 }
 0x2f6   : > { %v2023_v20 = vpop.f32.mrf.mxu0 }
 0x2f7   : > { %2124 = vst.msk [vmem:[%s4453_s30 + $0x40] sm:$0xf] %vm2107_vm0, %v2296_v42  ;;  %v2302_v43 = vpack.c.bf16 %v2032_v53, %v2032_v53  ;;  %v2024_v13 = vadd.f32 %v2262_v48, %v2023_v20 }
 0x2f9   : > { %2133 = vst.msk [vmem:[%s4453_s30 + $0x64] sm:$0xf] %vm2107_vm0, %v2302_v43  ;;  %v2298_v3 = vpack.c.bf16 %v2024_v13, %v2024_v13 }
 0x2fb   : > { %2127 = vst.msk [vmem:[%s4453_s30 + $0x4c] sm:$0xf] %vm2107_vm0, %v2298_v3 }
 0x30d   : > { %v1951_v18 = vpop.f32.mrf.mxu1 }
 0x30e   : > { %v1952_v30 = vadd.f32 %v1951_v18, %v1900_v25 }
 0x30f   : > { %v2516_v0 = vpop.f32.mrf.mxu1 }
 0x310   : > { %1958 = vst.msk [vmem:[%s385_s21] sm:$0x7] %vm1957_vm3, %v1952_v30 }
 0x311   : > { %v1954_v33 = vpop.f32.mrf.mxu1 }
 0x313   : > { %v2517_v5 = vpop.f32.mrf.mxu1 }
 0x314 PF: > { %s21_s13 = sadd.s32 1, %s3093_s13  }
 0x315   : > { %p18_p4 = scmp.ge.s32.totalorder %s21_s13, 4  }
 0x317   :  { %20 = sbr.rel (!%p18_p4) target bundleno = 1 (0x1), region = 101 }

// kernel: _lambda_.7
= control target key start
LH: loop header
LB: loop body
LE: loop exit
PB: predicated region body
PF: predicated region fallthrough
CT: control target
= control target key end

     0   :  { %s4484_s18 = smov 0   ;;  %s7237_s0 = inlined_call_operand.vmem [shape: f32[2,16,16,4], index: 0, kind: input, shape index: {}]   ;;  %s7238_s1 = inlined_call_operand.vmem [shape: bf16[36,8], index: 1, kind: input, shape index: {}]   ;;  %s7239_s2 = inlined_call_operand.vmem [shape: f32[1,8], index: 2, kind: input, shape index: {}, may-alias: {2,4}]   ;;  %s7240_s3 = inlined_call_operand.vmem [shape: bf16[72,8], index: 3, kind: input, shape index: {}]   ;;  %s7241_s4 = inlined_call_operand.vmem [shape: f32[1,8], index: 4, kind: input, shape index: {}, may-alias: {2,4}]   ;;  %s7242_s5 = inlined_call_operand.vmem [shape: bf16[2,10,24,8], index: 5, kind: output, shape index: {}]  }
   0x1 LB: > { %s3135_s19 = sadd.s32 4294967295, %s4438_s18   ;;  %p3139_p0 = scmp.ge.s32.totalorder %s4438_s18, 1  ;;  %s4438_s18 = sphi %s4484_s18, %s15_s18  }
   0x2   : > { %p187_p1 = scmp.lt.s32.totalorder %s4438_s18, 3 }
   0x4   : > { %p188_p2 = pnand %p3139_p0, %p187_p1 }
   0x6   : > { %191 = sbr.rel (%p188_p2) target bundleno = 1072 (0x430), region = 40 }
   0xb   : > { %p215_p3 = scmp.lt.s32.totalorder %s3135_s19, 1  ;;  %v7243_v0 = vmov 0.0   ;;  %s4441_s21 = smov 4   ;;  %vm294_vm0 = vcmask 1046528   ;;  %vm483_vm1 = vcmask 1045504   ;;  %vm2097_vm2 = vcmask 1041408  }
   0xc   : > { %v4493_v1 = vrot.slane %v7243_v0, 1  ;;  %s4442_s25 = smov 8   ;;  %s4443_s26 = smov 12   ;;  %vm1458_vm3 = vcmask 31744   ;;  %vm1555_vm4 = vcmask 97280   ;;  %vm1506_vm5 = vcmask 64512  }
   0xd   : > { %s7786_s19 = smov (!%p215_p3, %s3135_s19), 1  ;;  %s4444_s27 = smov 16   ;;  %vm1604_vm6 = vcmask 130048   ;;  %vm1653_vm7 = vcmask 162816   ;;  %vm1702_vm8 = vcmask 195584   ;;  %vm1751_vm9 = vcmask 228352  }
   0xe   : > { %7408 = vst [vmem:[#allocation3_spill] sm:$0xff] %v4493_v1  ;;  %v3326_v2 = vpack.i.bf16 %v4493_v1, %v4493_v1  ;;  %s3193_s20 = sshll.u32 %s7786_s19, 8  ;;  %s4445_s28 = smov 20   ;;  %vm1800_vm10 = vcmask 261120   ;;  %vm1897_vm11 = vcmask 1040384   ;;  %vm2048_vm12 = vcmask 293888  }
   0xf   : > { %s4504_s24 = scalar_lea.vmem %s7237_s0, %s3193_s20  ;;  %s4446_s6 = smov 24   ;;  %vm2900_vm13 = vcmask 1043456   ;;  %vm2733_vm14 = vcmask 326656   ;;  %vm2750_vm15 = vcmask 392192  }
  0x10   : > { %3327 = vrot.lane.b32.xlu0 %v3326_v2, %s4441_s21  ;;  %v4507_v3 = vld [vmem:[%s4504_s24 + $0x8] sm:$0xff]  ;;  %v4510_v4 = vld [vmem:[%s4504_s24 + $0x10] sm:$0xff]  ;;  %v4513_v5 = vld [vmem:[%s4504_s24] sm:$0xff]  ;;  %s4447_s11 = smov 28   ;;  %s4448_s12 = smov 32  }
  0x11   : > { %v298_v6 = vrot.slane %v4507_v3, 1  ;;  %v4517_v7 = vrot.slane %v4510_v4, 1  ;;  %v297_v8 = vrot.slane %v4513_v5, 1  ;;  %v4521_v9 = vld [vmem:[%s4504_s24 + $0x28] sm:$0xff]  ;;  %v4524_v10 = vld [vmem:[%s4504_s24 + $0x30] sm:$0xff]  ;;  %v4527_v11 = vld [vmem:[%s4504_s24 + $0x20] sm:$0xff] }
  0x12   : > { %v4530_v12 = vrot.slane %v4521_v9, 1  ;;  %v4533_v13 = vrot.slane %v4524_v10, 1  ;;  %v4536_v14 = vrot.slane %v4527_v11, 1  ;;  %v4539_v15 = vld [vmem:[%s4504_s24 + $0x18] sm:$0xff]  ;;  %v4555_v21 = vld [vmem:[%s4504_s24 + $0x40] sm:$0xff]  ;;  %v4558_v22 = vld [vmem:[%s4504_s24 + $0x48] sm:$0xff] }
  0x13   : > { %v4542_v16 = vld [vmem:[%s4504_s24 + $0x38] sm:$0xff]  ;;  %v4545_v17 = vpack.i.bf16 %v4517_v7, %v298_v6  ;;  %v299_v18 = vsel %vm294_vm0, %v297_v8, %v298_v6  ;;  %v4549_v19 = vrot.slane %v4539_v15, 1  ;;  %v4585_v28 = vrot.slane %v4555_v21, 1  ;;  %v4596_v31 = vld [vmem:[%s4504_s24 + $0x50] sm:$0xff]  ;;  %v4602_v33 = vld [vmem:[%s4504_s24 + $0x60] sm:$0xff]  ;;  %s4449_s15 = smov 40  }
  0x14   : > { %7409 = vst [vmem:[#allocation4_spill] sm:$0xff] %v4533_v13  ;;  %7410 = vst [vmem:[#allocation5_spill] sm:$0xff] %v4542_v16  ;;  %v4552_v20 = vrot.slane %v4542_v16, 1  ;;  %v4560_v23 = vpack.i.bf16 %v299_v18, %v297_v8  ;;  %v4565_v24 = vsel %vm294_vm0, %v4536_v14, %v4530_v12  ;;  %v4571_v25 = vpack.i.bf16 %v4533_v13, %v4530_v12  ;;  %v4599_v32 = vld [vmem:[%s4504_s24 + $0x58] sm:$0xff]  ;;  %v4605_v34 = vld [vmem:[%s4504_s24 + $0x68] sm:$0xff]  ;;  %s4450_s16 = smov 48  }
  0x15   : > { %7411 = vst [vmem:[#allocation6_spill] sm:$0xff] %v4545_v17  ;;  %3332 = vrot.lane.b32.xlu1 %v4545_v17, %s4441_s21  ;;  %v4577_v26 = vpack.i.bf16 %v4565_v24, %v4536_v14  ;;  %v4582_v27 = vsel %vm294_vm0, %v4517_v7, %v4549_v19  ;;  %7416 = vst [vmem:[#allocation11_spill] sm:$0xff] %v4585_v28  ;;  %v4588_v29 = vrot.slane %v4558_v22, 1  ;;  %v4625_v38 = vrot.slane %v4596_v31, 1  ;;  %v4637_v42 = vld [vmem:[%s4504_s24 + $0x70] sm:$0xff]  ;;  %v4640_v43 = vld [vmem:[%s4504_s24 + $0x78] sm:$0xff] }
  0x16   : > { %7412 = vst [vmem:[#allocation7_spill] sm:$0xff] %v4552_v20  ;;  %7413 = vst [vmem:[#allocation8_spill] sm:$0xff] %v4560_v23  ;;  %3342 = vrot.lane.b32.xlu0 %v4560_v23, %s4441_s21  ;;  %v4593_v30 = vsel %vm294_vm0, %v4533_v13, %v4552_v20  ;;  %v4611_v35 = vpack.i.bf16 %v4549_v19, %v4582_v27  ;;  %v4628_v39 = vrot.slane %v4599_v32, 1  ;;  %v4631_v40 = vrot.slane %v4602_v33, 1  ;;  %v4671_v50 = vld [vmem:[%s4504_s24 + $0x80] sm:$0xff]  ;;  %v4674_v51 = vld [vmem:[%s4504_s24 + $0x88] sm:$0xff] }
  0x17   : > { %7414 = vst [vmem:[#allocation9_spill] sm:$0xff] %v4571_v25  ;;  %7415 = vst [vmem:[#allocation10_spill] sm:$0xff] %v4577_v26  ;;  %v4617_v36 = vpack.i.bf16 %v4552_v20, %v4593_v30  ;;  %v4622_v37 = vsel %vm294_vm0, %v4585_v28, %v4588_v29  ;;  %v4634_v41 = vrot.slane %v4605_v34, 1  ;;  %v4652_v45 = vpack.i.bf16 %v4625_v38, %v4588_v29  ;;  %v4700_v57 = vld [vmem:[%s4504_s24 + $0x90] sm:$0xff]  ;;  %v4703_v58 = vld [vmem:[%s4504_s24 + $0x98] sm:$0xff]  ;;  %s4451_s17 = smov 56  }
  0x18   : > { %7417 = vst [vmem:[#allocation12_spill] sm:$0xff] %v4588_v29  ;;  %7418 = vst [vmem:[#allocation13_spill] sm:$0xff] %v4593_v30  ;;  %v4646_v44 = vpack.i.bf16 %v4622_v37, %v4585_v28  ;;  %v4657_v46 = vsel %vm294_vm0, %v4625_v38, %v4628_v39  ;;  %v4665_v48 = vrot.slane %v4637_v42, 1  ;;  %v4668_v49 = vrot.slane %v4640_v43, 1  ;;  %v4706_v59 = vld [vmem:[%s4504_s24 + $0xa0] sm:$0xff]  ;;  %v4709_v60 = vld [vmem:[%s4504_s24 + $0xa8] sm:$0xff] }
  0x19   : > { %3337 = vrot.lane.b32.xlu1 %v4571_v25, %s4441_s21  ;;  %7419 = vst [vmem:[#allocation14_spill] sm:$0xff] %v4611_v35  ;;  %7420 = vst [vmem:[#allocation15_spill] sm:$0xff] %v4617_v36  ;;  %v4662_v47 = vsel %vm294_vm0, %v4631_v40, %v4634_v41  ;;  %v4680_v52 = vpack.i.bf16 %v4628_v39, %v4657_v46  ;;  %v4689_v54 = vrot.slane %v4671_v50, 1  ;;  %v4692_v55 = vrot.slane %v4674_v51, 1  ;;  %v4741_v0 = vld [vmem:[%s4504_s24 + $0xb0] sm:$0xff]  ;;  %v4744_v1 = vld [vmem:[%s4504_s24 + $0xb8] sm:$0xff] }
  0x1a   : > { %3352 = vrot.lane.b32.xlu0 %v4577_v26, %s4441_s21  ;;  %7421 = vst [vmem:[#allocation16_spill] sm:$0xff] %v4622_v37  ;;  %7422 = vst [vmem:[#allocation17_spill] sm:$0xff] %v4625_v38  ;;  %v4686_v53 = vpack.i.bf16 %v4662_v47, %v4631_v40  ;;  %v4697_v56 = vsel %vm294_vm0, %v4665_v48, %v4668_v49  ;;  %v4715_v61 = vpack.i.bf16 %v4665_v48, %v4634_v41  ;;  %s4452_s20 = smov 64  }
  0x1b   : > { %7423 = vst [vmem:[#allocation18_spill] sm:$0xff] %v4628_v39  ;;  %7424 = vst [vmem:[#allocation19_spill] sm:$0xff] %v4631_v40  ;;  %v4721_v62 = vpack.i.bf16 %v4668_v49, %v4697_v56  ;;  %v4726_v63 = vsel %vm294_vm0, %v4689_v54, %v4692_v55  ;;  %v4729_v2 = vrot.slane %v4700_v57, 1  ;;  %v4732_v6 = vrot.slane %v4703_v58, 1  ;;  %v4813_v40 = vld [vmem:[%s4504_s24 + $0xe8] sm:$0xff] }
  0x1c   : > { %7425 = vst [vmem:[#allocation20_spill] sm:$0xff] %v4634_v41  ;;  %7426 = vst [vmem:[#allocation21_spill] sm:$0xff] %v4646_v44  ;;  %v4735_v8 = vrot.slane %v4706_v59, 1  ;;  %v4738_v18 = vrot.slane %v4709_v60, 1  ;;  %v486_v38 = vrot.slane %v4513_v5, 2  ;;  %v495_v25 = vrot.slane %v4521_v9, 2 }
  0x1d   : > { %3347 = vrot.lane.b32.xlu1 %v4611_v35, %s4441_s21  ;;  %7427 = vst [vmem:[#allocation22_spill] sm:$0xff] %v4652_v45  ;;  %7428 = vst [vmem:[#allocation23_spill] sm:$0xff] %v4657_v46  ;;  %v503_v23 = vrot.slane %v4558_v22, 2  ;;  %v4998_v37 = vrot.slane %v4596_v31, 2  ;;  %v5052_v13 = vrot.slane %v4671_v50, 2 }
  0x1e   : > { %3357 = vrot.lane.b32.xlu0 %v4617_v36, %s4441_s21  ;;  %7429 = vst [vmem:[#allocation24_spill] sm:$0xff] %v4662_v47  ;;  %7430 = vst [vmem:[#allocation25_spill] sm:$0xff] %v4665_v48  ;;  %v4761_v48 = vsel %vm294_vm0, %v4729_v2, %v4732_v6  ;;  %v4887_v36 = vrot.slane %v4527_v11, 2 }
  0x1f   : > { %7431 = vst [vmem:[#allocation26_spill] sm:$0xff] %v4668_v49  ;;  %7432 = vst [vmem:[#allocation27_spill] sm:$0xff] %v4680_v52  ;;  %v4750_v49 = vpack.i.bf16 %v4726_v63, %v4689_v54 }
  0x20   : > { %7433 = vst [vmem:[#allocation28_spill] sm:$0xff] %v4686_v53  ;;  %7434 = vst [vmem:[#allocation29_spill] sm:$0xff] %v4689_v54  ;;  %v4769_v54 = vrot.slane %v4741_v0, 1 }
  0x21   : > { %3362 = vrot.lane.b32.xlu1 %v4646_v44, %s4441_s21  ;;  %7435 = vst [vmem:[#allocation30_spill] sm:$0xff] %v4692_v55  ;;  %7436 = vst [vmem:[#allocation31_spill] sm:$0xff] %v4697_v56  ;;  %v4756_v56 = vpack.i.bf16 %v4729_v2, %v4692_v55  ;;  %v4775_v55 = vld [vmem:[%s4504_s24 + $0xc0] sm:$0xff] }
  0x22   : > { %3367 = vrot.lane.b32.xlu0 %v4652_v45, %s4441_s21  ;;  %7437 = vst [vmem:[#allocation32_spill] sm:$0xff] %v4715_v61  ;;  %7438 = vst [vmem:[#allocation33_spill] sm:$0xff] %v4721_v62  ;;  %v4793_v41 = vrot.slane %v4775_v55, 1 }
  0x23   : > { %7439 = vst [vmem:[#allocation34_spill] sm:$0xff] %v4726_v63  ;;  %7440 = vst [vmem:[#allocation35_spill] sm:$0xff] %v4729_v2  ;;  %v4766_v63 = vsel %vm294_vm0, %v4735_v8, %v4738_v18  ;;  %v4784_v2 = vpack.i.bf16 %v4732_v6, %v4761_v48 }
  0x24   : > { %7441 = vst [vmem:[#allocation36_spill] sm:$0xff] %v4732_v6  ;;  %7442 = vst [vmem:[#allocation37_spill] sm:$0xff] %v4735_v8  ;;  %v4804_v6 = vld [vmem:[%s4504_s24 + $0xd0] sm:$0xff] }
  0x25   : > { %3372 = vrot.lane.b32.xlu1 %v4680_v52, %s4441_s21  ;;  %7443 = vst [vmem:[#allocation38_spill] sm:$0xff] %v4738_v18  ;;  %7444 = vst [vmem:[#allocation39_spill] sm:$0xff] %v4750_v49  ;;  %v4833_v46 = vrot.slane %v4804_v6, 1  ;;  %v487_v52 = vrot.slane %v4507_v3, 2 }
  0x26   : > { %3377 = vrot.lane.b32.xlu0 %v4686_v53, %s4441_s21  ;;  %7445 = vst [vmem:[#allocation40_spill] sm:$0xff] %v4756_v56  ;;  %7446 = vst [vmem:[#allocation41_spill] sm:$0xff] %v4761_v48  ;;  %v4790_v53 = vpack.i.bf16 %v4766_v63, %v4735_v8  ;;  %v4807_v48 = vld [vmem:[%s4504_s24 + $0xd8] sm:$0xff] }
  0x27   : > { %7447 = vst [vmem:[#allocation42_spill] sm:$0xff] %v4766_v63  ;;  %7448 = vst [vmem:[#allocation43_spill] sm:$0xff] %v4769_v54  ;;  %v4819_v63 = vpack.i.bf16 %v4769_v54, %v4738_v18 }
  0x28   : > { %7450 = vst [vmem:[#allocation45_spill] sm:$0xff] %v4784_v2  ;;  %7451 = vst [vmem:[#allocation46_spill] sm:$0xff] %v4790_v53 }
  0x29   : > { %3382 = vrot.lane.b32.xlu1 %v4715_v61, %s4441_s21  ;;  %v4778_v61 = vld [vmem:[%s4504_s24 + $0xc8] sm:$0xff]  ;;  %7452 = vst [vmem:[#allocation47_spill] sm:$0xff] %v4793_v41  ;;  %7455 = vst [vmem:[#allocation50_spill] sm:$0xff] %v4804_v6 }
  0x2a   : > { %3387 = vrot.lane.b32.xlu0 %v4721_v62, %s4441_s21  ;;  %v4772_v62 = vrot.slane %v4744_v1, 1  ;;  %v4796_v47 = vrot.slane %v4778_v61, 1  ;;  %7456 = vst [vmem:[#allocation51_spill] sm:$0xff] %v4819_v63  ;;  %7459 = vst [vmem:[#allocation54_spill] sm:$0xff] %v4833_v46 }
  0x2b   : > { %7487 = vst [vmem:[#allocation81_spill] sm:$0xff] %v5052_v13 }
  0x2c   : > { %7449 = vst [vmem:[#allocation44_spill] sm:$0xff] %v4772_v62  ;;  %7453 = vst [vmem:[#allocation48_spill] sm:$0xff] %v4796_v47  ;;  %v4830_v39 = vsel %vm294_vm0, %v4793_v41, %v4796_v47  ;;  %v4859_v45 = vpack.i.bf16 %v4833_v46, %v4796_v47  ;;  %v4877_v47 = vrot.slane %v4510_v4, 2 }
  0x2d   : > { %3392 = vrot.lane.b32.xlu1 %v4750_v49, %s4441_s21  ;;  %v4801_v49 = vsel %vm294_vm0, %v4769_v54, %v4772_v62  ;;  %7458 = vst [vmem:[#allocation53_spill] sm:$0xff] %v4830_v39  ;;  %v7463_v54 = vmov 0.0  }
  0x2e   : > { %3397 = vrot.lane.b32.xlu0 %v4756_v56, %s4441_s21  ;;  %7454 = vst [vmem:[#allocation49_spill] sm:$0xff] %v4801_v49  ;;  %v4810_v56 = vld [vmem:[%s4504_s24 + $0xe0] sm:$0xff]  ;;  %v4825_v8 = vpack.i.bf16 %v4772_v62, %v4801_v49  ;;  %v4845_v62 = vrot.slane %v7463_v54, 2  ;;  %v4851_v49 = vpack.i.bf16 %v4830_v39, %v4793_v41  ;;  %7466 = vst [vmem:[#allocation60_spill] sm:$0xff] %v4859_v45 }
  0x2f   : > { %v4839_v18 = vrot.slane %v4810_v56, 1  ;;  %v488_v41 = vsel %vm483_vm1, %v486_v38, %v487_v52 }
  0x30   : > { %7457 = vst [vmem:[#allocation52_spill] sm:$0xff] %v4825_v8  ;;  %7464 = vst [vmem:[#allocation58_spill] sm:$0xff] %v4845_v62 }
  0x31   : > { %3402 = vrot.lane.b32.xlu1 %v4784_v2, %s4441_s21  ;;  %v4836_v2 = vrot.slane %v4807_v48, 1  ;;  %7461 = vst [vmem:[#allocation56_spill] sm:$0xff] %v4839_v18  ;;  %7465 = vst [vmem:[#allocation59_spill] sm:$0xff] %v4851_v49 }
  0x32   : > { %3407 = vrot.lane.b32.xlu0 %v4790_v53, %s4441_s21  ;;  %v4842_v53 = vrot.slane %v4813_v40, 1 }
  0x33   : > { %7460 = vst [vmem:[#allocation55_spill] sm:$0xff] %v4836_v2  ;;  %v4864_v44 = vsel %vm294_vm0, %v4833_v46, %v4836_v2 }
  0x34   : > { %7462 = vst [vmem:[#allocation57_spill] sm:$0xff] %v4842_v53  ;;  %7467 = vst [vmem:[#allocation61_spill] sm:$0xff] %v4864_v44  ;;  %v4869_v39 = vsel %vm294_vm0, %v4839_v18, %v4842_v53  ;;  %v4883_v46 = vpack.i.bf16 %v4836_v2, %v4864_v44  ;;  %v4899_v2 = vrot.slane %v4524_v10, 2  ;;  %v499_v44 = vrot.slane %v4542_v16, 2 }
  0x35   : > { %3412 = vrot.lane.b32.xlu1 %v4819_v63, %s4441_s21  ;;  %7468 = vst [vmem:[#allocation62_spill] sm:$0xff] %v4869_v39  ;;  %v491_v63 = vrot.slane %v4539_v15, 2  ;;  %v4894_v26 = vpack.i.bf16 %v4869_v39, %v4839_v18  ;;  %v4914_v39 = vsel %vm483_vm1, %v4887_v36, %v495_v25  ;;  %v5002_v16 = vrot.slane %v4602_v33, 2 }
  0x36   : > { %3417 = vrot.lane.b32.xlu0 %v4825_v8, %s4441_s21  ;;  %v4874_v8 = vpack.i.bf16 %v4845_v62, %v4845_v62  ;;  %7470 = vst [vmem:[#allocation64_spill] sm:$0xff] %v4883_v46  ;;  %7472 = vst [vmem:[#allocation66_spill] sm:$0xff] %v4899_v2 }
  0x37   : > { %7471 = vst [vmem:[#allocation65_spill] sm:$0xff] %v4894_v26  ;;  %v4904_v35 = vsel %vm483_vm1, %v4877_v47, %v491_v63  ;;  %v4908_v17 = vsel %vm483_vm1, %v491_v63, %v4845_v62  ;;  %v4929_v63 = vsel %vm483_vm1, %v495_v25, %v4845_v62  ;;  %7478 = vst [vmem:[#allocation72_spill] sm:$0xff] %v5002_v16 }
  0x38   : > { %7469 = vst [vmem:[#allocation63_spill] sm:$0xff] %v4874_v8  ;;  %v4923_v18 = vpack.i.bf16 %v4908_v17, %v4904_v35 }
  0x39   : > { %3422 = vrot.lane.b32.xlu1 %v4851_v49, %s4441_s21  ;;  %v489_v49 = vsel %vm483_vm1, %v487_v52, %v4845_v62  ;;  %v4916_v52 = vpack.i.bf16 %v488_v41, %v486_v38  ;;  %v4953_v38 = vpack.i.bf16 %v4914_v39, %v4887_v36  ;;  %v4978_v41 = vrot.slane %v4555_v21, 2 }
  0x3a   : > { %3427 = vrot.lane.b32.xlu0 %v4859_v45, %s4441_s21  ;;  %v4919_v45 = vpack.i.bf16 %v4877_v47, %v489_v49  ;;  %v4941_v49 = vsel %vm483_vm1, %v499_v44, %v4845_v62 }
  0x3b   : > { %7474 = vst [vmem:[#allocation68_spill] sm:$0xff] %v4941_v49  ;;  %7475 = vst [vmem:[#allocation69_spill] sm:$0xff] %v4978_v41  ;;  %v4991_v25 = vsel %vm483_vm1, %v4978_v41, %v503_v23 }
  0x3c   : > { %7476 = vst [vmem:[#allocation70_spill] sm:$0xff] %v4991_v25 }
  0x3d   : > { %3432 = vrot.lane.b32.xlu1 %v4883_v46, %s4441_s21  ;;  %v4933_v46 = vsel %vm483_vm1, %v4899_v2, %v499_v44  ;;  %v4957_v44 = vpack.i.bf16 %v4899_v2, %v4929_v63 }
  0x3e   : > { %3437 = vrot.lane.b32.xlu0 %v4894_v26, %s4441_s21  ;;  %7473 = vst [vmem:[#allocation67_spill] sm:$0xff] %v4933_v46  ;;  %v4961_v26 = vpack.i.bf16 %v4941_v49, %v4933_v46  ;;  %v511_v49 = vrot.slane %v4605_v34, 2 }
  0x40   : > { %v5029_v20 = vsel %vm483_vm1, %v5002_v16, %v511_v49  ;;  %v5049_v28 = vsel %vm483_vm1, %v511_v49, %v4845_v62 }
  0x41   : > { %434 = vrot.lane.b32.xlu1 %v4842_v53, %s4441_s21  ;;  %v4995_v53 = vsel %vm483_vm1, %v503_v23, %v4845_v62  ;;  %v5011_v23 = vpack.i.bf16 %v4991_v25, %v4978_v41  ;;  %7482 = vst [vmem:[#allocation76_spill] sm:$0xff] %v5029_v20  ;;  %v5032_v25 = vrot.slane %v4637_v42, 2  ;;  %v515_v41 = vrot.slane %v4640_v43, 2  ;;  %7486 = vst [vmem:[#allocation80_spill] sm:$0xff] %v5049_v28 }
  0x42   : > { %3442 = vrot.lane.b32.xlu0 %v4874_v8, %s4442_s25  ;;  %7477 = vst [vmem:[#allocation71_spill] sm:$0xff] %v4995_v53  ;;  %v507_v8 = vrot.slane %v4599_v32, 2  ;;  %v5017_v46 = vpack.i.bf16 %v4998_v37, %v4995_v53 }
  0x43   : > { %7479 = vst [vmem:[#allocation73_spill] sm:$0xff] %v5011_v23  ;;  %7483 = vst [vmem:[#allocation77_spill] sm:$0xff] %v5032_v25  ;;  %v5067_v49 = vpack.i.bf16 %v5032_v25, %v5049_v28  ;;  %v5088_v28 = vrot.slane %v4706_v59, 2 }
  0x44   : > { %7480 = vst [vmem:[#allocation74_spill] sm:$0xff] %v5017_v46  ;;  %v5021_v29 = vsel %vm483_vm1, %v4998_v37, %v507_v8  ;;  %v5025_v2 = vsel %vm483_vm1, %v507_v8, %v4845_v62  ;;  %v5045_v8 = vpack.i.bf16 %v5029_v20, %v5002_v16 }
  0x45   : > { %3447 = vrot.lane.b32.xlu1 %v4916_v52, %s4442_s25  ;;  %7481 = vst [vmem:[#allocation75_spill] sm:$0xff] %v5025_v2  ;;  %v5039_v53 = vpack.i.bf16 %v5025_v2, %v5021_v29  ;;  %v5057_v2 = vsel %vm483_vm1, %v5032_v25, %v515_v41  ;;  %7490 = vst [vmem:[#allocation84_spill] sm:$0xff] %v5067_v49 }
  0x46   : > { %3452 = vrot.lane.b32.xlu0 %v4919_v45, %s4442_s25  ;;  %7485 = vst [vmem:[#allocation79_spill] sm:$0xff] %v5045_v8  ;;  %7488 = vst [vmem:[#allocation82_spill] sm:$0xff] %v5057_v2 }
  0x47   : > { %7484 = vst [vmem:[#allocation78_spill] sm:$0xff] %v5039_v53  ;;  %7495 = vst [vmem:[#allocation89_spill] sm:$0xff] %v5088_v28 }
  0x49   : > { %3457 = vrot.lane.b32.xlu1 %v4923_v18, %s4442_s25 }
  0x4a   : > { %3462 = vrot.lane.b32.xlu0 %v4953_v38, %s4442_s25 }
  0x4d   : > { %3467 = vrot.lane.b32.xlu1 %v4957_v44, %s4442_s25 }
  0x4e   : > { %3472 = vrot.lane.b32.xlu0 %v4961_v26, %s4442_s25 }
  0x51   : > { %3477 = vrot.lane.b32.xlu1 %v5011_v23, %s4442_s25  ;;  %v519_v23 = vrot.slane %v4674_v51, 2 }
  0x52   : > { %3482 = vrot.lane.b32.xlu0 %v5017_v46, %s4442_s25  ;;  %v5061_v46 = vsel %vm483_vm1, %v515_v41, %v4845_v62  ;;  %v5080_v41 = vrot.slane %v4700_v57, 2 }
  0x53   : > { %7489 = vst [vmem:[#allocation83_spill] sm:$0xff] %v5061_v46  ;;  %v5073_v20 = vpack.i.bf16 %v5061_v46, %v5057_v2  ;;  %v5077_v16 = vsel %vm483_vm1, %v5052_v13, %v519_v23  ;;  %v5085_v25 = vsel %vm483_vm1, %v519_v23, %v4845_v62 }
  0x54   : > { %7492 = vst [vmem:[#allocation86_spill] sm:$0xff] %v5077_v16  ;;  %7493 = vst [vmem:[#allocation87_spill] sm:$0xff] %v5080_v41  ;;  %v5095_v46 = vpack.i.bf16 %v5077_v16, %v5052_v13  ;;  %v5101_v2 = vpack.i.bf16 %v5080_v41, %v5085_v25  ;;  %v5116_v16 = vrot.slane %v4741_v0, 2  ;;  %v531_v13 = vrot.slane %v4744_v1, 2 }
  0x55   : > { %3487 = vrot.lane.b32.xlu1 %v5039_v53, %s4442_s25  ;;  %7491 = vst [vmem:[#allocation85_spill] sm:$0xff] %v5073_v20  ;;  %v523_v53 = vrot.slane %v4703_v58, 2  ;;  %7494 = vst [vmem:[#allocation88_spill] sm:$0xff] %v5085_v25 }
  0x56   : > { %3492 = vrot.lane.b32.xlu0 %v5045_v8, %s4442_s25  ;;  %v527_v8 = vrot.slane %v4709_v60, 2  ;;  %7496 = vst [vmem:[#allocation90_spill] sm:$0xff] %v5095_v46  ;;  %7497 = vst [vmem:[#allocation91_spill] sm:$0xff] %v5101_v2 }
  0x57   : > { %v5105_v23 = vsel %vm483_vm1, %v5080_v41, %v523_v53  ;;  %v5109_v30 = vsel %vm483_vm1, %v523_v53, %v4845_v62  ;;  %7501 = vst [vmem:[#allocation95_spill] sm:$0xff] %v5116_v16 }
  0x58   : > { %7498 = vst [vmem:[#allocation92_spill] sm:$0xff] %v5105_v23  ;;  %7499 = vst [vmem:[#allocation93_spill] sm:$0xff] %v5109_v30  ;;  %v5123_v41 = vpack.i.bf16 %v5109_v30, %v5105_v23  ;;  %v5133_v25 = vsel %vm483_vm1, %v527_v8, %v4845_v62  ;;  %v5141_v30 = vsel %vm483_vm1, %v5116_v16, %v531_v13 }
  0x59   : > { %3497 = vrot.lane.b32.xlu1 %v5067_v49, %s4442_s25  ;;  %v5113_v49 = vsel %vm483_vm1, %v5088_v28, %v527_v8  ;;  %7504 = vst [vmem:[#allocation98_spill] sm:$0xff] %v5133_v25  ;;  %7506 = vst [vmem:[#allocation100_spill] sm:$0xff] %v5141_v30  ;;  %v5145_v23 = vsel %vm483_vm1, %v531_v13, %v4845_v62  ;;  %v5151_v8 = vpack.i.bf16 %v5116_v16, %v5133_v25 }
  0x5a   : > { %3502 = vrot.lane.b32.xlu0 %v5073_v20, %s4442_s25  ;;  %7500 = vst [vmem:[#allocation94_spill] sm:$0xff] %v5113_v49  ;;  %7502 = vst [vmem:[#allocation96_spill] sm:$0xff] %v5123_v41  ;;  %v5129_v53 = vpack.i.bf16 %v5113_v49, %v5088_v28  ;;  %v5136_v20 = vrot.slane %v4775_v55, 2  ;;  %v5157_v49 = vpack.i.bf16 %v5145_v23, %v5141_v30  ;;  %v5164_v13 = vrot.slane %v4804_v6, 2 }
  0x5b   : > { %7507 = vst [vmem:[#allocation101_spill] sm:$0xff] %v5145_v23  ;;  %7508 = vst [vmem:[#allocation102_spill] sm:$0xff] %v5151_v8  ;;  %v543_v16 = vrot.slane %v4813_v40, 2 }
  0x5c   : > { %7503 = vst [vmem:[#allocation97_spill] sm:$0xff] %v5129_v53  ;;  %7505 = vst [vmem:[#allocation99_spill] sm:$0xff] %v5136_v20 }
  0x5d   : > { %3507 = vrot.lane.b32.xlu1 %v5095_v46, %s4442_s25  ;;  %v535_v46 = vrot.slane %v4778_v61, 2  ;;  %7509 = vst [vmem:[#allocation103_spill] sm:$0xff] %v5157_v49  ;;  %7511 = vst [vmem:[#allocation105_spill] sm:$0xff] %v5164_v13 }
  0x5e   : > { %3512 = vrot.lane.b32.xlu0 %v5101_v2, %s4442_s25  ;;  %v5172_v2 = vrot.slane %v4810_v56, 2 }
  0x5f   : > { %v5161_v28 = vsel %vm483_vm1, %v5136_v20, %v535_v46  ;;  %v5169_v25 = vsel %vm483_vm1, %v535_v46, %v4845_v62 }
  0x60   : > { %7510 = vst [vmem:[#allocation104_spill] sm:$0xff] %v5161_v28  ;;  %7512 = vst [vmem:[#allocation106_spill] sm:$0xff] %v5169_v25  ;;  %v5181_v30 = vpack.i.bf16 %v5161_v28, %v5136_v20  ;;  %v5187_v46 = vpack.i.bf16 %v5164_v13, %v5169_v25  ;;  %v7590_v20 = vld [vmem:[#allocation72_spill] sm:$0xff] }
  0x61   : > { %3517 = vrot.lane.b32.xlu1 %v5123_v41, %s4442_s25  ;;  %v539_v41 = vrot.slane %v4807_v48, 2  ;;  %7513 = vst [vmem:[#allocation107_spill] sm:$0xff] %v5172_v2 }
  0x62   : > { %3522 = vrot.lane.b32.xlu0 %v5129_v53, %s4442_s25  ;;  %7514 = vst [vmem:[#allocation108_spill] sm:$0xff] %v5181_v30  ;;  %7515 = vst [vmem:[#allocation109_spill] sm:$0xff] %v5187_v46 }
  0x63   : > { %v5191_v53 = vsel %vm483_vm1, %v5164_v13, %v539_v41  ;;  %v5195_v23 = vsel %vm483_vm1, %v539_v41, %v4845_v62  ;;  %v5219_v41 = vsel %vm483_vm1, %v543_v16, %v4845_v62 }
  0x64   : > { %7516 = vst [vmem:[#allocation110_spill] sm:$0xff] %v5191_v53  ;;  %7517 = vst [vmem:[#allocation111_spill] sm:$0xff] %v5195_v23  ;;  %v5205_v28 = vpack.i.bf16 %v5195_v23, %v5191_v53  ;;  %v3556_v23 = vpack.i.bf16 %v4513_v5, %v7463_v54  ;;  %v5230_v53 = vpack.i.bf16 %v4527_v11, %v4539_v15  ;;  %v7522_v5 = vld [vmem:[#allocation5_spill] sm:$0xff] }
  0x65   : > { %3527 = vrot.lane.b32.xlu1 %v5151_v8, %s4442_s25  ;;  %v5199_v8 = vsel %vm483_vm1, %v5172_v2, %v543_v16  ;;  %7521 = vst [vmem:[#allocation115_spill] sm:$0xff] %v5219_v41  ;;  %v5235_v16 = vpack.i.bf16 %v4524_v10, %v4521_v9  ;;  %v5253_v9 = vpack.i.bf16 %v4602_v33, %v4599_v32 }
  0x66   : > { %3532 = vrot.lane.b32.xlu0 %v5157_v49, %s4442_s25  ;;  %7518 = vst [vmem:[#allocation112_spill] sm:$0xff] %v5199_v8  ;;  %7519 = vst [vmem:[#allocation113_spill] sm:$0xff] %v5205_v28  ;;  %v5211_v13 = vpack.i.bf16 %v5199_v8, %v5172_v2  ;;  %v3561_v2 = vpack.i.bf16 %v4510_v4, %v4507_v3  ;;  %v5247_v3 = vpack.i.bf16 %v4596_v31, %v4558_v22  ;;  %v7538_v8 = vld [vmem:[#allocation9_spill] sm:$0xff] }
  0x67   : > { %v3591_v10 = vpack.i.bf16 %v4637_v42, %v4605_v34  ;;  %v3596_v11 = vpack.i.bf16 %v4671_v50, %v4640_v43  ;;  %v3601_v15 = vpack.i.bf16 %v4700_v57, %v4674_v51  ;;  %v3606_v22 = vpack.i.bf16 %v4706_v59, %v4703_v58 }
  0x68   : > { %7520 = vst [vmem:[#allocation114_spill] sm:$0xff] %v5211_v13 }
  0x69   : > { %3537 = vrot.lane.b32.xlu1 %v5181_v30, %s4442_s25  ;;  %v257_v30 = vld [vmem:[%s4504_s24 + $0xf8] sm:$0xff] }
  0x6a   : > { %3542 = vrot.lane.b32.xlu0 %v5187_v46, %s4442_s25 }
  0x6d   : > { %3547 = vrot.lane.b32.xlu1 %v5205_v28, %s4442_s25 }
  0x6e   : > { %3552 = vrot.lane.b32.xlu0 %v5211_v13, %s4442_s25  ;;  %v5241_v13 = vpack.i.bf16 %v4555_v21, %v7522_v5 }
  0x71   : > { %638 = vrot.lane.b32.xlu1 %v5219_v41, %s4442_s25 }
  0x72   : > { %3557 = vrot.lane.b32.xlu0 %v3556_v23, %s4443_s26  ;;  %v5277_v23 = vpack.i.bf16 %v4775_v55, %v4744_v1 }
  0x74   : > { %7524 = vst [vmem:[#allocation116_spill] sm:$0xff] %v5277_v23 }
  0x75   : > { %3562 = vrot.lane.b32.xlu1 %v3561_v2, %s4443_s26  ;;  %v3611_v2 = vpack.i.bf16 %v4741_v0, %v4709_v60 }
  0x76   : > { %3567 = vrot.lane.b32.xlu0 %v5230_v53, %s4443_s26 }
  0x79   : > { %3572 = vrot.lane.b32.xlu1 %v5235_v16, %s4443_s26 }
  0x7a   : > { %3577 = vrot.lane.b32.xlu0 %v5241_v13, %s4443_s26 }
  0x7d   : > { %3582 = vrot.lane.b32.xlu1 %v5247_v3, %s4443_s26 }
  0x7e   : > { %3587 = vrot.lane.b32.xlu0 %v5253_v9, %s4443_s26 }
  0x81   : > { %3592 = vrot.lane.b32.xlu1 %v3591_v10, %s4443_s26 }
  0x82   : > { %3597 = vrot.lane.b32.xlu0 %v3596_v11, %s4443_s26  ;;  %v5267_v21 = vpop.permute.xlu0 %3327  ;;  %v3621_v11 = vpack.i.bf16 %v4804_v6, %v4778_v61  ;;  %v7593_v6 = vld [vmem:[#allocation78_spill] sm:$0xff] }
  0x83   : > { %7523 = vst [vmem:[#allocation5_spill] sm:$0xff] %v5267_v21  ;;  %v7592_v21 = vld [vmem:[#allocation80_spill] sm:$0xff] }
  0x85   : > { %3602 = vrot.lane.b32.xlu1 %v3601_v15, %s4443_s26  ;;  %v5287_v15 = vld [vmem:[%s4504_s24 + $0xf0] sm:$0xff] }
  0x86   : > { %3607 = vrot.lane.b32.xlu0 %v3606_v22, %s4443_s26  ;;  %7527 = vst [vmem:[#allocation119_spill] sm:$0xff] %v5287_v15  ;;  %v3626_v22 = vpack.i.bf16 %v4810_v56, %v4807_v48 }
  0x87   : > { %v5279_v5 = vpop.permute.xlu1 %3332 }
  0x88   : > { %7525 = vst [vmem:[#allocation117_spill] sm:$0xff] %v5279_v5  ;;  %v5281_v10 = vpop.permute.xlu0 %3342 }
  0x89   : > { %7526 = vst [vmem:[#allocation118_spill] sm:$0xff] %v5281_v10  ;;  %3612 = vrot.lane.b32.xlu1 %v3611_v2, %s4443_s26  ;;  %v3631_v2 = vpack.i.bf16 %v5287_v15, %v4813_v40  ;;  %v7535_v40 = vld [vmem:[#allocation6_spill] sm:$0xff] }
  0x8a   : > { %3617 = vrot.lane.b32.xlu0 %v5277_v23, %s4443_s26 }
  0x8b   : > { %v5293_v62 = vpop.permute.xlu1 %3337 }
  0x8c   : > { %7528 = vst [vmem:[#allocation120_spill] sm:$0xff] %v5293_v62  ;;  %v5295_v28 = vpop.permute.xlu0 %3352 }
  0x8d   : > { %7529 = vst [vmem:[#allocation121_spill] sm:$0xff] %v5295_v28  ;;  %3622 = vrot.lane.b32.xlu1 %v3621_v11, %s4443_s26  ;;  %v7534_v11 = vld [vmem:[#allocation8_spill] sm:$0xff] }
  0x8e   : > { %3627 = vrot.lane.b32.xlu0 %v3626_v22, %s4443_s26  ;;  %v7587_v28 = vld [vmem:[#allocation20_spill] sm:$0xff] }
  0x8f   : > { %v5301_v46 = vpop.permute.xlu1 %3347 }
  0x90   : > { %7530 = vst [vmem:[#allocation122_spill] sm:$0xff] %v5301_v46  ;;  %v5304_v25 = vpop.permute.xlu0 %3357 }
  0x91   : > { %7531 = vst [vmem:[#allocation123_spill] sm:$0xff] %v5304_v25  ;;  %3632 = vrot.lane.b32.xlu1 %v3631_v2, %s4443_s26  ;;  %v7536_v25 = vld [vmem:[#allocation14_spill] sm:$0xff] }
  0x92   : > { %753 = vrot.lane.b32.xlu0 %v257_v30, %s4443_s26  ;;  %v7537_v30 = vld [vmem:[#allocation10_spill] sm:$0xff] }
  0x93   : > { %v5308_v48 = vpop.permute.xlu1 %3362 }
  0x94   : > { %7532 = vst [vmem:[#allocation124_spill] sm:$0xff] %v5308_v48  ;;  %v5310_v56 = vpop.permute.xlu0 %3367 }
  0x95   : > { %7533 = vst [vmem:[#allocation125_spill] sm:$0xff] %v5310_v56  ;;  %3637 = vrot.lane.b32.xlu1 %v7534_v11, %s4444_s27  ;;  %v7539_v11 = vld [vmem:[#allocation15_spill] sm:$0xff] }
  0x96   : > { %3642 = vrot.lane.b32.xlu0 %v7535_v40, %s4444_s27 }
  0x97   : > { %v5316_v22 = vpop.permute.xlu1 %3372 }
  0x98   : > { %v5318_v41 = vpop.permute.xlu0 %3377 }
  0x99   : > { %3647 = vrot.lane.b32.xlu1 %v7536_v25, %s4444_s27  ;;  %v3681_v25 = vpack.i.bf16 %v4510_v4, %v7463_v54  ;;  %v4402_v54 = vld [vmem:[%s7238_s1 + $0x8] sm:$0xff]   ;;  %v3380_v23 = vunpack.i.h.bf16 %v5318_v41 }
  0x9a   : > { %3652 = vrot.lane.b32.xlu0 %v7537_v30, %s4444_s27 }
  0x9b   : > { %v5324_v2 = vpop.permute.xlu1 %3382 }
  0x9c   : > { %v5326_v48 = vpop.permute.xlu0 %3387 }
  0x9d   : > { %3657 = vrot.lane.b32.xlu1 %v7538_v8, %s4444_s27  ;;  %v3390_v49 = vunpack.i.h.bf16 %v5326_v48 }
  0x9e   : > { %3662 = vrot.lane.b32.xlu0 %v7539_v11, %s4444_s27  ;;  %v4401_v11 = vld [vmem:[%s7238_s1 + $0x10] ss:$0 sps:$4 sm:$0x33]  }
  0x9f   : > { %v5332_v40 = vpop.permute.xlu1 %3392  ;;  %3300 = vmatprep.subr.msk.bf16.mxu0 %vm2097_vm2, %v4401_v11  ;;  %3301 = vmatprep.subr.msk.bf16.mxu1 %vm2097_vm2, %v4401_v11 }
  0xa0   : > { %v5334_v15 = vpop.permute.xlu0 %3397 }
  0xa1   : > { %3667 = vrot.lane.b32.xlu1 %v4916_v52, %s4445_s28 }
  0xa2   : > { %3672 = vrot.lane.b32.xlu0 %v4919_v45, %s4445_s28  ;;  %v2099_v45 = vsel %vm2097_vm2, %v4401_v11, 0  ;;  %v4403_v11 = vld [vmem:[%s7238_s1] sm:$0xff]   ;;  %vm2887_vm2 = vcmask 588800  }
  0xa3   : > { %v5342_v30 = vpop.permute.xlu1 %3402  ;;  %3239 = vmatpush3.bf16.msra.mxu0 %v2099_v45  ;;  %3297 = vmatpush3.bf16.msra.mxu1 %v2099_v45 }
  0xa4   : > { %v5344_v8 = vpop.permute.xlu0 %3407  ;;  %3240 = vmatprep.subr.bf16.mxu0 %v4402_v54  ;;  %3295 = vmatprep.subr.bf16.mxu1 %v4402_v54 }
  0xa5   : > { %3677 = vrot.lane.b32.xlu1 %v4923_v18, %s4445_s28 }
  0xa6   : > { %3682 = vrot.lane.b32.xlu0 %v3681_v25, %s4446_s6 }
  0xa7   : > { %v5352_v52 = vpop.permute.xlu1 %3412  ;;  %3241 = vmatpush3.bf16.msra.mxu0 %v4402_v54  ;;  %3298 = vmatpush3.bf16.msra.mxu1 %v4402_v54  ;;  %v7544_v54 = vpack.i.bf16 %v4530_v12, %v4565_v24  ;;  %v7549_v12 = vpack.i.bf16 %v4929_v63, %v4914_v39  ;;  %v7556_v39 = vld [vmem:[#allocation13_spill] sm:$0xff]  ;;  %v7557_v63 = vld [vmem:[#allocation4_spill] sm:$0xff] }
  0xa8   : > { %v5354_v4 = vpop.permute.xlu0 %3417  ;;  %3242 = vmatprep.subr.bf16.mxu0 %v4403_v11  ;;  %3296 = vmatprep.subr.bf16.mxu1 %v4403_v11 }
  0xa9   : > { %3687 = vrot.lane.b32.xlu1 %v5230_v53, %s4446_s6  ;;  %v7540_v53 = vpack.i.bf16 %v4582_v27, %v4517_v7  ;;  %v7545_v7 = vpack.i.bf16 %v4904_v35, %v4877_v47  ;;  %v7548_v27 = vpack.i.bf16 %v4887_v36, %v4908_v17 }
  0xaa   : > { %3692 = vrot.lane.b32.xlu0 %v5235_v16, %s4446_s6  ;;  %v7541_v16 = vpack.i.bf16 %v4536_v14, %v4549_v19 }
  0xab   : > { %v5363_v18 = vpop.permute.xlu1 %3422  ;;  %3243 = vmatpush3.bf16.msra.mxu0 %v4403_v11  ;;  %3299 = vmatpush3.bf16.msra.mxu1 %v4403_v11 }
  0xac   : > { %v5365_v25 = vpop.permute.xlu0 %3427 }
  0xad   : > { %3697 = vrot.lane.b32.xlu1 %v7540_v53, %s4447_s11 }
  0xae   : > { %3702 = vrot.lane.b32.xlu0 %v7541_v16, %s4447_s11  ;;  %v7562_v16 = vld [vmem:[#allocation7_spill] sm:$0xff] }
  0xaf   : > { %v5378_v45 = vpop.permute.xlu1 %3432 }
  0xb0   : > { %7542 = vst [vmem:[#allocation8_spill] sm:$0xff] %v5378_v45  ;;  %v5380_v46 = vpop.permute.xlu0 %3437  ;;  %v3389_v45 = vunpack.i.l.bf16 %v5326_v48 }
  0xb1   : > { %7543 = vst [vmem:[#allocation6_spill] sm:$0xff] %v5380_v46  ;;  %3707 = vrot.lane.b32.xlu1 %v7544_v54, %s4447_s11  ;;  %v7564_v54 = vld [vmem:[#allocation12_spill] sm:$0xff] }
  0xb2   : > { %3712 = vrot.lane.b32.xlu0 %v7545_v7, %s4448_s12  ;;  %v7565_v7 = vld [vmem:[#allocation16_spill] sm:$0xff] }
  0xb3   : > { %v5390_v14 = vpop.permute.xlu1 %434 }
  0xb4   : > { %7546 = vst [vmem:[#allocation14_spill] sm:$0xff] %v5390_v14  ;;  %v5392_v19 = vpop.permute.xlu0 %3442 }
  0xb5   : > { %7547 = vst [vmem:[#allocation10_spill] sm:$0xff] %v5392_v19  ;;  %3717 = vrot.lane.b32.xlu1 %v7548_v27, %s4448_s12  ;;  %v7566_v27 = vpack.i.bf16 %v7564_v54, %v7565_v7  ;;  %v7574_v54 = vld [vmem:[#allocation70_spill] sm:$0xff]  ;;  %v7586_v19 = vld [vmem:[#allocation24_spill] sm:$0xff] }
  0xb6   : > { %3722 = vrot.lane.b32.xlu0 %v7549_v12, %s4448_s12  ;;  %v3831_v62 = vpack.i.bf16 %v7587_v28, %v7586_v19  ;;  %v3375_v28 = vunpack.i.h.bf16 %v5316_v22 }
  0xb7   : > { %v5402_v24 = vpop.permute.xlu1 %3447 }
  0xb8   : > { %7550 = vst [vmem:[#allocation9_spill] sm:$0xff] %v5402_v24  ;;  %v5404_v11 = vpop.permute.xlu0 %3452 }
  0xb9   : > { %7551 = vst [vmem:[#allocation15_spill] sm:$0xff] %v5404_v11  ;;  %3727 = vrot.lane.b32.xlu1 %v4953_v38, %s4445_s28  ;;  %v7558_v38 = vpack.i.bf16 %v7556_v39, %v7557_v63  ;;  %v7567_v39 = vld [vmem:[#allocation67_spill] sm:$0xff]  ;;  %v7568_v63 = vld [vmem:[#allocation66_spill] sm:$0xff] }
  0xba   : > { %3732 = vrot.lane.b32.xlu0 %v4957_v44, %s4445_s28  ;;  %v7585_v11 = vld [vmem:[#allocation19_spill] sm:$0xff] }
  0xbb   : > { %v5410_v35 = vpop.permute.xlu1 %3457 }
  0xbc   : > { %7552 = vst [vmem:[#allocation126_spill] sm:$0xff] %v5410_v35  ;;  %v5412_v47 = vpop.permute.xlu0 %3462 }
  0xbd   : > { %7553 = vst [vmem:[#allocation127_spill] sm:$0xff] %v5412_v47  ;;  %3737 = vrot.lane.b32.xlu1 %v4961_v26, %s4445_s28  ;;  %v7561_v26 = vld [vmem:[#allocation11_spill] sm:$0xff] }
  0xbe   : > { %3742 = vrot.lane.b32.xlu0 %v5241_v13, %s4446_s6  ;;  %v7563_v13 = vpack.i.bf16 %v7561_v26, %v7562_v16 }
  0xbf   : > { %v5418_v17 = vpop.permute.xlu1 %3467 }
  0xc0   : > { %7554 = vst [vmem:[#allocation128_spill] sm:$0xff] %v5418_v17  ;;  %v5420_v36 = vpop.permute.xlu0 %3472 }
  0xc1   : > { %7555 = vst [vmem:[#allocation129_spill] sm:$0xff] %v5420_v36  ;;  %3747 = vrot.lane.b32.xlu1 %v5247_v3, %s4446_s6  ;;  %v7571_v36 = vld [vmem:[#allocation68_spill] sm:$0xff] }
  0xc2   : > { %3752 = vrot.lane.b32.xlu0 %v7558_v38, %s4447_s11  ;;  %v7569_v38 = vpack.i.bf16 %v7567_v39, %v7568_v63  ;;  %v7577_v63 = vld [vmem:[#allocation22_spill] sm:$0xff] }
  0xc3   : > { %v5428_v44 = vpop.permute.xlu1 %3477 }
  0xc4   : > { %7559 = vst [vmem:[#allocation13_spill] sm:$0xff] %v5428_v44  ;;  %v5430_v53 = vpop.permute.xlu0 %3482  ;;  %v7570_v44 = vld [vmem:[#allocation69_spill] sm:$0xff] }
  0xc5   : > { %7560 = vst [vmem:[#allocation4_spill] sm:$0xff] %v5430_v53  ;;  %3757 = vrot.lane.b32.xlu1 %v7563_v13, %s4447_s11  ;;  %v7572_v17 = vpack.i.bf16 %v7570_v44, %v7571_v36  ;;  %v7573_v13 = vld [vmem:[#allocation71_spill] sm:$0xff] }
  0xc6   : > { %3762 = vrot.lane.b32.xlu0 %v7566_v27, %s4447_s11  ;;  %v7575_v7 = vpack.i.bf16 %v7573_v13, %v7574_v54  ;;  %v7576_v27 = vld [vmem:[#allocation21_spill] sm:$0xff]  ;;  %v7581_v13 = vld [vmem:[#allocation74_spill] sm:$0xff] }
  0xc7   : > { %v5440_v3 = vpop.permute.xlu1 %3487 }
  0xc8   : > { %v5442_v12 = vpop.permute.xlu0 %3492 }
  0xc9   : > { %3767 = vrot.lane.b32.xlu1 %v7569_v38, %s4448_s12  ;;  %v7580_v38 = vld [vmem:[#allocation73_spill] sm:$0xff] }
  0xca   : > { %3772 = vrot.lane.b32.xlu0 %v7572_v17, %s4448_s12  ;;  %v7578_v17 = vld [vmem:[#allocation27_spill] sm:$0xff] }
  0xcb   : > { %v5452_v26 = vpop.permute.xlu1 %3497 }
  0xcc   : > { %v5454_v16 = vpop.permute.xlu0 %3502 }
  0xcd   : > { %3777 = vrot.lane.b32.xlu1 %v7575_v7, %s4448_s12  ;;  %v3816_v7 = vpack.i.bf16 %v4741_v0, %v4605_v34 }
  0xce   : > { %3782 = vrot.lane.b32.xlu0 %v7576_v27, %s4444_s27  ;;  %v7582_v27 = vld [vmem:[#allocation17_spill] sm:$0xff] }
  0xcf   : > { %v5462_v47 = vpop.permute.xlu1 %3507 }
  0xd0   : > { %v5464_v39 = vpop.permute.xlu0 %3512 }
  0xd1   : > { %3787 = vrot.lane.b32.xlu1 %v7577_v63, %s4444_s27  ;;  %v7583_v63 = vld [vmem:[#allocation23_spill] sm:$0xff] }
  0xd2   : > { %3792 = vrot.lane.b32.xlu0 %v7578_v17, %s4444_s27  ;;  %v3821_v35 = vpack.i.bf16 %v7583_v63, %v7582_v27  ;;  %v7584_v17 = vld [vmem:[#allocation18_spill] sm:$0xff]  ;;  %v3370_v27 = vunpack.i.h.bf16 %v5310_v56  ;;  %v3384_v56 = vunpack.i.l.bf16 %v5324_v2  ;;  %v3494_v63 = vunpack.i.l.bf16 %v5442_v12 }
  0xd3   : > { %v5470_v36 = vpop.permute.xlu1 %3517  ;;  %v3826_v24 = vpack.i.bf16 %v7585_v11, %v7584_v17  ;;  %v3385_v11 = vunpack.i.h.bf16 %v5324_v2  ;;  %v3400_v17 = vunpack.i.h.bf16 %v5334_v15  ;;  %v5525_v2 = vsel %vm1458_vm3, %v4599_v32, %v3375_v28 }
  0xd4   : > { %7579 = vst [vmem:[#allocation11_spill] sm:$0xff] %v5470_v36  ;;  %v5472_v44 = vpop.permute.xlu0 %3522 }
  0xd5   : > { %3797 = vrot.lane.b32.xlu1 %v7580_v38, %s4445_s28  ;;  %v7589_v38 = vld [vmem:[#allocation75_spill] sm:$0xff]  ;;  %v1482_v32 = vsel %vm1458_vm3, 0.0, %v3385_v11  ;;  %v1488_v28 = vsel %vm1458_vm3, 0.0, %v3400_v17  ;;  %v3424_v17 = vunpack.i.l.bf16 %v5363_v18 }
  0xd6   : > { %3802 = vrot.lane.b32.xlu0 %v7581_v13, %s4445_s28  ;;  %v3841_v5 = vpack.i.bf16 %v7590_v20, %v7589_v38  ;;  %v7591_v13 = vld [vmem:[#allocation76_spill] sm:$0xff]  ;;  %v3399_v38 = vunpack.i.l.bf16 %v5334_v15  ;;  %v5545_v15 = vsel %vm1458_vm3, %v4605_v34, %v3384_v56  ;;  %v3415_v34 = vunpack.i.h.bf16 %v5352_v52 }
  0xd7   : > { %v5478_v54 = vpop.permute.xlu1 %3527  ;;  %v3430_v56 = vunpack.i.h.bf16 %v5365_v25 }
  0xd8   : > { %v5488_v10 = vpop.permute.xlu0 %3532  ;;  %v3530_v20 = vunpack.i.h.bf16 %v5478_v54 }
  0xd9   : > { %7588 = vst [vmem:[#allocation7_spill] sm:$0xff] %v5488_v10  ;;  %3807 = vrot.lane.b32.xlu1 %v7593_v6, %s4445_s28  ;;  %v3374_v6 = vunpack.i.l.bf16 %v5316_v22  ;;  %v3395_v10 = vunpack.i.h.bf16 %v5332_v40  ;;  %v3394_v22 = vunpack.i.l.bf16 %v5332_v40  ;;  %v5536_v40 = vsel %vm1458_vm3, %v4602_v33, %v3380_v23 }
  0xda   : > { %3812 = vrot.lane.b32.xlu0 %v5253_v9, %s4446_s6  ;;  %v3379_v9 = vunpack.i.l.bf16 %v5318_v41  ;;  %v1476_v41 = vsel %vm1458_vm3, 0.0, %v3370_v27  ;;  %v3409_v27 = vunpack.i.l.bf16 %v5344_v8  ;;  %v5553_v33 = vsel %vm1458_vm3, %v4637_v42, %v3389_v45 }
  0xdb   : > { %v5502_v19 = vpop.permute.xlu1 %3537  ;;  %v5558_v23 = vsel %vm1458_vm3, %v4671_v50, %v3395_v10  ;;  %v1485_v11 = vsel %vm1458_vm3, 0.0, %v3394_v22  ;;  %v3425_v45 = vunpack.i.h.bf16 %v5363_v18  ;;  %v3500_v18 = vunpack.i.h.bf16 %v5452_v26 }
  0xdc   : > { %v5511_v36 = vpop.permute.xlu0 %3542  ;;  %v1491_v10 = vsel %vm1458_vm3, 0.0, %v3409_v27  ;;  %v7601_v27 = vpack.i.bf16 %v5021_v29, %v4998_v37  ;;  %v1497_v37 = vsel %vm1458_vm3, 0.0, %v3424_v17 }
  0xdd   : > { %3817 = vrot.lane.b32.xlu1 %v3816_v7, %s4446_s6  ;;  %v5532_v7 = vsel %vm1458_vm3, %v4596_v31, %v3374_v6  ;;  %v5549_v31 = vsel %vm1458_vm3, %v4640_v43, %v3390_v49  ;;  %v5566_v43 = vsel %vm1458_vm3, %v4674_v51, %v3399_v38  ;;  %v3405_v49 = vunpack.i.h.bf16 %v5342_v30 }
  0xde   : > { %3822 = vrot.lane.b32.xlu0 %v3821_v35, %s4447_s11  ;;  %v1479_v35 = vsel %vm1458_vm3, 0.0, %v3379_v9  ;;  %v3420_v51 = vunpack.i.h.bf16 %v5354_v4  ;;  %v3419_v38 = vunpack.i.l.bf16 %v5354_v4  ;;  %v3524_v9 = vunpack.i.l.bf16 %v5472_v44 }
  0xdf   : > { %v5528_v48 = vpop.permute.xlu1 %3547  ;;  %v3429_v4 = vunpack.i.l.bf16 %v5365_v25 }
  0xe0   : > { %7598 = vst [vmem:[#allocation12_spill] sm:$0xff] %v5528_v48  ;;  %v5540_v14 = vpop.permute.xlu0 %3552  ;;  %v1540_v25 = vsel %vm1506_vm5, %v1491_v10, %v3524_v9  ;;  %v7604_v48 = vld [vmem:[#allocation46_spill] sm:$0xff] }
  0xe1   : > { %3827 = vrot.lane.b32.xlu1 %v3826_v24, %s4447_s11  ;;  %v3414_v24 = vunpack.i.l.bf16 %v5352_v52  ;;  %v1494_v52 = vsel %vm1458_vm3, 0.0, %v3415_v34 }
  0xe2   : > { %3832 = vrot.lane.b32.xlu0 %v3831_v62, %s4447_s11  ;;  %v3515_v62 = vunpack.i.h.bf16 %v5464_v39 }
  0xe3   : > { %v5571_v50 = vpop.permute.xlu1 %638 }
  0xe4   : > { %7599 = vst [vmem:[#allocation16_spill] sm:$0xff] %v5571_v50  ;;  %v5577_v6 = vpop.permute.xlu0 %3557  ;;  %v3485_v50 = vunpack.i.h.bf16 %v5430_v53  ;;  %v1537_v34 = vsel %vm1506_vm5, %v1488_v28, %v3515_v62  ;;  %v3554_v62 = vunpack.i.l.bf16 %v5540_v14 }
  0xe5   : > { %7600 = vst [vmem:[#allocation67_spill] sm:$0xff] %v5577_v6  ;;  %v5583_v22 = vunpack.i.l.bf16 %v5577_v6  ;;  %3837 = vrot.lane.b32.xlu1 %v7601_v27, %s4448_s12  ;;  %v3439_v6 = vunpack.i.l.bf16 %v5380_v46  ;;  %v3539_v27 = vunpack.i.l.bf16 %v5502_v19  ;;  %v3545_v46 = vunpack.i.h.bf16 %v5511_v36 }
  0xe6   : > { %3842 = vrot.lane.b32.xlu0 %v3841_v5, %s4448_s12  ;;  %v3509_v5 = vunpack.i.l.bf16 %v5462_v47  ;;  %v1525_v28 = vsel %vm1506_vm5, %v1476_v41, %v3485_v50 }
  0xe7   : > { %v5598_v29 = vpop.permute.xlu1 %3562  ;;  %v5613_v17 = vsel %vm1555_vm4, %v1537_v34, %v5583_v22  ;;  %v5622_v10 = vsel %vm1555_vm4, %v1540_v25, %v5583_v22  ;;  %v1503_v9 = vsel %vm1458_vm3, 0.0, %v3439_v6  ;;  %v1543_v34 = vsel %vm1506_vm5, %v1494_v52, %v3530_v20 }
  0xe8   : > { %7602 = vst [vmem:[#allocation66_spill] sm:$0xff] %v5598_v29  ;;  %v5604_v53 = vpop.permute.xlu0 %3567  ;;  %7605 = vst [vmem:[#allocation68_spill] sm:$0xff] %v5613_v17  ;;  %v1500_v29 = vsel %vm1458_vm3, 0.0, %v3430_v56  ;;  %v5631_v41 = vsel %vm1555_vm4, %v1525_v28, %v5583_v22  ;;  %v1531_v56 = vsel %vm1506_vm5, %v1482_v32, %v3500_v18  ;;  %v1534_v20 = vsel %vm1506_vm5, %v1485_v11, %v3509_v5  ;;  %v7614_v11 = vld [vmem:[#allocation52_spill] sm:$0xff] }
  0xe9   : > { %7603 = vst [vmem:[#allocation69_spill] sm:$0xff] %v5604_v53  ;;  %3847 = vrot.lane.b32.xlu1 %v7604_v48, %s4444_s27  ;;  %v7606_v53 = vld [vmem:[#allocation51_spill] sm:$0xff]  ;;  %7607 = vst [vmem:[#allocation71_spill] sm:$0xff] %v5622_v10  ;;  %v1528_v48 = vsel %vm1506_vm5, %v1479_v35, %v3494_v63  ;;  %v5643_v63 = vsel %vm1555_vm4, %v1543_v34, %v5583_v22  ;;  %v1549_v35 = vsel %vm1506_vm5, %v1500_v29, %v3545_v46 }
  0xea   : > { %3852 = vrot.lane.b32.xlu0 %v7606_v53, %s4444_s27  ;;  %7608 = vst [vmem:[#allocation70_spill] sm:$0xff] %v5631_v41  ;;  %v1546_v53 = vsel %vm1506_vm5, %v1497_v37, %v3539_v27  ;;  %v5639_v25 = vsel %vm1555_vm4, %v1528_v48, %v5583_v22  ;;  %7610 = vst [vmem:[#allocation22_spill] sm:$0xff] %v5643_v63  ;;  %v7611_v32 = vpack.i.bf16 %v7592_v21, %v7591_v13  ;;  %v7696_v63 = vld [vmem:[#allocation61_spill] sm:$0xff] }
  0xeb   : > { %v5627_v17 = vpop.permute.xlu1 %3572  ;;  %7609 = vst [vmem:[#allocation21_spill] sm:$0xff] %v5639_v25  ;;  %v5653_v6 = vsel %vm1555_vm4, %v1546_v53, %v5583_v22  ;;  %v5657_v52 = vsel %vm1555_vm4, %v1531_v56, %v5583_v22  ;;  %v3489_v37 = vunpack.i.l.bf16 %v5440_v3  ;;  %v1552_v18 = vsel %vm1506_vm5, %v1503_v9, %v3554_v62 }
  0xec   : > { %v5635_v50 = vpop.permute.xlu0 %3577  ;;  %7612 = vst [vmem:[#allocation27_spill] sm:$0xff] %v5653_v6  ;;  %7613 = vst [vmem:[#allocation73_spill] sm:$0xff] %v5657_v52  ;;  %v5665_v46 = vsel %vm1555_vm4, %v1534_v20, %v5583_v22  ;;  %v5669_v21 = vsel %vm1555_vm4, %v1549_v35, %v5583_v22  ;;  %v1490_v13 = vsel %vm1458_vm3, %v4703_v58, %v3405_v49  ;;  %v3490_v29 = vunpack.i.h.bf16 %v5440_v3  ;;  %v7687_v52 = vld [vmem:[#allocation82_spill] sm:$0xff] }
  0xed   : > { %3857 = vrot.lane.b32.xlu1 %v7611_v32, %s4448_s12  ;;  %7615 = vst [vmem:[#allocation74_spill] sm:$0xff] %v5665_v46  ;;  %7616 = vst [vmem:[#allocation17_spill] sm:$0xff] %v5669_v21  ;;  %v3495_v27 = vunpack.i.h.bf16 %v5442_v12  ;;  %v5679_v28 = vsel %vm1555_vm4, %v1552_v18, %v5583_v22  ;;  %v7618_v62 = vunpack.i.l.bf16 %v5342_v30  ;;  %v7619_v48 = vunpack.i.h.bf16 %v5344_v8  ;;  %v7690_v6 = vld [vmem:[#allocation10_spill] sm:$0xff] }
  0xee   : > { %3862 = vrot.lane.b32.xlu0 %v7614_v11, %s4444_s27  ;;  %7617 = vst [vmem:[#allocation23_spill] sm:$0xff] %v5679_v28  ;;  %v5691_v3 = vsel %vm1458_vm3, %v4709_v60, %v3414_v24  ;;  %v5695_v12 = vsel %vm1458_vm3, %v4744_v1, %v3420_v51  ;;  %v1495_v30 = vsel %vm1458_vm3, %v4741_v0, %v3419_v38  ;;  %v3504_v8 = vunpack.i.l.bf16 %v5454_v16  ;;  %v7621_v24 = vld [vmem:[#allocation8_spill] sm:$0xff] }
  0xef   : > { %v5675_v5 = vpop.permute.xlu1 %3582  ;;  %v1489_v9 = vsel %vm1458_vm3, %v4700_v57, %v7618_v62  ;;  %v1492_v58 = vsel %vm1458_vm3, %v4706_v59, %v7619_v48  ;;  %v3499_v57 = vunpack.i.l.bf16 %v5452_v26  ;;  %v7620_v59 = vld [vmem:[#allocation97_spill] sm:$0xff]  ;;  %v5708_v60 = vsel %vm1458_vm3, %v4775_v55, %v3425_v45  ;;  %v7622_v26 = vld [vmem:[#allocation102_spill] sm:$0xff] }
  0xf0   : > { %v5697_v49 = vpop.permute.xlu0 %3587  ;;  %v5712_v1 = vsel %vm1458_vm3, %v4778_v61, %v3429_v4  ;;  %v3435_v51 = vunpack.i.h.bf16 %v7621_v24  ;;  %v1526_v0 = vsel %vm1506_vm5, %v5532_v7, %v3489_v37  ;;  %v3434_v38 = vunpack.i.l.bf16 %v7621_v24 }
  0xf1   : > { %v3590_v34 = vunpack.i.h.bf16 %v5697_v49  ;;  %3867 = vrot.lane.b32.xlu1 %v7620_v59, %s4445_s28  ;;  %v1527_v56 = vsel %vm1506_vm5, %v5525_v2, %v3490_v29  ;;  %v1529_v55 = vsel %vm1506_vm5, %v5536_v40, %v3495_v27  ;;  %v3505_v53 = vunpack.i.h.bf16 %v5454_v16  ;;  %v7624_v40 = vld [vmem:[#allocation103_spill] sm:$0xff] }
  0xf2   : > { %3872 = vrot.lane.b32.xlu0 %v7622_v26, %s4445_s28  ;;  %v3510_v20 = vunpack.i.h.bf16 %v5462_v47  ;;  %v1530_v37 = vsel %vm1506_vm5, %v5545_v15, %v3499_v57  ;;  %v1532_v2 = vsel %vm1506_vm5, %v5553_v33, %v3504_v8  ;;  %v3514_v29 = vunpack.i.l.bf16 %v5464_v39  ;;  %v7625_v27 = vld [vmem:[#allocation11_spill] sm:$0xff]  ;;  %v7628_v15 = vld [vmem:[#allocation116_spill] sm:$0xff] }
  0xf3   : > { %v5725_v45 = vsel %vm1555_vm4, %v1526_v0, %v3590_v34  ;;  %v3593_v4 = vpop.permute.xlu1 %3592  ;;  %v3519_v16 = vunpack.i.l.bf16 %v7625_v27  ;;  %v3520_v33 = vunpack.i.h.bf16 %v7625_v27  ;;  %v3525_v48 = vunpack.i.h.bf16 %v5472_v44 }
  0xf4   : > { %7623 = vst [vmem:[#allocation18_spill] sm:$0xff] %v5725_v45  ;;  %v3595_v7 = vunpack.i.h.bf16 %v3593_v4  ;;  %v3594_v35 = vunpack.i.l.bf16 %v3593_v4  ;;  %v3598_v32 = vpop.permute.xlu0 %3597  ;;  %v1533_v34 = vsel %vm1506_vm5, %v5549_v31, %v3505_v53  ;;  %v1535_v59 = vsel %vm1506_vm5, %v5558_v23, %v3510_v20  ;;  %v7631_v4 = vld [vmem:[#allocation7_spill] sm:$0xff] }
  0xf5   : > { %v3600_v18 = vunpack.i.h.bf16 %v3598_v32  ;;  %v3599_v11 = vunpack.i.l.bf16 %v3598_v32  ;;  %3877 = vrot.lane.b32.xlu1 %v7624_v40, %s4445_s28  ;;  %v3534_v44 = vunpack.i.l.bf16 %v7631_v4  ;;  %v7632_v32 = vld [vmem:[#allocation28_spill] sm:$0xff]  ;;  %v1538_v31 = vsel %vm1506_vm5, %v1489_v9, %v3519_v16 }
  0xf6   : > { %v5738_v47 = vsel %vm1555_vm4, %v1527_v56, %v3594_v35  ;;  %v5741_v62 = vsel %vm1555_vm4, %v1529_v55, %v3595_v7  ;;  %3882 = vrot.lane.b32.xlu0 %v7628_v15, %s4446_s6  ;;  %v3529_v55 = vunpack.i.l.bf16 %v5478_v54  ;;  %v7635_v54 = vld [vmem:[#allocation32_spill] sm:$0xff]  ;;  %v1539_v20 = vsel %vm1506_vm5, %v1490_v13, %v3520_v33 }
  0xf7   : > { %7626 = vst [vmem:[#allocation19_spill] sm:$0xff] %v5738_v47  ;;  %7627 = vst [vmem:[#allocation24_spill] sm:$0xff] %v5741_v62  ;;  %v5748_v57 = vsel %vm1555_vm4, %v1530_v37, %v3599_v11  ;;  %v5751_v39 = vsel %vm1555_vm4, %v1532_v2, %v3600_v18  ;;  %v3603_v8 = vpop.permute.xlu1 %3602  ;;  %v1536_v37 = vsel %vm1506_vm5, %v5566_v43, %v3514_v29  ;;  %v3535_v11 = vunpack.i.h.bf16 %v7631_v4  ;;  %v7698_v47 = vld [vmem:[#allocation55_spill] sm:$0xff] }
  0xf8   : > { %7629 = vst [vmem:[#allocation20_spill] sm:$0xff] %v5748_v57  ;;  %7630 = vst [vmem:[#allocation75_spill] sm:$0xff] %v5751_v39  ;;  %v3605_v0 = vunpack.i.h.bf16 %v3603_v8  ;;  %v3604_v26 = vunpack.i.l.bf16 %v3603_v8  ;;  %v3608_v56 = vpop.permute.xlu0 %3607  ;;  %v1541_v2 = vsel %vm1506_vm5, %v1492_v58, %v3525_v48  ;;  %v3540_v40 = vunpack.i.h.bf16 %v5502_v19  ;;  %v7686_v39 = vld [vmem:[#allocation77_spill] sm:$0xff] }
  0xf9   : > { %v3610_v7 = vunpack.i.h.bf16 %v3608_v56  ;;  %v3609_v35 = vunpack.i.l.bf16 %v3608_v56  ;;  %3887 = vrot.lane.b32.xlu1 %v7632_v32, %s4444_s27  ;;  %v1542_v15 = vsel %vm1506_vm5, %v5691_v3, %v3529_v55  ;;  %v1544_v13 = vsel %vm1506_vm5, %v1495_v30, %v3534_v44  ;;  %v7640_v3 = vld [vmem:[#allocation49_spill] sm:$0xff]  ;;  %v7641_v30 = vld [vmem:[#allocation43_spill] sm:$0xff]  ;;  %v7643_v56 = vld [vmem:[#allocation50_spill] sm:$0xff] }
  0xfa   : > { %v5765_v53 = vsel %vm1555_vm4, %v1533_v34, %v3604_v26  ;;  %v5768_v23 = vsel %vm1555_vm4, %v1535_v59, %v3605_v0  ;;  %3892 = vrot.lane.b32.xlu0 %v7635_v54, %s4444_s27  ;;  %v7637_v48 = vpack.i.bf16 %v4637_v42, %v4778_v61  ;;  %v3544_v8 = vunpack.i.l.bf16 %v5511_v36  ;;  %v7638_v34 = vld [vmem:[#allocation12_spill] sm:$0xff]  ;;  %v7644_v42 = vld [vmem:[#allocation6_spill] sm:$0xff] }
  0xfb   : > { %7633 = vst [vmem:[#allocation72_spill] sm:$0xff] %v5765_v53  ;;  %7634 = vst [vmem:[#allocation76_spill] sm:$0xff] %v5768_v23  ;;  %v5775_v18 = vsel %vm1555_vm4, %v1538_v31, %v3610_v7  ;;  %v5778_v43 = vsel %vm1555_vm4, %v1536_v37, %v3609_v35  ;;  %v3613_v9 = vpop.permute.xlu1 %3612  ;;  %v3549_v59 = vunpack.i.l.bf16 %v7638_v34  ;;  %v7642_v26 = vpack.i.bf16 %v7640_v3, %v7641_v30  ;;  %v7683_v23 = vld [vmem:[#allocation29_spill] sm:$0xff] }
  0xfc   : > { %7636 = vst [vmem:[#allocation80_spill] sm:$0xff] %v5778_v43  ;;  %v3615_v29 = vunpack.i.h.bf16 %v3613_v9  ;;  %v3614_v27 = vunpack.i.l.bf16 %v3613_v9  ;;  %v3618_v16 = vpop.permute.xlu0 %3617  ;;  %v1501_v55 = vsel %vm1458_vm3, %v7643_v56, %v3434_v38  ;;  %v3440_v61 = vunpack.i.h.bf16 %v7644_v42  ;;  %v7647_v9 = vld [vmem:[#allocation47_spill] sm:$0xff] }
  0xfd   : > { %v3620_v58 = vunpack.i.h.bf16 %v3618_v16  ;;  %v3619_v33 = vunpack.i.l.bf16 %v3618_v16  ;;  %3897 = vrot.lane.b32.xlu1 %v7637_v48, %s4446_s6  ;;  %v1545_v7 = vsel %vm1506_vm5, %v5695_v12, %v3535_v11  ;;  %v1547_v35 = vsel %vm1506_vm5, %v5708_v60, %v3540_v40  ;;  %v5832_v16 = vld [vmem:[%s4504_s24 + $0xd8] sm:$0xff] }
  0xfe   : > { %v5792_v19 = vsel %vm1555_vm4, %v1539_v20, %v3614_v27  ;;  %v5795_v0 = vsel %vm1555_vm4, %v1541_v2, %v3615_v29  ;;  %3902 = vrot.lane.b32.xlu0 %v7642_v26, %s4447_s11  ;;  %v3550_v31 = vunpack.i.h.bf16 %v7638_v34  ;;  %v3555_v54 = vunpack.i.h.bf16 %v5540_v14  ;;  %v7648_v29 = vld [vmem:[#allocation44_spill] sm:$0xff]  ;;  %v7652_v14 = vld [vmem:[#allocation33_spill] sm:$0xff]  ;;  %v5851_v34 = vld [vmem:[%s4504_s24 + $0xe0] sm:$0xff] }
  0xff   : > { %7639 = vst [vmem:[#allocation78_spill] sm:$0xff] %v5795_v0  ;;  %v5805_v36 = vsel %vm1555_vm4, %v1542_v15, %v3619_v33  ;;  %v5808_v4 = vsel %vm1555_vm4, %v1544_v13, %v3620_v58  ;;  %v3623_v44 = vpop.permute.xlu1 %3622  ;;  %v7649_v27 = vpack.i.bf16 %v7647_v9, %v7648_v29  ;;  %v1548_v12 = vsel %vm1506_vm5, %v5712_v1, %v3544_v8  ;;  %v5839_v13 = vld [vmem:[%s4504_s24 + $0xe8] sm:$0xff]  ;;  %v7653_v1 = vld [vmem:[#allocation14_spill] sm:$0xff]  ;;  %v7666_v29 = vld [vmem:[#allocation5_spill] sm:$0xff] }
 0x100   : > { %7645 = vst [vmem:[#allocation46_spill] sm:$0xff] %v5805_v36  ;;  %7646 = vst [vmem:[#allocation51_spill] sm:$0xff] %v5808_v4  ;;  %v3625_v32 = vunpack.i.h.bf16 %v3623_v44  ;;  %v3624_v37 = vunpack.i.l.bf16 %v3623_v44  ;;  %v3628_v38 = vpop.permute.xlu0 %3627  ;;  %v1550_v60 = vsel %vm1506_vm5, %v1501_v55, %v3549_v59  ;;  %v1502_v15 = vsel %vm1458_vm3, %v5832_v16, %v3435_v51  ;;  %v7656_v59 = vld [vmem:[#allocation16_spill] sm:$0xff]  ;;  %v7658_v44 = vld [vmem:[#allocation79_spill] sm:$0xff] }
 0x101   : > { %v3630_v20 = vunpack.i.h.bf16 %v3628_v38  ;;  %v3629_v2 = vunpack.i.l.bf16 %v3628_v38  ;;  %3907 = vrot.lane.b32.xlu1 %v7649_v27, %s4447_s11  ;;  %v1505_v58 = vsel %vm1458_vm3, %v5839_v13, %v7653_v1  ;;  %v1504_v24 = vsel %vm1458_vm3, %v5851_v34, %v3440_v61  ;;  %v7663_v38 = vld [vmem:[#allocation84_spill] sm:$0xff]  ;;  %v7669_v1 = vld [vmem:[#allocation99_spill] sm:$0xff] }
 0x102   : > { %v5824_v11 = vsel %vm1555_vm4, %v1545_v7, %v3624_v37  ;;  %v5827_v40 = vsel %vm1555_vm4, %v1547_v35, %v3625_v32  ;;  %3912 = vrot.lane.b32.xlu0 %v7652_v14, %s4444_s27  ;;  %v1554_v51 = vsel %vm1506_vm5, %v1505_v58, %v7656_v59  ;;  %v1551_v56 = vsel %vm1506_vm5, %v1502_v15, %v3550_v31  ;;  %v7659_v7 = vld [vmem:[#allocation53_spill] sm:$0xff]  ;;  %v7660_v35 = vld [vmem:[#allocation48_spill] sm:$0xff]  ;;  %v7664_v31 = vld [vmem:[#allocation95_spill] sm:$0xff] }
 0x103   : > { %7650 = vst [vmem:[#allocation52_spill] sm:$0xff] %v5824_v11  ;;  %7651 = vst [vmem:[#allocation97_spill] sm:$0xff] %v5827_v40  ;;  %v5845_v33 = vsel %vm1555_vm4, %v1550_v60, %v3630_v20  ;;  %v5848_v48 = vsel %vm1555_vm4, %v1548_v12, %v3629_v2  ;;  %v3633_v8 = vpop.permute.xlu1 %3632  ;;  %v1553_v55 = vsel %vm1506_vm5, %v1504_v24, %v3555_v54  ;;  %v7665_v54 = vld [vmem:[#allocation100_spill] sm:$0xff]  ;;  %v3330_v27 = vunpack.i.h.bf16 %v7666_v29  ;;  %v7667_v60 = vld [vmem:[#allocation117_spill] sm:$0xff] }
 0x104   : > { %7654 = vst [vmem:[#allocation8_spill] sm:$0xff] %v5845_v33  ;;  %7655 = vst [vmem:[#allocation102_spill] sm:$0xff] %v5848_v48  ;;  %v3635_v3 = vunpack.i.h.bf16 %v3633_v8  ;;  %v3634_v30 = vunpack.i.l.bf16 %v3633_v8  ;;  %v754_v26 = vpop.permute.xlu0 %753  ;;  %v3926_v32 = vpack.i.bf16 %v7660_v35, %v7659_v7  ;;  %v3931_v20 = vpack.i.bf16 %v7665_v54, %v7664_v31  ;;  %v7668_v15 = vld [vmem:[#allocation101_spill] sm:$0xff]  ;;  %v7670_v24 = vld [vmem:[#allocation118_spill] sm:$0xff] }
 0x105   : > { %v5860_v42 = vsel %vm1555_vm4, %v1554_v51, %v754_v26  ;;  %3917 = vrot.lane.b32.xlu1 %v7658_v44, %s4445_s28  ;;  %v3329_v12 = vunpack.i.l.bf16 %v7666_v29  ;;  %v3335_v14 = vunpack.i.h.bf16 %v7667_v60  ;;  %v3936_v58 = vpack.i.bf16 %v7669_v1, %v7668_v15  ;;  %v7672_v26 = vld [vmem:[#allocation121_spill] sm:$0xff]  ;;  %v7673_v44 = vld [vmem:[#allocation122_spill] sm:$0xff]  ;;  %v7675_v31 = vld [vmem:[#allocation112_spill] sm:$0xff] }
 0x106   : > { %7657 = vst [vmem:[#allocation103_spill] sm:$0xff] %v5860_v42  ;;  %v5867_v61 = vsel %vm1555_vm4, %v1551_v56, %v3634_v30  ;;  %v5870_v37 = vsel %vm1555_vm4, %v1553_v55, %v3635_v3  ;;  %3922 = vrot.lane.b32.xlu0 %v7663_v38, %s4445_s28  ;;  %v3334_v8 = vunpack.i.l.bf16 %v7667_v60  ;;  %v3345_v59 = vunpack.i.h.bf16 %v7670_v24  ;;  %v7671_v3 = vld [vmem:[#allocation120_spill] sm:$0xff]  ;;  %v7676_v54 = vld [vmem:[#allocation115_spill] sm:$0xff]  ;;  %v7689_v48 = vld [vmem:[#allocation81_spill] sm:$0xff] }
 0x107   : > { %7661 = vst [vmem:[#allocation11_spill] sm:$0xff] %v5867_v61  ;;  %7662 = vst [vmem:[#allocation116_spill] sm:$0xff] %v5870_v37  ;;  %v5876_v2 = vpop.permute.xlu1 %3637  ;;  %v3344_v51 = vunpack.i.l.bf16 %v7670_v24  ;;  %v3339_v30 = vunpack.i.l.bf16 %v7671_v3  ;;  %v3355_v56 = vunpack.i.h.bf16 %v7672_v26  ;;  %v3354_v55 = vunpack.i.l.bf16 %v7672_v26  ;;  %v4412_v26 = vld [vmem:[%s4504_s24 + $0x78] sm:$0xff]  ;;  %v4414_v29 = vld [vmem:[%s4504_s24 + $0x8] sm:$0xff] }
 0x108   : > { %v5878_v9 = vpop.permute.xlu0 %3642  ;;  %v3350_v7 = vunpack.i.h.bf16 %v7673_v44  ;;  %v1460_v15 = vsel %vm1458_vm3, 0.0, %v3330_v27  ;;  %v1459_v1 = vsel %vm1458_vm3, 0.0, %v3329_v12  ;;  %v1464_v24 = vsel %vm1458_vm3, 0.0, %v3335_v14  ;;  %v4415_v42 = vld [vmem:[%s4504_s24] sm:$0xff]  ;;  %v7677_v12 = vld [vmem:[#allocation85_spill] sm:$0xff]  ;;  %v7678_v14 = vld [vmem:[#allocation104_spill] sm:$0xff] }
 0x109   : > { %3927 = vrot.lane.b32.xlu1 %v3926_v32, %s4447_s11  ;;  %v7674_v32 = vld [vmem:[#allocation119_spill] sm:$0xff]  ;;  %v1462_v61 = vsel %vm1458_vm3, %v4415_v42, %v3345_v59  ;;  %v1461_v27 = vsel %vm1458_vm3, 0.0, %v3344_v51  ;;  %v4416_v33 = vld [vmem:[%s4504_s24 + $0x28] sm:$0xff]  ;;  %v4418_v42 = vld [vmem:[%s4504_s24 + $0x18] sm:$0xff] }
 0x10a   : > { %3932 = vrot.lane.b32.xlu0 %v3931_v20, %s4448_s12  ;;  %v5897_v38 = vrot.slane %v7674_v32, 2  ;;  %v3349_v20 = vunpack.i.l.bf16 %v7673_v44  ;;  %v4413_v32 = vld [vmem:[%s4504_s24 + $0x80] sm:$0xff]  ;;  %v1463_v44 = vsel %vm1458_vm3, %v4414_v29, %v3334_v8  ;;  %v5928_v29 = vsel %vm1458_vm3, 0.0, %v3354_v55  ;;  %v7682_v55 = vld [vmem:[#allocation26_spill] sm:$0xff] }
 0x10b   : > { %v5894_v35 = vpop.permute.xlu1 %3647  ;;  %v3946_v37 = vpack.i.bf16 %v4413_v32, %v4412_v26  ;;  %v5921_v26 = vsel %vm1458_vm3, %v4416_v33, %v3339_v30  ;;  %v4417_v32 = vld [vmem:[%s4504_s24 + $0x20] sm:$0xff]  ;;  %v5932_v59 = vsel %vm1458_vm3, %v4418_v42, %v3350_v7  ;;  %v4420_v33 = vld [vmem:[%s4504_s24 + $0x88] sm:$0xff]  ;;  %v4421_v30 = vld [vmem:[%s4504_s24 + $0xd0] sm:$0xff]  ;;  %v3966_v46 = vpack.i.bf16 %v7683_v23, %v7682_v55 }
 0x10c   : > { %v5902_v60 = vpop.permute.xlu0 %3652  ;;  %v5925_v8 = vsel %vm1458_vm3, %v4417_v32, %v3355_v56  ;;  %v3956_v21 = vpack.i.bf16 %v4421_v30, %v4420_v33  ;;  %v7680_v56 = vld [vmem:[#allocation25_spill] sm:$0xff]  ;;  %v7681_v32 = vld [vmem:[#allocation31_spill] sm:$0xff]  ;;  %v7684_v7 = vld [vmem:[#allocation34_spill] sm:$0xff]  ;;  %v3445_v33 = vunpack.i.h.bf16 %v7690_v6  ;;  %v3444_v30 = vunpack.i.l.bf16 %v7690_v6 }
 0x10d   : > { %3937 = vrot.lane.b32.xlu1 %v3936_v58, %s4448_s12  ;;  %v7679_v58 = vld [vmem:[#allocation106_spill] sm:$0xff]  ;;  %v3961_v43 = vpack.i.bf16 %v7681_v32, %v7680_v56  ;;  %v7692_v23 = vld [vmem:[#allocation88_spill] sm:$0xff]  ;;  %v7697_v6 = vld [vmem:[#allocation67_spill] sm:$0xff] }
 0x10e   : > { %3942 = vrot.lane.b32.xlu0 %v7677_v12, %s4445_s28  ;;  %v3951_v28 = vpack.i.bf16 %v7679_v58, %v7678_v14  ;;  %v4419_v12 = vld [vmem:[%s4504_s24 + $0x10] sm:$0xff]  ;;  %v7685_v42 = vld [vmem:[#allocation30_spill] sm:$0xff]  ;;  %v1508_v11 = vsel %vm1506_vm5, %v1460_v15, %v3445_v33  ;;  %v1507_v4 = vsel %vm1506_vm5, %v1459_v1, %v3444_v30  ;;  %v3560_v62 = vunpack.i.h.bf16 %v7697_v6  ;;  %v7699_v32 = vld [vmem:[#allocation56_spill] sm:$0xff] }
 0x10f   : > { %v5934_v51 = vpop.permute.xlu1 %3657  ;;  %v5938_v14 = vsel %vm1458_vm3, %v4419_v12, %v3349_v20  ;;  %v3971_v53 = vpack.i.bf16 %v7685_v42, %v7684_v7  ;;  %v3976_v20 = vpack.i.bf16 %v7687_v52, %v7686_v39  ;;  %v7688_v12 = vld [vmem:[#allocation83_spill] sm:$0xff]  ;;  %v7691_v56 = vld [vmem:[#allocation86_spill] sm:$0xff] }
 0x110   : > { %v5940_v58 = vpop.permute.xlu0 %3662  ;;  %v3981_v40 = vpack.i.bf16 %v7689_v48, %v7688_v12  ;;  %v7694_v52 = vld [vmem:[#allocation15_spill] sm:$0xff] }
 0x111   : > { %3947 = vrot.lane.b32.xlu1 %v3946_v37, %s4446_s6  ;;  %v7693_v37 = vld [vmem:[#allocation9_spill] sm:$0xff]  ;;  %v3455_v39 = vunpack.i.h.bf16 %v7694_v52  ;;  %v3454_v48 = vunpack.i.l.bf16 %v7694_v52  ;;  %v7695_v52 = vld [vmem:[#allocation54_spill] sm:$0xff]  ;;  %v7702_v6 = vld [vmem:[#allocation127_spill] sm:$0xff] }
 0x112   : > { %3952 = vrot.lane.b32.xlu0 %v3951_v28, %s4448_s12  ;;  %v3449_v55 = vunpack.i.l.bf16 %v7693_v37  ;;  %v3450_v42 = vunpack.i.h.bf16 %v7693_v37  ;;  %v5972_v28 = vld [vmem:[%s4504_s24 + $0x90] sm:$0xff]  ;;  %v1509_v37 = vsel %vm1506_vm5, %v1459_v1, %v3445_v33 }
 0x113   : > { %v5961_v7 = vpop.permute.xlu1 %3667  ;;  %v5990_v33 = vsel %vm1506_vm5, %v1464_v24, %v3455_v39  ;;  %v1512_v1 = vsel %vm1506_vm5, %v1463_v44, %v3454_v48  ;;  %v7703_v24 = vld [vmem:[#allocation69_spill] sm:$0xff]  ;;  %v3639_v44 = vunpack.i.l.bf16 %v5876_v2  ;;  %v1557_v39 = vsel %vm1555_vm4, %v1508_v11, %v3560_v62 }
 0x114   : > { %v5966_v12 = vpop.permute.xlu0 %3672  ;;  %v1510_v57 = vsel %vm1506_vm5, %v1461_v27, %v3449_v55  ;;  %v1511_v15 = vsel %vm1506_vm5, %v1462_v61, %v3450_v42  ;;  %v3569_v42 = vunpack.i.l.bf16 %v7703_v24  ;;  %v3640_v48 = vunpack.i.h.bf16 %v5876_v2 }
 0x115   : > { %3957 = vrot.lane.b32.xlu1 %v3956_v21, %s4446_s6  ;;  %v7701_v21 = vld [vmem:[#allocation126_spill] sm:$0xff]  ;;  %v3644_v27 = vunpack.i.l.bf16 %v5878_v9  ;;  %v3645_v61 = vunpack.i.h.bf16 %v5878_v9  ;;  %v1559_v36 = vsel %vm1555_vm4, %v1510_v57, %v5583_v22  ;;  %v3670_v11 = vunpack.i.h.bf16 %v5961_v7 }
 0x116   : > { %3962 = vrot.lane.b32.xlu0 %v3961_v43, %s4447_s11  ;;  %v7700_v43 = vld [vmem:[#allocation66_spill] sm:$0xff]  ;;  %v3669_v2 = vunpack.i.l.bf16 %v5961_v7  ;;  %v1561_v9 = vsel %vm1555_vm4, %v1512_v1, %v3569_v42  ;;  %v3675_v57 = vunpack.i.h.bf16 %v5966_v12 }
 0x117   : > { %v5984_v25 = vpop.permute.xlu1 %3677  ;;  %v3564_v30 = vunpack.i.l.bf16 %v7700_v43  ;;  %v3565_v55 = vunpack.i.h.bf16 %v7700_v43  ;;  %v1556_v43 = vsel %vm1555_vm4, %v1507_v4, %v5583_v22  ;;  %v3650_v4 = vunpack.i.h.bf16 %v5894_v35 }
 0x118   : > { %v3683_v41 = vpop.permute.xlu0 %3682  ;;  %v3679_v7 = vunpack.i.l.bf16 %v5984_v25 }
 0x119   : > { %3967 = vrot.lane.b32.xlu1 %v3966_v46, %s4447_s11  ;;  %v1558_v45 = vsel %vm1555_vm4, %v1509_v37, %v3564_v30  ;;  %v1560_v62 = vsel %vm1555_vm4, %v1511_v15, %v3565_v55  ;;  %v1605_v37 = vsel %vm1604_vm6, %v1556_v43, %v3639_v44  ;;  %v3674_v30 = vunpack.i.l.bf16 %v5966_v12 }
 0x11a   : > { %3972 = vrot.lane.b32.xlu0 %v3971_v53, %s4447_s11  ;;  %v3649_v53 = vunpack.i.l.bf16 %v5894_v35  ;;  %v1606_v15 = vsel %vm1604_vm6, %v1557_v39, %v3640_v48  ;;  %v1607_v35 = vsel %vm1604_vm6, %v1558_v45, %v3644_v27  ;;  %v3680_v55 = vunpack.i.h.bf16 %v5984_v25  ;;  %v7704_v27 = vld [vmem:[#allocation59_spill] sm:$0xff] }
 0x11b   : > { %v3688_v46 = vpop.permute.xlu1 %3687  ;;  %v3685_v42 = vunpack.i.h.bf16 %v3683_v41  ;;  %v6031_v44 = vunpack.i.l.bf16 %v3683_v41  ;;  %v1610_v12 = vsel %vm1604_vm6, %v1561_v9, %v3650_v4  ;;  %v1655_v39 = vsel %vm1653_vm7, %v1606_v15, %v3670_v11  ;;  %v7705_v41 = vld [vmem:[#allocation60_spill] sm:$0xff] }
 0x11c   : > { %v6013_v0 = vpop.permute.xlu0 %3692  ;;  %v1609_v1 = vsel %vm1604_vm6, %v1560_v62, %v3649_v53  ;;  %v3689_v45 = vunpack.i.l.bf16 %v3688_v46  ;;  %v1656_v25 = vsel %vm1653_vm7, %v1607_v35, %v3674_v30  ;;  %v1659_v62 = vsel %vm1653_vm7, %v1610_v12, %v3680_v55  ;;  %v7707_v12 = vld [vmem:[#allocation64_spill] sm:$0xff] }
 0x11d   : > { %3977 = vrot.lane.b32.xlu1 %v3976_v20, %s4448_s12  ;;  %v1608_v20 = vsel %vm1604_vm6, %v1559_v36, %v3645_v61  ;;  %v1658_v53 = vsel %vm1653_vm7, %v1609_v1, %v3679_v7  ;;  %v3690_v4 = vunpack.i.h.bf16 %v3688_v46  ;;  %v3694_v11 = vunpack.i.l.bf16 %v6013_v0 }
 0x11e   : > { %3982 = vrot.lane.b32.xlu0 %v3981_v40, %s4448_s12  ;;  %v1654_v40 = vsel %vm1653_vm7, %v1605_v37, %v3669_v2  ;;  %v1657_v36 = vsel %vm1653_vm7, %v1608_v20, %v3675_v57  ;;  %v1704_v9 = vsel %vm1702_vm8, %v1655_v39, %v3685_v42  ;;  %v1705_v15 = vsel %vm1702_vm8, %v1656_v25, %v3689_v45 }
 0x11f   : > { %v3698_v10 = vpop.permute.xlu1 %3697  ;;  %v1703_v37 = vsel %vm1702_vm8, %v1654_v40, %v6031_v44  ;;  %v1706_v35 = vsel %vm1702_vm8, %v1657_v36, %v6031_v44  ;;  %v7706_v46 = vpack.i.bf16 %v7692_v23, %v7691_v56  ;;  %v1707_v40 = vsel %vm1702_vm8, %v1658_v53, %v3690_v4 }
 0x120   : > { %v3703_v43 = vpop.permute.xlu0 %3702  ;;  %v3700_v61 = vunpack.i.h.bf16 %v3698_v10  ;;  %v3699_v48 = vunpack.i.l.bf16 %v3698_v10  ;;  %v1708_v39 = vsel %vm1702_vm8, %v1659_v62, %v3694_v11 }
 0x121   : > { %3987 = vrot.lane.b32.xlu1 %v7704_v27, %s4444_s27  ;;  %v3705_v57 = vunpack.i.h.bf16 %v3703_v43  ;;  %v3704_v30 = vunpack.i.l.bf16 %v3703_v43 }
 0x122   : > { %3992 = vrot.lane.b32.xlu0 %v7705_v41, %s4444_s27  ;;  %v1752_v55 = vsel %vm1751_vm9, %v1703_v37, %v3699_v48  ;;  %v1753_v1 = vsel %vm1751_vm9, %v1704_v9, %v3700_v61  ;;  %v7708_v9 = vld [vmem:[#allocation108_spill] sm:$0xff] }
 0x123   : > { %v3708_v2 = vpop.permute.xlu1 %3707  ;;  %v1754_v23 = vsel %vm1751_vm9, %v1705_v15, %v3704_v30  ;;  %v1755_v25 = vsel %vm1751_vm9, %v1706_v35, %v3705_v57  ;;  %v7709_v30 = vld [vmem:[#allocation109_spill] sm:$0xff] }
 0x124   : > { %v3713_v10 = vpop.permute.xlu0 %3712  ;;  %v3710_v42 = vunpack.i.h.bf16 %v3708_v2  ;;  %v3709_v43 = vunpack.i.l.bf16 %v3708_v2 }
 0x125   : > { %v3715_v7 = vunpack.i.h.bf16 %v3713_v10  ;;  %v3714_v20 = vunpack.i.l.bf16 %v3713_v10  ;;  %3997 = vrot.lane.b32.xlu1 %v7706_v46, %s4448_s12  ;;  %v7710_v46 = vunpack.i.h.bf16 %v7701_v21 }
 0x126   : > { %4002 = vrot.lane.b32.xlu0 %v7707_v12, %s4444_s27  ;;  %v1756_v62 = vsel %vm1751_vm9, %v1707_v40, %v3709_v43  ;;  %v1757_v11 = vsel %vm1751_vm9, %v1708_v39, %v3710_v42  ;;  %v7711_v12 = vunpack.i.l.bf16 %v7701_v21  ;;  %v7712_v39 = vld [vmem:[#allocation128_spill] sm:$0xff] }
 0x127   : > { %v3718_v45 = vpop.permute.xlu1 %3717  ;;  %v1801_v27 = vsel %vm1800_vm10, %v1752_v55, %v3714_v20  ;;  %v1802_v56 = vsel %vm1800_vm10, %v1753_v1, %v3715_v7  ;;  %v1515_v55 = vsel %vm1506_vm5, %v5932_v59, %v7710_v46  ;;  %v7714_v59 = vunpack.i.l.bf16 %v7702_v6 }
 0x128   : > { %v3720_v36 = vunpack.i.h.bf16 %v3718_v45  ;;  %v3719_v61 = vunpack.i.l.bf16 %v3718_v45  ;;  %v3723_v48 = vpop.permute.xlu0 %3722  ;;  %v1898_v53 = vrot.slane %v1801_v27, 7  ;;  %v1899_v4 = vrot.slane %v1802_v56, 7  ;;  %v7713_v27 = vld [vmem:[#allocation113_spill] sm:$0xff] }
 0x129   : > { %v3725_v41 = vunpack.i.h.bf16 %v3723_v48  ;;  %v3724_v2 = vunpack.i.l.bf16 %v3723_v48  ;;  %4007 = vrot.lane.b32.xlu1 %v7708_v9, %s4445_s28  ;;  %v1514_v40 = vsel %vm1506_vm5, %v5938_v14, %v7711_v12  ;;  %v3469_v45 = vunpack.i.l.bf16 %v7712_v39 }
 0x12a   : > { %v1804_v37 = vsel %vm1800_vm10, %v1755_v25, %v3720_v36  ;;  %4012 = vrot.lane.b32.xlu0 %v7709_v30, %s4445_s28  ;;  %v1803_v57 = vsel %vm1800_vm10, %v1754_v23, %v3719_v61  ;;  %v1900_v56 = vsel %vm1897_vm11, %v1898_v53, %v1899_v4  ;;  %v1516_v25 = vsel %vm1506_vm5, %v5928_v29, %v7714_v59  ;;  %v7717_v53 = vld [vmem:[#allocation62_spill] sm:$0xff] }
 0x12b   : > { %v1903_v10 = vrot.slane %v1804_v37, 7  ;;  %v1805_v15 = vsel %vm1800_vm10, %v1756_v62, %v3724_v2  ;;  %v1806_v35 = vsel %vm1800_vm10, %v1757_v11, %v3725_v41  ;;  %v3728_v7 = vpop.permute.xlu1 %3727  ;;  %v1901_v20 = vrot.slane %v1803_v57, 7 }
 0x12c   : > { %v1904_v1 = vrot.slane %v1805_v15, 7  ;;  %v1906_v42 = vrot.slane %v1806_v35, 7  ;;  %v6079_v43 = vpop.permute.xlu0 %3732  ;;  %v7715_v36 = vunpack.i.h.bf16 %v7702_v6  ;;  %v7716_v14 = vpack.i.bf16 %v5851_v34, %v5832_v16  ;;  %v7718_v6 = vld [vmem:[#allocation57_spill] sm:$0xff] }
 0x12d   : > { %4017 = vrot.lane.b32.xlu1 %v7713_v27, %s4445_s28  ;;  %v1902_v23 = vsel %vm1897_vm11, %v1899_v4, %v1901_v20  ;;  %v3570_v41 = vunpack.i.h.bf16 %v7703_v24  ;;  %v3574_v2 = vunpack.i.l.bf16 %v5627_v17  ;;  %v4066_v4 = vpack.i.bf16 %v7718_v6, %v7717_v53 }
 0x12e   : > { %v1517_v21 = vsel %vm1506_vm5, %v5925_v8, %v7715_v36  ;;  %4022 = vrot.lane.b32.xlu0 %v7716_v14, %s4446_s6  ;;  %v2010_v61 = vpack.c.bf16 %v1902_v23, %v1900_v56  ;;  %v1905_v48 = vsel %vm1897_vm11, %v1903_v10, %v1904_v1  ;;  %v1907_v29 = vsel %vm1897_vm11, %v1904_v1, %v1906_v42 }
 0x12f   : > { %v3738_v9 = vpop.permute.xlu1 %3737  ;;  %v3575_v8 = vunpack.i.h.bf16 %v5627_v17  ;;  %v3579_v62 = vunpack.i.l.bf16 %v5635_v50  ;;  %v3654_v16 = vunpack.i.l.bf16 %v5902_v60  ;;  %v2011_v11 = vpack.c.bf16 %v1907_v29, %v1905_v48  ;;  %v7719_v17 = vld [vmem:[#allocation39_spill] sm:$0xff] }
 0x130   : > { %v3743_v34 = vpop.permute.xlu0 %3742  ;;  %3244 = vmatprep.mubr.msk.bf16.mxu0 %vm2048_vm12, %v2010_v61  ;;  %v1518_v24 = vsel %vm1506_vm5, %v5921_v26, %v3469_v45  ;;  %v3655_v37 = vunpack.i.h.bf16 %v5902_v60  ;;  %v1562_v30 = vsel %vm1555_vm4, %v5990_v33, %v5583_v22  ;;  %v3659_v57 = vunpack.i.l.bf16 %v5934_v51  ;;  %v7720_v26 = vld [vmem:[#allocation40_spill] sm:$0xff] }
 0x131   : > { %4027 = vrot.lane.b32.xlu1 %v7719_v17, %s4444_s27  ;;  %v3660_v10 = vunpack.i.h.bf16 %v5934_v51  ;;  %v3664_v15 = vunpack.i.l.bf16 %v5940_v58  ;;  %v3730_v35 = vunpack.i.h.bf16 %v3728_v7  ;;  %v3729_v20 = vunpack.i.l.bf16 %v3728_v7  ;;  %3245 = vmatmul.mubr.msk.bf16.vlgmr.msra.gmra.mxu0 %vm2048_vm12, %v2011_v11  ;;  %v7726_v17 = vld [vmem:[#allocation45_spill] sm:$0xff] }
 0x132   : > { %4032 = vrot.lane.b32.xlu0 %v7720_v26, %s4444_s27  ;;  %v1563_v60 = vsel %vm1555_vm4, %v1514_v40, %v3570_v41  ;;  %v1564_v33 = vsel %vm1555_vm4, %v1515_v55, %v3574_v2  ;;  %v1565_v46 = vsel %vm1555_vm4, %v1516_v25, %v5583_v22  ;;  %v3735_v1 = vunpack.i.h.bf16 %v6079_v43 }
 0x133   : > { %v6131_v42 = vpop.permute.xlu1 %3747  ;;  %v1566_v51 = vsel %vm1555_vm4, %v1517_v21, %v3575_v8  ;;  %v1567_v7 = vsel %vm1555_vm4, %v1518_v24, %v3579_v62  ;;  %v1611_v12 = vsel %vm1604_vm6, %v1562_v30, %v3654_v16  ;;  %v3739_v45 = vunpack.i.l.bf16 %v3738_v9 }
 0x134   : > { %v3753_v27 = vpop.permute.xlu0 %3752  ;;  %v1612_v56 = vsel %vm1604_vm6, %v1563_v60, %v3655_v37  ;;  %v1613_v40 = vsel %vm1604_vm6, %v1564_v33, %v3659_v57  ;;  %v3665_v55 = vunpack.i.h.bf16 %v5940_v58  ;;  %v3734_v23 = vunpack.i.l.bf16 %v6079_v43 }
 0x135   : > { %v7721_v59 = vpack.i.bf16 %v5972_v28, %v5839_v13  ;;  %v1614_v25 = vsel %vm1604_vm6, %v1565_v46, %v3660_v10  ;;  %v1615_v36 = vsel %vm1604_vm6, %v1566_v51, %v3664_v15  ;;  %v1660_v21 = vsel %vm1653_vm7, %v1611_v12, %v3729_v20 }
 0x136   : > { %v1661_v14 = vsel %vm1653_vm7, %v1612_v56, %v3730_v35  ;;  %v7722_v61 = vpack.i.bf16 %v7696_v63, %v7695_v52  ;;  %v1663_v58 = vsel %vm1653_vm7, %v1614_v25, %v3735_v1  ;;  %v3740_v43 = vunpack.i.h.bf16 %v3738_v9  ;;  %v7724_v9 = vld [vmem:[#allocation105_spill] sm:$0xff] }
 0x137   : > { %4037 = vrot.lane.b32.xlu1 %v7721_v59, %s4446_s6  ;;  %v3745_v48 = vunpack.i.h.bf16 %v3743_v34  ;;  %v3744_v41 = vunpack.i.l.bf16 %v3743_v34  ;;  %v3758_v13 = vpop.permute.xlu1 %3757  ;;  %v3695_v28 = vunpack.i.h.bf16 %v6013_v0  ;;  %v1664_v2 = vsel %vm1653_vm7, %v1615_v36, %v3739_v45  ;;  %v7725_v34 = vld [vmem:[#allocation110_spill] sm:$0xff] }
 0x138   : > { %4042 = vrot.lane.b32.xlu0 %v7722_v61, %s4447_s11  ;;  %v3755_v29 = vunpack.i.h.bf16 %v3753_v27  ;;  %v3754_v8 = vunpack.i.l.bf16 %v3753_v27  ;;  %v3763_v62 = vpop.permute.xlu0 %3762  ;;  %v1616_v16 = vsel %vm1604_vm6, %v1567_v7, %v3665_v55  ;;  %v1662_v11 = vsel %vm1653_vm7, %v1613_v40, %v3734_v23  ;;  %v7727_v45 = vld [vmem:[#allocation90_spill] sm:$0xff]  ;;  %v7728_v23 = vld [vmem:[#allocation91_spill] sm:$0xff] }
 0x139   : > { %v1709_v63 = vsel %vm1702_vm8, %v1660_v21, %v6031_v44  ;;  %v7723_v52 = vpack.i.bf16 %v7699_v32, %v7698_v47  ;;  %v4071_v0 = vpack.i.bf16 %v7725_v34, %v7724_v9  ;;  %v3749_v24 = vunpack.i.l.bf16 %v6131_v42 }
 0x13a   : > { %v1710_v37 = vsel %vm1702_vm8, %v1661_v14, %v3695_v28  ;;  %v3759_v30 = vunpack.i.l.bf16 %v3758_v13  ;;  %v1712_v57 = vsel %vm1702_vm8, %v1663_v58, %v6031_v44  ;;  %v1665_v10 = vsel %vm1653_vm7, %v1616_v16, %v3740_v43 }
 0x13b   : > { %4047 = vrot.lane.b32.xlu1 %v7723_v52, %s4447_s11  ;;  %v1711_v15 = vsel %vm1702_vm8, %v1662_v11, %v3744_v41  ;;  %v1713_v47 = vsel %vm1702_vm8, %v1664_v2, %v3745_v48  ;;  %v3760_v32 = vunpack.i.h.bf16 %v3758_v13  ;;  %v3768_v35 = vpop.permute.xlu1 %3767  ;;  %v1758_v20 = vsel %vm1751_vm9, %v1709_v63, %v3754_v8  ;;  %v7729_v2 = vld [vmem:[#allocation111_spill] sm:$0xff] }
 0x13c   : > { %4052 = vrot.lane.b32.xlu0 %v7726_v17, %s4444_s27  ;;  %v1759_v26 = vsel %vm1751_vm9, %v1710_v37, %v3755_v29  ;;  %v3770_v60 = vunpack.i.h.bf16 %v3768_v35  ;;  %v3769_v33 = vunpack.i.l.bf16 %v3768_v35  ;;  %v3773_v46 = vpop.permute.xlu0 %3772  ;;  %v3765_v1 = vunpack.i.h.bf16 %v3763_v62  ;;  %v7730_v29 = vld [vmem:[#allocation107_spill] sm:$0xff]  ;;  %v4423_v35 = vld [vmem:[%s4504_s24 + $0x98] sm:$0xff] }
 0x13d   : > { %v3764_v51 = vunpack.i.l.bf16 %v3763_v62  ;;  %v3775_v7 = vunpack.i.h.bf16 %v3773_v46  ;;  %v3774_v12 = vunpack.i.l.bf16 %v3773_v46  ;;  %v1714_v27 = vsel %vm1702_vm8, %v1665_v10, %v3749_v24  ;;  %v7731_v37 = vld [vmem:[#allocation123_spill] sm:$0xff]  ;;  %v7732_v10 = vld [vmem:[#allocation124_spill] sm:$0xff]  ;;  %v7733_v46 = vld [vmem:[#allocation125_spill] sm:$0xff] }
 0x13e   : > { %v1760_v56 = vsel %vm1751_vm9, %v1711_v15, %v3759_v30  ;;  %v1807_v40 = vsel %vm1800_vm10, %v1758_v20, %v3769_v33  ;;  %v1808_v55 = vsel %vm1800_vm10, %v1759_v26, %v3770_v60  ;;  %v1761_v59 = vsel %vm1751_vm9, %v1712_v57, %v3760_v32  ;;  %v4424_v20 = vld [vmem:[%s4504_s24 + $0xa0] sm:$0xff]  ;;  %v6218_v60 = vld [vmem:[%s4504_s24 + $0xf8] sm:$0xff] }
 0x13f   : > { %4057 = vrot.lane.b32.xlu1 %v7727_v45, %s4445_s28  ;;  %v1908_v25 = vrot.slane %v1807_v40, 7  ;;  %v1909_v36 = vrot.slane %v1808_v55, 7  ;;  %v1809_v21 = vsel %vm1800_vm10, %v1760_v56, %v3774_v12  ;;  %v3778_v14 = vpop.permute.xlu1 %3777  ;;  %v1810_v61 = vsel %vm1800_vm10, %v1761_v59, %v3775_v7  ;;  %v7735_v45 = vld [vmem:[#allocation129_spill] sm:$0xff] }
 0x140   : > { %4062 = vrot.lane.b32.xlu0 %v7728_v23, %s4445_s28  ;;  %v1911_v58 = vrot.slane %v1809_v21, 7  ;;  %v3780_v43 = vunpack.i.h.bf16 %v3778_v14  ;;  %v3779_v48 = vunpack.i.l.bf16 %v3778_v14  ;;  %v6187_v41 = vpop.permute.xlu0 %3782  ;;  %v1762_v13 = vsel %vm1751_vm9, %v1713_v47, %v3764_v51  ;;  %v7734_v51 = vld [vmem:[#allocation96_spill] sm:$0xff]  ;;  %v7736_v40 = vld [vmem:[#allocation13_spill] sm:$0xff] }
 0x141   : > { %v1763_v28 = vsel %vm1751_vm9, %v1714_v27, %v3765_v1  ;;  %v4076_v8 = vpack.i.bf16 %v7730_v29, %v7729_v2  ;;  %v1910_v62 = vsel %vm1897_vm11, %v1908_v25, %v1909_v36  ;;  %v4151_v52 = vpack.i.bf16 %v5897_v38, %v7676_v54  ;;  %v7737_v21 = vld [vmem:[#allocation4_spill] sm:$0xff]  ;;  %v4430_v29 = vld [vmem:[%s4504_s24 + $0xf0] sm:$0xff] }
 0x142   : > { %v1811_v16 = vsel %vm1800_vm10, %v1762_v13, %v3779_v48  ;;  %v1812_v11 = vsel %vm1800_vm10, %v1763_v28, %v3780_v43  ;;  %v1912_v63 = vsel %vm1897_vm11, %v1909_v36, %v1911_v58  ;;  %v1913_v53 = vrot.slane %v1810_v61, 7  ;;  %v4426_v61 = vld [vmem:[%s4504_s24 + $0x38] sm:$0xff]  ;;  %v4427_v43 = vld [vmem:[%s4504_s24 + $0x30] sm:$0xff]  ;;  %v4428_v13 = vld [vmem:[%s4504_s24 + $0x40] sm:$0xff] }
 0x143   : > { %4067 = vrot.lane.b32.xlu1 %v4066_v4, %s4447_s11  ;;  %v1914_v4 = vrot.slane %v1811_v16, 7  ;;  %v1916_v9 = vrot.slane %v1812_v11, 7  ;;  %v6204_v34 = vpop.permute.xlu1 %3787  ;;  %v3340_v24 = vunpack.i.h.bf16 %v7671_v3  ;;  %v3360_v30 = vunpack.i.h.bf16 %v7731_v37  ;;  %v4429_v2 = vld [vmem:[%s4504_s24 + $0xa8] sm:$0xff] }
 0x144   : > { %4072 = vrot.lane.b32.xlu0 %v4071_v0, %s4448_s12  ;;  %v3359_v57 = vunpack.i.l.bf16 %v7731_v37  ;;  %v6209_v0 = vpop.permute.xlu0 %3792  ;;  %v2012_v17 = vpack.c.bf16 %v1912_v63, %v1910_v62  ;;  %v3365_v15 = vunpack.i.h.bf16 %v7732_v10  ;;  %v4086_v26 = vpack.i.bf16 %v4424_v20, %v4423_v35  ;;  %v4431_v16 = vld [vmem:[%s4504_s24 + $0x48] sm:$0xff]  ;;  %v7742_v35 = vld [vmem:[#allocation37_spill] sm:$0xff] }
 0x145   : > { %v1915_v47 = vsel %vm1897_vm11, %v1913_v53, %v1914_v4  ;;  %v1917_v32 = vsel %vm1897_vm11, %v1914_v4, %v1916_v9  ;;  %v6221_v3 = vrot.slane %v6218_v60, 1  ;;  %v3364_v33 = vunpack.i.l.bf16 %v7732_v10  ;;  %v7739_v53 = vld [vmem:[#allocation35_spill] sm:$0xff]  ;;  %v7740_v4 = vld [vmem:[#allocation41_spill] sm:$0xff] }
 0x146   : > { %v3369_v1 = vunpack.i.l.bf16 %v7733_v46  ;;  %3248 = vmatprep.mubr.msk.bf16.mxu0 %vm2048_vm12, %v2012_v17  ;;  %v2013_v7 = vpack.c.bf16 %v1917_v32, %v1915_v47  ;;  %v3470_v12 = vunpack.i.h.bf16 %v7712_v39  ;;  %v3475_v27 = vunpack.i.h.bf16 %v7735_v45  ;;  %v7741_v32 = vld [vmem:[#allocation36_spill] sm:$0xff]  ;;  %v7743_v46 = vld [vmem:[#allocation42_spill] sm:$0xff] }
 0x147   : > { %4077 = vrot.lane.b32.xlu1 %v4076_v8, %s4448_s12  ;;  %v3474_v56 = vunpack.i.l.bf16 %v7735_v45  ;;  %v3480_v55 = vunpack.i.h.bf16 %v7736_v40  ;;  %v6232_v23 = vpop.permute.xlu1 %3797  ;;  %v1470_v59 = vsel %vm1458_vm3, 0.0, %v3340_v24  ;;  %v936_v25 = vrot.slane %v6218_v60, 2 }
 0x148   : > { %4082 = vrot.lane.b32.xlu0 %v7734_v51, %s4445_s28  ;;  %v3479_v36 = vunpack.i.l.bf16 %v7736_v40  ;;  %v3484_v14 = vunpack.i.l.bf16 %v7737_v21  ;;  %v6238_v39 = vpop.permute.xlu0 %3802  ;;  %3249 = vmatmul.mubr.msk.bf16.gmra.mxu0 %vm2048_vm12, %v2013_v7  ;;  %v1472_v58 = vsel %vm1458_vm3, %v4426_v61, %v3360_v30  ;;  %v1471_v48 = vsel %vm1458_vm3, %v4427_v43, %v3359_v57  ;;  %v7745_v7 = vld [vmem:[#allocation87_spill] sm:$0xff] }
 0x149   : > { %v1474_v28 = vsel %vm1458_vm3, %v4428_v13, %v3365_v15  ;;  %v4096_v8 = vpack.i.bf16 %v4430_v29, %v4429_v2  ;;  %v1473_v62 = vsel %vm1458_vm3, 0.0, %v3364_v33  ;;  %v1475_v11 = vsel %vm1458_vm3, %v4431_v16, %v3369_v1  ;;  %v7744_v1 = vld [vmem:[#allocation38_spill] sm:$0xff] }
 0x14a   : > { %v7738_v63 = vpack.i.bf16 %v7676_v54, %v7675_v31  ;;  %v4101_v9 = vpack.i.bf16 %v7740_v4, %v7739_v53  ;;  %v6259_v24 = vrot.slane %v4430_v29, 1  ;;  %v1519_v37 = vsel %vm1506_vm5, %v1470_v59, %v3470_v12  ;;  %v7746_v12 = vld [vmem:[#allocation92_spill] sm:$0xff]  ;;  %v7754_v54 = vld [vmem:[#allocation3_spill] sm:$0xff] }
 0x14b   : > { %4087 = vrot.lane.b32.xlu1 %v4086_v26, %s4446_s6  ;;  %v1520_v30 = vsel %vm1506_vm5, %v1471_v48, %v3474_v56  ;;  %v1521_v57 = vsel %vm1506_vm5, %v1472_v58, %v3475_v27  ;;  %v1523_v17 = vsel %vm1506_vm5, %v1474_v28, %v3480_v55  ;;  %v6265_v10 = vpop.permute.xlu1 %3807  ;;  %v1522_v15 = vsel %vm1506_vm5, %v1473_v62, %v3479_v36  ;;  %v7747_v27 = vld [vmem:[#allocation93_spill] sm:$0xff]  ;;  %v7749_v36 = vld [vmem:[#allocation94_spill] sm:$0xff] }
 0x14c   : > { %4092 = vrot.lane.b32.xlu0 %v7738_v63, %s4448_s12  ;;  %v6269_v31 = vsel %vm1506_vm5, %v1475_v11, %v3484_v14  ;;  %v6271_v47 = vpop.permute.xlu0 %3812  ;;  %v4106_v20 = vpack.i.bf16 %v7742_v35, %v7741_v32  ;;  %v6278_v26 = vsel %vm294_vm0, %v6259_v24, %v6221_v3  ;;  %v3580_v33 = vunpack.i.h.bf16 %v5635_v50  ;;  %v7748_v56 = vld [vmem:[#allocation89_spill] sm:$0xff]  ;;  %v7750_v50 = vld [vmem:[#allocation98_spill] sm:$0xff] }
 0x14d   : > { %v4111_v51 = vpack.i.bf16 %v7744_v1, %v7743_v46  ;;  %v4116_v45 = vpack.i.bf16 %v7746_v12, %v7745_v7  ;;  %v4121_v40 = vpack.i.bf16 %v7748_v56, %v7747_v27  ;;  %v3584_v55 = vunpack.i.l.bf16 %v5675_v5 }
 0x14e   : > { %v4131_v59 = vpack.i.bf16 %v6259_v24, %v7718_v6  ;;  %v4136_v21 = vpack.i.bf16 %v7750_v50, %v7749_v36  ;;  %v3785_v14 = vunpack.i.h.bf16 %v6187_v41  ;;  %v3784_v61 = vunpack.i.l.bf16 %v6187_v41 }
 0x14f   : > { %4097 = vrot.lane.b32.xlu1 %v4096_v8, %s4446_s6  ;;  %v6296_v58 = vpop.permute.xlu1 %3817  ;;  %v4141_v43 = vpack.i.bf16 %v6221_v3, %v6278_v26  ;;  %v3585_v48 = vunpack.i.h.bf16 %v5675_v5  ;;  %v3800_v13 = vunpack.i.h.bf16 %v6232_v23  ;;  %v3799_v28 = vunpack.i.l.bf16 %v6232_v23 }
 0x150   : > { %4102 = vrot.lane.b32.xlu0 %v4101_v9, %s4447_s11  ;;  %v3823_v2 = vpop.permute.xlu0 %3822  ;;  %v6307_v6 = vsel %vm483_vm1, %v5897_v38, %v936_v25  ;;  %v1569_v41 = vsel %vm1555_vm4, %v1520_v30, %v3580_v33  ;;  %v3589_v29 = vunpack.i.l.bf16 %v5697_v49  ;;  %v1568_v8 = vsel %vm1555_vm4, %v1519_v37, %v5583_v22 }
 0x151   : > { %v1571_v5 = vsel %vm1555_vm4, %v1522_v15, %v5583_v22  ;;  %v1570_v23 = vsel %vm1555_vm4, %v1521_v57, %v3584_v55  ;;  %v3790_v62 = vunpack.i.h.bf16 %v6204_v34  ;;  %v3789_v16 = vunpack.i.l.bf16 %v6204_v34 }
 0x152   : > { %v3794_v11 = vunpack.i.l.bf16 %v6209_v0  ;;  %v1617_v49 = vsel %vm1604_vm6, %v1568_v8, %v3784_v61  ;;  %v1618_v63 = vsel %vm1604_vm6, %v1569_v41, %v3785_v14  ;;  %v3805_v53 = vunpack.i.h.bf16 %v6238_v39 }
 0x153   : > { %4107 = vrot.lane.b32.xlu1 %v4106_v20, %s4447_s11  ;;  %v3804_v22 = vunpack.i.l.bf16 %v6238_v39  ;;  %v3828_v4 = vpop.permute.xlu1 %3827  ;;  %v1572_v9 = vsel %vm1555_vm4, %v1523_v17, %v3585_v48  ;;  %v3750_v37 = vunpack.i.h.bf16 %v6131_v42  ;;  %v1666_v30 = vsel %vm1653_vm7, %v1617_v49, %v3799_v28 }
 0x154   : > { %4112 = vrot.lane.b32.xlu0 %v4111_v51, %s4447_s11  ;;  %v1667_v34 = vsel %vm1653_vm7, %v1618_v63, %v3800_v13  ;;  %v6329_v57 = vpop.permute.xlu0 %3832  ;;  %v3795_v15 = vunpack.i.h.bf16 %v6209_v0  ;;  %v3814_v32 = vunpack.i.l.bf16 %v6271_v47  ;;  %v3825_v35 = vunpack.i.h.bf16 %v3823_v2  ;;  %v7751_v13 = vld [vmem:[#allocation65_spill] sm:$0xff] }
 0x155   : > { %v3824_v20 = vunpack.i.l.bf16 %v3823_v2  ;;  %v1619_v39 = vsel %vm1604_vm6, %v1570_v23, %v3789_v16  ;;  %v1620_v17 = vsel %vm1604_vm6, %v1571_v5, %v3790_v62  ;;  %v1621_v42 = vsel %vm1604_vm6, %v1572_v9, %v3794_v11 }
 0x156   : > { %v3829_v33 = vunpack.i.l.bf16 %v3828_v4  ;;  %v1668_v46 = vsel %vm1653_vm7, %v1619_v39, %v3804_v22  ;;  %v1669_v1 = vsel %vm1653_vm7, %v1620_v17, %v3805_v53  ;;  %v1715_v0 = vsel %vm1702_vm8, %v1666_v30, %v6031_v44 }
 0x157   : > { %4117 = vrot.lane.b32.xlu1 %v4116_v45, %s4448_s12  ;;  %v1716_v51 = vsel %vm1702_vm8, %v1667_v34, %v3750_v37  ;;  %v3838_v7 = vpop.permute.xlu1 %3837  ;;  %v3810_v12 = vunpack.i.h.bf16 %v6265_v10  ;;  %v3809_v45 = vunpack.i.l.bf16 %v6265_v10  ;;  %v1717_v14 = vsel %vm1702_vm8, %v1668_v46, %v3814_v32 }
 0x158   : > { %4122 = vrot.lane.b32.xlu0 %v4121_v40, %s4448_s12  ;;  %v3840_v27 = vunpack.i.h.bf16 %v3838_v7  ;;  %v3839_v56 = vunpack.i.l.bf16 %v3838_v7  ;;  %v3843_v55 = vpop.permute.xlu0 %3842  ;;  %v1764_v40 = vsel %vm1751_vm9, %v1715_v0, %v3824_v20  ;;  %v1765_v61 = vsel %vm1751_vm9, %v1716_v51, %v3825_v35 }
 0x159   : > { %v3844_v48 = vunpack.i.l.bf16 %v3843_v55  ;;  %v3815_v28 = vunpack.i.h.bf16 %v6271_v47  ;;  %v1766_v2 = vsel %vm1751_vm9, %v1717_v14, %v3829_v33  ;;  %v3830_v8 = vunpack.i.h.bf16 %v3828_v4 }
 0x15a   : > { %v1813_v41 = vsel %vm1800_vm10, %v1764_v40, %v3839_v56  ;;  %v1814_v10 = vsel %vm1800_vm10, %v1765_v61, %v3840_v27  ;;  %v1670_v11 = vsel %vm1653_vm7, %v1621_v42, %v3809_v45  ;;  %v3819_v49 = vunpack.i.l.bf16 %v6296_v58  ;;  %v7753_v42 = vld [vmem:[#allocation114_spill] sm:$0xff] }
 0x15b   : > { %4127 = vrot.lane.b32.xlu1 %v7751_v13, %s4444_s27  ;;  %v1918_v5 = vrot.slane %v1813_v41, 7  ;;  %v1919_v23 = vrot.slane %v1814_v10, 7  ;;  %v1815_v62 = vsel %vm1800_vm10, %v1766_v2, %v3844_v48  ;;  %v6356_v16 = vpop.permute.xlu1 %3847  ;;  %v3845_v47 = vunpack.i.h.bf16 %v3843_v55 }
 0x15c   : > { %4132 = vrot.lane.b32.xlu0 %v4131_v59, %s4444_s27  ;;  %v1921_v63 = vrot.slane %v1815_v62, 7  ;;  %v6360_v53 = vpop.permute.xlu0 %3852  ;;  %v1573_v22 = vsel %vm1555_vm4, %v6269_v31, %v3589_v29  ;;  %v3835_v59 = vunpack.i.h.bf16 %v6329_v57  ;;  %v3834_v4 = vunpack.i.l.bf16 %v6329_v57  ;;  %v7752_v29 = vld [vmem:[#allocation58_spill] sm:$0xff] }
 0x15d   : > { %v1920_v9 = vsel %vm1897_vm11, %v1918_v5, %v1919_v23  ;;  %v1622_v37 = vsel %vm1604_vm6, %v1573_v22, %v3795_v15  ;;  %v1718_v30 = vsel %vm1702_vm8, %v1669_v1, %v6031_v44  ;;  %v938_v36 = vsel %vm483_vm1, %v936_v25, %v7752_v29 }
 0x15e   : > { %v1922_v31 = vsel %vm1897_vm11, %v1919_v23, %v1921_v63  ;;  %v1671_v50 = vsel %vm1653_vm7, %v1622_v37, %v3810_v12  ;;  %v1767_v34 = vsel %vm1751_vm9, %v1718_v30, %v3830_v8  ;;  %v4156_v33 = vpack.i.bf16 %v938_v36, %v6307_v6 }
 0x15f   : > { %4137 = vrot.lane.b32.xlu1 %v4136_v21, %s4448_s12  ;;  %v1719_v21 = vsel %vm1702_vm8, %v1670_v11, %v3815_v28  ;;  %v3858_v57 = vpop.permute.xlu1 %3857  ;;  %v2014_v15 = vpack.c.bf16 %v1922_v31, %v1920_v9  ;;  %v1720_v32 = vsel %vm1702_vm8, %v1671_v50, %v3819_v49  ;;  %v1816_v35 = vsel %vm1800_vm10, %v1767_v34, %v3845_v47  ;;  %v7755_v11 = vld [vmem:[#allocation68_spill] sm:$0xff]  ;;  %v7756_v31 = vld [vmem:[#allocation71_spill] sm:$0xff]  ;;  %v7757_v50 = vld [vmem:[#allocation78_spill] sm:$0xff] }
 0x160   : > { %4142 = vrot.lane.b32.xlu0 %v4141_v43, %s4444_s27  ;;  %v3860_v43 = vunpack.i.h.bf16 %v3858_v57  ;;  %v3859_v20 = vunpack.i.l.bf16 %v3858_v57  ;;  %v6388_v39 = vpop.permute.xlu0 %3862  ;;  %v1768_v17 = vsel %vm1751_vm9, %v1719_v21, %v3834_v4  ;;  %v1769_v25 = vsel %vm1751_vm9, %v1720_v32, %v3835_v59 }
 0x161   : > { %3252 = vmatprep.mubr.msk.bf16.mxu0 %vm2048_vm12, %v2014_v15  ;;  %v1923_v0 = vrot.slane %v1816_v35, 7  ;;  %v4161_v55 = vpack.i.bf16 %v6278_v26, %v6259_v24  ;;  %v4171_v24 = vpack.i.bf16 %v6307_v6, %v5897_v38  ;;  %v3850_v6 = vunpack.i.h.bf16 %v6356_v16 }
 0x162   : > { %v1817_v46 = vsel %vm1800_vm10, %v1768_v17, %v3859_v20  ;;  %v1818_v1 = vsel %vm1800_vm10, %v1769_v25, %v3860_v43  ;;  %v3849_v28 = vunpack.i.l.bf16 %v6356_v16  ;;  %v3854_v8 = vunpack.i.l.bf16 %v6360_v53 }
 0x163   : > { %4147 = vrot.lane.b32.xlu1 %v7753_v42, %s4445_s28  ;;  %v1924_v51 = vrot.slane %v1817_v46, 7  ;;  %v1926_v7 = vrot.slane %v1818_v1, 7  ;;  %v3868_v12 = vpop.permute.xlu1 %3867  ;;  %v3855_v5 = vunpack.i.h.bf16 %v6360_v53  ;;  %v3864_v23 = vunpack.i.l.bf16 %v6388_v39 }
 0x164   : > { %4152 = vrot.lane.b32.xlu0 %v4151_v52, %s4445_s28  ;;  %v3873_v45 = vpop.permute.xlu0 %3872  ;;  %v4166_v52 = vpack.i.bf16 %v7754_v54, %v6221_v3  ;;  %v4176_v3 = vpack.i.bf16 %v7752_v29, %v938_v36  ;;  %v3870_v41 = vunpack.i.h.bf16 %v3868_v12  ;;  %v3869_v10 = vunpack.i.l.bf16 %v3868_v12 }
 0x165   : > { %v1925_v27 = vsel %vm1897_vm11, %v1923_v0, %v1924_v51  ;;  %v1927_v56 = vsel %vm1897_vm11, %v1924_v51, %v1926_v7  ;;  %v1635_v49 = vsel %vm1604_vm6, %v7755_v11, %v3849_v28  ;;  %v1636_v47 = vsel %vm1604_vm6, %v5775_v18, %v3850_v6 }
 0x166   : > { %v2015_v14 = vpack.c.bf16 %v1927_v56, %v1925_v27  ;;  %v3875_v63 = vunpack.i.h.bf16 %v3873_v45  ;;  %v3874_v16 = vunpack.i.l.bf16 %v3873_v45  ;;  %v1684_v59 = vsel %vm1653_vm7, %v1635_v49, %v3869_v10 }
 0x167   : > { %4157 = vrot.lane.b32.xlu1 %v4156_v33, %s4445_s28  ;;  %v6411_v40 = vpop.permute.xlu1 %3877  ;;  %v1685_v4 = vsel %vm1653_vm7, %v1636_v47, %v3870_v41  ;;  %v3820_v53 = vunpack.i.h.bf16 %v6296_v58  ;;  %v1637_v9 = vsel %vm1604_vm6, %v5792_v19, %v3854_v8  ;;  %v1638_v36 = vsel %vm1604_vm6, %v7756_v31, %v3855_v5 }
 0x168   : > { %1143 = vrot.lane.b32.xlu0 %v6218_v60, %s4446_s6  ;;  %v6413_v61 = vpop.permute.xlu0 %3882  ;;  %3253 = vmatmul.mubr.msk.bf16.gmra.mxu0 %vm2048_vm12, %v2015_v14  ;;  %v3865_v18 = vunpack.i.h.bf16 %v6388_v39  ;;  %v1639_v21 = vsel %vm1604_vm6, %v7757_v50, %v3864_v23  ;;  %v1686_v15 = vsel %vm1653_vm7, %v1637_v9, %v3874_v16  ;;  %v1687_v58 = vsel %vm1653_vm7, %v1638_v36, %v3875_v63 }
 0x169   : > { %v3884_v34 = vunpack.i.l.bf16 %v6413_v61  ;;  %v1733_v19 = vsel %vm1702_vm8, %v1684_v59, %v6031_v44  ;;  %v1734_v32 = vsel %vm1702_vm8, %v1685_v4, %v3820_v53  ;;  %v3879_v43 = vunpack.i.l.bf16 %v6411_v40 }
 0x16a   : > { %v3880_v25 = vunpack.i.h.bf16 %v6411_v40  ;;  %v3885_v42 = vunpack.i.h.bf16 %v6413_v61  ;;  %v1736_v10 = vsel %vm1702_vm8, %v1687_v58, %v6031_v44  ;;  %vm2767_vm0 = vcmask 457728  }
 0x16b   : > { %4162 = vrot.lane.b32.xlu1 %v4161_v55, %s4447_s11  ;;  %v6420_v26 = vpop.permute.xlu1 %3887  ;;  %v1735_v1 = vsel %vm1702_vm8, %v1686_v15, %v3884_v34  ;;  %v1688_v61 = vsel %vm1653_vm7, %v1639_v21, %v3879_v43  ;;  %vm3049_vm3 = vcmask 60416  }
 0x16c   : > { %4167 = vrot.lane.b32.xlu0 %v4166_v52, %s4447_s11  ;;  %v6422_v60 = vpop.permute.xlu0 %3892  ;;  %v7758_v52 = vld [vmem:[#allocation46_spill] sm:$0xff]  ;;  %v1737_v23 = vsel %vm1702_vm8, %v1688_v61, %v3885_v42  ;;  %v3890_v11 = vunpack.i.h.bf16 %v6420_v26  ;;  %v3889_v9 = vunpack.i.l.bf16 %v6420_v26 }
 0x16d   : > { %v1640_v40 = vsel %vm1604_vm6, %v7758_v52, %v3865_v18  ;;  %v3894_v36 = vunpack.i.l.bf16 %v6422_v60  ;;  %v3895_v43 = vunpack.i.h.bf16 %v6422_v60 }
 0x16f   : > { %1268 = vrot.lane.b32.xlu1 %v7754_v54, %s4447_s11  ;;  %v6428_v48 = vpop.permute.xlu1 %3897 }
 0x170   : > { %4172 = vrot.lane.b32.xlu0 %v4171_v24, %s4448_s12  ;;  %v3903_v13 = vpop.permute.xlu0 %3902  ;;  %v3899_v0 = vunpack.i.l.bf16 %v6428_v48 }
 0x171   : > { %v3905_v37 = vunpack.i.h.bf16 %v3903_v13  ;;  %v3904_v30 = vunpack.i.l.bf16 %v3903_v13 }
 0x173   : > { %4177 = vrot.lane.b32.xlu1 %v4176_v3, %s4448_s12  ;;  %v6433_v38 = vpop.permute.xlu1 %3907  ;;  %v1782_v33 = vsel %vm1751_vm9, %v1733_v19, %v3904_v30  ;;  %v1783_v46 = vsel %vm1751_vm9, %v1734_v32, %v3905_v37  ;;  %v7759_v32 = vld [vmem:[#allocation70_spill] sm:$0xff] }
 0x174   : > { %1409 = vrot.lane.b32.xlu0 %v7752_v29, %s4448_s12  ;;  %v6437_v2 = vpop.permute.xlu0 %3912  ;;  %v3909_v20 = vunpack.i.l.bf16 %v6433_v38  ;;  %v3910_v45 = vunpack.i.h.bf16 %v6433_v38  ;;  %v1689_v38 = vsel %vm1653_vm7, %v1640_v40, %v3880_v25 }
 0x175   : > { %v1738_v49 = vsel %vm1702_vm8, %v1689_v38, %v3899_v0  ;;  %v3915_v52 = vunpack.i.h.bf16 %v6437_v2  ;;  %v3914_v40 = vunpack.i.l.bf16 %v6437_v2 }
 0x176   : > { %v1784_v24 = vsel %vm1751_vm9, %v1735_v1, %v3909_v20  ;;  %v1785_v47 = vsel %vm1751_vm9, %v1736_v10, %v3910_v45  ;;  %v7761_v1 = vld [vmem:[#allocation19_spill] sm:$0xff] }
 0x177   : > { %v6442_v62 = vpop.permute.xlu1 %3917  ;;  %v1625_v0 = vsel %vm1604_vm6, %v7761_v1, %v3894_v36 }
 0x178   : > { %v6448_v22 = vpop.permute.xlu0 %3922  ;;  %v3920_v18 = vunpack.i.h.bf16 %v6442_v62 }
 0x179   : > { %v3924_v42 = vunpack.i.l.bf16 %v6448_v22 }
 0x17b   : > { %v3928_v57 = vpop.permute.xlu1 %3927 }
 0x17c   : > { %v3933_v35 = vpop.permute.xlu0 %3932  ;;  %v3930_v13 = vunpack.i.h.bf16 %v3928_v57  ;;  %v3929_v6 = vunpack.i.l.bf16 %v3928_v57  ;;  %v3919_v57 = vunpack.i.l.bf16 %v6442_v62  ;;  %v3925_v62 = vunpack.i.h.bf16 %v6448_v22 }
 0x17d   : > { %v3935_v39 = vunpack.i.h.bf16 %v3933_v35  ;;  %v3934_v17 = vunpack.i.l.bf16 %v3933_v35  ;;  %v1623_v35 = vsel %vm1604_vm6, %v7759_v32, %v3889_v9 }
 0x17e   : > { %v1786_v37 = vsel %vm1751_vm9, %v1737_v23, %v3929_v6  ;;  %v1787_v30 = vsel %vm1751_vm9, %v1738_v49, %v3930_v13 }
 0x17f   : > { %v1831_v51 = vsel %vm1800_vm10, %v1782_v33, %v3934_v17  ;;  %v1832_v7 = vsel %vm1800_vm10, %v1783_v46, %v3935_v39  ;;  %v3938_v12 = vpop.permute.xlu1 %3937  ;;  %v7760_v17 = vld [vmem:[#allocation18_spill] sm:$0xff] }
 0x180   : > { %v1948_v27 = vrot.slane %v1831_v51, 7  ;;  %v1949_v56 = vrot.slane %v1832_v7, 7  ;;  %v3939_v55 = vunpack.i.l.bf16 %v3938_v12  ;;  %v6477_v14 = vpop.permute.xlu0 %3942  ;;  %v3940_v3 = vunpack.i.h.bf16 %v3938_v12 }
 0x181   : > { %v1624_v25 = vsel %vm1604_vm6, %v7760_v17, %v3890_v11  ;;  %v1672_v51 = vsel %vm1653_vm7, %v1623_v35, %v3919_v57  ;;  %v3900_v12 = vunpack.i.h.bf16 %v6428_v48 }
 0x182   : > { %v1833_v28 = vsel %vm1800_vm10, %v1784_v24, %v3939_v55  ;;  %v1950_v41 = vsel %vm1897_vm11, %v1948_v27, %v1949_v56  ;;  %v1834_v16 = vsel %vm1800_vm10, %v1785_v47, %v3940_v3  ;;  %v1673_v60 = vsel %vm1653_vm7, %v1624_v25, %v3920_v18  ;;  %v7762_v55 = vld [vmem:[#allocation21_spill] sm:$0xff] }
 0x183   : > { %v1951_v8 = vrot.slane %v1833_v28, 7  ;;  %v6488_v5 = vpop.permute.xlu1 %3947  ;;  %v1953_v15 = vrot.slane %v1834_v16, 7  ;;  %v1626_v22 = vsel %vm1604_vm6, %v7762_v55, %v3895_v43  ;;  %v1674_v24 = vsel %vm1653_vm7, %v1625_v0, %v3924_v42 }
 0x184   : > { %v3953_v63 = vpop.permute.xlu0 %3952  ;;  %v3949_v45 = vunpack.i.l.bf16 %v6488_v5  ;;  %v1675_v3 = vsel %vm1653_vm7, %v1626_v22, %v3925_v62  ;;  %v1721_v48 = vsel %vm1702_vm8, %v1672_v51, %v6031_v44  ;;  %v1722_v13 = vsel %vm1702_vm8, %v1673_v60, %v3900_v12 }
 0x185   : > { %v3955_v59 = vunpack.i.h.bf16 %v3953_v63  ;;  %v3954_v4 = vunpack.i.l.bf16 %v3953_v63  ;;  %v1952_v53 = vsel %vm1897_vm11, %v1949_v56, %v1951_v8  ;;  %v3945_v28 = vunpack.i.h.bf16 %v6477_v14 }
 0x186   : > { %v2020_v31 = vpack.c.bf16 %v1952_v53, %v1950_v41  ;;  %v3944_v41 = vunpack.i.l.bf16 %v6477_v14  ;;  %v1723_v2 = vsel %vm1702_vm8, %v1674_v24, %v3949_v45  ;;  %v3950_v47 = vunpack.i.h.bf16 %v6488_v5 }
 0x187   : > { %v1835_v50 = vsel %vm1800_vm10, %v1786_v37, %v3954_v4  ;;  %v1836_v21 = vsel %vm1800_vm10, %v1787_v30, %v3955_v59  ;;  %v6503_v34 = vpop.permute.xlu1 %3957  ;;  %v1724_v32 = vsel %vm1702_vm8, %v1675_v3, %v6031_v44 }
 0x188   : > { %v1954_v58 = vrot.slane %v1835_v50, 7  ;;  %v1956_v26 = vrot.slane %v1836_v21, 7  ;;  %v3963_v19 = vpop.permute.xlu0 %3962  ;;  %3264 = vmatprep.mubr.msk.bf16.mxu1 %vm2048_vm12, %v2020_v31  ;;  %v3959_v30 = vunpack.i.l.bf16 %v6503_v34  ;;  %v7763_v50 = vld [vmem:[#allocation24_spill] sm:$0xff] }
 0x189   : > { %v3965_v27 = vunpack.i.h.bf16 %v3963_v19  ;;  %v3964_v56 = vunpack.i.l.bf16 %v3963_v19  ;;  %v1627_v5 = vsel %vm1604_vm6, %v7763_v50, %v3914_v40 }
 0x18a   : > { %v1955_v20 = vsel %vm1897_vm11, %v1953_v15, %v1954_v58  ;;  %v1957_v39 = vsel %vm1897_vm11, %v1954_v58, %v1956_v26  ;;  %v7764_v58 = vld [vmem:[#allocation20_spill] sm:$0xff]  ;;  %v1676_v19 = vsel %vm1653_vm7, %v1627_v5, %v3944_v41 }
 0x18b   : > { %v3968_v33 = vpop.permute.xlu1 %3967  ;;  %v2021_v46 = vpack.c.bf16 %v1957_v39, %v1955_v20  ;;  %v1770_v23 = vsel %vm1751_vm9, %v1721_v48, %v3964_v56  ;;  %v1771_v11 = vsel %vm1751_vm9, %v1722_v13, %v3965_v27  ;;  %v1628_v26 = vsel %vm1604_vm6, %v7764_v58, %v3915_v52  ;;  %v7769_v58 = vld [vmem:[#allocation97_spill] sm:$0xff] }
 0x18c   : > { %v3973_v7 = vpop.permute.xlu0 %3972  ;;  %v3969_v61 = vunpack.i.l.bf16 %v3968_v33  ;;  %v3970_v4 = vunpack.i.h.bf16 %v3968_v33  ;;  %v1677_v43 = vsel %vm1653_vm7, %v1628_v26, %v3945_v28  ;;  %v1725_v20 = vsel %vm1702_vm8, %v1676_v19, %v3950_v47 }
 0x18d   : > { %3265 = vmatmul.mubr.msk.bf16.vlgmr.msra.gmra.mxu1 %vm2048_vm12, %v2021_v46  ;;  %v3975_v21 = vunpack.i.h.bf16 %v3973_v7  ;;  %v3974_v57 = vunpack.i.l.bf16 %v3973_v7  ;;  %v1726_v62 = vsel %vm1702_vm8, %v1677_v43, %v3959_v30 }
 0x18e   : > { %v1772_v63 = vsel %vm1751_vm9, %v1723_v2, %v3969_v61  ;;  %v1773_v39 = vsel %vm1751_vm9, %v1724_v32, %v3970_v4 }
 0x18f   : > { %v3978_v6 = vpop.permute.xlu1 %3977  ;;  %v1774_v0 = vsel %vm1751_vm9, %v1725_v20, %v3974_v57  ;;  %v1775_v51 = vsel %vm1751_vm9, %v1726_v62, %v3975_v21  ;;  %v7768_v21 = vld [vmem:[#allocation27_spill] sm:$0xff] }
 0x190   : > { %v3980_v38 = vunpack.i.h.bf16 %v3978_v6  ;;  %v3979_v10 = vunpack.i.l.bf16 %v3978_v6  ;;  %v3983_v8 = vpop.permute.xlu0 %3982 }
 0x191   : > { %v3984_v49 = vunpack.i.l.bf16 %v3983_v8  ;;  %v3985_v31 = vunpack.i.h.bf16 %v3983_v8 }
 0x192   : > { %v1819_v16 = vsel %vm1800_vm10, %v1770_v23, %v3979_v10  ;;  %v1820_v59 = vsel %vm1800_vm10, %v1771_v11, %v3980_v38 }
 0x193   : > { %v1928_v14 = vrot.slane %v1819_v16, 7  ;;  %v1929_v53 = vrot.slane %v1820_v59, 7  ;;  %v1821_v9 = vsel %vm1800_vm10, %v1772_v63, %v3984_v49  ;;  %v3988_v37 = vpop.permute.xlu1 %3987  ;;  %v1822_v42 = vsel %vm1800_vm10, %v1773_v39, %v3985_v31  ;;  %v7765_v63 = vld [vmem:[#allocation22_spill] sm:$0xff]  ;;  %v7766_v59 = vld [vmem:[#allocation51_spill] sm:$0xff] }
 0x194   : > { %v1931_v36 = vrot.slane %v1821_v9, 7  ;;  %v3993_v18 = vpop.permute.xlu0 %3992  ;;  %v1933_v12 = vrot.slane %v1822_v42, 7  ;;  %v3990_v41 = vunpack.i.h.bf16 %v3988_v37  ;;  %v3989_v38 = vunpack.i.l.bf16 %v3988_v37 }
 0x195   : > { %v1930_v15 = vsel %vm1897_vm11, %v1928_v14, %v1929_v53  ;;  %v3994_v23 = vunpack.i.l.bf16 %v3993_v18  ;;  %v3995_v11 = vunpack.i.h.bf16 %v3993_v18  ;;  %v3960_v31 = vunpack.i.h.bf16 %v6503_v34 }
 0x196   : > { %v1932_v35 = vsel %vm1897_vm11, %v1929_v53, %v1931_v36  ;;  %v1641_v16 = vsel %vm1604_vm6, %v7765_v63, %v3989_v38  ;;  %v1642_v4 = vsel %vm1604_vm6, %v7766_v59, %v3990_v41  ;;  %v7767_v36 = vld [vmem:[#allocation52_spill] sm:$0xff] }
 0x197   : > { %v3998_v17 = vpop.permute.xlu1 %3997  ;;  %v2016_v25 = vpack.c.bf16 %v1932_v35, %v1930_v15  ;;  %v1643_v18 = vsel %vm1604_vm6, %v7767_v36, %v3994_v23  ;;  %v1644_v57 = vsel %vm1604_vm6, %v7768_v21, %v3995_v11 }
 0x198   : > { %v4000_v33 = vunpack.i.h.bf16 %v3998_v17  ;;  %v3999_v46 = vunpack.i.l.bf16 %v3998_v17  ;;  %v6557_v1 = vpop.permute.xlu0 %4002 }
 0x199   : > { %3256 = vmatprep.mubr.msk.bf16.mxu0 %vm2048_vm12, %v2016_v25  ;;  %v4004_v49 = vunpack.i.l.bf16 %v6557_v1  ;;  %v4005_v15 = vunpack.i.h.bf16 %v6557_v1 }
 0x19a   : > { %v1823_v60 = vsel %vm1800_vm10, %v1774_v0, %v3999_v46  ;;  %v1824_v7 = vsel %vm1800_vm10, %v1775_v51, %v4000_v33 }
 0x19b   : > { %v1934_v45 = vrot.slane %v1823_v60, 7  ;;  %v1936_v27 = vrot.slane %v1824_v7, 7  ;;  %v4008_v56 = vpop.permute.xlu1 %4007  ;;  %v1645_v26 = vsel %vm1604_vm6, %v7769_v58, %v4004_v49 }
 0x19c   : > { %v4013_v55 = vpop.permute.xlu0 %4012  ;;  %v4010_v8 = vunpack.i.h.bf16 %v4008_v56  ;;  %v4009_v2 = vunpack.i.l.bf16 %v4008_v56 }
 0x19d   : > { %v1935_v22 = vsel %vm1897_vm11, %v1933_v12, %v1934_v45  ;;  %v1937_v52 = vsel %vm1897_vm11, %v1934_v45, %v1936_v27  ;;  %v4015_v14 = vunpack.i.h.bf16 %v4013_v55  ;;  %v4014_v53 = vunpack.i.l.bf16 %v4013_v55 }
 0x19e   : > { %v2017_v40 = vpack.c.bf16 %v1937_v52, %v1935_v22  ;;  %v1690_v37 = vsel %vm1653_vm7, %v1641_v16, %v4009_v2  ;;  %v1691_v30 = vsel %vm1653_vm7, %v1642_v4, %v4010_v8 }
 0x19f   : > { %v6566_v61 = vpop.permute.xlu1 %4017  ;;  %v1692_v35 = vsel %vm1653_vm7, %v1643_v18, %v4014_v53  ;;  %v1693_v34 = vsel %vm1653_vm7, %v1644_v57, %v4015_v14  ;;  %v1739_v43 = vsel %vm1702_vm8, %v1690_v37, %v6031_v44  ;;  %v1740_v20 = vsel %vm1702_vm8, %v1691_v30, %v3960_v31 }
 0x1a0   : > { %v6568_v24 = vpop.permute.xlu0 %4022  ;;  %3257 = vmatmul.mubr.msk.bf16.gmra.mxu0 %vm2048_vm12, %v2017_v40  ;;  %v4019_v17 = vunpack.i.l.bf16 %v6566_v61  ;;  %v4020_v33 = vunpack.i.h.bf16 %v6566_v61  ;;  %v7770_v40 = vld [vmem:[#allocation102_spill] sm:$0xff]  ;;  %v1742_v11 = vsel %vm1702_vm8, %v1693_v34, %v6031_v44 }
 0x1a1   : > { %v4024_v19 = vunpack.i.l.bf16 %v6568_v24  ;;  %v4025_v46 = vunpack.i.h.bf16 %v6568_v24  ;;  %v1646_v61 = vsel %vm1604_vm6, %v7770_v40, %v4005_v15 }
 0x1a2   : > { %v1694_v24 = vsel %vm1653_vm7, %v1645_v26, %v4019_v17 }
 0x1a3   : > { %v6571_v3 = vpop.permute.xlu1 %4027  ;;  %v1741_v51 = vsel %vm1702_vm8, %v1692_v35, %v4024_v19  ;;  %v1743_v16 = vsel %vm1702_vm8, %v1694_v24, %v4025_v46 }
 0x1a4   : > { %v6573_v48 = vpop.permute.xlu0 %4032  ;;  %v4030_v59 = vunpack.i.h.bf16 %v6571_v3  ;;  %v4029_v18 = vunpack.i.l.bf16 %v6571_v3 }
 0x1a5   : > { %v4034_v57 = vunpack.i.l.bf16 %v6573_v48  ;;  %v4035_v17 = vunpack.i.h.bf16 %v6573_v48 }
 0x1a9   : > { %v6575_v13 = vpop.permute.xlu1 %4037 }
 0x1aa   : > { %v4043_v6 = vpop.permute.xlu0 %4042  ;;  %v4039_v60 = vunpack.i.l.bf16 %v6575_v13 }
 0x1ab   : > { %v4045_v50 = vunpack.i.h.bf16 %v4043_v6  ;;  %v4044_v5 = vunpack.i.l.bf16 %v4043_v6 }
 0x1ad   : > { %v6577_v28 = vpop.permute.xlu1 %4047  ;;  %v1788_v1 = vsel %vm1751_vm9, %v1739_v43, %v4044_v5  ;;  %v1789_v0 = vsel %vm1751_vm9, %v1740_v20, %v4045_v50  ;;  %v7771_v20 = vld [vmem:[#allocation73_spill] sm:$0xff] }
 0x1ae   : > { %v6579_v10 = vpop.permute.xlu0 %4052  ;;  %v4049_v25 = vunpack.i.l.bf16 %v6577_v28  ;;  %v4050_v27 = vunpack.i.h.bf16 %v6577_v28  ;;  %v1695_v28 = vsel %vm1653_vm7, %v1646_v61, %v4020_v33 }
 0x1af   : > { %v1744_v4 = vsel %vm1702_vm8, %v1695_v28, %v4039_v60  ;;  %v4055_v40 = vunpack.i.h.bf16 %v6579_v10  ;;  %v4054_v61 = vunpack.i.l.bf16 %v6579_v10 }
 0x1b0   : > { %v1790_v6 = vsel %vm1751_vm9, %v1741_v51, %v4049_v25  ;;  %v1791_v14 = vsel %vm1751_vm9, %v1742_v11, %v4050_v27  ;;  %v7773_v51 = vld [vmem:[#allocation72_spill] sm:$0xff] }
 0x1b1   : > { %v6582_v47 = vpop.permute.xlu1 %4057  ;;  %v1631_v60 = vsel %vm1604_vm6, %v7773_v51, %v4034_v57 }
 0x1b2   : > { %v6588_v9 = vpop.permute.xlu0 %4062  ;;  %v4060_v15 = vunpack.i.h.bf16 %v6582_v47 }
 0x1b3   : > { %v4064_v46 = vunpack.i.l.bf16 %v6588_v9 }
 0x1b5   : > { %v4068_v32 = vpop.permute.xlu1 %4067 }
 0x1b6   : > { %v4073_v39 = vpop.permute.xlu0 %4072  ;;  %v4070_v38 = vunpack.i.h.bf16 %v4068_v32  ;;  %v4069_v8 = vunpack.i.l.bf16 %v4068_v32  ;;  %v4059_v32 = vunpack.i.l.bf16 %v6582_v47  ;;  %v4065_v47 = vunpack.i.h.bf16 %v6588_v9 }
 0x1b7   : > { %v4075_v62 = vunpack.i.h.bf16 %v4073_v39  ;;  %v4074_v42 = vunpack.i.l.bf16 %v4073_v39  ;;  %v1629_v39 = vsel %vm1604_vm6, %v7771_v20, %v4029_v18 }
 0x1b8   : > { %v1792_v50 = vsel %vm1751_vm9, %v1743_v16, %v4069_v8  ;;  %v1793_v5 = vsel %vm1751_vm9, %v1744_v4, %v4070_v38 }
 0x1b9   : > { %v1837_v7 = vsel %vm1800_vm10, %v1788_v1, %v4074_v42  ;;  %v1838_v12 = vsel %vm1800_vm10, %v1789_v0, %v4075_v62  ;;  %v4078_v45 = vpop.permute.xlu1 %4077  ;;  %v7772_v42 = vld [vmem:[#allocation75_spill] sm:$0xff] }
 0x1ba   : > { %v1958_v56 = vrot.slane %v1837_v7, 7  ;;  %v1959_v55 = vrot.slane %v1838_v12, 7  ;;  %v4079_v22 = vunpack.i.l.bf16 %v4078_v45  ;;  %v6617_v52 = vpop.permute.xlu0 %4082  ;;  %v4080_v41 = vunpack.i.h.bf16 %v4078_v45 }
 0x1bb   : > { %v1630_v33 = vsel %vm1604_vm6, %v7772_v42, %v4030_v59  ;;  %v1678_v7 = vsel %vm1653_vm7, %v1629_v39, %v4059_v32  ;;  %v4040_v45 = vunpack.i.h.bf16 %v6575_v13 }
 0x1bc   : > { %v1839_v2 = vsel %vm1800_vm10, %v1790_v6, %v4079_v22  ;;  %v1960_v23 = vsel %vm1897_vm11, %v1958_v56, %v1959_v55  ;;  %v1840_v37 = vsel %vm1800_vm10, %v1791_v14, %v4080_v41  ;;  %v1679_v48 = vsel %vm1653_vm7, %v1630_v33, %v4060_v15  ;;  %v7774_v22 = vld [vmem:[#allocation74_spill] sm:$0xff] }
 0x1bd   : > { %v1961_v49 = vrot.slane %v1839_v2, 7  ;;  %v6628_v63 = vpop.permute.xlu1 %4087  ;;  %v1963_v35 = vrot.slane %v1840_v37, 7  ;;  %v1632_v9 = vsel %vm1604_vm6, %v7774_v22, %v4035_v17  ;;  %v1680_v6 = vsel %vm1653_vm7, %v1631_v60, %v4064_v46 }
 0x1be   : > { %v4093_v53 = vpop.permute.xlu0 %4092  ;;  %v4089_v27 = vunpack.i.l.bf16 %v6628_v63  ;;  %v1681_v41 = vsel %vm1653_vm7, %v1632_v9, %v4065_v47  ;;  %v1727_v13 = vsel %vm1702_vm8, %v1678_v7, %v6031_v44  ;;  %v1728_v38 = vsel %vm1702_vm8, %v1679_v48, %v4040_v45 }
 0x1bf   : > { %v4095_v30 = vunpack.i.h.bf16 %v4093_v53  ;;  %v4094_v31 = vunpack.i.l.bf16 %v4093_v53  ;;  %v1962_v36 = vsel %vm1897_vm11, %v1959_v55, %v1961_v49  ;;  %v4085_v2 = vunpack.i.h.bf16 %v6617_v52 }
 0x1c0   : > { %v2022_v21 = vpack.c.bf16 %v1962_v36, %v1960_v23  ;;  %v4084_v23 = vunpack.i.l.bf16 %v6617_v52  ;;  %v1729_v10 = vsel %vm1702_vm8, %v1680_v6, %v4089_v27  ;;  %v4090_v14 = vunpack.i.h.bf16 %v6628_v63 }
 0x1c1   : > { %v1841_v58 = vsel %vm1800_vm10, %v1792_v50, %v4094_v31  ;;  %v1842_v26 = vsel %vm1800_vm10, %v1793_v5, %v4095_v30  ;;  %v6643_v19 = vpop.permute.xlu1 %4097  ;;  %v1730_v20 = vsel %vm1702_vm8, %v1681_v41, %v6031_v44 }
 0x1c2   : > { %v1964_v34 = vrot.slane %v1841_v58, 7  ;;  %v1966_v3 = vrot.slane %v1842_v26, 7  ;;  %v4103_v43 = vpop.permute.xlu0 %4102  ;;  %3268 = vmatprep.mubr.msk.bf16.mxu1 %vm2048_vm12, %v2022_v21  ;;  %v4099_v5 = vunpack.i.l.bf16 %v6643_v19  ;;  %v7775_v58 = vld [vmem:[#allocation76_spill] sm:$0xff] }
 0x1c3   : > { %v4105_v56 = vunpack.i.h.bf16 %v4103_v43  ;;  %v4104_v55 = vunpack.i.l.bf16 %v4103_v43  ;;  %v1633_v63 = vsel %vm1604_vm6, %v7775_v58, %v4054_v61 }
 0x1c4   : > { %v1965_v25 = vsel %vm1897_vm11, %v1963_v35, %v1964_v34  ;;  %v1967_v62 = vsel %vm1897_vm11, %v1964_v34, %v1966_v3  ;;  %v7776_v34 = vld [vmem:[#allocation80_spill] sm:$0xff]  ;;  %v1682_v43 = vsel %vm1653_vm7, %v1633_v63, %v4084_v23 }
 0x1c5   : > { %v4108_v1 = vpop.permute.xlu1 %4107  ;;  %v2023_v0 = vpack.c.bf16 %v1967_v62, %v1965_v25  ;;  %v1776_v16 = vsel %vm1751_vm9, %v1727_v13, %v4104_v55  ;;  %v1777_v59 = vsel %vm1751_vm9, %v1728_v38, %v4105_v56  ;;  %v1634_v3 = vsel %vm1604_vm6, %v7776_v34, %v4055_v40  ;;  %v7782_v63 = vld [vmem:[#allocation116_spill] sm:$0xff] }
 0x1c6   : > { %v4113_v12 = vpop.permute.xlu0 %4112  ;;  %v4109_v24 = vunpack.i.l.bf16 %v4108_v1  ;;  %v4110_v31 = vunpack.i.h.bf16 %v4108_v1  ;;  %v1683_v17 = vsel %vm1653_vm7, %v1634_v3, %v4085_v2  ;;  %v1731_v25 = vsel %vm1702_vm8, %v1682_v43, %v4090_v14 }
 0x1c7   : > { %3269 = vmatmul.mubr.msk.bf16.gmra.mxu1 %vm2048_vm12, %v2023_v0  ;;  %v4115_v26 = vunpack.i.h.bf16 %v4113_v12  ;;  %v4114_v32 = vunpack.i.l.bf16 %v4113_v12  ;;  %v1732_v47 = vsel %vm1702_vm8, %v1683_v17, %v4099_v5 }
 0x1c8   : > { %v1778_v53 = vsel %vm1751_vm9, %v1729_v10, %v4109_v24  ;;  %v1779_v62 = vsel %vm1751_vm9, %v1730_v20, %v4110_v31 }
 0x1c9   : > { %v4118_v8 = vpop.permute.xlu1 %4117  ;;  %v1780_v60 = vsel %vm1751_vm9, %v1731_v25, %v4114_v32  ;;  %v1781_v7 = vsel %vm1751_vm9, %v1732_v47, %v4115_v26 }
 0x1ca   : > { %v4120_v28 = vunpack.i.h.bf16 %v4118_v8  ;;  %v4119_v11 = vunpack.i.l.bf16 %v4118_v8  ;;  %v4123_v49 = vpop.permute.xlu0 %4122 }
 0x1cb   : > { %v4124_v4 = vunpack.i.l.bf16 %v4123_v49  ;;  %v4125_v21 = vunpack.i.h.bf16 %v4123_v49 }
 0x1cc   : > { %v1825_v37 = vsel %vm1800_vm10, %v1776_v16, %v4119_v11  ;;  %v1826_v30 = vsel %vm1800_vm10, %v1777_v59, %v4120_v28  ;;  %v4100_v16 = vunpack.i.h.bf16 %v6643_v19 }
 0x1cd   : > { %v1938_v52 = vrot.slane %v1825_v37, 7  ;;  %v1939_v36 = vrot.slane %v1826_v30, 7  ;;  %v1827_v18 = vsel %vm1800_vm10, %v1778_v53, %v4124_v4  ;;  %v4128_v50 = vpop.permute.xlu1 %4127  ;;  %v1828_v46 = vsel %vm1800_vm10, %v1779_v62, %v4125_v21  ;;  %v7777_v53 = vld [vmem:[#allocation17_spill] sm:$0xff]  ;;  %v7778_v30 = vld [vmem:[#allocation8_spill] sm:$0xff]  ;;  %v7781_v21 = vld [vmem:[#allocation103_spill] sm:$0xff] }
 0x1ce   : > { %v1941_v57 = vrot.slane %v1827_v18, 7  ;;  %v4133_v15 = vpop.permute.xlu0 %4132  ;;  %v1943_v45 = vrot.slane %v1828_v46, 7  ;;  %v4130_v6 = vunpack.i.h.bf16 %v4128_v50  ;;  %v4129_v41 = vunpack.i.l.bf16 %v4128_v50  ;;  %v7780_v18 = vld [vmem:[#allocation11_spill] sm:$0xff] }
 0x1cf   : > { %v1940_v35 = vsel %vm1897_vm11, %v1938_v52, %v1939_v36  ;;  %v4135_v13 = vunpack.i.h.bf16 %v4133_v15  ;;  %v4134_v38 = vunpack.i.l.bf16 %v4133_v15  ;;  %v7779_v52 = vld [vmem:[#allocation23_spill] sm:$0xff] }
 0x1d0   : > { %v1942_v39 = vsel %vm1897_vm11, %v1939_v36, %v1941_v57  ;;  %v1647_v37 = vsel %vm1604_vm6, %v7777_v53, %v4129_v41  ;;  %v1648_v31 = vsel %vm1604_vm6, %v7778_v30, %v4130_v6  ;;  %v6755_v53 = vld [vmem:[%s7239_s2] ss:$0 sm:$0xff] }
 0x1d1   : > { %v4138_v42 = vpop.permute.xlu1 %4137  ;;  %v2018_v33 = vpack.c.bf16 %v1942_v39, %v1940_v35  ;;  %v1650_v36 = vsel %vm1604_vm6, %v7779_v52, %v4135_v13  ;;  %v1649_v50 = vsel %vm1604_vm6, %v7780_v18, %v4134_v38 }
 0x1d2   : > { %v4140_v1 = vunpack.i.h.bf16 %v4138_v42  ;;  %v4139_v0 = vunpack.i.l.bf16 %v4138_v42  ;;  %v4143_v51 = vpop.permute.xlu0 %4142 }
 0x1d3   : > { %3260 = vmatprep.mubr.msk.bf16.mxu0 %vm2048_vm12, %v2018_v33  ;;  %v4145_v2 = vunpack.i.h.bf16 %v4143_v51  ;;  %v4144_v49 = vunpack.i.l.bf16 %v4143_v51 }
 0x1d4   : > { %v1829_v48 = vsel %vm1800_vm10, %v1780_v60, %v4139_v0  ;;  %v1830_v12 = vsel %vm1800_vm10, %v1781_v7, %v4140_v1 }
 0x1d5   : > { %v1944_v27 = vrot.slane %v1829_v48, 7  ;;  %v1946_v56 = vrot.slane %v1830_v12, 7  ;;  %v4148_v55 = vpop.permute.xlu1 %4147  ;;  %v1652_v57 = vsel %vm1604_vm6, %v7781_v21, %v4145_v2  ;;  %v1651_v26 = vsel %vm1604_vm6, %v7782_v63, %v4144_v49 }
 0x1d6   : > { %v4153_v22 = vpop.permute.xlu0 %4152  ;;  %v4150_v23 = vunpack.i.h.bf16 %v4148_v55  ;;  %v4149_v28 = vunpack.i.l.bf16 %v4148_v55 }
 0x1d7   : > { %v1945_v9 = vsel %vm1897_vm11, %v1943_v45, %v1944_v27  ;;  %v1947_v40 = vsel %vm1897_vm11, %v1944_v27, %v1946_v56  ;;  %v4155_v11 = vunpack.i.h.bf16 %v4153_v22  ;;  %v4154_v10 = vunpack.i.l.bf16 %v4153_v22 }
 0x1d8   : > { %v2019_v61 = vpack.c.bf16 %v1947_v40, %v1945_v9  ;;  %v1696_v19 = vsel %vm1653_vm7, %v1647_v37, %v4149_v28  ;;  %v1697_v15 = vsel %vm1653_vm7, %v1648_v31, %v4150_v23 }
 0x1d9   : > { %v4158_v24 = vpop.permute.xlu1 %4157  ;;  %v1699_v58 = vsel %vm1653_vm7, %v1650_v36, %v4155_v11  ;;  %v1698_v32 = vsel %vm1653_vm7, %v1649_v50, %v4154_v10  ;;  %v1745_v17 = vsel %vm1702_vm8, %v1696_v19, %v6031_v44  ;;  %v1746_v25 = vsel %vm1702_vm8, %v1697_v15, %v4100_v16 }
 0x1da   : > { %v1144_v8 = vpop.permute.xlu0 %1143  ;;  %3261 = vmatmul.mubr.msk.bf16.gmra.mxu0 %vm2048_vm12, %v2019_v61  ;;  %v4160_v59 = vunpack.i.h.bf16 %v4158_v24  ;;  %v4159_v4 = vunpack.i.l.bf16 %v4158_v24  ;;  %v1748_v62 = vsel %vm1702_vm8, %v1699_v58, %v6031_v44 }
 0x1db   : > { %v1747_v33 = vsel %vm1702_vm8, %v1698_v32, %v1144_v8 }
 0x1dc   : > { %v1701_v3 = vsel %vm1653_vm7, %v1652_v57, %v4160_v59  ;;  %v1700_v39 = vsel %vm1653_vm7, %v1651_v26, %v4159_v4 }
 0x1dd   : > { %v4163_v14 = vpop.permute.xlu1 %4162  ;;  %v1749_v60 = vsel %vm1702_vm8, %v1700_v39, %v6031_v44  ;;  %v1750_v7 = vsel %vm1702_vm8, %v1701_v3, %v6031_v44 }
 0x1de   : > { %v4168_v5 = vpop.permute.xlu0 %4167  ;;  %v4165_v35 = vunpack.i.h.bf16 %v4163_v14  ;;  %v4164_v34 = vunpack.i.l.bf16 %v4163_v14 }
 0x1df   : > { %v4170_v43 = vunpack.i.h.bf16 %v4168_v5  ;;  %v4169_v47 = vunpack.i.l.bf16 %v4168_v5 }
 0x1e0   : > { %v1794_v0 = vsel %vm1751_vm9, %v1745_v17, %v4164_v34  ;;  %v1795_v51 = vsel %vm1751_vm9, %v1746_v25, %v4165_v35 }
 0x1e1   : > { %v1269_v20 = vpop.permute.xlu1 %1268  ;;  %v1799_v56 = vsel %vm1751_vm9, %v1750_v7, %v4170_v43  ;;  %v1796_v24 = vsel %vm1751_vm9, %v1747_v33, %v4169_v47  ;;  %v1797_v6 = vsel %vm1751_vm9, %v1748_v62, %v4170_v43 }
 0x1e2   : > { %v4173_v42 = vpop.permute.xlu0 %4172  ;;  %v1798_v48 = vsel %vm1751_vm9, %v1749_v60, %v1269_v20 }
 0x1e3   : > { %v4175_v46 = vunpack.i.h.bf16 %v4173_v42  ;;  %v4174_v1 = vunpack.i.l.bf16 %v4173_v42 }
 0x1e5   : > { %v1843_v12 = vsel %vm1800_vm10, %v1794_v0, %v4174_v1  ;;  %v1844_v45 = vsel %vm1800_vm10, %v1795_v51, %v4175_v46  ;;  %v4178_v27 = vpop.permute.xlu1 %4177 }
 0x1e6   : > { %v1968_v55 = vrot.slane %v1843_v12, 7  ;;  %v1969_v22 = vrot.slane %v1844_v45, 7  ;;  %v4180_v9 = vunpack.i.h.bf16 %v4178_v27  ;;  %v4179_v40 = vunpack.i.l.bf16 %v4178_v27  ;;  %v1410_v61 = vpop.permute.xlu0 %1409  ;;  %v7783_v12 = vld [vmem:[#allocation63_spill] sm:$0xff] }
 0x1e7   : > { %v1847_v41 = vsel %vm1800_vm10, %v1798_v48, %v1410_v61  ;;  %v1848_v13 = vsel %vm1800_vm10, %v1799_v56, %v1410_v61 }
 0x1e8   : > { %v1845_v38 = vsel %vm1800_vm10, %v1796_v24, %v4179_v40  ;;  %v1846_v8 = vsel %vm1800_vm10, %v1797_v6, %v4180_v9  ;;  %v1974_v2 = vrot.slane %v1847_v41, 7  ;;  %v1976_v23 = vrot.slane %v1848_v13, 7 }
 0x1e9   : > { %v1971_v28 = vrot.slane %v1845_v38, 7  ;;  %v1973_v11 = vrot.slane %v1846_v8, 7  ;;  %v1970_v49 = vsel %vm1897_vm11, %v1968_v55, %v1969_v22 }
 0x1ea   : > { %v1977_v10 = vsel %vm1897_vm11, %v1974_v2, %v1976_v23 }
 0x1eb   : > { %v1975_v16 = vsel %vm1897_vm11, %v1973_v11, %v1974_v2  ;;  %v1972_v59 = vsel %vm1897_vm11, %v1969_v22, %v1971_v28 }
 0x1ec   : > { %v2024_v4 = vpack.c.bf16 %v1972_v59, %v1970_v49  ;;  %v2025_v14 = vpack.c.bf16 %v1977_v10, %v1975_v16 }
 0x1ee   : > { %3272 = vmatprep.mubr.msk.bf16.mxu1 %vm2048_vm12, %v2024_v4 }
 0x1ef   : > { %3273 = vmatmul.mubr.msk.bf16.gmra.mxu1 %vm2048_vm12, %v2025_v14 }
 0x1f1   : > { %v3246_v37 = vpop.f32.mrf.mxu0 }
 0x1f2   : > { %v2144_v30 = vadd.f32 %v3246_v37, %v6755_v53 }
 0x1f3   : > { %v2135_v31 = vpop.f32.mrf.mxu0 }
 0x1f4   : > { %v2136_v52 = vadd.f32 %v6755_v53, %v2135_v31  ;;  %v2264_v18 = vmax.f32 %v2144_v30, 0.0 }
 0x1f5   : > { %v3247_v36 = vpop.f32.mrf.mxu0 }
 0x1f6   : > { %v2262_v50 = vmax.f32 %v2136_v52, 0.0  ;;  %v2147_v5 = vadd.f32 %v3247_v36, %v6755_v53 }
 0x1f7   : > { %v2138_v21 = vpop.f32.mrf.mxu0 }
 0x1f8   : > { %v2294_v57 = vmax.f32 %v2262_v50, %v2264_v18  ;;  %v2139_v19 = vadd.f32 %v6755_v53, %v2138_v21  ;;  %v2265_v15 = vmax.f32 %v2147_v5, 0.0  ;;  %v7784_v21 = vmov 0.0  }
 0x1fa   : > { %2310 = vst.msk [vmem:[#allocation2] sm:$0xff] %vm1506_vm5, %v2294_v57  ;;  %v2263_v58 = vmax.f32 %v2139_v19, 0.0 }
 0x1fc   : > { %v2295_v63 = vmax.f32 %v2263_v58, %v2265_v15 }
 0x1fe   : > { %2311 = vst.msk [vmem:[#allocation2 + $0x8] sm:$0xff] %vm1506_vm5, %v2295_v63 }
 0x205   : > { %v2326_v26 = vld [vmem:[#allocation2] ss:$2 sm:$0xff]  ;;  %v2342_v32 = vld [vmem:[#allocation2 + $0x1] ss:$2 sm:$0xff] }
 0x206   : > { %v6763_v35 = vmax.f32 %v2326_v26, %v2342_v32 }
 0x208   : > { %v3250_v34 = vpop.f32.mrf.mxu0  ;;  %v2381_v43 = vrot.slane %v6763_v35, 1  ;;  %v2412_v20 = vrot.slane %v6763_v35, 2 }
 0x209   : > { %v2160_v3 = vadd.f32 %v3250_v34, %v6755_v53 }
 0x20a   : > { %v2151_v39 = vpop.f32.mrf.mxu0  ;;  %v4181_v25 = vpack.i.bf16 %v2381_v43, %v7754_v54  ;;  %v2413_v62 = vsel %vm483_vm1, %v2412_v20, %v7752_v29 }
 0x20b   : > { %v2152_v17 = vadd.f32 %v6755_v53, %v2151_v39  ;;  %v4191_v33 = vpack.i.bf16 %v2413_v62, %v2412_v20  ;;  %v2268_v47 = vmax.f32 %v2160_v3, 0.0 }
 0x20c   : > { %v3251_v42 = vpop.f32.mrf.mxu0  ;;  %4182 = vrot.lane.b32.xlu1 %v4181_v25, %s4442_s25 }
 0x20d   : > { %v2266_v46 = vmax.f32 %v2152_v17, 0.0  ;;  %v2163_v1 = vadd.f32 %v3251_v42, %v6755_v53  ;;  %4192 = vrot.lane.b32.xlu0 %v4191_v33, %s4444_s27 }
 0x20e   : > { %v2154_v0 = vpop.f32.mrf.mxu0 }
 0x20f   : > { %v2296_v51 = vmax.f32 %v2266_v46, %v2268_v47  ;;  %v2155_v60 = vadd.f32 %v6755_v53, %v2154_v0  ;;  %v2269_v7 = vmax.f32 %v2163_v1, 0.0 }
 0x210   : > { %4187 = vrot.lane.b32.xlu1 %v7783_v12, %s4444_s27 }
 0x211   : > { %2312 = vst.msk [vmem:[#allocation2 + $0x10] sm:$0xff] %vm1506_vm5, %v2296_v51  ;;  %v2267_v48 = vmax.f32 %v2155_v60, 0.0 }
 0x213   : > { %v2297_v45 = vmax.f32 %v2267_v48, %v2269_v7 }
 0x215   : > { %2313 = vst.msk [vmem:[#allocation2 + $0x18] sm:$0xff] %vm1506_vm5, %v2297_v45 }
 0x21c   : > { %v2328_v27 = vld [vmem:[#allocation2 + $0x10] ss:$2 sm:$0xff]  ;;  %v2344_v56 = vld [vmem:[#allocation2 + $0x11] ss:$2 sm:$0xff] }
 0x21d   : > { %v6780_v55 = vmax.f32 %v2328_v27, %v2344_v56 }
 0x21f   : > { %v4196_v22 = vpack.i.bf16 %v6780_v55, %v6763_v35  ;;  %v2414_v9 = vrot.slane %v6780_v55, 2  ;;  %v2382_v24 = vrot.slane %v6780_v55, 1  ;;  %v4236_v57 = vpack.i.bf16 %v6780_v55, %v7784_v21 }
 0x221   : > { %4197 = vrot.lane.b32.xlu1 %v4196_v22, %s4446_s6  ;;  %v2415_v40 = vsel %vm483_vm1, %v2414_v9, %v7752_v29  ;;  %v4206_v6 = vpack.i.bf16 %v2382_v24, %v2381_v43 }
 0x222   : > { %v6788_v61 = vpack.i.bf16 %v2415_v40, %v2414_v9 }
 0x224   : > { %4217 = vrot.lane.b32.xlu0 %v6788_v61, %s4449_s15 }
 0x225   : > { %4202 = vrot.lane.b32.xlu1 %v6788_v61, %s4444_s27 }
 0x228   : > { %v3254_v41 = vpop.f32.mrf.mxu0 }
 0x229   : > { %v2176_v13 = vadd.f32 %v3254_v41, %v6755_v53  ;;  %4207 = vrot.lane.b32.xlu1 %v4206_v6, %s4448_s12 }
 0x22a   : > { %v2167_v38 = vpop.f32.mrf.mxu0 }
 0x22b   : > { %v2168_v8 = vadd.f32 %v6755_v53, %v2167_v38  ;;  %v2272_v23 = vmax.f32 %v2176_v13, 0.0 }
 0x22c   : > { %v3255_v2 = vpop.f32.mrf.mxu0 }
 0x22d   : > { %v2270_v28 = vmax.f32 %v2168_v8, 0.0  ;;  %v2179_v11 = vadd.f32 %v3255_v2, %v6755_v53  ;;  %4212 = vrot.lane.b32.xlu1 %v4191_v33, %s4449_s15 }
 0x22e   : > { %v2170_v49 = vpop.f32.mrf.mxu0 }
 0x22f   : > { %v2298_v10 = vmax.f32 %v2270_v28, %v2272_v23  ;;  %v2171_v16 = vadd.f32 %v6755_v53, %v2170_v49  ;;  %v2273_v59 = vmax.f32 %v2179_v11, 0.0 }
 0x231   : > { %2314 = vst.msk [vmem:[#allocation2 + $0x20] sm:$0xff] %vm1506_vm5, %v2298_v10  ;;  %v2271_v4 = vmax.f32 %v2171_v16, 0.0 }
 0x233   : > { %v2299_v14 = vmax.f32 %v2271_v4, %v2273_v59 }
 0x235   : > { %2315 = vst.msk [vmem:[#allocation2 + $0x28] sm:$0xff] %vm1506_vm5, %v2299_v14 }
 0x23c   : > { %v2330_v37 = vld [vmem:[#allocation2 + $0x20] ss:$2 sm:$0xff]  ;;  %v2346_v30 = vld [vmem:[#allocation2 + $0x21] ss:$2 sm:$0xff] }
 0x23d   : > { %v6803_v31 = vmax.f32 %v2330_v37, %v2346_v30 }
 0x23f   : > { %v2383_v52 = vrot.slane %v6803_v31, 1  ;;  %v2416_v36 = vrot.slane %v6803_v31, 2 }
 0x241   : > { %v4221_v18 = vpack.i.bf16 %v2383_v52, %v2382_v24  ;;  %v2417_v50 = vsel %vm483_vm1, %v2416_v36, %v7752_v29 }
 0x242   : > { %v6809_v5 = vpack.i.bf16 %v2417_v50, %v2416_v36 }
 0x243   : > { %4222 = vrot.lane.b32.xlu0 %v4221_v18, %s4442_s25 }
 0x244   : > { %4232 = vrot.lane.b32.xlu1 %v6809_v5, %s4449_s15 }
 0x247   : > { %4227 = vrot.lane.b32.xlu0 %v6809_v5, %s4444_s27 }
 0x248   : > { %4237 = vrot.lane.b32.xlu1 %v4236_v57, %s4450_s16 }
 0x24d   : > { %v3266_v19 = vpop.f32.mrf.mxu1 }
 0x24e   : > { %v2224_v15 = vadd.f32 %v3266_v19, %v6755_v53 }
 0x24f   : > { %v2215_v58 = vpop.f32.mrf.mxu1 }
 0x250   : > { %v2216_v63 = vadd.f32 %v6755_v53, %v2215_v58  ;;  %v2284_v32 = vmax.f32 %v2224_v15, 0.0 }
 0x251   : > { %v3267_v26 = vpop.f32.mrf.mxu1 }
 0x252   : > { %v2282_v34 = vmax.f32 %v2216_v63, 0.0  ;;  %v2227_v3 = vadd.f32 %v3267_v26, %v6755_v53 }
 0x253   : > { %v2218_v43 = vpop.f32.mrf.mxu1 }
 0x254   : > { %v2304_v20 = vmax.f32 %v2282_v34, %v2284_v32  ;;  %v2219_v39 = vadd.f32 %v6755_v53, %v2218_v43  ;;  %v2285_v17 = vmax.f32 %v2227_v3, 0.0 }
 0x256   : > { %2320 = vst.msk [vmem:[#allocation2 + $0x50] sm:$0xff] %vm1506_vm5, %v2304_v20  ;;  %v2283_v25 = vmax.f32 %v2219_v39, 0.0  ;;  %v4404_v39 = vld [vmem:[%s7240_s3 + $0x20] ss:$0 sps:$4 sm:$0xff]  }
 0x257   : > { %3302 = vmatprep.subr.msk.bf16.mxu1 %vm2900_vm13, %v4404_v39 }
 0x258   : > { %v2305_v62 = vmax.f32 %v2283_v25, %v2285_v17  ;;  %v2902_v17 = vsel %vm2900_vm13, %v4404_v39, 0 }
 0x259   : > { %3277 = vmatpush3.bf16.msra.mxu1 %v2902_v17 }
 0x25a   : > { %2321 = vst.msk [vmem:[#allocation2 + $0x58] sm:$0xff] %vm1506_vm5, %v2305_v62 }
 0x260   : > { %v3258_v42 = vpop.f32.mrf.mxu0 }
 0x261   : > { %v2192_v33 = vadd.f32 %v3258_v42, %v6755_v53  ;;  %v2336_v25 = vld [vmem:[#allocation2 + $0x50] ss:$2 sm:$0xff]  ;;  %v2352_v62 = vld [vmem:[#allocation2 + $0x51] ss:$2 sm:$0xff] }
 0x262   : > { %v2183_v47 = vpop.f32.mrf.mxu0  ;;  %v4405_v42 = vld [vmem:[%s7240_s3 + $0x18] sm:$0xff]  }
 0x263   : > { %v2184_v46 = vadd.f32 %v6755_v53, %v2183_v47  ;;  %v2276_v0 = vmax.f32 %v2192_v33, 0.0  ;;  %3278 = vmatprep.subr.bf16.mxu1 %v4405_v42 }
 0x264   : > { %v3259_v1 = vpop.f32.mrf.mxu0  ;;  %3279 = vmatpush3.bf16.msra.mxu1 %v4405_v42 }
 0x265   : > { %v2274_v51 = vmax.f32 %v2184_v46, 0.0  ;;  %v2195_v60 = vadd.f32 %v3259_v1, %v6755_v53 }
 0x266   : > { %v2186_v7 = vpop.f32.mrf.mxu0 }
 0x267   : > { %v2300_v48 = vmax.f32 %v2274_v51, %v2276_v0  ;;  %v2187_v45 = vadd.f32 %v6755_v53, %v2186_v7  ;;  %v2277_v27 = vmax.f32 %v2195_v60, 0.0  ;;  %v6871_v0 = vmax.f32 %v2336_v25, %v2352_v62 }
 0x269   : > { %2316 = vst.msk [vmem:[#allocation2 + $0x30] sm:$0xff] %vm1506_vm5, %v2300_v48  ;;  %v2275_v56 = vmax.f32 %v2187_v45, 0.0 }
 0x26b   : > { %v2301_v22 = vmax.f32 %v2275_v56, %v2277_v27  ;;  %v4406_v27 = vld [vmem:[%s7240_s3 + $0x10] sm:$0xff]  }
 0x26c   : > { %3280 = vmatprep.subr.bf16.mxu1 %v4406_v27 }
 0x26d   : > { %2317 = vst.msk [vmem:[#allocation2 + $0x38] sm:$0xff] %vm1506_vm5, %v2301_v22  ;;  %3281 = vmatpush3.bf16.msra.mxu1 %v4406_v27 }
 0x274   : > { %v2332_v9 = vld [vmem:[#allocation2 + $0x30] ss:$2 sm:$0xff]  ;;  %v2348_v40 = vld [vmem:[#allocation2 + $0x31] ss:$2 sm:$0xff] }
 0x275   : > { %v6831_v24 = vmax.f32 %v2332_v9, %v2348_v40 }
 0x277   : > { %v4241_v6 = vpack.i.bf16 %v6831_v24, %v6803_v31  ;;  %v2384_v41 = vrot.slane %v6831_v24, 1  ;;  %v2418_v13 = vrot.slane %v6831_v24, 2 }
 0x279   : > { %4242 = vrot.lane.b32.xlu0 %v4241_v6, %s4446_s6  ;;  %v4246_v38 = vpack.i.bf16 %v2384_v41, %v2383_v52  ;;  %v2419_v8 = vsel %vm483_vm1, %v2418_v13, %v7752_v29 }
 0x27a   : > { %v6843_v2 = vpack.i.bf16 %v2419_v8, %v2418_v13 }
 0x27d   : > { %4247 = vrot.lane.b32.xlu0 %v4246_v38, %s4448_s12 }
 0x27e   : > { %v4183_v39 = vpop.permute.xlu1 %4182 }
 0x281   : > { %4252 = vrot.lane.b32.xlu0 %v6843_v2, %s4449_s15 }
 0x282   : > { %v4188_v17 = vpop.permute.xlu1 %4187 }
 0x285   : > { %4257 = vrot.lane.b32.xlu0 %v4241_v6, %s4450_s16 }
 0x287   : > { %v3270_v23 = vpop.f32.mrf.mxu1 }
 0x288   : > { %v2240_v28 = vadd.f32 %v3270_v23, %v6755_v53 }
 0x289   : > { %v2231_v11 = vpop.f32.mrf.mxu1  ;;  %4262 = vrot.lane.b32.xlu0 %v4221_v18, %s4451_s17 }
 0x28a   : > { %v2232_v49 = vadd.f32 %v6755_v53, %v2231_v11  ;;  %v2288_v16 = vmax.f32 %v2240_v28, 0.0 }
 0x28b   : > { %v3271_v10 = vpop.f32.mrf.mxu1 }
 0x28c   : > { %v2286_v59 = vmax.f32 %v2232_v49, 0.0  ;;  %v2243_v4 = vadd.f32 %v3271_v10, %v6755_v53 }
 0x28d   : > { %v2234_v14 = vpop.f32.mrf.mxu1  ;;  %4277 = vrot.lane.b32.xlu0 %v6788_v61, %s4452_s20 }
 0x28e   : > { %v2306_v37 = vmax.f32 %v2286_v59, %v2288_v16  ;;  %v2235_v30 = vadd.f32 %v6755_v53, %v2234_v14  ;;  %v2289_v52 = vmax.f32 %v2243_v4, 0.0  ;;  %v2422_v59 = vrot.slane %v6871_v0, 2  ;;  %v4407_v4 = vld [vmem:[%s7240_s3 + $0x8] sm:$0xff]  }
 0x28f   : > { %3282 = vmatprep.subr.bf16.mxu1 %v4407_v4 }
 0x290   : > { %2322 = vst.msk [vmem:[#allocation2 + $0x60] sm:$0xff] %vm1506_vm5, %v2306_v37  ;;  %v2287_v36 = vmax.f32 %v2235_v30, 0.0  ;;  %v4408_v37 = vld [vmem:[%s7240_s3] sm:$0xff]   ;;  %3283 = vmatpush3.bf16.msra.mxu1 %v4407_v4  ;;  %v2423_v30 = vsel %vm483_vm1, %v2422_v59, %v7752_v29 }
 0x291   : > { %3284 = vmatprep.subr.bf16.mxu1 %v4408_v37 }
 0x292   : > { %v2307_v50 = vmax.f32 %v2287_v36, %v2289_v52  ;;  %v4316_v36 = vpack.i.bf16 %v2423_v30, %v2422_v59 }
 0x293   : > { %v4198_v62 = vpop.permute.xlu1 %4197 }
 0x294   : > { %2323 = vst.msk [vmem:[#allocation2 + $0x68] sm:$0xff] %vm1506_vm5, %v2307_v50  ;;  %v2386_v50 = vrot.slane %v6871_v0, 1  ;;  %3285 = vmatpush3.bf16.msra.mxu1 %v4408_v37 }
 0x29a   : > { %v3262_v18 = vpop.f32.mrf.mxu0 }
 0x29b   : > { %v2208_v21 = vadd.f32 %v3262_v18, %v6755_v53  ;;  %v2338_v11 = vld [vmem:[#allocation2 + $0x60] ss:$2 sm:$0xff]  ;;  %v2354_v49 = vld [vmem:[#allocation2 + $0x61] ss:$2 sm:$0xff] }
 0x29c   : > { %v2199_v57 = vpop.f32.mrf.mxu0  ;;  %v6897_v14 = vmax.f32 %v2338_v11, %v2354_v49 }
 0x29d   : > { %v2200_v19 = vadd.f32 %v6755_v53, %v2199_v57  ;;  %v2280_v58 = vmax.f32 %v2208_v21, 0.0 }
 0x29e   : > { %v3263_v15 = vpop.f32.mrf.mxu0  ;;  %v2387_v52 = vrot.slane %v6897_v14, 1  ;;  %v2424_v18 = vrot.slane %v6897_v14, 2 }
 0x29f   : > { %v2278_v63 = vmax.f32 %v2200_v19, 0.0  ;;  %v2211_v26 = vadd.f32 %v3263_v15, %v6755_v53 }
 0x2a0   : > { %v2202_v32 = vpop.f32.mrf.mxu0  ;;  %v2425_v21 = vsel %vm483_vm1, %v2424_v18, %v7752_v29 }
 0x2a1   : > { %v2302_v61 = vmax.f32 %v2278_v63, %v2280_v58  ;;  %v2203_v34 = vadd.f32 %v6755_v53, %v2202_v32  ;;  %v2281_v3 = vmax.f32 %v2211_v26, 0.0  ;;  %v4321_v15 = vpack.i.bf16 %v2425_v21, %v2424_v18 }
 0x2a3   : > { %2318 = vst.msk [vmem:[#allocation2 + $0x40] sm:$0xff] %vm1506_vm5, %v2302_v61  ;;  %v2279_v43 = vmax.f32 %v2203_v34, 0.0 }
 0x2a5   : > { %v2303_v20 = vmax.f32 %v2279_v43, %v2281_v3 }
 0x2a7   : > { %2319 = vst.msk [vmem:[#allocation2 + $0x48] sm:$0xff] %vm1506_vm5, %v2303_v20 }
 0x2ae   : > { %v2334_v33 = vld [vmem:[#allocation2 + $0x40] ss:$2 sm:$0xff]  ;;  %v2350_v47 = vld [vmem:[#allocation2 + $0x41] ss:$2 sm:$0xff] }
 0x2af   : > { %v3274_v46 = vpop.f32.mrf.mxu1  ;;  %v6869_v1 = vmax.f32 %v2334_v33, %v2350_v47  ;;  %v6946_v33 = vpop.permute.xlu1 %4202 }
 0x2b0   : > { %v2256_v51 = vadd.f32 %v3274_v46, %v6755_v53 }
 0x2b1   : > { %v2247_v60 = vpop.f32.mrf.mxu1  ;;  %v4266_v7 = vpack.i.bf16 %v6871_v0, %v6869_v1  ;;  %v2385_v48 = vrot.slane %v6869_v1, 1  ;;  %v2420_v45 = vrot.slane %v6869_v1, 2 }
 0x2b2   : > { %v2248_v56 = vadd.f32 %v6755_v53, %v2247_v60  ;;  %v2292_v40 = vmax.f32 %v2256_v51, 0.0  ;;  %v4185_v51 = vunpack.i.h.bf16 %v4183_v39  ;;  %v4184_v60 = vunpack.i.l.bf16 %v4183_v39 }
 0x2b3   : > { %v3275_v22 = vpop.f32.mrf.mxu1  ;;  %4267 = vrot.lane.b32.xlu1 %v4266_v7, %s4450_s16  ;;  %v4286_v9 = vpack.i.bf16 %v2385_v48, %v2384_v41  ;;  %v2421_v38 = vsel %vm483_vm1, %v2420_v45, %v7752_v29 }
 0x2b4   : > { %v2290_v6 = vmax.f32 %v2248_v56, 0.0  ;;  %v2259_v13 = vadd.f32 %v3275_v22, %v6755_v53  ;;  %v4296_v41 = vpack.i.bf16 %v2421_v38, %v2420_v45  ;;  %v2671_v45 = vsel %vm1506_vm5, 0.0, %v4185_v51 }
 0x2b5   : > { %v2250_v8 = vpop.f32.mrf.mxu1  ;;  %4287 = vrot.lane.b32.xlu0 %v4286_v9, %s4442_s25 }
 0x2b6   : > { %v2308_v23 = vmax.f32 %v2290_v6, %v2292_v40  ;;  %v2251_v28 = vadd.f32 %v6755_v53, %v2250_v8  ;;  %v2293_v10 = vmax.f32 %v2259_v13, 0.0  ;;  %v2670_v40 = vsel %vm1506_vm5, 0.0, %v4184_v60 }
 0x2b7   : > { %4272 = vrot.lane.b32.xlu1 %v4286_v9, %s4451_s17  ;;  %v2672_v9 = vsel %vm1506_vm5, %v6763_v35, %v4185_v51  ;;  %v4190_v6 = vunpack.i.h.bf16 %v4188_v17  ;;  %v4200_v8 = vunpack.i.h.bf16 %v4198_v62 }
 0x2b8   : > { %2324 = vst.msk [vmem:[#allocation2 + $0x70] sm:$0xff] %vm1506_vm5, %v2308_v23  ;;  %v2291_v16 = vmax.f32 %v2251_v28, 0.0  ;;  %v4199_v28 = vunpack.i.l.bf16 %v4198_v62 }
 0x2b9   : > { %4297 = vrot.lane.b32.xlu0 %v4296_v41, %s4452_s20  ;;  %v2686_v35 = vsel %vm1604_vm6, %v2670_v40, %v4190_v6 }
 0x2ba   : > { %v2309_v53 = vmax.f32 %v2291_v16, %v2293_v10 }
 0x2bb   : > { %4282 = vrot.lane.b32.xlu1 %v6809_v5, %s4452_s20  ;;  %v4301_v5 = vpack.i.bf16 %v2387_v52, %v2386_v50 }
 0x2bc   : > { %2325 = vst.msk [vmem:[#allocation2 + $0x78] sm:$0xff] %vm1506_vm5, %v2309_v53 }
 0x2bd   : > { %4307 = vrot.lane.b32.xlu0 %v6843_v2, %s4444_s27 }
 0x2bf   : > { %4292 = vrot.lane.b32.xlu1 %v6843_v2, %s4452_s20  ;;  %v4336_v2 = vpack.i.bf16 %v2386_v50, %v2385_v48  ;;  %v4189_v48 = vunpack.i.l.bf16 %v4188_v17  ;;  %v2702_v50 = vsel %vm1702_vm8, %v2686_v35, %v4199_v28 }
 0x2c1   : > { %4317 = vrot.lane.b32.xlu0 %v4316_v36, %s4444_s27  ;;  %v2685_v38 = vsel %vm1604_vm6, %v2670_v40, %v4189_v48 }
 0x2c2   : > { %v2701_v16 = vsel %vm1702_vm8, %v2685_v38, %v6031_v44 }
 0x2c3   : > { %4302 = vrot.lane.b32.xlu1 %v4301_v5, %s4442_s25  ;;  %v2340_v57 = vld [vmem:[#allocation2 + $0x70] ss:$2 sm:$0xff]  ;;  %v2356_v19 = vld [vmem:[#allocation2 + $0x71] ss:$2 sm:$0xff]  ;;  %s3303_s25 = smul.u32 120, %s7786_s19 }
 0x2c4   : > { %v2364_v58 = vmax.f32 %v2340_v57, %v2356_v19  ;;  %v4205_v19 = vunpack.i.h.bf16 %v6946_v33 }
 0x2c5   : > { %4327 = vrot.lane.b32.xlu0 %v4266_v7, %s4446_s6  ;;  %s7169_s9 = scalar_lea.vmem %s7242_s5, %s3303_s25 }
 0x2c6   : > { %v4331_v63 = vpack.i.bf16 %v2364_v58, %v6897_v14  ;;  %v2499_v26 = vrot.slane %v2364_v58, 1  ;;  %v2524_v61 = vrot.slane %v2364_v58, 2  ;;  %v4204_v58 = vunpack.i.l.bf16 %v6946_v33 }
 0x2c7   : > { %4312 = vrot.lane.b32.xlu1 %v4296_v41, %s4444_s27 }
 0x2c8   : > { %v4341_v32 = vpack.i.bf16 %v2499_v26, %v2387_v52  ;;  %v2525_v34 = vsel %vm483_vm1, %v2524_v61, %v7752_v29  ;;  %v4376_v3 = vpack.i.bf16 %v7754_v54, %v2499_v26  ;;  %v4193_v29 = vpop.permute.xlu0 %4192  ;;  %vm2784_vm1 = vcmask 523264  }
 0x2c9   : > { %4337 = vrot.lane.b32.xlu0 %v4336_v2, %s4448_s12  ;;  %v4361_v43 = vpack.i.bf16 %v2525_v34, %v2524_v61  ;;  %v4194_v7 = vunpack.i.l.bf16 %v4193_v29  ;;  %v4195_v56 = vunpack.i.h.bf16 %v4193_v29 }
 0x2cb   : > { %4322 = vrot.lane.b32.xlu1 %v4321_v15, %s4444_s27  ;;  %v2687_v13 = vsel %vm1604_vm6, %v2671_v45, %v4194_v7  ;;  %v2688_v49 = vsel %vm1604_vm6, %v2672_v9, %v4195_v56 }
 0x2cc   : > { %v4218_v20 = vpop.permute.xlu0 %4217  ;;  %v2703_v59 = vsel %vm1702_vm8, %v2687_v13, %v6031_v44  ;;  %v2704_v53 = vsel %vm1702_vm8, %v2688_v49, %v4200_v8 }
 0x2cd   : > { %4347 = vrot.lane.b32.xlu0 %v4296_v41, %s4449_s15  ;;  %v4220_v57 = vunpack.i.h.bf16 %v4218_v20 }
 0x2cf   : > { %4332 = vrot.lane.b32.xlu1 %v4331_v63, %s4446_s6 }
 0x2d0   : > { %v6940_v54 = vpop.permute.xlu0 %4222 }
 0x2d1   : > { %4357 = vrot.lane.b32.xlu0 %v4321_v15, %s4449_s15  ;;  %v4224_v10 = vunpack.i.l.bf16 %v6940_v54  ;;  %v4225_v52 = vunpack.i.h.bf16 %v6940_v54 }
 0x2d3   : > { %4342 = vrot.lane.b32.xlu1 %v4341_v32, %s4448_s12 }
 0x2d4   : > { %v6942_v25 = vpop.permute.xlu0 %4227 }
 0x2d5   : > { %4367 = vrot.lane.b32.xlu0 %v4331_v63, %s4450_s16  ;;  %v4229_v21 = vunpack.i.l.bf16 %v6942_v25  ;;  %v4230_v39 = vunpack.i.h.bf16 %v6942_v25 }
 0x2d7   : > { %4352 = vrot.lane.b32.xlu1 %v4316_v36, %s4449_s15 }
 0x2d9   : > { %4377 = vrot.lane.b32.xlu0 %v4376_v3, %s4451_s17  ;;  %v2675_v3 = vsel %vm1506_vm5, 0.0, %v4225_v52 }
 0x2da   : > { %v2691_v54 = vsel %vm1604_vm6, %v2675_v3, %v4229_v21 }
 0x2db   : > { %4362 = vrot.lane.b32.xlu1 %v4361_v43, %s4449_s15  ;;  %v2707_v9 = vsel %vm1702_vm8, %v2691_v54, %v6031_v44 }
 0x2dd   : > { %4387 = vrot.lane.b32.xlu0 %v4321_v15, %s4452_s20  ;;  %v2673_v15 = vsel %vm1506_vm5, 0.0, %v4224_v10 }
 0x2df   : > { %4372 = vrot.lane.b32.xlu1 %v4301_v5, %s4451_s17  ;;  %v4219_v5 = vunpack.i.l.bf16 %v4218_v20  ;;  %v2689_v20 = vsel %vm1604_vm6, %v2673_v15, %v4204_v58 }
 0x2e0   : > { %v2705_v45 = vsel %vm1702_vm8, %v2689_v20, %v6031_v44 }
 0x2e1   : > { %4397 = vrot.lane.b32.xlu0 %v7783_v12, %s4452_s20  ;;  %v4208_v12 = vpop.permute.xlu1 %4207 }
 0x2e2   : > { %v4210_v23 = vunpack.i.h.bf16 %v4208_v12  ;;  %v4209_v41 = vunpack.i.l.bf16 %v4208_v12 }
 0x2e3   : > { %4382 = vrot.lane.b32.xlu1 %v4316_v36, %s4452_s20 }
 0x2e4   : > { %v2719_v37 = vsel %vm1800_vm10, %v2703_v59, %v4210_v23  ;;  %v2720_v18 = vsel %vm1800_vm10, %v2704_v53, %v4210_v23  ;;  %v2717_v2 = vsel %vm1800_vm10, %v2701_v16, %v4209_v41  ;;  %v2718_v63 = vsel %vm1800_vm10, %v2702_v50, %v4209_v41 }
 0x2e5   : > { %v4213_v27 = vpop.permute.xlu1 %4212  ;;  %v2736_v26 = vsel %vm2733_vm14, %v2719_v37, %v4219_v5  ;;  %v2737_v29 = vsel %vm2733_vm14, %v2720_v18, %v4220_v57 }
 0x2e6   : > { %v4214_v4 = vunpack.i.l.bf16 %v4213_v27  ;;  %v4215_v30 = vunpack.i.h.bf16 %v4213_v27 }
 0x2e7   : > { %4392 = vrot.lane.b32.xlu1 %v4361_v43, %s4452_s20  ;;  %v2674_v43 = vsel %vm1506_vm5, %v6780_v55, %v4224_v10  ;;  %v2676_v55 = vsel %vm1506_vm5, %v6803_v31, %v4225_v52 }
 0x2e8   : > { %v2734_v32 = vsel %vm2733_vm14, %v2717_v2, %v4214_v4  ;;  %v2735_v34 = vsel %vm2733_vm14, %v2718_v63, %v4215_v30  ;;  %v2690_v27 = vsel %vm1604_vm6, %v2674_v43, %v4205_v19  ;;  %v2692_v31 = vsel %vm1604_vm6, %v2676_v55, %v4230_v39 }
 0x2e9   : > { %v6960_v11 = vpop.permute.xlu1 %4232 }
 0x2ea   : > { %v4235_v62 = vunpack.i.h.bf16 %v6960_v11  ;;  %v4234_v7 = vunpack.i.l.bf16 %v6960_v11 }
 0x2eb   : > { %v6944_v42 = vpop.permute.xlu0 %4242 }
 0x2ec   : > { %v4245_v48 = vunpack.i.h.bf16 %v6944_v42  ;;  %v4244_v25 = vunpack.i.l.bf16 %v6944_v42 }
 0x2ed   : > { %v4238_v61 = vpop.permute.xlu1 %4237 }
 0x2ee   : > { %v4240_v33 = vunpack.i.h.bf16 %v4238_v61  ;;  %v6994_v12 = vunpack.i.l.bf16 %v4238_v61  ;;  %v2706_v49 = vsel %vm1702_vm8, %v2690_v27, %v4244_v25  ;;  %v2708_v41 = vsel %vm1702_vm8, %v2692_v31, %v4245_v48 }
 0x2ef   : > { %v6948_v47 = vpop.permute.xlu0 %4247 }
 0x2f0   : > { %v4250_v17 = vunpack.i.h.bf16 %v6948_v47  ;;  %v4249_v56 = vunpack.i.l.bf16 %v6948_v47  ;;  %v2752_v38 = vsel %vm2750_vm15, %v2735_v34, %v4240_v33  ;;  %v2751_v47 = vsel %vm2750_vm15, %v2734_v32, %v6994_v12 }
 0x2f1   : > { %v2753_v4 = vsel %vm2750_vm15, %v2736_v26, %v6994_v12 }
 0x2f2   : > { %v2723_v6 = vsel %vm1800_vm10, %v2707_v9, %v4250_v17  ;;  %v2722_v16 = vsel %vm1800_vm10, %v2706_v49, %v4249_v56  ;;  %v2724_v59 = vsel %vm1800_vm10, %v2708_v41, %v4250_v17 }
 0x2f3   : > { %v6950_v46 = vpop.permute.xlu0 %4252 }
 0x2f4   : > { %v4254_v51 = vunpack.i.l.bf16 %v6950_v46  ;;  %v4255_v13 = vunpack.i.h.bf16 %v6950_v46  ;;  %v2721_v46 = vsel %vm1800_vm10, %v2705_v45, %v4249_v56 }
 0x2f5   : > { %v2738_v26 = vsel %vm2733_vm14, %v2721_v46, %v4234_v7 }
 0x2f6   : > { %v2740_v8 = vsel %vm2733_vm14, %v2723_v6, %v4254_v51  ;;  %v2741_v37 = vsel %vm2733_vm14, %v2724_v59, %v4255_v13  ;;  %v2755_v25 = vsel %vm2750_vm15, %v2738_v26, %v6994_v12 }
 0x2f7   : > { %v6953_v22 = vpop.permute.xlu0 %4257  ;;  %v2757_v50 = vsel %vm2750_vm15, %v2740_v8, %v6994_v12 }
 0x2f8   : > { %v4259_v30 = vunpack.i.l.bf16 %v6953_v22  ;;  %v4260_v32 = vunpack.i.h.bf16 %v6953_v22 }
 0x2fa   : > { %v2754_v3 = vsel %vm2750_vm15, %v2737_v29, %v4259_v30  ;;  %v2739_v29 = vsel %vm2733_vm14, %v2722_v16, %v4235_v62 }
 0x2fb   : > { %v6972_v36 = vpop.permute.xlu0 %4262  ;;  %v2756_v9 = vsel %vm2750_vm15, %v2739_v29, %v4260_v32 }
 0x2fc   : > { %v4264_v42 = vunpack.i.l.bf16 %v6972_v36  ;;  %v4265_v5 = vunpack.i.h.bf16 %v6972_v36 }
 0x2fe   : > { %v2768_v52 = vsel %vm2767_vm0, %v2751_v47, %v4264_v42  ;;  %v2769_v18 = vsel %vm2767_vm0, %v2752_v38, %v4264_v42  ;;  %v2770_v54 = vsel %vm2767_vm0, %v2753_v4, %v4265_v5  ;;  %v2771_v17 = vsel %vm2767_vm0, %v2754_v3, %v4265_v5 }
 0x2ff   : > { %v4278_v60 = vpop.permute.xlu0 %4277 }
 0x300   : > { %v4279_v23 = vunpack.i.l.bf16 %v4278_v60  ;;  %v4280_v10 = vunpack.i.h.bf16 %v4278_v60 }
 0x302   : > { %v2785_v21 = vsel %vm2784_vm1, %v2768_v52, %v4279_v23  ;;  %v2786_v2 = vsel %vm2784_vm1, %v2769_v18, %v4280_v10 }
 0x303   : > { %v2817_v33 = vrot.slane %v2785_v21, 7  ;;  %v2818_v51 = vrot.slane %v2786_v2, 7 }
 0x305   : > { %v2819_v49 = vsel %vm1897_vm11, %v2817_v33, %v2818_v51 }
 0x325   : > { %v7008_v40 = vpop.permute.xlu1 %4267 }
 0x326   : > { %v4269_v35 = vunpack.i.l.bf16 %v7008_v40  ;;  %v4270_v3 = vunpack.i.h.bf16 %v7008_v40 }
 0x327   : > { %v7018_v28 = vpop.permute.xlu0 %4287 }
 0x328   : > { %v2758_v15 = vsel %vm2750_vm15, %v2741_v37, %v4269_v35  ;;  %v4289_v52 = vunpack.i.l.bf16 %v7018_v28  ;;  %v4290_v21 = vunpack.i.h.bf16 %v7018_v28 }
 0x329   : > { %v4273_v53 = vpop.permute.xlu1 %4272 }
 0x32a   : > { %v4275_v57 = vunpack.i.h.bf16 %v4273_v53  ;;  %v4274_v43 = vunpack.i.l.bf16 %v4273_v53  ;;  %v2677_v2 = vsel %vm1506_vm5, 0.0, %v4289_v52  ;;  %v2679_v28 = vsel %vm1506_vm5, 0.0, %v4290_v21 }
 0x32b   : > { %v4298_v19 = vpop.permute.xlu0 %4297 }
 0x32c   : > { %v4300_v58 = vunpack.i.h.bf16 %v4298_v19  ;;  %v4299_v63 = vunpack.i.l.bf16 %v4298_v19  ;;  %v2774_v61 = vsel %vm2767_vm0, %v2757_v50, %v4275_v57  ;;  %v2775_v36 = vsel %vm2767_vm0, %v2758_v15, %v4275_v57 }
 0x32d   : > { %v4283_v34 = vpop.permute.xlu1 %4282  ;;  %v2772_v31 = vsel %vm2767_vm0, %v2755_v25, %v4274_v43  ;;  %v2773_v42 = vsel %vm2767_vm0, %v2756_v9, %v4274_v43  ;;  %v2680_v43 = vsel %vm1506_vm5, %v6869_v1, %v4290_v21 }
 0x32e   : > { %v4285_v20 = vunpack.i.h.bf16 %v4283_v34  ;;  %v4284_v39 = vunpack.i.l.bf16 %v4283_v34  ;;  %v2791_v55 = vsel %vm2784_vm1, %v2774_v61, %v4299_v63  ;;  %v2792_v22 = vsel %vm2784_vm1, %v2775_v36, %v4300_v58 }
 0x32f   : > { %v4308_v60 = vpop.permute.xlu0 %4307  ;;  %v2826_v38 = vrot.slane %v2791_v55, 7  ;;  %v2827_v8 = vrot.slane %v2792_v22, 7  ;;  %v2678_v61 = vsel %vm1506_vm5, %v6831_v24, %v4289_v52 }
 0x330   : > { %v2787_v7 = vsel %vm2784_vm1, %v2770_v54, %v4284_v39  ;;  %v2788_v48 = vsel %vm2784_vm1, %v2771_v17, %v4285_v20  ;;  %v4309_v50 = vunpack.i.l.bf16 %v4308_v60  ;;  %v4310_v57 = vunpack.i.h.bf16 %v4308_v60 }
 0x331   : > { %v2820_v45 = vrot.slane %v2787_v7, 7  ;;  %v2821_v27 = vrot.slane %v2788_v48, 7  ;;  %v4293_v56 = vpop.permute.xlu1 %4292  ;;  %v2828_v16 = vsel %vm1897_vm11, %v2826_v38, %v2827_v8 }
 0x332   : > { %v4295_v6 = vunpack.i.h.bf16 %v4293_v56  ;;  %v4294_v13 = vunpack.i.l.bf16 %v4293_v56  ;;  %v2693_v58 = vsel %vm1604_vm6, %v2677_v2, %v4309_v50  ;;  %v2694_v20 = vsel %vm1604_vm6, %v2678_v61, %v4310_v57 }
 0x333   : > { %v4318_v47 = vpop.permute.xlu0 %4317  ;;  %v2822_v11 = vsel %vm1897_vm11, %v2820_v45, %v2821_v27  ;;  %v2709_v33 = vsel %vm1702_vm8, %v2693_v58, %v6031_v44 }
 0x334   : > { %v2789_v62 = vsel %vm2784_vm1, %v2772_v31, %v4294_v13  ;;  %v2790_v23 = vsel %vm2784_vm1, %v2773_v42, %v4295_v6  ;;  %v2849_v46 = vpack.c.bf16 %v2822_v11, %v2819_v49  ;;  %v4319_v36 = vunpack.i.l.bf16 %v4318_v47 }
 0x335   : > { %v2823_v41 = vrot.slane %v2789_v62, 7  ;;  %v2824_v10 = vrot.slane %v2790_v23, 7  ;;  %v4303_v35 = vpop.permute.xlu1 %4302  ;;  %v4320_v51 = vunpack.i.h.bf16 %v4318_v47 }
 0x336   : > { %3286 = vmatprep.mubr.msk.bf16.mxu1 %vm2887_vm2, %v2849_v46  ;;  %v4304_v5 = vunpack.i.l.bf16 %v4303_v35  ;;  %v4305_v34 = vunpack.i.h.bf16 %v4303_v35 }
 0x337   : > { %v2825_v59 = vsel %vm1897_vm11, %v2823_v41, %v2824_v10  ;;  %v4328_v4 = vpop.permute.xlu0 %4327 }
 0x338   : > { %v2850_v53 = vpack.c.bf16 %v2828_v16, %v2825_v59  ;;  %v2681_v63 = vsel %vm1506_vm5, 0.0, %v4304_v5  ;;  %v2682_v54 = vsel %vm1506_vm5, %v6871_v0, %v4304_v5  ;;  %v4329_v60 = vunpack.i.l.bf16 %v4328_v4 }
 0x339   : > { %v4313_v37 = vpop.permute.xlu1 %4312  ;;  %v2697_v17 = vsel %vm1604_vm6, %v2681_v63, %v4319_v36  ;;  %v2683_v7 = vsel %vm1506_vm5, 0.0, %v4305_v34  ;;  %v4330_v48 = vunpack.i.h.bf16 %v4328_v4  ;;  %v2684_v0 = vsel %vm1506_vm5, %v6897_v14, %v4305_v34 }
 0x33a   : > { %3287 = vmatmul.mubr.msk.bf16.vlgmr.msra.gmra.mxu1 %vm2887_vm2, %v2850_v53  ;;  %v4314_v15 = vunpack.i.l.bf16 %v4313_v37  ;;  %v4315_v26 = vunpack.i.h.bf16 %v4313_v37  ;;  %v2713_v45 = vsel %vm1702_vm8, %v2697_v17, %v6031_v44  ;;  %v2698_v56 = vsel %vm1604_vm6, %v2682_v54, %v4320_v51 }
 0x33b   : > { %v4338_v30 = vpop.permute.xlu0 %4337  ;;  %v2710_v38 = vsel %vm1702_vm8, %v2694_v20, %v4329_v60 }
 0x33c   : > { %v2695_v24 = vsel %vm1604_vm6, %v2679_v28, %v4314_v15  ;;  %v2696_v55 = vsel %vm1604_vm6, %v2680_v43, %v4315_v26  ;;  %v4340_v29 = vunpack.i.h.bf16 %v4338_v30  ;;  %v4339_v25 = vunpack.i.l.bf16 %v4338_v30 }
 0x33d   : > { %v4323_v18 = vpop.permute.xlu1 %4322  ;;  %v2711_v27 = vsel %vm1702_vm8, %v2695_v24, %v6031_v44  ;;  %v2712_v31 = vsel %vm1702_vm8, %v2696_v55, %v4330_v48 }
 0x33e   : > { %v4324_v22 = vunpack.i.l.bf16 %v4323_v18  ;;  %v4325_v6 = vunpack.i.h.bf16 %v4323_v18  ;;  %v2725_v62 = vsel %vm1800_vm10, %v2709_v33, %v4339_v25  ;;  %v2726_v23 = vsel %vm1800_vm10, %v2710_v38, %v4339_v25 }
 0x33f   : > { %v4348_v19 = vpop.permute.xlu0 %4347  ;;  %v2727_v49 = vsel %vm1800_vm10, %v2711_v27, %v4340_v29  ;;  %v2728_v10 = vsel %vm1800_vm10, %v2712_v31, %v4340_v29 }
 0x340   : > { %v4350_v13 = vunpack.i.h.bf16 %v4348_v19  ;;  %v4349_v42 = vunpack.i.l.bf16 %v4348_v19  ;;  %v2699_v8 = vsel %vm1604_vm6, %v2683_v7, %v4324_v22  ;;  %v2700_v4 = vsel %vm1604_vm6, %v2684_v0, %v4325_v6 }
 0x341   : > { %v4333_v32 = vpop.permute.xlu1 %4332  ;;  %v2715_v30 = vsel %vm1702_vm8, %v2699_v8, %v6031_v44 }
 0x342   : > { %v4335_v14 = vunpack.i.h.bf16 %v4333_v32  ;;  %v4334_v47 = vunpack.i.l.bf16 %v4333_v32  ;;  %v2742_v53 = vsel %vm2733_vm14, %v2725_v62, %v4349_v42  ;;  %v2743_v37 = vsel %vm2733_vm14, %v2726_v23, %v4350_v13 }
 0x343   : > { %v7077_v39 = vpop.permute.xlu0 %4357  ;;  %v2759_v28 = vsel %vm2750_vm15, %v2742_v53, %v6994_v12  ;;  %v2760_v17 = vsel %vm2750_vm15, %v2743_v37, %v4270_v3 }
 0x344   : > { %v2714_v52 = vsel %vm1702_vm8, %v2698_v56, %v4334_v47  ;;  %v2716_v50 = vsel %vm1702_vm8, %v2700_v4, %v4335_v14  ;;  %v4360_v5 = vunpack.i.h.bf16 %v7077_v39  ;;  %v4359_v18 = vunpack.i.l.bf16 %v7077_v39 }
 0x345   : > { %v4343_v1 = vpop.permute.xlu1 %4342 }
 0x346   : > { %v4344_v41 = vunpack.i.l.bf16 %v4343_v1  ;;  %v4345_v35 = vunpack.i.h.bf16 %v4343_v1 }
 0x347   : > { %v7094_v9 = vpop.permute.xlu0 %4367 }
 0x348   : > { %v2729_v57 = vsel %vm1800_vm10, %v2713_v45, %v4344_v41  ;;  %v2730_v19 = vsel %vm1800_vm10, %v2714_v52, %v4344_v41  ;;  %v2731_v58 = vsel %vm1800_vm10, %v2715_v30, %v4345_v35  ;;  %v2732_v63 = vsel %vm1800_vm10, %v2716_v50, %v4345_v35 }
 0x349   : > { %v4353_v11 = vpop.permute.xlu1 %4352  ;;  %v4369_v61 = vunpack.i.l.bf16 %v7094_v9  ;;  %v2746_v43 = vsel %vm2733_vm14, %v2729_v57, %v4359_v18  ;;  %v4370_v20 = vunpack.i.h.bf16 %v7094_v9  ;;  %v2747_v39 = vsel %vm2733_vm14, %v2730_v19, %v4360_v5 }
 0x34a   : > { %v4355_v46 = vunpack.i.h.bf16 %v4353_v11  ;;  %v4354_v16 = vunpack.i.l.bf16 %v4353_v11 }
 0x34b   : > { %v7103_v59 = vpop.permute.xlu0 %4377  ;;  %v2764_v41 = vsel %vm2750_vm15, %v2747_v39, %v4370_v20 }
 0x34c   : > { %v2744_v44 = vsel %vm2733_vm14, %v2727_v49, %v4354_v16  ;;  %v2745_v26 = vsel %vm2733_vm14, %v2728_v10, %v4355_v46  ;;  %v4380_v40 = vunpack.i.h.bf16 %v7103_v59  ;;  %v4379_v3 = vunpack.i.l.bf16 %v7103_v59 }
 0x34d   : > { %v4363_v21 = vpop.permute.xlu1 %4362  ;;  %v2761_v51 = vsel %vm2750_vm15, %v2744_v44, %v6994_v12  ;;  %v2762_v60 = vsel %vm2750_vm15, %v2745_v26, %v4369_v61  ;;  %v2763_v10 = vsel %vm2750_vm15, %v2746_v43, %v6994_v12 }
 0x34e   : > { %v4365_v2 = vunpack.i.h.bf16 %v4363_v21  ;;  %v4364_v15 = vunpack.i.l.bf16 %v4363_v21  ;;  %v2780_v59 = vsel %vm2767_vm0, %v2763_v10, %v4379_v3  ;;  %v2781_v4 = vsel %vm2767_vm0, %v2764_v41, %v4379_v3 }
 0x34f   : > { %v4388_v32 = vpop.permute.xlu0 %4387 }
 0x350   : > { %v2748_v36 = vsel %vm2733_vm14, %v2731_v58, %v4364_v15  ;;  %v2749_v34 = vsel %vm2733_vm14, %v2732_v63, %v4365_v2  ;;  %v4390_v24 = vunpack.i.h.bf16 %v4388_v32  ;;  %v4389_v1 = vunpack.i.l.bf16 %v4388_v32  ;;  %v3163_v32 = vld [vmem:[%s7241_s4] ss:$0 sm:$0xff] }
 0x351   : > { %v4373_v54 = vpop.permute.xlu1 %4372  ;;  %v2765_v55 = vsel %vm2750_vm15, %v2748_v36, %v6994_v12  ;;  %v2766_v22 = vsel %vm2750_vm15, %v2749_v34, %v6994_v12  ;;  %v4453_v63 = vmov 0.0|0.0  }
 0x352   : > { %v4375_v33 = vunpack.i.h.bf16 %v4373_v54  ;;  %v4374_v7 = vunpack.i.l.bf16 %v4373_v54  ;;  %v2782_v31 = vsel %vm2767_vm0, %v2765_v55, %v4380_v40  ;;  %v2783_v6 = vsel %vm2767_vm0, %v2766_v22, %v4380_v40  ;;  %3053 = vst.msk [vmem:[%s7169_s9 + $0xc] sm:$0xf] %vm3049_vm3, %v4453_v63  ;;  %3056 = vst.msk [vmem:[%s7169_s9 + $0x18] sm:$0xf] %vm3049_vm3, %v4453_v63 }
 0x353   : > { %v4398_v48 = vpop.permute.xlu0 %4397  ;;  %v3173_v44 = vcombine.low %v4453_v63, %v4453_v63  ;;  %v3174_v26 = vcombine.high %v4453_v63, %v4453_v63  ;;  %3059 = vst.msk [vmem:[%s7169_s9 + $0x24] sm:$0xf] %vm3049_vm3, %v4453_v63  ;;  %3062 = vst.msk [vmem:[%s7169_s9 + $0x30] sm:$0xf] %vm3049_vm3, %v4453_v63 }
 0x354   : > { %v2778_v29 = vsel %vm2767_vm0, %v2761_v51, %v4375_v33  ;;  %v2779_v25 = vsel %vm2767_vm0, %v2762_v60, %v4375_v33  ;;  %v4400_v27 = vunpack.i.h.bf16 %v4398_v48  ;;  %v4399_v56 = vunpack.i.l.bf16 %v4398_v48  ;;  %3065 = vst.msk [vmem:[%s7169_s9 + $0x3c] sm:$0xf] %vm3049_vm3, %v4453_v63  ;;  %3068 = vst.msk [vmem:[%s7169_s9 + $0x48] sm:$0xf] %vm3049_vm3, %v4453_v63 }
 0x355   : > { %v2795_v0 = vsel %vm2784_vm1, %v2778_v29, %v4389_v1  ;;  %v2796_v45 = vsel %vm2784_vm1, %v2779_v25, %v4390_v24  ;;  %v4383_v9 = vpop.permute.xlu1 %4382  ;;  %v2776_v38 = vsel %vm2767_vm0, %v2759_v28, %v4374_v7  ;;  %v2777_v8 = vsel %vm2767_vm0, %v2760_v17, %v4374_v7  ;;  %3050 = vst.msk [vmem:[%s7169_s9] sm:$0xf] %vm3049_vm3, %v3173_v44 }
 0x356   : > { %v4385_v13 = vunpack.i.h.bf16 %v4383_v9  ;;  %v4384_v42 = vunpack.i.l.bf16 %v4383_v9  ;;  %v2832_v14 = vrot.slane %v2795_v0, 7  ;;  %v2833_v47 = vrot.slane %v2796_v45, 7  ;;  %3051 = vst.msk [vmem:[%s7169_s9 + $0x4] sm:$0xf] %vm3049_vm3, %v3174_v26  ;;  %3052 = vst.msk [vmem:[%s7169_s9 + $0x8] sm:$0xf] %vm3049_vm3, %v3173_v44 }
 0x357   : > { %v2799_v11 = vsel %vm2784_vm1, %v2782_v31, %v4399_v56  ;;  %v2800_v62 = vsel %vm2784_vm1, %v2783_v6, %v4400_v27  ;;  %3055 = vst.msk [vmem:[%s7169_s9 + $0x14] sm:$0xf] %vm3049_vm3, %v3173_v44  ;;  %3058 = vst.msk [vmem:[%s7169_s9 + $0x20] sm:$0xf] %vm3049_vm3, %v3173_v44 }
 0x358   : > { %v2793_v23 = vsel %vm2784_vm1, %v2776_v38, %v4384_v42  ;;  %v2794_v49 = vsel %vm2784_vm1, %v2777_v8, %v4385_v13  ;;  %v2838_v30 = vrot.slane %v2799_v11, 7  ;;  %v2839_v52 = vrot.slane %v2800_v62, 7  ;;  %3061 = vst.msk [vmem:[%s7169_s9 + $0x2c] sm:$0xf] %vm3049_vm3, %v3173_v44  ;;  %3064 = vst.msk [vmem:[%s7169_s9 + $0x38] sm:$0xf] %vm3049_vm3, %v3173_v44 }
 0x359   : > { %v2829_v35 = vrot.slane %v2793_v23, 7  ;;  %v2830_v46 = vrot.slane %v2794_v49, 7  ;;  %v4393_v16 = vpop.permute.xlu1 %4392  ;;  %v2834_v5 = vsel %vm1897_vm11, %v2832_v14, %v2833_v47  ;;  %3067 = vst.msk [vmem:[%s7169_s9 + $0x44] sm:$0xf] %vm3049_vm3, %v3173_v44  ;;  %3070 = vst.msk [vmem:[%s7169_s9 + $0x50] sm:$0xf] %vm3049_vm3, %v3173_v44 }
 0x35a   : > { %v4395_v53 = vunpack.i.h.bf16 %v4393_v16  ;;  %v4394_v37 = vunpack.i.l.bf16 %v4393_v16  ;;  %v2840_v15 = vsel %vm1897_vm11, %v2838_v30, %v2839_v52  ;;  %3071 = vst.msk [vmem:[%s7169_s9 + $0x54] sm:$0xf] %vm3049_vm3, %v4453_v63  ;;  %3073 = vst.msk [vmem:[%s7169_s9 + $0x5c] sm:$0xf] %vm3049_vm3, %v3173_v44 }
 0x35b   : > { %v2831_v50 = vsel %vm1897_vm11, %v2829_v35, %v2830_v46  ;;  %3074 = vst.msk [vmem:[%s7169_s9 + $0x60] sm:$0xf] %vm3049_vm3, %v4453_v63  ;;  %3076 = vst.msk [vmem:[%s7169_s9 + $0x68] sm:$0xf] %vm3049_vm3, %v3173_v44 }
 0x35c   : > { %v2797_v18 = vsel %vm2784_vm1, %v2780_v59, %v4394_v37  ;;  %v2798_v12 = vsel %vm2784_vm1, %v2781_v4, %v4395_v53  ;;  %v2851_v21 = vpack.c.bf16 %v2834_v5, %v2831_v50  ;;  %3077 = vst.msk [vmem:[%s7169_s9 + $0x6c] sm:$0xf] %vm3049_vm3, %v3173_v44  ;;  %3078 = vst.msk [vmem:[%s7169_s9 + $0x70] sm:$0xf] %vm3049_vm3, %v3174_v26 }
 0x35d   : > { %v2835_v57 = vrot.slane %v2797_v18, 7  ;;  %v2836_v19 = vrot.slane %v2798_v12, 7  ;;  %3079 = vst.msk [vmem:[%s7169_s9 + $0x74] sm:$0xf] %vm3049_vm3, %v3173_v44 }
 0x35e   : > { %3290 = vmatprep.mubr.msk.bf16.mxu1 %vm2887_vm2, %v2851_v21 }
 0x35f   : > { %v2837_v2 = vsel %vm1897_vm11, %v2835_v57, %v2836_v19 }
 0x360   : > { %v2852_v58 = vpack.c.bf16 %v2840_v15, %v2837_v2 }
 0x362   : > { %3291 = vmatmul.mubr.msk.bf16.gmra.mxu1 %vm2887_vm2, %v2852_v58 }
 0x3fa   : > { %v3288_v61 = vpop.f32.mrf.mxu1 }
 0x3fb   : > { %v2947_v36 = vadd.f32 %v3288_v61, %v3163_v32 }
 0x3fc   : > { %v2938_v34 = vpop.f32.mrf.mxu1 }
 0x3fd   : > { %v2971_v28 = vmax.f32 %v2947_v36, 0.0  ;;  %v2939_v43 = vadd.f32 %v3163_v32, %v2938_v34 }
 0x3fe   : > { %v3289_v20 = vpop.f32.mrf.mxu1 }
 0x3ff   : > { %v3199_v39 = vpack.c.bf16 %v2971_v28, %v2971_v28  ;;  %v2969_v54 = vmax.f32 %v2939_v43, 0.0  ;;  %v2950_v17 = vadd.f32 %v3289_v20, %v3163_v32 }
 0x400   : > { %v2941_v24 = vpop.f32.mrf.mxu1 }
 0x401   : > { %3060 = vst.msk [vmem:[%s7169_s9 + $0x28] sm:$0xf] %vm3049_vm3, %v3199_v39  ;;  %v3195_v33 = vpack.c.bf16 %v2969_v54, %v2969_v54  ;;  %v2972_v51 = vmax.f32 %v2950_v17, 0.0  ;;  %v2942_v60 = vadd.f32 %v3163_v32, %v2941_v24 }
 0x403   : > { %3054 = vst.msk [vmem:[%s7169_s9 + $0x10] sm:$0xf] %vm3049_vm3, %v3195_v33  ;;  %v3201_v55 = vpack.c.bf16 %v2972_v51, %v2972_v51  ;;  %v2970_v22 = vmax.f32 %v2942_v60, 0.0 }
 0x405   : > { %3063 = vst.msk [vmem:[%s7169_s9 + $0x34] sm:$0xf] %vm3049_vm3, %v3201_v55  ;;  %v3197_v1 = vpack.c.bf16 %v2970_v22, %v2970_v22 }
 0x407   : > { %3057 = vst.msk [vmem:[%s7169_s9 + $0x1c] sm:$0xf] %vm3049_vm3, %v3197_v1 }
 0x422   : > { %v3292_v7 = vpop.f32.mrf.mxu1 }
 0x423   : > { %v2963_v48 = vadd.f32 %v3292_v7, %v3163_v32 }
 0x424   : > { %v2954_v40 = vpop.f32.mrf.mxu1 }
 0x425   : > { %v2975_v3 = vmax.f32 %v2963_v48, 0.0  ;;  %v2955_v29 = vadd.f32 %v3163_v32, %v2954_v40 }
 0x426   : > { %v3293_v25 = vpop.f32.mrf.mxu1 }
 0x427   : > { %v3207_v0 = vpack.c.bf16 %v2975_v3, %v2975_v3  ;;  %v2973_v45 = vmax.f32 %v2955_v29, 0.0  ;;  %v2966_v27 = vadd.f32 %v3293_v25, %v3163_v32 }
 0x428   : > { %v2957_v56 = vpop.f32.mrf.mxu1 }
 0x429   : > { %3072 = vst.msk [vmem:[%s7169_s9 + $0x58] sm:$0xf] %vm3049_vm3, %v3207_v0  ;;  %v3203_v9 = vpack.c.bf16 %v2973_v45, %v2973_v45  ;;  %v2976_v31 = vmax.f32 %v2966_v27, 0.0  ;;  %v2958_v6 = vadd.f32 %v3163_v32, %v2957_v56 }
 0x42b   : > { %3066 = vst.msk [vmem:[%s7169_s9 + $0x40] sm:$0xf] %vm3049_vm3, %v3203_v9  ;;  %v3209_v13 = vpack.c.bf16 %v2976_v31, %v2976_v31  ;;  %v2974_v42 = vmax.f32 %v2958_v6, 0.0 }
 0x42d   : > { %3075 = vst.msk [vmem:[%s7169_s9 + $0x64] sm:$0xf] %vm3049_vm3, %v3209_v13  ;;  %v3205_v38 = vpack.c.bf16 %v2974_v42, %v2974_v42 }
 0x42f   : > { %3069 = vst.msk [vmem:[%s7169_s9 + $0x4c] sm:$0xf] %vm3049_vm3, %v3205_v38 }
 0x430 PF: > { %s15_s18 = sadd.s32 1, %s4438_s18  }
 0x431   : > { %p12_p4 = scmp.ge.s32.totalorder %s15_s18, 4  }
 0x433   :  { %14 = sbr.rel (!%p12_p4) target bundleno = 1 (0x1), region = 85 }

</bundles_post_ra>
